<compile_context>
chip_gen: v5e
topology: v5e:2x2
jax: 0.10.0
libtpu: 0.0.40
codegen_flags: <defaults>
</compile_context>

<pallas_src>
import jax
import jax.numpy as jnp
from jax import lax
from jax.experimental import pallas as pl
from jax.experimental.pallas import tpu as pltpu


# ----------------------------- Pallas kernel ------------------------------- #
def _auto2d_fused_kernel(x_ref, w_ref, b_ref, o_ref, halo_ref):
    """All conv layers for ONE image, entirely in VMEM.

    x_ref:    (1, H, W*Cp)         lane-dense image (channels padded to Cp)
    w_ref:    (L, K, W*Cp, W*Cp)   block-structured conv weights (im2col folded in)
    b_ref:    (L, 1, W*Cp)         biases tiled along W
    o_ref:    (1, H, W*Cp)         output of the final layer
    halo_ref: (halo+H+halo, W*Cp)  scratch with zero halo rows above/below the
                                   current activation; shifted-window reads give
                                   the zero-filled height shift with no MXU work.
    """
    num_layers = w_ref.shape[0]
    ksize = w_ref.shape[1]
    H, WC = x_ref.shape[1], x_ref.shape[2]
    halo = (halo_ref.shape[0] - H) // 2
    pad_lo = (ksize - 1) // 2                      # PyTorch 'same': lo=(K-1)//2

    # Zero the halo buffer once; the interior rows are overwritten every layer.
    halo_ref[...] = jnp.zeros_like(halo_ref)

    act = x_ref[0]                                 # (H, W*Cp) f32, stays in VMEM
    for layer in range(num_layers):                # fully unrolled (L small)
        # Aligned (sublane-multiple offset) store into the zero-padded buffer.
        halo_ref[halo:halo + H, :] = act
        acc = None
        for kh in range(ksize):
            s = kh - pad_lo
            if s == 0:
                xs = act                           # identity shift: reuse value
            else:
                # Height shift with zero fill: xs[r] = act[r + s], 0 out of range.
                xs = halo_ref[halo + s:halo + s + H, :]
            # Lane-dense GEMM: (H, 128) @ (128, 128).  The kw/ci contraction and
            # the 'same' padding along W live inside the precomputed weight.
            term = jnp.dot(xs, w_ref[layer, kh],
                           preferred_element_type=jnp.float32,
                           precision=lax.Precision.HIGHEST)
            acc = term if acc is None else acc + term
        acc = acc + b_ref[layer]                   # (H, W*Cp) + (1, W*Cp)
        # ReLU between stages, no activation on the final projection.
        act = jnp.maximum(acc, 0.0) if layer + 1 < num_layers else acc

    o_ref[0] = act.astype(o_ref.dtype)


# --------------------------- parameter packing ------------------------------ #
def init_auto_map2d_params(key, in_ch, layers=6, filt=8, block=4, step=3):
    """Deterministic synthetic parameters (shapes implied by the assumed Auto2D)."""
    del step  # TODO(synk): `step`'s role in Auto2D is unknown; accepted but unused.
    params = []
    ch = in_ch
    for i in range(layers):
        out_ch = filt if i < layers - 1 else in_ch
        key, wk, bk = jax.random.split(key, 3)
        fan_in = block * block * ch
        w = jax.random.normal(wk, (block, block, ch, out_ch), jnp.float32)
        w = w / jnp.sqrt(jnp.float32(fan_in))
        b = 0.01 * jax.random.normal(bk, (out_ch,), jnp.float32)
        params.append((w, b))
        ch = out_ch
    return params


def pack_auto2d_params(params, w_sp, c_pad):
    """Fold im2col + 'same' width padding into block-structured weights.

    For every layer builds
        wbig[kh, win*c_pad + ci, wo*c_pad + co] = w[kh, win - wo + pad_lo, ci, co]
    (zero when the kw index is out of range), so that on the lane-dense
    (H, W*c_pad) activation layout
        out[h] = sum_kh shift_rows(x, kh - pad_lo) @ wbig[kh] + bias
    reproduces a stride-1, 'same'-padded (lo=(K-1)//2, hi=K-1-lo) cross-correlation.
    """
    ksize = params[0][0].shape[0]
    pad_lo = (ksize - 1) // 2

    win = jnp.arange(w_sp)[:, None]                       # (W, 1) input column
    wo = jnp.arange(w_sp)[None, :]                        # (1, W) output column
    kw_idx = win - wo + pad_lo                            # (W, W)
    valid = ((kw_idx >= 0) & (kw_idx < ksize)).astype(jnp.float32)
    kw_idx = jnp.clip(kw_idx, 0, ksize - 1)

    wbigs, bflats = [], []
    for w, b in params:
        cin, cout = w.shape[2], w.shape[3]
        g = w[:, kw_idx, :, :]                            # (K, W, W, cin, cout)
        g = g * valid[None, :, :, None, None]             # zero invalid kw (W-pad)
        g = jnp.transpose(g, (0, 1, 3, 2, 4))             # (K, win, cin, wo, cout)
        g = jnp.pad(g, ((0, 0), (0, 0), (0, c_pad - cin),
                        (0, 0), (0, c_pad - cout)))       # pad channels to c_pad
        wbigs.append(g.reshape(ksize, w_sp * c_pad, w_sp * c_pad))
        b_pad = jnp.pad(b, (0, c_pad - cout))
        bflats.append(jnp.tile(b_pad, w_sp).reshape(1, w_sp * c_pad))

    wstack = jnp.stack(wbigs)                             # (L, K, W*c_pad, W*c_pad)
    bstack = jnp.stack(bflats)                            # (L, 1, W*c_pad)
    return wstack, bstack


# --------------------------- AutoMap2D forward ------------------------------ #
def auto_map2d_forward(x_nchw, wstack, bstack):
    """x_nchw: (N, C, H, W) float32 -> (N, C, H, W) float32."""
    N, C, H, W_sp = x_nchw.shape
    num_layers, ksize, WC, _ = wstack.shape
    c_pad = WC // W_sp
    # Halo rows above/below the activation (multiple of 8 -> aligned interior store).
    halo = ((ksize - 1 + 7) // 8) * 8

    # NCHW -> NHWC, pad channels to c_pad, flatten (W, C) into one lane-dense axis.
    x = jnp.transpose(x_nchw, (0, 2, 3, 1))
    x = jnp.pad(x, ((0, 0), (0, 0), (0, 0), (0, c_pad - C)))
    x2 = x.reshape(N, H, WC)

    out2 = pl.pallas_call(
        _auto2d_fused_kernel,
        out_shape=jax.ShapeDtypeStruct((N, H, WC), x2.dtype),
        grid=(N,),
        in_specs=[
            pl.BlockSpec((1, H, WC), lambda n: (n, 0, 0)),                      # image/step
            pl.BlockSpec((num_layers, ksize, WC, WC), lambda n: (0, 0, 0, 0)),  # resident
            pl.BlockSpec((num_layers, 1, WC), lambda n: (0, 0, 0)),             # resident
        ],
        out_specs=pl.BlockSpec((1, H, WC), lambda n: (n, 0, 0)),
        scratch_shapes=[pltpu.VMEM((halo + H + halo, WC), jnp.float32)],
        compiler_params=pltpu.CompilerParams(
            # 2 grid steps -> shards across v7x's two TensorCores; harmless on v5e/v6e.
            dimension_semantics=("parallel",)),
    )(x2, wstack, bstack)

    out = out2.reshape(N, H, W_sp, c_pad)[..., :C]        # drop padded channels
    return jnp.transpose(out, (0, 3, 1, 2))               # NHWC -> NCHW


# ----------------------------- XLA reference -------------------------------- #
def auto_map2d_reference(x_nchw, params):
    """Pure-XLA reference: stride-1 'same'-padded conv stack, ReLU between layers."""
    x = jnp.transpose(x_nchw, (0, 2, 3, 1))
    n_layers = len(params)
    for i, (w, b) in enumerate(params):
        ksize = w.shape[0]
        pad_lo = (ksize - 1) // 2
        pad_hi = ksize - 1 - pad_lo
        x = lax.conv_general_dilated(
            x, w, window_strides=(1, 1),
            padding=((pad_lo, pad_hi), (pad_lo, pad_hi)),
            dimension_numbers=("NHWC", "HWIO", "NHWC"),
            precision=lax.Precision.HIGHEST) + b
        if i + 1 < n_layers:
            x = jnp.maximum(x, 0.0)
    return jnp.transpose(x, (0, 3, 1, 2))


# ----------------------------------- main ----------------------------------- #
if __name__ == "__main__":
    key = jax.random.PRNGKey(0)
    kx, kp = jax.random.split(key)

    # Small shapes consistent with AutoMap2D(layers=6, filter=8, block=4, step=3).
    N, C, H, W = 2, 4, 16, 16
    LAYERS, FILTER, BLOCK, STEP = 6, 8, 4, 3

    x = jax.random.normal(kx, (N, C, H, W), jnp.float32)
    params = init_auto_map2d_params(kp, C, LAYERS, FILTER, BLOCK, STEP)

    # c_pad = 8 -> lane axis W*c_pad = 128: fully lane-dense blocks, loads, stores.
    c_pad = max(C, FILTER)
    wstack, bstack = pack_auto2d_params(params, W, c_pad)

    y = jax.jit(auto_map2d_forward)(x, wstack, bstack)
    jax.block_until_ready(y)

    assert y.shape == (N, C, H, W), y.shape
    assert y.dtype == jnp.float32, y.dtype
    assert bool(jnp.all(jnp.isfinite(y)))

    # Correctness vs. an f32 XLA conv reference of the same assumed semantics.
    y_ref = auto_map2d_reference(x, params)
    err = float(jnp.max(jnp.abs(y - y_ref)))
    scale = float(jnp.max(jnp.abs(y_ref))) + 1e-6
    assert err / scale < 1e-2, (err, scale)

    print("KERNEL_OK")
</pallas_src>

<mosaic_0001>
module attributes {stable_mosaic.version = 11 : i64} {
  func.func @_auto2d_fused_kernel(%arg0: i32, %arg1: memref<1x16x128xf32, #tpu.memory_space<vmem>>, %arg2: memref<6x4x128x128xf32, #tpu.memory_space<vmem>>, %arg3: memref<6x1x128xf32, #tpu.memory_space<vmem>>, %arg4: memref<1x16x128xf32, #tpu.memory_space<vmem>>, %arg5: memref<32x128xf32, #tpu.memory_space<vmem>>) attributes {dimension_semantics = [#tpu.dimension_semantics<parallel>], iteration_bounds = array<i64: 2>, scalar_prefetch = 0 : i64, scratch_operands = 1 : i64, tpu.core_type = #tpu.core_type<tc>, window_params = [{transform_indices = @transform_0, window_bounds = array<i64: 1, 16, 128>}, {pipeline_mode = #tpu.pipeline_mode<synchronous>, transform_indices = @transform_1, window_bounds = array<i64: 6, 4, 128, 128>}, {pipeline_mode = #tpu.pipeline_mode<synchronous>, transform_indices = @transform_2, window_bounds = array<i64: 6, 1, 128>}, {transform_indices = @transform_3, window_bounds = array<i64: 1, 16, 128>}]} {
    %cst = arith.constant 0.000000e+00 : f32
    %0 = vector.broadcast %cst : f32 to vector<32x128xf32>
    %c0 = arith.constant 0 : index
    %c0_0 = arith.constant 0 : index
    %1 = vector.load %arg5[%c0, %c0_0] : memref<32x128xf32, #tpu.memory_space<vmem>>, vector<32x128xf32>
    tpu.vector_store %arg5[%c0, %c0_0], %0 {strides = array<i32>} : memref<32x128xf32, #tpu.memory_space<vmem>>, vector<32x128xf32>,
    %c0_1 = arith.constant 0 : index
    %c0_2 = arith.constant 0 : index
    %c0_3 = arith.constant 0 : index
    %2 = vector.load %arg1[%c0_1, %c0_2, %c0_3] : memref<1x16x128xf32, #tpu.memory_space<vmem>>, vector<1x16x128xf32>
    %3 = vector.shape_cast %2 : vector<1x16x128xf32> to vector<16x128xf32>
    %c8 = arith.constant 8 : index
    %c0_4 = arith.constant 0 : index
    %4 = vector.load %arg5[%c8, %c0_4] : memref<32x128xf32, #tpu.memory_space<vmem>>, vector<16x128xf32>
    tpu.vector_store %arg5[%c8, %c0_4], %3 {strides = array<i32>} : memref<32x128xf32, #tpu.memory_space<vmem>>, vector<16x128xf32>,
    %c7 = arith.constant 7 : index
    %c0_5 = arith.constant 0 : index
    %5 = vector.load %arg5[%c7, %c0_5] : memref<32x128xf32, #tpu.memory_space<vmem>>, vector<16x128xf32>
    %c0_6 = arith.constant 0 : index
    %c0_7 = arith.constant 0 : index
    %c0_8 = arith.constant 0 : index
    %c0_9 = arith.constant 0 : index
    %6 = vector.load %arg2[%c0_6, %c0_7, %c0_8, %c0_9] : memref<6x4x128x128xf32, #tpu.memory_space<vmem>>, vector<1x1x128x128xf32>
    %7 = vector.shape_cast %6 : vector<1x1x128x128xf32> to vector<128x128xf32>
    %cst_10 = arith.constant dense<0.000000e+00> : vector<16x128xf32>
    %8 = tpu.matmul %5, %7, %cst_10 {dimension_numbers = #tpu.dot_dimension_numbers<[1], [0], [0], [1], [0, 0, 1, 1], [], []>, precision = #tpu.contract_precision<fp32>} : vector<16x128xf32>, vector<128x128xf32>, vector<16x128xf32> -> vector<16x128xf32>
    %c0_11 = arith.constant 0 : index
    %c1 = arith.constant 1 : index
    %c0_12 = arith.constant 0 : index
    %c0_13 = arith.constant 0 : index
    %9 = vector.load %arg2[%c0_11, %c1, %c0_12, %c0_13] : memref<6x4x128x128xf32, #tpu.memory_space<vmem>>, vector<1x1x128x128xf32>
    %10 = vector.shape_cast %9 : vector<1x1x128x128xf32> to vector<128x128xf32>
    %cst_14 = arith.constant dense<0.000000e+00> : vector<16x128xf32>
    %11 = tpu.matmul %3, %10, %cst_14 {dimension_numbers = #tpu.dot_dimension_numbers<[1], [0], [0], [1], [0, 0, 1, 1], [], []>, precision = #tpu.contract_precision<fp32>} : vector<16x128xf32>, vector<128x128xf32>, vector<16x128xf32> -> vector<16x128xf32>
    %12 = arith.addf %8, %11 : vector<16x128xf32>
    %c9 = arith.constant 9 : index
    %c0_15 = arith.constant 0 : index
    %13 = vector.load %arg5[%c9, %c0_15] : memref<32x128xf32, #tpu.memory_space<vmem>>, vector<16x128xf32>
    %c0_16 = arith.constant 0 : index
    %c2 = arith.constant 2 : index
    %c0_17 = arith.constant 0 : index
    %c0_18 = arith.constant 0 : index
    %14 = vector.load %arg2[%c0_16, %c2, %c0_17, %c0_18] : memref<6x4x128x128xf32, #tpu.memory_space<vmem>>, vector<1x1x128x128xf32>
    %15 = vector.shape_cast %14 : vector<1x1x128x128xf32> to vector<128x128xf32>
    %cst_19 = arith.constant dense<0.000000e+00> : vector<16x128xf32>
    %16 = tpu.matmul %13, %15, %cst_19 {dimension_numbers = #tpu.dot_dimension_numbers<[1], [0], [0], [1], [0, 0, 1, 1], [], []>, precision = #tpu.contract_precision<fp32>} : vector<16x128xf32>, vector<128x128xf32>, vector<16x128xf32> -> vector<16x128xf32>
    %17 = arith.addf %12, %16 : vector<16x128xf32>
    %c10 = arith.constant 10 : index
    %c0_20 = arith.constant 0 : index
    %18 = vector.load %arg5[%c10, %c0_20] : memref<32x128xf32, #tpu.memory_space<vmem>>, vector<16x128xf32>
    %c0_21 = arith.constant 0 : index
    %c3 = arith.constant 3 : index
    %c0_22 = arith.constant 0 : index
    %c0_23 = arith.constant 0 : index
    %19 = vector.load %arg2[%c0_21, %c3, %c0_22, %c0_23] : memref<6x4x128x128xf32, #tpu.memory_space<vmem>>, vector<1x1x128x128xf32>
    %20 = vector.shape_cast %19 : vector<1x1x128x128xf32> to vector<128x128xf32>
    %cst_24 = arith.constant dense<0.000000e+00> : vector<16x128xf32>
    %21 = tpu.matmul %18, %20, %cst_24 {dimension_numbers = #tpu.dot_dimension_numbers<[1], [0], [0], [1], [0, 0, 1, 1], [], []>, precision = #tpu.contract_precision<fp32>} : vector<16x128xf32>, vector<128x128xf32>, vector<16x128xf32> -> vector<16x128xf32>
    %22 = arith.addf %17, %21 : vector<16x128xf32>
    %c0_25 = arith.constant 0 : index
    %c0_26 = arith.constant 0 : index
    %c0_27 = arith.constant 0 : index
    %23 = vector.load %arg3[%c0_25, %c0_26, %c0_27] : memref<6x1x128xf32, #tpu.memory_space<vmem>>, vector<1x1x128xf32>
    %24 = vector.shape_cast %23 : vector<1x1x128xf32> to vector<1x128xf32>
    %25 = vector.broadcast %24 : vector<1x128xf32> to vector<16x128xf32>
    %26 = arith.addf %22, %25 : vector<16x128xf32>
    %cst_28 = arith.constant 0.000000e+00 : f32
    %27 = vector.broadcast %cst_28 : f32 to vector<16x128xf32>
    %28 = arith.maximumf %26, %27 : vector<16x128xf32>
    %c8_29 = arith.constant 8 : index
    %c0_30 = arith.constant 0 : index
    %29 = vector.load %arg5[%c8_29, %c0_30] : memref<32x128xf32, #tpu.memory_space<vmem>>, vector<16x128xf32>
    tpu.vector_store %arg5[%c8_29, %c0_30], %28 {strides = array<i32>} : memref<32x128xf32, #tpu.memory_space<vmem>>, vector<16x128xf32>,
    %c7_31 = arith.constant 7 : index
    %c0_32 = arith.constant 0 : index
    %30 = vector.load %arg5[%c7_31, %c0_32] : memref<32x128xf32, #tpu.memory_space<vmem>>, vector<16x128xf32>
    %c1_33 = arith.constant 1 : index
    %c0_34 = arith.constant 0 : index
    %c0_35 = arith.constant 0 : index
    %c0_36 = arith.constant 0 : index
    %31 = vector.load %arg2[%c1_33, %c0_34, %c0_35, %c0_36] : memref<6x4x128x128xf32, #tpu.memory_space<vmem>>, vector<1x1x128x128xf32>
    %32 = vector.shape_cast %31 : vector<1x1x128x128xf32> to vector<128x128xf32>
    %cst_37 = arith.constant dense<0.000000e+00> : vector<16x128xf32>
    %33 = tpu.matmul %30, %32, %cst_37 {dimension_numbers = #tpu.dot_dimension_numbers<[1], [0], [0], [1], [0, 0, 1, 1], [], []>, precision = #tpu.contract_precision<fp32>} : vector<16x128xf32>, vector<128x128xf32>, vector<16x128xf32> -> vector<16x128xf32>
    %c1_38 = arith.constant 1 : index
    %c1_39 = arith.constant 1 : index
    %c0_40 = arith.constant 0 : index
    %c0_41 = arith.constant 0 : index
    %34 = vector.load %arg2[%c1_38, %c1_39, %c0_40, %c0_41] : memref<6x4x128x128xf32, #tpu.memory_space<vmem>>, vector<1x1x128x128xf32>
    %35 = vector.shape_cast %34 : vector<1x1x128x128xf32> to vector<128x128xf32>
    %cst_42 = arith.constant dense<0.000000e+00> : vector<16x128xf32>
    %36 = tpu.matmul %28, %35, %cst_42 {dimension_numbers = #tpu.dot_dimension_numbers<[1], [0], [0], [1], [0, 0, 1, 1], [], []>, precision = #tpu.contract_precision<fp32>} : vector<16x128xf32>, vector<128x128xf32>, vector<16x128xf32> -> vector<16x128xf32>
    %37 = arith.addf %33, %36 : vector<16x128xf32>
    %c9_43 = arith.constant 9 : index
    %c0_44 = arith.constant 0 : index
    %38 = vector.load %arg5[%c9_43, %c0_44] : memref<32x128xf32, #tpu.memory_space<vmem>>, vector<16x128xf32>
    %c1_45 = arith.constant 1 : index
    %c2_46 = arith.constant 2 : index
    %c0_47 = arith.constant 0 : index
    %c0_48 = arith.constant 0 : index
    %39 = vector.load %arg2[%c1_45, %c2_46, %c0_47, %c0_48] : memref<6x4x128x128xf32, #tpu.memory_space<vmem>>, vector<1x1x128x128xf32>
    %40 = vector.shape_cast %39 : vector<1x1x128x128xf32> to vector<128x128xf32>
    %cst_49 = arith.constant dense<0.000000e+00> : vector<16x128xf32>
    %41 = tpu.matmul %38, %40, %cst_49 {dimension_numbers = #tpu.dot_dimension_numbers<[1], [0], [0], [1], [0, 0, 1, 1], [], []>, precision = #tpu.contract_precision<fp32>} : vector<16x128xf32>, vector<128x128xf32>, vector<16x128xf32> -> vector<16x128xf32>
    %42 = arith.addf %37, %41 : vector<16x128xf32>
    %c10_50 = arith.constant 10 : index
    %c0_51 = arith.constant 0 : index
    %43 = vector.load %arg5[%c10_50, %c0_51] : memref<32x128xf32, #tpu.memory_space<vmem>>, vector<16x128xf32>
    %c1_52 = arith.constant 1 : index
    %c3_53 = arith.constant 3 : index
    %c0_54 = arith.constant 0 : index
    %c0_55 = arith.constant 0 : index
    %44 = vector.load %arg2[%c1_52, %c3_53, %c0_54, %c0_55] : memref<6x4x128x128xf32, #tpu.memory_space<vmem>>, vector<1x1x128x128xf32>
    %45 = vector.shape_cast %44 : vector<1x1x128x128xf32> to vector<128x128xf32>
    %cst_56 = arith.constant dense<0.000000e+00> : vector<16x128xf32>
    %46 = tpu.matmul %43, %45, %cst_56 {dimension_numbers = #tpu.dot_dimension_numbers<[1], [0], [0], [1], [0, 0, 1, 1], [], []>, precision = #tpu.contract_precision<fp32>} : vector<16x128xf32>, vector<128x128xf32>, vector<16x128xf32> -> vector<16x128xf32>
    %47 = arith.addf %42, %46 : vector<16x128xf32>
    %c1_57 = arith.constant 1 : index
    %c0_58 = arith.constant 0 : index
    %c0_59 = arith.constant 0 : index
    %48 = vector.load %arg3[%c1_57, %c0_58, %c0_59] : memref<6x1x128xf32, #tpu.memory_space<vmem>>, vector<1x1x128xf32>
    %49 = vector.shape_cast %48 : vector<1x1x128xf32> to vector<1x128xf32>
    %50 = vector.broadcast %49 : vector<1x128xf32> to vector<16x128xf32>
    %51 = arith.addf %47, %50 : vector<16x128xf32>
    %cst_60 = arith.constant 0.000000e+00 : f32
    %52 = vector.broadcast %cst_60 : f32 to vector<16x128xf32>
    %53 = arith.maximumf %51, %52 : vector<16x128xf32>
    %c8_61 = arith.constant 8 : index
    %c0_62 = arith.constant 0 : index
    %54 = vector.load %arg5[%c8_61, %c0_62] : memref<32x128xf32, #tpu.memory_space<vmem>>, vector<16x128xf32>
    tpu.vector_store %arg5[%c8_61, %c0_62], %53 {strides = array<i32>} : memref<32x128xf32, #tpu.memory_space<vmem>>, vector<16x128xf32>,
    %c7_63 = arith.constant 7 : index
    %c0_64 = arith.constant 0 : index
    %55 = vector.load %arg5[%c7_63, %c0_64] : memref<32x128xf32, #tpu.memory_space<vmem>>, vector<16x128xf32>
    %c2_65 = arith.constant 2 : index
    %c0_66 = arith.constant 0 : index
    %c0_67 = arith.constant 0 : index
    %c0_68 = arith.constant 0 : index
    %56 = vector.load %arg2[%c2_65, %c0_66, %c0_67, %c0_68] : memref<6x4x128x128xf32, #tpu.memory_space<vmem>>, vector<1x1x128x128xf32>
    %57 = vector.shape_cast %56 : vector<1x1x128x128xf32> to vector<128x128xf32>
    %cst_69 = arith.constant dense<0.000000e+00> : vector<16x128xf32>
    %58 = tpu.matmul %55, %57, %cst_69 {dimension_numbers = #tpu.dot_dimension_numbers<[1], [0], [0], [1], [0, 0, 1, 1], [], []>, precision = #tpu.contract_precision<fp32>} : vector<16x128xf32>, vector<128x128xf32>, vector<16x128xf32> -> vector<16x128xf32>
    %c2_70 = arith.constant 2 : index
    %c1_71 = arith.constant 1 : index
    %c0_72 = arith.constant 0 : index
    %c0_73 = arith.constant 0 : index
    %59 = vector.load %arg2[%c2_70, %c1_71, %c0_72, %c0_73] : memref<6x4x128x128xf32, #tpu.memory_space<vmem>>, vector<1x1x128x128xf32>
    %60 = vector.shape_cast %59 : vector<1x1x128x128xf32> to vector<128x128xf32>
    %cst_74 = arith.constant dense<0.000000e+00> : vector<16x128xf32>
    %61 = tpu.matmul %53, %60, %cst_74 {dimension_numbers = #tpu.dot_dimension_numbers<[1], [0], [0], [1], [0, 0, 1, 1], [], []>, precision = #tpu.contract_precision<fp32>} : vector<16x128xf32>, vector<128x128xf32>, vector<16x128xf32> -> vector<16x128xf32>
    %62 = arith.addf %58, %61 : vector<16x128xf32>
    %c9_75 = arith.constant 9 : index
    %c0_76 = arith.constant 0 : index
    %63 = vector.load %arg5[%c9_75, %c0_76] : memref<32x128xf32, #tpu.memory_space<vmem>>, vector<16x128xf32>
    %c2_77 = arith.constant 2 : index
    %c2_78 = arith.constant 2 : index
    %c0_79 = arith.constant 0 : index
    %c0_80 = arith.constant 0 : index
    %64 = vector.load %arg2[%c2_77, %c2_78, %c0_79, %c0_80] : memref<6x4x128x128xf32, #tpu.memory_space<vmem>>, vector<1x1x128x128xf32>
    %65 = vector.shape_cast %64 : vector<1x1x128x128xf32> to vector<128x128xf32>
    %cst_81 = arith.constant dense<0.000000e+00> : vector<16x128xf32>
    %66 = tpu.matmul %63, %65, %cst_81 {dimension_numbers = #tpu.dot_dimension_numbers<[1], [0], [0], [1], [0, 0, 1, 1], [], []>, precision = #tpu.contract_precision<fp32>} : vector<16x128xf32>, vector<128x128xf32>, vector<16x128xf32> -> vector<16x128xf32>
    %67 = arith.addf %62, %66 : vector<16x128xf32>
    %c10_82 = arith.constant 10 : index
    %c0_83 = arith.constant 0 : index
    %68 = vector.load %arg5[%c10_82, %c0_83] : memref<32x128xf32, #tpu.memory_space<vmem>>, vector<16x128xf32>
    %c2_84 = arith.constant 2 : index
    %c3_85 = arith.constant 3 : index
    %c0_86 = arith.constant 0 : index
    %c0_87 = arith.constant 0 : index
    %69 = vector.load %arg2[%c2_84, %c3_85, %c0_86, %c0_87] : memref<6x4x128x128xf32, #tpu.memory_space<vmem>>, vector<1x1x128x128xf32>
    %70 = vector.shape_cast %69 : vector<1x1x128x128xf32> to vector<128x128xf32>
    %cst_88 = arith.constant dense<0.000000e+00> : vector<16x128xf32>
    %71 = tpu.matmul %68, %70, %cst_88 {dimension_numbers = #tpu.dot_dimension_numbers<[1], [0], [0], [1], [0, 0, 1, 1], [], []>, precision = #tpu.contract_precision<fp32>} : vector<16x128xf32>, vector<128x128xf32>, vector<16x128xf32> -> vector<16x128xf32>
    %72 = arith.addf %67, %71 : vector<16x128xf32>
    %c2_89 = arith.constant 2 : index
    %c0_90 = arith.constant 0 : index
    %c0_91 = arith.constant 0 : index
    %73 = vector.load %arg3[%c2_89, %c0_90, %c0_91] : memref<6x1x128xf32, #tpu.memory_space<vmem>>, vector<1x1x128xf32>
    %74 = vector.shape_cast %73 : vector<1x1x128xf32> to vector<1x128xf32>
    %75 = vector.broadcast %74 : vector<1x128xf32> to vector<16x128xf32>
    %76 = arith.addf %72, %75 : vector<16x128xf32>
    %cst_92 = arith.constant 0.000000e+00 : f32
    %77 = vector.broadcast %cst_92 : f32 to vector<16x128xf32>
    %78 = arith.maximumf %76, %77 : vector<16x128xf32>
    %c8_93 = arith.constant 8 : index
    %c0_94 = arith.constant 0 : index
    %79 = vector.load %arg5[%c8_93, %c0_94] : memref<32x128xf32, #tpu.memory_space<vmem>>, vector<16x128xf32>
    tpu.vector_store %arg5[%c8_93, %c0_94], %78 {strides = array<i32>} : memref<32x128xf32, #tpu.memory_space<vmem>>, vector<16x128xf32>,
    %c7_95 = arith.constant 7 : index
    %c0_96 = arith.constant 0 : index
    %80 = vector.load %arg5[%c7_95, %c0_96] : memref<32x128xf32, #tpu.memory_space<vmem>>, vector<16x128xf32>
    %c3_97 = arith.constant 3 : index
    %c0_98 = arith.constant 0 : index
    %c0_99 = arith.constant 0 : index
    %c0_100 = arith.constant 0 : index
    %81 = vector.load %arg2[%c3_97, %c0_98, %c0_99, %c0_100] : memref<6x4x128x128xf32, #tpu.memory_space<vmem>>, vector<1x1x128x128xf32>
    %82 = vector.shape_cast %81 : vector<1x1x128x128xf32> to vector<128x128xf32>
    %cst_101 = arith.constant dense<0.000000e+00> : vector<16x128xf32>
    %83 = tpu.matmul %80, %82, %cst_101 {dimension_numbers = #tpu.dot_dimension_numbers<[1], [0], [0], [1], [0, 0, 1, 1], [], []>, precision = #tpu.contract_precision<fp32>} : vector<16x128xf32>, vector<128x128xf32>, vector<16x128xf32> -> vector<16x128xf32>
    %c3_102 = arith.constant 3 : index
    %c1_103 = arith.constant 1 : index
    %c0_104 = arith.constant 0 : index
    %c0_105 = arith.constant 0 : index
    %84 = vector.load %arg2[%c3_102, %c1_103, %c0_104, %c0_105] : memref<6x4x128x128xf32, #tpu.memory_space<vmem>>, vector<1x1x128x128xf32>
    %85 = vector.shape_cast %84 : vector<1x1x128x128xf32> to vector<128x128xf32>
    %cst_106 = arith.constant dense<0.000000e+00> : vector<16x128xf32>
    %86 = tpu.matmul %78, %85, %cst_106 {dimension_numbers = #tpu.dot_dimension_numbers<[1], [0], [0], [1], [0, 0, 1, 1], [], []>, precision = #tpu.contract_precision<fp32>} : vector<16x128xf32>, vector<128x128xf32>, vector<16x128xf32> -> vector<16x128xf32>
    %87 = arith.addf %83, %86 : vector<16x128xf32>
    %c9_107 = arith.constant 9 : index
    %c0_108 = arith.constant 0 : index
    %88 = vector.load %arg5[%c9_107, %c0_108] : memref<32x128xf32, #tpu.memory_space<vmem>>, vector<16x128xf32>
    %c3_109 = arith.constant 3 : index
    %c2_110 = arith.constant 2 : index
    %c0_111 = arith.constant 0 : index
    %c0_112 = arith.constant 0 : index
    %89 = vector.load %arg2[%c3_109, %c2_110, %c0_111, %c0_112] : memref<6x4x128x128xf32, #tpu.memory_space<vmem>>, vector<1x1x128x128xf32>
    %90 = vector.shape_cast %89 : vector<1x1x128x128xf32> to vector<128x128xf32>
    %cst_113 = arith.constant dense<0.000000e+00> : vector<16x128xf32>
    %91 = tpu.matmul %88, %90, %cst_113 {dimension_numbers = #tpu.dot_dimension_numbers<[1], [0], [0], [1], [0, 0, 1, 1], [], []>, precision = #tpu.contract_precision<fp32>} : vector<16x128xf32>, vector<128x128xf32>, vector<16x128xf32> -> vector<16x128xf32>
    %92 = arith.addf %87, %91 : vector<16x128xf32>
    %c10_114 = arith.constant 10 : index
    %c0_115 = arith.constant 0 : index
    %93 = vector.load %arg5[%c10_114, %c0_115] : memref<32x128xf32, #tpu.memory_space<vmem>>, vector<16x128xf32>
    %c3_116 = arith.constant 3 : index
    %c3_117 = arith.constant 3 : index
    %c0_118 = arith.constant 0 : index
    %c0_119 = arith.constant 0 : index
    %94 = vector.load %arg2[%c3_116, %c3_117, %c0_118, %c0_119] : memref<6x4x128x128xf32, #tpu.memory_space<vmem>>, vector<1x1x128x128xf32>
    %95 = vector.shape_cast %94 : vector<1x1x128x128xf32> to vector<128x128xf32>
    %cst_120 = arith.constant dense<0.000000e+00> : vector<16x128xf32>
    %96 = tpu.matmul %93, %95, %cst_120 {dimension_numbers = #tpu.dot_dimension_numbers<[1], [0], [0], [1], [0, 0, 1, 1], [], []>, precision = #tpu.contract_precision<fp32>} : vector<16x128xf32>, vector<128x128xf32>, vector<16x128xf32> -> vector<16x128xf32>
    %97 = arith.addf %92, %96 : vector<16x128xf32>
    %c3_121 = arith.constant 3 : index
    %c0_122 = arith.constant 0 : index
    %c0_123 = arith.constant 0 : index
    %98 = vector.load %arg3[%c3_121, %c0_122, %c0_123] : memref<6x1x128xf32, #tpu.memory_space<vmem>>, vector<1x1x128xf32>
    %99 = vector.shape_cast %98 : vector<1x1x128xf32> to vector<1x128xf32>
    %100 = vector.broadcast %99 : vector<1x128xf32> to vector<16x128xf32>
    %101 = arith.addf %97, %100 : vector<16x128xf32>
    %cst_124 = arith.constant 0.000000e+00 : f32
    %102 = vector.broadcast %cst_124 : f32 to vector<16x128xf32>
    %103 = arith.maximumf %101, %102 : vector<16x128xf32>
    %c8_125 = arith.constant 8 : index
    %c0_126 = arith.constant 0 : index
    %104 = vector.load %arg5[%c8_125, %c0_126] : memref<32x128xf32, #tpu.memory_space<vmem>>, vector<16x128xf32>
    tpu.vector_store %arg5[%c8_125, %c0_126], %103 {strides = array<i32>} : memref<32x128xf32, #tpu.memory_space<vmem>>, vector<16x128xf32>,
    %c7_127 = arith.constant 7 : index
    %c0_128 = arith.constant 0 : index
    %105 = vector.load %arg5[%c7_127, %c0_128] : memref<32x128xf32, #tpu.memory_space<vmem>>, vector<16x128xf32>
    %c4 = arith.constant 4 : index
    %c0_129 = arith.constant 0 : index
    %c0_130 = arith.constant 0 : index
    %c0_131 = arith.constant 0 : index
    %106 = vector.load %arg2[%c4, %c0_129, %c0_130, %c0_131] : memref<6x4x128x128xf32, #tpu.memory_space<vmem>>, vector<1x1x128x128xf32>
    %107 = vector.shape_cast %106 : vector<1x1x128x128xf32> to vector<128x128xf32>
    %cst_132 = arith.constant dense<0.000000e+00> : vector<16x128xf32>
    %108 = tpu.matmul %105, %107, %cst_132 {dimension_numbers = #tpu.dot_dimension_numbers<[1], [0], [0], [1], [0, 0, 1, 1], [], []>, precision = #tpu.contract_precision<fp32>} : vector<16x128xf32>, vector<128x128xf32>, vector<16x128xf32> -> vector<16x128xf32>
    %c4_133 = arith.constant 4 : index
    %c1_134 = arith.constant 1 : index
    %c0_135 = arith.constant 0 : index
    %c0_136 = arith.constant 0 : index
    %109 = vector.load %arg2[%c4_133, %c1_134, %c0_135, %c0_136] : memref<6x4x128x128xf32, #tpu.memory_space<vmem>>, vector<1x1x128x128xf32>
    %110 = vector.shape_cast %109 : vector<1x1x128x128xf32> to vector<128x128xf32>
    %cst_137 = arith.constant dense<0.000000e+00> : vector<16x128xf32>
    %111 = tpu.matmul %103, %110, %cst_137 {dimension_numbers = #tpu.dot_dimension_numbers<[1], [0], [0], [1], [0, 0, 1, 1], [], []>, precision = #tpu.contract_precision<fp32>} : vector<16x128xf32>, vector<128x128xf32>, vector<16x128xf32> -> vector<16x128xf32>
    %112 = arith.addf %108, %111 : vector<16x128xf32>
    %c9_138 = arith.constant 9 : index
    %c0_139 = arith.constant 0 : index
    %113 = vector.load %arg5[%c9_138, %c0_139] : memref<32x128xf32, #tpu.memory_space<vmem>>, vector<16x128xf32>
    %c4_140 = arith.constant 4 : index
    %c2_141 = arith.constant 2 : index
    %c0_142 = arith.constant 0 : index
    %c0_143 = arith.constant 0 : index
    %114 = vector.load %arg2[%c4_140, %c2_141, %c0_142, %c0_143] : memref<6x4x128x128xf32, #tpu.memory_space<vmem>>, vector<1x1x128x128xf32>
    %115 = vector.shape_cast %114 : vector<1x1x128x128xf32> to vector<128x128xf32>
    %cst_144 = arith.constant dense<0.000000e+00> : vector<16x128xf32>
    %116 = tpu.matmul %113, %115, %cst_144 {dimension_numbers = #tpu.dot_dimension_numbers<[1], [0], [0], [1], [0, 0, 1, 1], [], []>, precision = #tpu.contract_precision<fp32>} : vector<16x128xf32>, vector<128x128xf32>, vector<16x128xf32> -> vector<16x128xf32>
    %117 = arith.addf %112, %116 : vector<16x128xf32>
    %c10_145 = arith.constant 10 : index
    %c0_146 = arith.constant 0 : index
    %118 = vector.load %arg5[%c10_145, %c0_146] : memref<32x128xf32, #tpu.memory_space<vmem>>, vector<16x128xf32>
    %c4_147 = arith.constant 4 : index
    %c3_148 = arith.constant 3 : index
    %c0_149 = arith.constant 0 : index
    %c0_150 = arith.constant 0 : index
    %119 = vector.load %arg2[%c4_147, %c3_148, %c0_149, %c0_150] : memref<6x4x128x128xf32, #tpu.memory_space<vmem>>, vector<1x1x128x128xf32>
    %120 = vector.shape_cast %119 : vector<1x1x128x128xf32> to vector<128x128xf32>
    %cst_151 = arith.constant dense<0.000000e+00> : vector<16x128xf32>
    %121 = tpu.matmul %118, %120, %cst_151 {dimension_numbers = #tpu.dot_dimension_numbers<[1], [0], [0], [1], [0, 0, 1, 1], [], []>, precision = #tpu.contract_precision<fp32>} : vector<16x128xf32>, vector<128x128xf32>, vector<16x128xf32> -> vector<16x128xf32>
    %122 = arith.addf %117, %121 : vector<16x128xf32>
    %c4_152 = arith.constant 4 : index
    %c0_153 = arith.constant 0 : index
    %c0_154 = arith.constant 0 : index
    %123 = vector.load %arg3[%c4_152, %c0_153, %c0_154] : memref<6x1x128xf32, #tpu.memory_space<vmem>>, vector<1x1x128xf32>
    %124 = vector.shape_cast %123 : vector<1x1x128xf32> to vector<1x128xf32>
    %125 = vector.broadcast %124 : vector<1x128xf32> to vector<16x128xf32>
    %126 = arith.addf %122, %125 : vector<16x128xf32>
    %cst_155 = arith.constant 0.000000e+00 : f32
    %127 = vector.broadcast %cst_155 : f32 to vector<16x128xf32>
    %128 = arith.maximumf %126, %127 : vector<16x128xf32>
    %c8_156 = arith.constant 8 : index
    %c0_157 = arith.constant 0 : index
    %129 = vector.load %arg5[%c8_156, %c0_157] : memref<32x128xf32, #tpu.memory_space<vmem>>, vector<16x128xf32>
    tpu.vector_store %arg5[%c8_156, %c0_157], %128 {strides = array<i32>} : memref<32x128xf32, #tpu.memory_space<vmem>>, vector<16x128xf32>,
    %c7_158 = arith.constant 7 : index
    %c0_159 = arith.constant 0 : index
    %130 = vector.load %arg5[%c7_158, %c0_159] : memref<32x128xf32, #tpu.memory_space<vmem>>, vector<16x128xf32>
    %c5 = arith.constant 5 : index
    %c0_160 = arith.constant 0 : index
    %c0_161 = arith.constant 0 : index
    %c0_162 = arith.constant 0 : index
    %131 = vector.load %arg2[%c5, %c0_160, %c0_161, %c0_162] : memref<6x4x128x128xf32, #tpu.memory_space<vmem>>, vector<1x1x128x128xf32>
    %132 = vector.shape_cast %131 : vector<1x1x128x128xf32> to vector<128x128xf32>
    %cst_163 = arith.constant dense<0.000000e+00> : vector<16x128xf32>
    %133 = tpu.matmul %130, %132, %cst_163 {dimension_numbers = #tpu.dot_dimension_numbers<[1], [0], [0], [1], [0, 0, 1, 1], [], []>, precision = #tpu.contract_precision<fp32>} : vector<16x128xf32>, vector<128x128xf32>, vector<16x128xf32> -> vector<16x128xf32>
    %c5_164 = arith.constant 5 : index
    %c1_165 = arith.constant 1 : index
    %c0_166 = arith.constant 0 : index
    %c0_167 = arith.constant 0 : index
    %134 = vector.load %arg2[%c5_164, %c1_165, %c0_166, %c0_167] : memref<6x4x128x128xf32, #tpu.memory_space<vmem>>, vector<1x1x128x128xf32>
    %135 = vector.shape_cast %134 : vector<1x1x128x128xf32> to vector<128x128xf32>
    %cst_168 = arith.constant dense<0.000000e+00> : vector<16x128xf32>
    %136 = tpu.matmul %128, %135, %cst_168 {dimension_numbers = #tpu.dot_dimension_numbers<[1], [0], [0], [1], [0, 0, 1, 1], [], []>, precision = #tpu.contract_precision<fp32>} : vector<16x128xf32>, vector<128x128xf32>, vector<16x128xf32> -> vector<16x128xf32>
    %137 = arith.addf %133, %136 : vector<16x128xf32>
    %c9_169 = arith.constant 9 : index
    %c0_170 = arith.constant 0 : index
    %138 = vector.load %arg5[%c9_169, %c0_170] : memref<32x128xf32, #tpu.memory_space<vmem>>, vector<16x128xf32>
    %c5_171 = arith.constant 5 : index
    %c2_172 = arith.constant 2 : index
    %c0_173 = arith.constant 0 : index
    %c0_174 = arith.constant 0 : index
    %139 = vector.load %arg2[%c5_171, %c2_172, %c0_173, %c0_174] : memref<6x4x128x128xf32, #tpu.memory_space<vmem>>, vector<1x1x128x128xf32>
    %140 = vector.shape_cast %139 : vector<1x1x128x128xf32> to vector<128x128xf32>
    %cst_175 = arith.constant dense<0.000000e+00> : vector<16x128xf32>
    %141 = tpu.matmul %138, %140, %cst_175 {dimension_numbers = #tpu.dot_dimension_numbers<[1], [0], [0], [1], [0, 0, 1, 1], [], []>, precision = #tpu.contract_precision<fp32>} : vector<16x128xf32>, vector<128x128xf32>, vector<16x128xf32> -> vector<16x128xf32>
    %142 = arith.addf %137, %141 : vector<16x128xf32>
    %c10_176 = arith.constant 10 : index
    %c0_177 = arith.constant 0 : index
    %143 = vector.load %arg5[%c10_176, %c0_177] : memref<32x128xf32, #tpu.memory_space<vmem>>, vector<16x128xf32>
    %c5_178 = arith.constant 5 : index
    %c3_179 = arith.constant 3 : index
    %c0_180 = arith.constant 0 : index
    %c0_181 = arith.constant 0 : index
    %144 = vector.load %arg2[%c5_178, %c3_179, %c0_180, %c0_181] : memref<6x4x128x128xf32, #tpu.memory_space<vmem>>, vector<1x1x128x128xf32>
    %145 = vector.shape_cast %144 : vector<1x1x128x128xf32> to vector<128x128xf32>
    %cst_182 = arith.constant dense<0.000000e+00> : vector<16x128xf32>
    %146 = tpu.matmul %143, %145, %cst_182 {dimension_numbers = #tpu.dot_dimension_numbers<[1], [0], [0], [1], [0, 0, 1, 1], [], []>, precision = #tpu.contract_precision<fp32>} : vector<16x128xf32>, vector<128x128xf32>, vector<16x128xf32> -> vector<16x128xf32>
    %147 = arith.addf %142, %146 : vector<16x128xf32>
    %c5_183 = arith.constant 5 : index
    %c0_184 = arith.constant 0 : index
    %c0_185 = arith.constant 0 : index
    %148 = vector.load %arg3[%c5_183, %c0_184, %c0_185] : memref<6x1x128xf32, #tpu.memory_space<vmem>>, vector<1x1x128xf32>
    %149 = vector.shape_cast %148 : vector<1x1x128xf32> to vector<1x128xf32>
    %150 = vector.broadcast %149 : vector<1x128xf32> to vector<16x128xf32>
    %151 = arith.addf %147, %150 : vector<16x128xf32>
    %c0_186 = arith.constant 0 : index
    %c0_187 = arith.constant 0 : index
    %c0_188 = arith.constant 0 : index
    %152 = vector.load %arg4[%c0_186, %c0_187, %c0_188] : memref<1x16x128xf32, #tpu.memory_space<vmem>>, vector<1x16x128xf32>
    %153 = vector.shape_cast %152 : vector<1x16x128xf32> to vector<16x128xf32>
    %154 = vector.shape_cast %151 : vector<16x128xf32> to vector<1x16x128xf32>
    tpu.vector_store %arg4[%c0_186, %c0_187, %c0_188], %154 {strides = array<i32>} : memref<1x16x128xf32, #tpu.memory_space<vmem>>, vector<1x16x128xf32>,
    return
  }
  func.func @transform_0(%arg0: i32) -> (i32, i32, i32) {
    %c0_i32 = arith.constant 0 : i32
    %c0_i32_0 = arith.constant 0 : i32
    %c0_i32_1 = arith.constant 0 : i32
    return %arg0, %c0_i32, %c0_i32_0 : i32, i32, i32
  }
  func.func @transform_1(%arg0: i32) -> (i32, i32, i32, i32) {
    %c0_i32 = arith.constant 0 : i32
    %c0_i32_0 = arith.constant 0 : i32
    %c0_i32_1 = arith.constant 0 : i32
    %c0_i32_2 = arith.constant 0 : i32
    %c0_i32_3 = arith.constant 0 : i32
    return %c0_i32, %c0_i32_0, %c0_i32_1, %c0_i32_2 : i32, i32, i32, i32
  }
  func.func @transform_2(%arg0: i32) -> (i32, i32, i32) {
    %c0_i32 = arith.constant 0 : i32
    %c0_i32_0 = arith.constant 0 : i32
    %c0_i32_1 = arith.constant 0 : i32
    %c0_i32_2 = arith.constant 0 : i32
    return %c0_i32, %c0_i32_0, %c0_i32_1 : i32, i32, i32
  }
  func.func @transform_3(%arg0: i32) -> (i32, i32, i32) {
    %c0_i32 = arith.constant 0 : i32
    %c0_i32_0 = arith.constant 0 : i32
    %c0_i32_1 = arith.constant 0 : i32
    return %arg0, %c0_i32, %c0_i32_0 : i32, i32, i32
  }
}

</mosaic_0001>

<bundles_post_ra>
// kernel: auto_map2d_forward.1
= control target key start
LH: loop header
LB: loop body
LE: loop exit
PB: predicated region body
PF: predicated region fallthrough
CT: control target
= control target key end

     0   :  { %8 = vsyncpa [#allocation4], 0  ;;  %s16735_s0 = inlined_call_operand.vmem [shape: f32[2,16,128], index: 0, kind: input, shape index: {}]   ;;  %s16736_s1 = inlined_call_operand.hbm [shape: f32[6,4,128,128], index: 1, kind: input, shape index: {}]   ;;  %s16737_s2 = inlined_call_operand.hbm [shape: f32[6,1,128], index: 2, kind: input, shape index: {}]   ;;  %s16738_s3 = inlined_call_operand.vmem [shape: f32[2,16,128], index: 3, kind: output, shape index: {}]  }
   0x1   :  { %9 = vsyncpa [#allocation6], 0  ;;  %s9908_s12 = smov 0  }
   0x2 LB: > { %s125_s15 = sshll.u32 %s16736_s1, 4  ;;  %s9917_s16 = sadd.s32 4294967295, %s9879_s12   ;;  %s9879_s12 = sphi %s9908_s12, %s15_s12   ;;  %s126_s15 = int_to_ptr.hbm [resolvable:$true] %s125_s15 }
   0x3   : > { %p9750_p0 = scmp.ge.s32.totalorder %s9879_s12, 1  ;;  %p114_p1 = scmp.lt.s32.totalorder %s9879_s12, 3 }
   0x4   : > { %p9780_p2 = scmp.eq.s32.totalorder %s9917_s16, 0  ;;  %s9881_s18 = smov [#allocation3]  }
   0x5   : > { %p9922_p3 = pnand %p9750_p0, %p114_p1  ;;  %s127_s19 = sshll.u32 %s9881_s18, 4  ;;  %s128_s19 = int_to_ptr.vmem [resolvable:$true] %s127_s19 }
   0x6   : > { %s139_s22 = sshll.u32 %s16737_s2, 4  ;;  %s9882_s23 = smov [#allocation5]   ;;  %s140_s22 = int_to_ptr.hbm [resolvable:$true] %s139_s22 }
   0x7   : > { %p9773_p4 = pneg %p9922_p3  ;;  %s141_s24 = sshll.u32 %s9882_s23, 4  ;;  %s142_s24 = int_to_ptr.vmem [resolvable:$true] %s141_s24 }
   0x8   : > { %s9883_s25 = smov 128   ;;  %s9884_s26 = smov 8  }
   0x9   : > { %p9774_p5 = pnand %p9780_p2, %p9773_p4  ;;  %s9885_s27 = smov 16  }
   0xa   : > { %s9886_s28 = smov 1   ;;  %165 = sbr.rel (%p9922_p3) target bundleno = 1864 (0x748), region = 32 }
   0xb   : > { %9776 = dma.hbm_to_vmem [thread:$0]  (!%p9774_p5), %s126_s15, 49152, %s128_s19, [#allocation4], %s9883_s25, %s9883_s25, %s9884_s26  }
   0xc   : > { %9779 = dma.hbm_to_vmem [thread:$0]  (!%p9774_p5), %s140_s22, 96, %s142_s24, [#allocation6], %s9885_s27, %s9885_s27, %s9886_s28  }
   0xf   : > { %9870 = dma.done.wait (%p9780_p2), [#allocation4], 49152  }
  0x10   : > { %9872 = vsyncadd (%p9780_p2), [#allocation4], 4294918144 }
  0x11   : > { %9874 = dma.done.wait (%p9780_p2), [#allocation6], 96  }
  0x12   : > { %9876 = vsyncadd (%p9780_p2), [#allocation6], 4294967200  ;;  %v247_v0 = vld [vmem:[#allocation3 + $0xf8] sm:$0xff]  ;;  %v246_v1 = vld [vmem:[#allocation3 + $0xf0] sm:$0xff]  ;;  %p195_p6 = scmp.lt.s32.totalorder %s9917_s16, 1 }
  0x13   : > { %v245_v2 = vld [vmem:[#allocation3 + $0xe8] sm:$0xff]  ;;  %v9943_v3 = vand.u32 4294901760, %v247_v0  ;;  %v9945_v4 = vand.u32 4294901760, %v246_v1  ;;  %v244_v6 = vld [vmem:[#allocation3 + $0xe0] sm:$0xff]  ;;  %v243_v7 = vld [vmem:[#allocation3 + $0xd8] sm:$0xff] }
  0x14   : > { %v9947_v5 = vand.u32 4294901760, %v245_v2  ;;  %v242_v8 = vld [vmem:[#allocation3 + $0xd0] sm:$0xff]  ;;  %v9949_v9 = vand.u32 4294901760, %v244_v6  ;;  %v9951_v10 = vand.u32 4294901760, %v243_v7  ;;  %v241_v12 = vld [vmem:[#allocation3 + $0xc8] sm:$0xff]  ;;  %v240_v13 = vld [vmem:[#allocation3 + $0xc0] sm:$0xff] }
  0x15   : > { %v9953_v11 = vand.u32 4294901760, %v242_v8  ;;  %249 = vmatpush.msra.mxu0 %v9943_v3  ;;  %v9957_v14 = vsub.f32 %v247_v0, %v9943_v3  ;;  %v9960_v15 = vsub.f32 %v246_v1, %v9945_v4  ;;  %462 = vmatpush.msra.mxu3 %v9943_v3  ;;  %v9966_v17 = vand.u32 4294901760, %v241_v12  ;;  %v239_v18 = vld [vmem:[#allocation3 + $0xb8] sm:$0xff]  ;;  %v238_v26 = vld [vmem:[#allocation3 + $0xb0] sm:$0xff]  ;;  %s17724_s16 = smov (!%p195_p6, %s9917_s16), 1  ;;  %v237_v36 = vld [vmem:[#allocation3 + $0xa8] sm:$0xff] }
  0x16   : > { %v9964_v16 = vsub.f32 %v245_v2, %v9947_v5  ;;  %v9970_v19 = vsub.f32 %v244_v6, %v9949_v9  ;;  %v9973_v20 = vsub.f32 %v243_v7, %v9951_v10  ;;  %v9975_v21 = vand.u32 4294901760, %v240_v13  ;;  %v236_v42 = vld [vmem:[#allocation3 + $0xa0] sm:$0xff]  ;;  %v235_v48 = vld [vmem:[#allocation3 + $0x98] sm:$0xff]  ;;  %s9763_s29 = sshll.u32 %s17724_s16, 4  ;;  %v234_v54 = vld [vmem:[#allocation3 + $0x90] sm:$0xff] }
  0x17   : > { %251 = vmatpush.msra.mxu0 %v9945_v4  ;;  %404 = vmatpush.msra.mxu2 %v9957_v14  ;;  %v16754_v22 = vand.u32 4294901760, %v9957_v14  ;;  %v16753_v23 = vand.u32 4294901760, %v9960_v15  ;;  %v9983_v25 = vsub.f32 %v242_v8, %v9953_v11  ;;  %v9987_v28 = vand.u32 4294901760, %v239_v18  ;;  %v230_v59 = vld [vmem:[#allocation3 + $0x78] sm:$0xff]  ;;  %s10062_s5 = scalar_lea.vmem %s16735_s0, %s9763_s29  ;;  %v233_v61 = vld [vmem:[#allocation3 + $0x88] sm:$0xff]  ;;  %v229_v2 = vld [vmem:[#allocation3 + $0x70] sm:$0xff]  ;;  %s204_s8 = scalar_lea.vmem %s16738_s3, %s9763_s29 }
  0x18   : > { %v16750_v24 = vand.u32 4294901760, %v9964_v16  ;;  %464 = vmatpush.msra.mxu3 %v9945_v4  ;;  %v16749_v27 = vand.u32 4294901760, %v9970_v19  ;;  %v9990_v29 = vsub.f32 %v241_v12, %v9966_v17  ;;  %v16748_v33 = vand.u32 4294901760, %v9973_v20  ;;  %v232_v7 = vld [vmem:[#allocation3 + $0x80] sm:$0xff] }
  0x19   : > { %253 = vmatpush.msra.mxu0 %v9947_v5  ;;  %407 = vmatpush.msra.mxu2 %v9960_v15  ;;  %v300_v30 = vsub.f32 %v9957_v14, %v16754_v22  ;;  %v306_v31 = vsub.f32 %v9960_v15, %v16753_v23  ;;  %v10010_v34 = vand.u32 4294901760, %v238_v26  ;;  %v10013_v35 = vsub.f32 %v240_v13, %v9975_v21  ;;  %v10081_v12 = vld [vmem:[%s10062_s5] sm:$0xff] }
  0x1a   : > { %v312_v32 = vsub.f32 %v9964_v16, %v16750_v24  ;;  %466 = vmatpush.msra.mxu3 %v9947_v5  ;;  %v318_v39 = vsub.f32 %v9970_v19, %v16749_v27  ;;  %v16746_v40 = vand.u32 4294901760, %v9983_v25  ;;  %v16745_v41 = vand.u32 4294901760, %v9990_v29  ;;  %211 = vst [vmem:[#allocation2 + $0x8] sm:$0xff] %v10081_v12 }
  0x1b   : > { %255 = vmatpush.msra.mxu0 %v9949_v9  ;;  %v301_v37 = vand.u32 4294901760, %v300_v30  ;;  %410 = vmatpush.msra.mxu2 %v9964_v16  ;;  %v307_v38 = vand.u32 4294901760, %v306_v31  ;;  %v324_v44 = vsub.f32 %v9973_v20, %v16748_v33  ;;  %v10027_v45 = vand.u32 4294901760, %v237_v36  ;;  %v228_v31 = vld [vmem:[#allocation3 + $0x68] sm:$0xff] }
  0x1c   : > { %468 = vmatpush.msra.mxu3 %v9949_v9  ;;  %v313_v43 = vand.u32 4294901760, %v312_v32  ;;  %v10030_v46 = vsub.f32 %v239_v18, %v9987_v28  ;;  %v16743_v47 = vand.u32 4294901760, %v10013_v35  ;;  %v319_v49 = vand.u32 4294901760, %v318_v39 }
  0x1d   : > { %257 = vmatpush.msra.mxu0 %v9951_v10  ;;  %302 = vmatpush.msra.mxu1 %v301_v37  ;;  %v330_v50 = vsub.f32 %v9983_v25, %v16746_v40  ;;  %v10040_v51 = vand.u32 4294901760, %v236_v42  ;;  %v10043_v52 = vsub.f32 %v238_v26, %v10010_v34  ;;  %v336_v53 = vsub.f32 %v9990_v29, %v16745_v41 }
  0x1e   : > { %413 = vmatpush.msra.mxu2 %v9970_v19  ;;  %470 = vmatpush.msra.mxu3 %v9951_v10  ;;  %v325_v55 = vand.u32 4294901760, %v324_v44  ;;  %v10051_v56 = vand.u32 4294901760, %v235_v48  ;;  %v16742_v57 = vand.u32 4294901760, %v10030_v46  ;;  %v10055_v58 = vsub.f32 %v237_v36, %v10027_v45 }
  0x1f   : > { %259 = vmatpush.msra.mxu0 %v9953_v11  ;;  %308 = vmatpush.msra.mxu1 %v307_v38  ;;  %v342_v60 = vsub.f32 %v10013_v35, %v16743_v47  ;;  %v331_v62 = vand.u32 4294901760, %v330_v50  ;;  %v10070_v63 = vand.u32 4294901760, %v234_v54  ;;  %v16741_v0 = vand.u32 4294901760, %v10043_v52  ;;  %v224_v47 = vld [vmem:[#allocation3 + $0x48] sm:$0xff] }
  0x20   : > { %416 = vmatpush.msra.mxu2 %v9973_v20  ;;  %472 = vmatpush.msra.mxu3 %v9953_v11  ;;  %v10074_v1 = vsub.f32 %v236_v42, %v10040_v51  ;;  %v337_v6 = vand.u32 4294901760, %v336_v53  ;;  %v10078_v8 = vand.u32 4294901760, %v230_v59  ;;  %v348_v13 = vsub.f32 %v10030_v46, %v16742_v57 }
  0x21   : > { %261 = vmatpush.msra.mxu0 %v9966_v17  ;;  %314 = vmatpush.msra.mxu1 %v313_v43  ;;  %17185 = vst [vmem:[#allocation9_spill] sm:$0xff] %v10070_v63  ;;  %v10087_v18 = vand.u32 4294901760, %v233_v61  ;;  %v16739_v26 = vand.u32 4294901760, %v10055_v58  ;;  %v10091_v30 = vsub.f32 %v235_v48, %v10051_v56  ;;  %v343_v32 = vand.u32 4294901760, %v342_v60  ;;  %v227_v43 = vld [vmem:[#allocation3 + $0x60] sm:$0xff]  ;;  %v226_v60 = vld [vmem:[#allocation3 + $0x58] sm:$0xff] }
  0x22   : > { %419 = vmatpush.msra.mxu2 %v9983_v25  ;;  %474 = vmatpush.msra.mxu3 %v9966_v17  ;;  %v10096_v36 = vand.u32 4294901760, %v229_v2  ;;  %v354_v37 = vsub.f32 %v10043_v52, %v16741_v0  ;;  %v10102_v38 = vand.u32 4294901760, %v232_v7  ;;  %v16740_v39 = vand.u32 4294901760, %v10074_v1 }
  0x23   : > { %263 = vmatpush.msra.mxu0 %v9975_v21  ;;  %320 = vmatpush.msra.mxu1 %v319_v49  ;;  %17186 = vst [vmem:[#allocation10_spill] sm:$0xff] %v10087_v18  ;;  %v10106_v42 = vsub.f32 %v234_v54, %v10070_v63  ;;  %v10111_v44 = vsub.f32 %v230_v59, %v10078_v8  ;;  %v10113_v48 = vand.u32 4294901760, %v228_v31  ;;  %v349_v49 = vand.u32 4294901760, %v348_v13 }
  0x24   : > { %422 = vmatpush.msra.mxu2 %v9990_v29  ;;  %476 = vmatpush.msra.mxu3 %v9975_v21  ;;  %17187 = vst [vmem:[#allocation11_spill] sm:$0xff] %v10102_v38  ;;  %v360_v50 = vsub.f32 %v10055_v58, %v16739_v26  ;;  %v16744_v53 = vand.u32 4294901760, %v10091_v30  ;;  %v10121_v54 = vsub.f32 %v233_v61, %v10087_v18  ;;  %v10128_v59 = vand.u32 4294901760, %v227_v43 }
  0x25   : > { %265 = vmatpush.msra.mxu0 %v9987_v28  ;;  %326 = vmatpush.msra.mxu1 %v325_v55  ;;  %v10126_v55 = vsub.f32 %v229_v2, %v10096_v36  ;;  %v16747_v61 = vand.u32 4294901760, %v10106_v42  ;;  %v10136_v13 = vsub.f32 %v232_v7, %v10102_v38  ;;  %v16751_v2 = vand.u32 4294901760, %v10111_v44 }
  0x26   : > { %425 = vmatpush.msra.mxu2 %v10013_v35  ;;  %478 = vmatpush.msra.mxu3 %v9987_v28  ;;  %v10142_v26 = vsub.f32 %v228_v31, %v10113_v48  ;;  %v372_v7 = vsub.f32 %v10091_v30, %v16744_v53  ;;  %v10149_v0 = vand.u32 4294901760, %v226_v60  ;;  %v10155_v57 = vsub.f32 %v227_v43, %v10128_v59 }
  0x27   : > { %267 = vmatpush.msra.mxu0 %v10010_v34  ;;  %332 = vmatpush.msra.mxu1 %v331_v62  ;;  %v355_v62 = vand.u32 4294901760, %v354_v37  ;;  %v361_v37 = vand.u32 4294901760, %v360_v50  ;;  %v16755_v31 = vand.u32 4294901760, %v10126_v55  ;;  %v378_v53 = vsub.f32 %v10106_v42, %v16747_v61 }
  0x28   : > { %428 = vmatpush.msra.mxu2 %v10030_v46  ;;  %480 = vmatpush.msra.mxu3 %v10010_v34  ;;  %v16757_v41 = vand.u32 4294901760, %v10136_v13  ;;  %v672_v43 = vsub.f32 %v10111_v44, %v16751_v2  ;;  %v373_v61 = vand.u32 4294901760, %v372_v7  ;;  %v10179_v27 = vsub.f32 %v226_v60, %v10149_v0  ;;  %v222_v7 = vld [vmem:[#allocation3 + $0x38] sm:$0xff] }
  0x29   : > { %269 = vmatpush.msra.mxu0 %v10027_v45  ;;  %338 = vmatpush.msra.mxu1 %v337_v6  ;;  %v366_v6 = vsub.f32 %v10074_v1, %v16740_v39  ;;  %v16752_v39 = vand.u32 4294901760, %v10121_v54  ;;  %v10181_v24 = vand.u32 4294901760, %v224_v47  ;;  %v678_v2 = vsub.f32 %v10126_v55, %v16755_v31 }
  0x2a   : > { %431 = vmatpush.msra.mxu2 %v10043_v52  ;;  %482 = vmatpush.msra.mxu3 %v10027_v45  ;;  %v390_v60 = vsub.f32 %v10136_v13, %v16757_v41  ;;  %v9887_v22 = vmov 0.0   ;;  %v17188_v31 = vand.u32 4294901760, %v9957_v14  ;;  %v10209_v14 = vand.u32 4294901760, %v222_v7 }
  0x2b   : > { %271 = vmatpush.msra.mxu0 %v10040_v51  ;;  %344 = vmatpush.msra.mxu1 %v343_v32  ;;  %v225_v32 = vld [vmem:[#allocation3 + $0x50] sm:$0xff]  ;;  %v367_v50 = vand.u32 4294901760, %v366_v6  ;;  %v223_v6 = vld [vmem:[#allocation3 + $0x40] sm:$0xff]  ;;  %v384_v33 = vsub.f32 %v10121_v54, %v16752_v39  ;;  %v379_v39 = vand.u32 4294901760, %v378_v53  ;;  %205 = vst [vmem:[#allocation2] sm:$0xff] %v9887_v22 }
  0x2c   : > { %434 = vmatpush.msra.mxu2 %v10055_v58  ;;  %484 = vmatpush.msra.mxu3 %v10040_v51  ;;  %v10165_v40 = vand.u32 4294901760, %v225_v32  ;;  %208 = vst [vmem:[#allocation2 + $0x18] sm:$0xff] %v9887_v22 }
  0x2d   : > { %273 = vmatpush.msra.mxu0 %v10051_v56  ;;  %350 = vmatpush.msra.mxu1 %v349_v49  ;;  %v10158_v49 = vld [vmem:[%s10062_s5 + $0x8] sm:$0xff]  ;;  %v385_v41 = vand.u32 4294901760, %v384_v33 }
  0x2e   : > { %437 = vmatpush.msra.mxu2 %v10074_v1  ;;  %486 = vmatpush.msra.mxu3 %v10051_v56  ;;  %212 = vst [vmem:[#allocation2 + $0x10] sm:$0xff] %v10158_v49  ;;  %v10194_v23 = vsub.f32 %v225_v32, %v10165_v40  ;;  %v220_v33 = vld [vmem:[#allocation3 + $0x28] sm:$0xff] }
  0x2f   : > { %275 = vmatpush.msra.mxu0 %v10070_v63  ;;  %356 = vmatpush.msra.mxu1 %v355_v62  ;;  %v10196_v62 = vand.u32 4294901760, %v223_v6 }
  0x30   : > { %440 = vmatpush.msra.mxu2 %v10091_v30  ;;  %488 = vmatpush.msra.mxu3 %v10070_v63  ;;  %v10207_v63 = vsub.f32 %v224_v47, %v10181_v24  ;;  %v17194_v47 = vand.u32 4294901760, %v9970_v19  ;;  %v17196_v19 = vand.u32 4294901760, %v9973_v20 }
  0x31   : > { %277 = vmatpush.msra.mxu0 %v10087_v18  ;;  %362 = vmatpush.msra.mxu1 %v361_v37  ;;  %v673_v37 = vand.u32 4294901760, %v672_v43  ;;  %v679_v43 = vand.u32 4294901760, %v678_v2  ;;  %v10220_v32 = vsub.f32 %v223_v6, %v10196_v62  ;;  %v10234_v6 = vand.u32 4294901760, %v220_v33 }
  0x32   : > { %443 = vmatpush.msra.mxu2 %v10106_v42  ;;  %490 = vmatpush.msra.mxu3 %v10087_v18  ;;  %v221_v18 = vld [vmem:[#allocation3 + $0x30] sm:$0xff] }
  0x33   : > { %279 = vmatpush.msra.mxu0 %v10102_v38  ;;  %368 = vmatpush.msra.mxu1 %v367_v50  ;;  %v17189_v50 = vand.u32 4294901760, %v10142_v26 }
  0x34   : > { %446 = vmatpush.msra.mxu2 %v10121_v54  ;;  %492 = vmatpush.msra.mxu3 %v10102_v38  ;;  %v10222_v38 = vand.u32 4294901760, %v221_v18 }
  0x35   : > { %509 = vmatpush.msrb.mxu0 %v17188_v31  ;;  %v684_v53 = vsub.f32 %v10142_v26, %v17189_v50  ;;  %374 = vmatpush.msra.mxu1 %v373_v61  ;;  %v17190_v31 = vand.u32 4294901760, %v9960_v15  ;;  %v17191_v50 = vand.u32 4294901760, %v10155_v57  ;;  %v391_v61 = vand.u32 4294901760, %v390_v60 }
  0x36   : > { %449 = vmatpush.msra.mxu2 %v10136_v13  ;;  %v17192_v15 = vand.u32 4294901760, %v9964_v16  ;;  %674 = vmatpush.msrb.mxu3 %v673_v37  ;;  %v707_v60 = vand.u32 4294901760, %v10207_v63 }
  0x37   : > { %513 = vmatpush.msrb.mxu0 %v17190_v31  ;;  %v690_v22 = vsub.f32 %v10155_v57, %v17191_v50  ;;  %380 = vmatpush.msra.mxu1 %v379_v39  ;;  %v685_v2 = vand.u32 4294901760, %v684_v53  ;;  %v17193_v39 = vand.u32 4294901760, %v10179_v27  ;;  %v10232_v50 = vsub.f32 %v222_v7, %v10209_v14 }
  0x38   : > { %621 = vmatpush.msrb.mxu2 %v10078_v8  ;;  %680 = vmatpush.msrb.mxu3 %v679_v43  ;;  %v713_v53 = vand.u32 4294901760, %v10220_v32  ;;  %v10247_v7 = vand.u32 4294901760, %v10081_v12 }
  0x39   : > { %517 = vmatpush.msrb.mxu0 %v17192_v15  ;;  %386 = vmatpush.msra.mxu1 %v385_v41  ;;  %v696_v31 = vsub.f32 %v10179_v27, %v17193_v39  ;;  %v691_v16 = vand.u32 4294901760, %v690_v22  ;;  %v17195_v41 = vand.u32 4294901760, %v10194_v23  ;;  %v10244_v15 = vsub.f32 %v221_v18, %v10222_v38  ;;  %v219_v39 = vld [vmem:[#allocation3 + $0x20] sm:$0xff] }
  0x3a   : > { %623 = vmatpush.msrb.mxu2 %v10096_v36  ;;  %686 = vmatpush.msrb.mxu3 %v685_v2  ;;  %v708_v22 = vsub.f32 %v10207_v63, %v707_v60  ;;  %v16760_v18 = vand.u32 4294901760, %v10232_v50  ;;  %v714_v2 = vsub.f32 %v10220_v32, %v713_v53 }
  0x3b   : > { %521 = vmatpush.msrb.mxu0 %v17194_v47  ;;  %392 = vmatpush.msra.mxu1 %v391_v61  ;;  %v702_v37 = vsub.f32 %v10194_v23, %v17195_v41  ;;  %v697_v43 = vand.u32 4294901760, %v696_v31  ;;  %v10258_v61 = vsub.f32 %v220_v33, %v10234_v6  ;;  %v218_v47 = vld [vmem:[#allocation3 + $0x18] sm:$0xff]  ;;  %v17197_v41 = vand.u32 4294901760, %v9983_v25  ;;  %v217_v25 = vld [vmem:[#allocation3 + $0x10] sm:$0xff] }
  0x3c   : > { %625 = vmatpush.msrb.mxu2 %v10113_v48  ;;  %692 = vmatpush.msrb.mxu3 %v691_v16  ;;  %v725_v31 = vand.u32 4294901760, %v10244_v15  ;;  %v10272_v33 = vsub.f32 %v10081_v12, %v10247_v7  ;;  %v709_v16 = vand.u32 4294901760, %v708_v22  ;;  %v17199_v12 = vand.u32 4294901760, %v10013_v35 }
  0x3d   : > { %525 = vmatpush.msrb.mxu0 %v17196_v19  ;;  %580 = vmatpush.msrb.mxu1 %v9943_v3  ;;  %v10263_v3 = vand.u32 4294901760, %v219_v39  ;;  %v703_v20 = vand.u32 4294901760, %v702_v37  ;;  %v17198_v19 = vand.u32 4294901760, %v9990_v29  ;;  %v720_v37 = vsub.f32 %v10232_v50, %v16760_v18 }
  0x3e   : > { %627 = vmatpush.msrb.mxu2 %v10128_v59  ;;  %698 = vmatpush.msrb.mxu3 %v697_v43  ;;  %v715_v43 = vand.u32 4294901760, %v714_v2  ;;  %v726_v22 = vsub.f32 %v10244_v15, %v725_v31  ;;  %v282_v18 = vand.u32 4294901760, %v10272_v33  ;;  %v17200_v35 = vand.u32 4294901760, %v10030_v46  ;;  %v215_v46 = vld [vmem:[#allocation3] sm:$0xff] }
  0x3f   : > { %529 = vmatpush.msrb.mxu0 %v17197_v41  ;;  %582 = vmatpush.msrb.mxu1 %v9945_v4  ;;  %v10277_v4 = vand.u32 4294901760, %v218_v47  ;;  %v16761_v41 = vand.u32 4294901760, %v10258_v61  ;;  %v10288_v29 = vsub.f32 %v219_v39, %v10263_v3  ;;  %v721_v39 = vand.u32 4294901760, %v720_v37 }
  0x40   : > { %629 = vmatpush.msrb.mxu2 %v10149_v0  ;;  %704 = vmatpush.msrb.mxu3 %v703_v20  ;;  %v283_v37 = vsub.f32 %v10272_v33, %v282_v18 }
  0x41   : > { %533 = vmatpush.msrb.mxu0 %v17198_v19  ;;  %584 = vmatpush.msrb.mxu1 %v9947_v5  ;;  %v10290_v5 = vand.u32 4294901760, %v217_v25  ;;  %v216_v19 = vld [vmem:[#allocation3 + $0x8] sm:$0xff]  ;;  %v732_v20 = vsub.f32 %v10258_v61, %v16761_v41  ;;  %v17202_v41 = vand.u32 4294901760, %v10055_v58 }
  0x42   : > { %631 = vmatpush.msrb.mxu2 %v10165_v40  ;;  %710 = vmatpush.msrb.mxu3 %v709_v16  ;;  %v10307_v2 = vand.u32 4294901760, %v216_v19  ;;  %v727_v16 = vand.u32 4294901760, %v726_v22  ;;  %v17203_v22 = vand.u32 4294901760, %v10074_v1 }
  0x43   : > { %537 = vmatpush.msrb.mxu0 %v17199_v12  ;;  %586 = vmatpush.msrb.mxu1 %v9949_v9  ;;  %v10301_v9 = vsub.f32 %v218_v47, %v10277_v4  ;;  %v10310_v12 = vand.u32 4294901760, %v10158_v49  ;;  %v10317_v47 = vsub.f32 %v217_v25, %v10290_v5 }
  0x44   : > { %633 = vmatpush.msrb.mxu2 %v10181_v24  ;;  %716 = vmatpush.msrb.mxu3 %v715_v43  ;;  %v10331_v43 = vsub.f32 %v216_v19, %v10307_v2 }
  0x45   : > { %541 = vmatpush.msrb.mxu0 %v17200_v35  ;;  %588 = vmatpush.msrb.mxu1 %v9951_v10  ;;  %v17201_v35 = vand.u32 4294901760, %v10043_v52  ;;  %v737_v10 = vand.u32 4294901760, %v10288_v29  ;;  %v743_v52 = vand.u32 4294901760, %v10301_v9  ;;  %v289_v25 = vsub.f32 %v10158_v49, %v10310_v12 }
  0x46   : > { %635 = vmatpush.msrb.mxu2 %v10196_v62  ;;  %722 = vmatpush.msrb.mxu3 %v721_v39  ;;  %v749_v58 = vand.u32 4294901760, %v10317_v47  ;;  %v284_v39 = vand.u32 4294901760, %v283_v37  ;;  %v17204_v49 = vand.u32 4294901760, %v10091_v30  ;;  %v755_v19 = vand.u32 4294901760, %v10331_v43 }
  0x47   : > { %545 = vmatpush.msrb.mxu0 %v17201_v35  ;;  %590 = vmatpush.msrb.mxu1 %v9953_v11  ;;  %v10325_v35 = vand.u32 4294901760, %v215_v46  ;;  %v733_v11 = vand.u32 4294901760, %v732_v20  ;;  %v290_v20 = vand.u32 4294901760, %v289_v25  ;;  %v17205_v30 = vand.u32 4294901760, %v10106_v42 }
  0x48   : > { %637 = vmatpush.msrb.mxu2 %v10209_v14  ;;  %728 = vmatpush.msrb.mxu3 %v727_v16  ;;  %v750_v37 = vsub.f32 %v10317_v47, %v749_v58 }
  0x49   : > { %549 = vmatpush.msrb.mxu0 %v17202_v41  ;;  %592 = vmatpush.msrb.mxu1 %v9966_v17  ;;  %v738_v17 = vsub.f32 %v10288_v29, %v737_v10  ;;  %v213_v41 = vld [vmem:[#allocation2 + $0x7] sm:$0xff]  ;;  %v10348_v1 = vsub.f32 %v215_v46, %v10325_v35  ;;  %v291_v42 = vsub.f32 %v289_v25, %v290_v20 }
  0x4a   : > { %639 = vmatpush.msrb.mxu2 %v10222_v38  ;;  %734 = vmatpush.msrb.mxu3 %v733_v11  ;;  %v10352_v16 = vand.u32 4294901760, %v213_v41 }
  0x4b   : > { %553 = vmatpush.msrb.mxu0 %v17203_v22  ;;  %594 = vmatpush.msrb.mxu1 %v9975_v21  ;;  %v744_v21 = vsub.f32 %v10301_v9, %v743_v52  ;;  %v761_v11 = vand.u32 4294901760, %v10348_v1 }
  0x4c   : > { %641 = vmatpush.msrb.mxu2 %v10234_v6  ;;  %285 = vmatmul.f32.vlgmr.msra.gmra.mxu0 %v284_v39  ;;  %v10370_v22 = vsub.f32 %v213_v41, %v10352_v16  ;;  %v292_v41 = vand.u32 4294901760, %v291_v42 }
  0x4d   : > { %557 = vmatpush.msrb.mxu0 %v17204_v49  ;;  %596 = vmatpush.msrb.mxu1 %v9987_v28  ;;  %v739_v28 = vand.u32 4294901760, %v738_v17  ;;  %v745_v46 = vand.u32 4294901760, %v744_v21  ;;  %v17209_v49 = vand.u32 4294901760, %v10111_v44  ;;  %v17211_v21 = vand.u32 4294901760, %v10126_v55 }
  0x4e   : > { %452 = vmatmul.f32.vlgmr.msra.gmra.mxu2 %v10272_v33  ;;  %496 = vmatmul.f32.vlgmr.msra.gmra.mxu3 %v282_v18  ;;  %v17206_v33 = vand.u32 4294901760, %v10121_v54  ;;  %v751_v54 = vand.u32 4294901760, %v750_v37  ;;  %v17207_v18 = vand.u32 4294901760, %v10136_v13  ;;  %v654_v39 = vand.u32 4294901760, %v10370_v22 }
  0x4f   : > { %561 = vmatpush.msrb.mxu0 %v17205_v30  ;;  %598 = vmatpush.msrb.mxu1 %v10010_v34  ;;  %v756_v34 = vsub.f32 %v10331_v43, %v755_v19  ;;  %v17214_v37 = vand.u32 4294901760, %v10155_v57 }
  0x50   : > { %643 = vmatpush.msrb.mxu2 %v10263_v3  ;;  %740 = vmatpush.msrb.mxu3 %v739_v28  ;;  %v214_v28 = vld [vmem:[#allocation2 + $0xf] sm:$0xff] }
  0x51   : > { %565 = vmatpush.msrb.mxu0 %v17206_v33  ;;  %600 = vmatpush.msrb.mxu1 %v10027_v45  ;;  %v762_v45 = vsub.f32 %v10348_v1, %v761_v11  ;;  %v757_v17 = vand.u32 4294901760, %v756_v34 }
  0x52   : > { %645 = vmatpush.msrb.mxu2 %v10277_v4  ;;  %394 = vmatmul.f32.vlgmr.msra.gmra.mxu1 %v10247_v7 }
  0x53   : > { %569 = vmatpush.msrb.mxu0 %v17207_v18  ;;  %602 = vmatpush.msrb.mxu1 %v10040_v51  ;;  %v17208_v51 = vld [vmem:[#allocation9_spill] sm:$0xff]  ;;  %v763_v13 = vand.u32 4294901760, %v762_v45 }
  0x54   : > { %647 = vmatpush.msrb.mxu2 %v10290_v5  ;;  %746 = vmatpush.msrb.mxu3 %v745_v46  ;;  %v1000_v18 = vld [vmem:[#allocation3 + $0x128] sm:$0xff] }
  0x55   : > { %776 = vmatpush.msra.mxu0 %v10111_v44  ;;  %604 = vmatpush.msrb.mxu1 %v10051_v56  ;;  %v655_v56 = vsub.f32 %v10370_v22, %v654_v39  ;;  %v17213_v44 = vand.u32 4294901760, %v10142_v26 }
  0x56   : > { %649 = vmatpush.msrb.mxu2 %v10307_v2  ;;  %752 = vmatpush.msrb.mxu3 %v751_v54 }
  0x57   : > { %457 = vmatmul.f32.gmra.mxu2 %v289_v25  ;;  %779 = vmatpush.msra.mxu0 %v10126_v55  ;;  %v17210_v25 = vld [vmem:[#allocation10_spill] sm:$0xff]  ;;  %v656_v30 = vand.u32 4294901760, %v655_v56  ;;  %v10406_v55 = vand.u32 4294901760, %v214_v28 }
  0x58   : > { %606 = vmatpush.msrb.mxu1 %v17208_v51  ;;  %651 = vmatpush.msrb.mxu2 %v10325_v35 }
  0x59   : > { %758 = vmatpush.msrb.mxu3 %v757_v17  ;;  %293 = vmatmul.f32.gmra.mxu0 %v292_v41 }
  0x5a   : > { %502 = vmatmul.f32.gmra.mxu3 %v290_v20  ;;  %782 = vmatpush.msra.mxu0 %v10142_v26  ;;  %v17212_v20 = vld [vmem:[#allocation11_spill] sm:$0xff]  ;;  %v10419_v26 = vsub.f32 %v214_v28, %v10406_v55 }
  0x5b   : > { %881 = vmatpush.msra.mxu2 %v17209_v49  ;;  %608 = vmatpush.msrb.mxu1 %v17210_v25  ;;  %v998_v25 = vld [vmem:[#allocation3 + $0x118] sm:$0xff] }
  0x5c   : > { %764 = vmatpush.msrb.mxu3 %v763_v13  ;;  %398 = vmatmul.f32.gmra.mxu1 %v10310_v12  ;;  %v999_v13 = vld [vmem:[#allocation3 + $0x120] sm:$0xff] }
  0x5d   : > { %785 = vmatpush.msra.mxu0 %v10155_v57  ;;  %885 = vmatpush.msra.mxu2 %v17211_v21  ;;  %v17216_v57 = vand.u32 4294901760, %v10194_v23  ;;  %v10581_v28 = vand.u32 4294901760, %v999_v13 }
  0x5e   : > { %952 = vmatpush.msra.mxu3 %v10078_v8  ;;  %610 = vmatpush.msrb.mxu1 %v17212_v20 }
  0x5f   : > { %788 = vmatpush.msra.mxu0 %v10179_v27  ;;  %889 = vmatpush.msra.mxu2 %v17213_v44 }
  0x60   : > { %834 = vmatpush.msra.mxu1 %v10078_v8  ;;  %954 = vmatpush.msra.mxu3 %v10096_v36  ;;  %v17215_v8 = vand.u32 4294901760, %v10179_v27  ;;  %v662_v27 = vand.u32 4294901760, %v10419_v26 }
  0x61   : > { %657 = vmatmul.f32.vlgmr.msrb.gmra.mxu2 %v656_v30  ;;  %791 = vmatpush.msra.mxu0 %v10194_v23 }
  0x62   : > { %836 = vmatpush.msra.mxu1 %v10096_v36  ;;  %893 = vmatpush.msra.mxu2 %v17214_v37  ;;  %v663_v23 = vsub.f32 %v10419_v26, %v662_v27  ;;  %v17218_v36 = vand.u32 4294901760, %v10258_v61  ;;  %v997_v37 = vld [vmem:[#allocation3 + $0x110] sm:$0xff] }
  0x63   : > { %956 = vmatpush.msra.mxu3 %v10113_v48  ;;  %571 = vmatmul.f32.vlgmr.msrb.gmra.mxu0 %v10247_v7 }
  0x64   : > { %766 = vmatmul.f32.vlgmr.msrb.gmra.mxu3 %v10352_v16  ;;  %794 = vmatpush.msra.mxu0 %v10207_v63  ;;  %v17217_v63 = vand.u32 4294901760, %v10232_v50 }
  0x65   : > { %838 = vmatpush.msra.mxu1 %v10113_v48  ;;  %897 = vmatpush.msra.mxu2 %v17215_v8 }
  0x66   : > { %958 = vmatpush.msra.mxu3 %v10128_v59  ;;  %612 = vmatmul.f32.vlgmr.msrb.gmra.mxu1 %v10247_v7  ;;  %v1005_v7 = vld [vmem:[#allocation3 + $0x150] sm:$0xff] }
  0x67   : > { %797 = vmatpush.msra.mxu0 %v10220_v32  ;;  %840 = vmatpush.msra.mxu1 %v10128_v59  ;;  %v1008_v59 = vld [vmem:[#allocation3 + $0x168] sm:$0xff] }
  0x68   : > { %901 = vmatpush.msra.mxu2 %v17216_v57  ;;  %960 = vmatpush.msra.mxu3 %v10149_v0  ;;  %v10469_v32 = vand.u32 4294901760, %v1008_v59  ;;  %v10592_v57 = vand.u32 4294901760, %v998_v25 }
  0x69   : > { %800 = vmatpush.msra.mxu0 %v10232_v50  ;;  %842 = vmatpush.msra.mxu1 %v10149_v0  ;;  %v1009_v0 = vld [vmem:[#allocation3 + $0x170] sm:$0xff]  ;;  %v1006_v50 = vld [vmem:[#allocation3 + $0x158] sm:$0xff] }
  0x6a   : > { %905 = vmatpush.msra.mxu2 %v707_v60  ;;  %962 = vmatpush.msra.mxu3 %v10165_v40 }
  0x6b   : > { %803 = vmatpush.msra.mxu0 %v10244_v15  ;;  %844 = vmatpush.msra.mxu1 %v10165_v40  ;;  %v1010_v40 = vld [vmem:[#allocation3 + $0x178] sm:$0xff]  ;;  %v10491_v15 = vsub.f32 %v1008_v59, %v10469_v32 }
  0x6c   : > { %909 = vmatpush.msra.mxu2 %v713_v53  ;;  %964 = vmatpush.msra.mxu3 %v10181_v24  ;;  %v10457_v48 = vand.u32 4294901760, %v1010_v40 }
  0x6d   : > { %806 = vmatpush.msra.mxu0 %v10258_v61  ;;  %846 = vmatpush.msra.mxu1 %v10181_v24  ;;  %v664_v24 = vand.u32 4294901760, %v663_v23  ;;  %v10495_v61 = vand.u32 4294901760, %v1006_v50 }
  0x6e   : > { %913 = vmatpush.msra.mxu2 %v17217_v63  ;;  %966 = vmatpush.msra.mxu3 %v10196_v62 }
  0x6f   : > { %809 = vmatpush.msra.mxu0 %v10288_v29  ;;  %848 = vmatpush.msra.mxu1 %v10196_v62  ;;  %v10464_v62 = vand.u32 4294901760, %v1009_v0  ;;  %v10503_v29 = vand.u32 4294901760, %v1005_v7 }
  0x70   : > { %917 = vmatpush.msra.mxu2 %v725_v31  ;;  %968 = vmatpush.msra.mxu3 %v10209_v14 }
  0x71   : > { %575 = vmatmul.f32.gmra.mxu0 %v10310_v12  ;;  %850 = vmatpush.msra.mxu1 %v10209_v14  ;;  %v10472_v14 = vsub.f32 %v1010_v40, %v10457_v48  ;;  %v10480_v60 = vsub.f32 %v1009_v0, %v10464_v62 }
  0x72   : > { %812 = vmatpush.msra.mxu0 %v10301_v9  ;;  %921 = vmatpush.msra.mxu2 %v17218_v36  ;;  %v10604_v36 = vand.u32 4294901760, %v997_v37 }
  0x73   : > { %970 = vmatpush.msra.mxu3 %v10222_v38  ;;  %852 = vmatpush.msra.mxu1 %v10222_v38  ;;  %v1007_v38 = vld [vmem:[#allocation3 + $0x160] sm:$0xff]  ;;  %v1062_v53 = vand.u32 4294901760, %v10472_v14  ;;  %v1068_v31 = vand.u32 4294901760, %v10480_v60 }
  0x74   : > { %815 = vmatpush.msra.mxu0 %v10317_v47  ;;  %925 = vmatpush.msra.mxu2 %v737_v10  ;;  %v1074_v47 = vand.u32 4294901760, %v10491_v15 }
  0x75   : > { %972 = vmatpush.msra.mxu3 %v10234_v6  ;;  %665 = vmatmul.f32.gmra.mxu2 %v664_v24  ;;  %v996_v24 = vld [vmem:[#allocation3 + $0x108] sm:$0xff] }
  0x76   : > { %818 = vmatpush.msra.mxu0 %v10331_v43  ;;  %854 = vmatpush.msra.mxu1 %v10234_v6  ;;  %v10485_v6 = vand.u32 4294901760, %v1007_v38  ;;  %v1075_v46 = vsub.f32 %v10491_v15, %v1074_v47 }
  0x77   : > { %929 = vmatpush.msra.mxu2 %v743_v52  ;;  %974 = vmatpush.msra.mxu3 %v10263_v3  ;;  %v1069_v52 = vsub.f32 %v10480_v60, %v1068_v31 }
  0x78   : > { %770 = vmatmul.f32.gmra.mxu3 %v10406_v55  ;;  %821 = vmatpush.msra.mxu0 %v10348_v1  ;;  %v10506_v9 = vsub.f32 %v1007_v38, %v10485_v6  ;;  %v1076_v41 = vand.u32 4294901760, %v1075_v46  ;;  %v10608_v38 = vsub.f32 %v999_v13, %v10581_v28 }
  0x79   : > { %856 = vmatpush.msra.mxu1 %v10263_v3  ;;  %933 = vmatpush.msra.mxu2 %v749_v58  ;;  %v1004_v3 = vld [vmem:[#allocation3 + $0x148] sm:$0xff]  ;;  %v1002_v58 = vld [vmem:[#allocation3 + $0x138] sm:$0xff] }
  0x7a   : > { %976 = vmatpush.msra.mxu3 %v10277_v4  ;;  %616 = vmatmul.f32.gmra.mxu1 %v10310_v12  ;;  %v1063_v12 = vsub.f32 %v10472_v14, %v1062_v53  ;;  %v10514_v10 = vand.u32 4294901760, %v1004_v3  ;;  %v16775_v1 = vand.u32 4294901760, %v10506_v9  ;;  %v10545_v34 = vand.u32 4294901760, %v1002_v58 }
  0x7b   : > { %824 = vmatmul.f32.vlgmr.msra.gmra.mxu0 %v10370_v22  ;;  %858 = vmatpush.msra.mxu1 %v10277_v4  ;;  %v1003_v4 = vld [vmem:[#allocation3 + $0x140] sm:$0xff] }
  0x7c   : > { %1012 = vmatpush.msrb.mxu0 %v10457_v48  ;;  %937 = vmatpush.msra.mxu2 %v755_v19  ;;  %v10527_v43 = vand.u32 4294901760, %v1003_v4  ;;  %v10533_v19 = vsub.f32 %v1005_v7, %v10503_v29  ;;  %v1064_v33 = vand.u32 4294901760, %v1063_v12  ;;  %v1081_v45 = vsub.f32 %v10506_v9, %v16775_v1  ;;  %v1395_v1 = vld [vmem:[#allocation3 + $0x1b8] sm:$0xff] }
  0x7d   : > { %978 = vmatpush.msra.mxu3 %v10290_v5  ;;  %860 = vmatpush.msra.mxu1 %v10290_v5  ;;  %v10520_v5 = vsub.f32 %v1006_v50, %v10495_v61  ;;  %v10572_v56 = vsub.f32 %v1002_v58, %v10545_v34  ;;  %v1403_v50 = vld [vmem:[#allocation3 + $0x1f8] sm:$0xff]  ;;  %v10621_v12 = vsub.f32 %v998_v25, %v10592_v57  ;;  %v16763_v58 = vand.u32 4294901760, %v10608_v38 }
  0x7e   : > { %1014 = vmatpush.msrb.mxu0 %v10464_v62  ;;  %941 = vmatpush.msra.mxu2 %v761_v11  ;;  %v10541_v11 = vsub.f32 %v1004_v3, %v10514_v10  ;;  %v10551_v54 = vsub.f32 %v1003_v4, %v10527_v43  ;;  %v1082_v21 = vand.u32 4294901760, %v1081_v45  ;;  %v10617_v3 = vand.u32 4294901760, %v996_v24 }
  0x7f   : > { %980 = vmatpush.msra.mxu3 %v10307_v2  ;;  %943 = vmatmul.f32.vlgmr.msra.gmra.mxu2 %v10352_v16  ;;  %v16774_v42 = vand.u32 4294901760, %v10520_v5  ;;  %v16767_v23 = vand.u32 4294901760, %v10572_v56  ;;  %v10633_v46 = vand.u32 4294901760, %v1403_v50 }
  0x80   : > { %1016 = vmatpush.msrb.mxu0 %v10469_v32  ;;  %1167 = vmatpush.msrb.mxu2 %v10472_v14  ;;  %v16770_v51 = vand.u32 4294901760, %v10541_v11  ;;  %v16769_v49 = vand.u32 4294901760, %v10551_v54  ;;  %v10645_v13 = vsub.f32 %v996_v24, %v10617_v3 }
  0x81   : > { %862 = vmatpush.msra.mxu1 %v10307_v2  ;;  %982 = vmatpush.msra.mxu3 %v10325_v35  ;;  %v1001_v2 = vld [vmem:[#allocation3 + $0x130] sm:$0xff]  ;;  %v1087_v22 = vsub.f32 %v10520_v5, %v16774_v42  ;;  %v1111_v7 = vsub.f32 %v10572_v56, %v16767_v23 }
  0x82   : > { %984 = vmatmul.f32.vlgmr.msra.gmra.mxu3 %v10352_v16  ;;  %1018 = vmatpush.msrb.mxu0 %v10485_v6  ;;  %v1070_v16 = vand.u32 4294901760, %v1069_v52  ;;  %v10559_v17 = vand.u32 4294901760, %v1001_v2  ;;  %v1099_v44 = vsub.f32 %v10541_v11, %v16770_v51  ;;  %v1105_v40 = vsub.f32 %v10551_v54, %v16769_v49  ;;  %v995_v52 = vld [vmem:[#allocation3 + $0x100] sm:$0xff]  ;;  %v992_v49 = vld [vmem:[#allocation2 + $0x9] sm:$0xff] }
  0x83   : > { %1170 = vmatpush.msrb.mxu2 %v10480_v60  ;;  %1225 = vmatpush.msrb.mxu3 %v10457_v48  ;;  %v1088_v8 = vand.u32 4294901760, %v1087_v22  ;;  %v1401_v22 = vld [vmem:[#allocation3 + $0x1e8] sm:$0xff]  ;;  %v1394_v60 = vld [vmem:[#allocation3 + $0x1b0] sm:$0xff] }
  0x84   : > { %864 = vmatpush.msra.mxu1 %v10325_v35  ;;  %1020 = vmatpush.msrb.mxu0 %v10495_v61  ;;  %v16771_v35 = vand.u32 4294901760, %v10533_v19  ;;  %v10584_v20 = vsub.f32 %v1001_v2, %v10559_v17  ;;  %v1402_v2 = vld [vmem:[#allocation3 + $0x1f0] sm:$0xff]  ;;  %v10664_v24 = vand.u32 4294901760, %v1401_v22 }
  0x85   : > { %868 = vmatmul.f32.vlgmr.msra.gmra.mxu1 %v654_v39  ;;  %1173 = vmatpush.msrb.mxu2 %v10491_v15  ;;  %v10569_v39 = vand.u32 4294901760, %v1000_v18  ;;  %v10649_v25 = vand.u32 4294901760, %v1402_v2  ;;  %v17220_v15 = vand.u32 4294901760, %v10506_v9 }
  0x86   : > { %1065 = vmatpush.msrb.mxu1 %v1064_v33  ;;  %1227 = vmatpush.msrb.mxu3 %v10464_v62  ;;  %v1093_v30 = vsub.f32 %v10533_v19, %v16771_v35  ;;  %v16766_v59 = vand.u32 4294901760, %v10584_v20  ;;  %v10631_v33 = vsub.f32 %v997_v37, %v10604_v36  ;;  %v10657_v37 = vsub.f32 %v1403_v50, %v10633_v46 }
  0x87   : > { %1022 = vmatpush.msrb.mxu0 %v10503_v29  ;;  %1176 = vmatpush.msrb.mxu2 %v10506_v9  ;;  %v10596_v63 = vsub.f32 %v1000_v18, %v10569_v39  ;;  %v1112_v18 = vand.u32 4294901760, %v1111_v7  ;;  %v16768_v50 = vand.u32 4294901760, %v10645_v13  ;;  %v1399_v7 = vld [vmem:[#allocation3 + $0x1d8] sm:$0xff] }
  0x88   : > { %1071 = vmatpush.msrb.mxu1 %v1070_v16  ;;  %1229 = vmatpush.msrb.mxu3 %v10469_v32  ;;  %v1094_v0 = vand.u32 4294901760, %v1093_v30  ;;  %v10637_v16 = vand.u32 4294901760, %v995_v52  ;;  %v1129_v30 = vsub.f32 %v10608_v38, %v16763_v58  ;;  %v10687_v58 = vsub.f32 %v1401_v22, %v10664_v24 }
  0x89   : > { %829 = vmatmul.f32.gmra.mxu0 %v10419_v26  ;;  %947 = vmatmul.f32.gmra.mxu2 %v10406_v55  ;;  %v16764_v4 = vand.u32 4294901760, %v10596_v63  ;;  %v1106_v26 = vand.u32 4294901760, %v1105_v40 }
  0x8a   : > { %1024 = vmatpush.msrb.mxu0 %v10514_v10  ;;  %1077 = vmatpush.msrb.mxu1 %v1076_v41  ;;  %v16762_v41 = vand.u32 4294901760, %v10621_v12  ;;  %v10662_v40 = vsub.f32 %v995_v52, %v10637_v16  ;;  %v10674_v52 = vsub.f32 %v1402_v2, %v10649_v25  ;;  %v16777_v51 = vand.u32 4294901760, %v10687_v58 }
  0x8b   : > { %1179 = vmatpush.msrb.mxu2 %v10520_v5  ;;  %1231 = vmatpush.msrb.mxu3 %v10485_v6  ;;  %v1123_v45 = vsub.f32 %v10596_v63, %v16764_v4  ;;  %v10689_v4 = vand.u32 4294901760, %v1399_v7 }
  0x8c   : > { %988 = vmatmul.f32.gmra.mxu3 %v10406_v55  ;;  %1026 = vmatpush.msrb.mxu0 %v10527_v43  ;;  %v1100_v55 = vand.u32 4294901760, %v1099_v44  ;;  %v16765_v44 = vand.u32 4294901760, %v10631_v33  ;;  %v16773_v2 = vand.u32 4294901760, %v10662_v40 }
  0x8d   : > { %1083 = vmatpush.msrb.mxu1 %v1082_v21  ;;  %1182 = vmatpush.msrb.mxu2 %v10533_v19  ;;  %v10714_v35 = vsub.f32 %v1399_v7, %v10689_v4 }
  0x8e   : > { %1233 = vmatpush.msrb.mxu3 %v10495_v61  ;;  %874 = vmatmul.f32.gmra.mxu1 %v662_v27  ;;  %v1117_v27 = vsub.f32 %v10584_v20, %v16766_v59  ;;  %v16776_v59 = vand.u32 4294901760, %v10674_v52 }
  0x8f   : > { %1028 = vmatpush.msrb.mxu0 %v10545_v34  ;;  %1089 = vmatpush.msrb.mxu1 %v1088_v8  ;;  %v1400_v8 = vld [vmem:[#allocation3 + $0x1e0] sm:$0xff] }
  0x90   : > { %1185 = vmatpush.msrb.mxu2 %v10541_v11  ;;  %1235 = vmatpush.msrb.mxu3 %v10503_v29  ;;  %v1118_v21 = vand.u32 4294901760, %v1117_v27  ;;  %v1130_v27 = vand.u32 4294901760, %v1129_v30  ;;  %v1147_v30 = vsub.f32 %v10645_v13, %v16768_v50  ;;  %v1396_v50 = vld [vmem:[#allocation3 + $0x1c0] sm:$0xff] }
  0x91   : > { %1030 = vmatpush.msrb.mxu0 %v10559_v17  ;;  %1095 = vmatpush.msrb.mxu1 %v1094_v0  ;;  %v1124_v0 = vand.u32 4294901760, %v1123_v45  ;;  %v16772_v45 = vand.u32 4294901760, %v10657_v37  ;;  %v10729_v42 = vand.u32 4294901760, %v1396_v50 }
  0x92   : > { %1188 = vmatpush.msrb.mxu2 %v10551_v54  ;;  %1237 = vmatpush.msrb.mxu3 %v10514_v10 }
  0x93   : > { %1032 = vmatpush.msrb.mxu0 %v10569_v39  ;;  %1101 = vmatpush.msrb.mxu1 %v1100_v55  ;;  %v1135_v55 = vsub.f32 %v10621_v12, %v16762_v41  ;;  %v1398_v41 = vld [vmem:[#allocation3 + $0x1d0] sm:$0xff] }
  0x94   : > { %1191 = vmatpush.msrb.mxu2 %v10572_v56  ;;  %1239 = vmatpush.msrb.mxu3 %v10527_v43  ;;  %v10701_v23 = vand.u32 4294901760, %v1398_v41 }
  0x95   : > { %1034 = vmatpush.msrb.mxu0 %v10581_v28  ;;  %1107 = vmatpush.msrb.mxu1 %v1106_v26  ;;  %v10676_v26 = vand.u32 4294901760, %v1400_v8 }
  0x96   : > { %1194 = vmatpush.msrb.mxu2 %v10584_v20  ;;  %1241 = vmatpush.msrb.mxu3 %v10545_v34  ;;  %v10727_v7 = vsub.f32 %v1398_v41, %v10701_v23  ;;  %v1468_v41 = vsub.f32 %v10687_v58, %v16777_v51  ;;  %v1393_v51 = vld [vmem:[#allocation3 + $0x1a8] sm:$0xff] }
  0x97   : > { %1036 = vmatpush.msrb.mxu0 %v10592_v57  ;;  %1113 = vmatpush.msrb.mxu1 %v1112_v18  ;;  %17219 = vst [vmem:[#allocation9_spill] sm:$0xff] %v10676_v26  ;;  %v1141_v18 = vsub.f32 %v10631_v33, %v16765_v44  ;;  %v1397_v44 = vld [vmem:[#allocation3 + $0x1c8] sm:$0xff]  ;;  %v10699_v22 = vsub.f32 %v1400_v8, %v10676_v26 }
  0x98   : > { %1197 = vmatpush.msrb.mxu2 %v10596_v63  ;;  %1243 = vmatpush.msrb.mxu3 %v10559_v17  ;;  %v1153_v8 = vsub.f32 %v10662_v40, %v16773_v2 }
  0x99   : > { %1038 = vmatpush.msrb.mxu0 %v10604_v36  ;;  %1119 = vmatpush.msrb.mxu1 %v1118_v21  ;;  %v1136_v21 = vand.u32 4294901760, %v1135_v55  ;;  %v1456_v55 = vsub.f32 %v10657_v37, %v16772_v45  ;;  %v1462_v45 = vsub.f32 %v10674_v52, %v16776_v59  ;;  %v16778_v2 = vand.u32 4294901760, %v10699_v22 }
  0x9a   : > { %1200 = vmatpush.msrb.mxu2 %v10608_v38  ;;  %1245 = vmatpush.msrb.mxu3 %v10569_v39 }
  0x9b   : > { %1040 = vmatpush.msrb.mxu0 %v10617_v3  ;;  %1125 = vmatpush.msrb.mxu1 %v1124_v0  ;;  %v1142_v0 = vand.u32 4294901760, %v1141_v18  ;;  %v1148_v18 = vand.u32 4294901760, %v1147_v30  ;;  %v1457_v14 = vand.u32 4294901760, %v1456_v55  ;;  %v16779_v30 = vand.u32 4294901760, %v10714_v35 }
  0x9c   : > { %1203 = vmatpush.msrb.mxu2 %v10621_v12  ;;  %1247 = vmatpush.msrb.mxu3 %v10581_v28  ;;  %v1474_v55 = vsub.f32 %v10699_v22, %v16778_v2 }
  0x9d   : > { %1042 = vmatpush.msrb.mxu0 %v10637_v16  ;;  %1131 = vmatpush.msrb.mxu1 %v1130_v27  ;;  %v10716_v27 = vand.u32 4294901760, %v1397_v44  ;;  %v1480_v2 = vsub.f32 %v10714_v35, %v16779_v30 }
  0x9e   : > { %1206 = vmatpush.msrb.mxu2 %v10631_v33  ;;  %1249 = vmatpush.msrb.mxu3 %v10592_v57 }
  0x9f   : > { %1272 = vmatpush.msra.mxu0 %v1062_v53  ;;  %1137 = vmatpush.msrb.mxu1 %v1136_v21  ;;  %v10733_v53 = vand.u32 4294901760, %v992_v49  ;;  %v1154_v21 = vand.u32 4294901760, %v1153_v8  ;;  %v10742_v59 = vsub.f32 %v1397_v44, %v10716_v27  ;;  %v10755_v44 = vsub.f32 %v1396_v50, %v10729_v42 }
  0xa0   : > { %1209 = vmatpush.msrb.mxu2 %v10645_v13  ;;  %1251 = vmatpush.msrb.mxu3 %v10604_v36  ;;  %v17221_v8 = vand.u32 4294901760, %v10520_v5  ;;  %v1391_v5 = vld [vmem:[#allocation3 + $0x198] sm:$0xff] }
  0xa1   : > { %1276 = vmatpush.msra.mxu0 %v1068_v31  ;;  %1143 = vmatpush.msrb.mxu1 %v1142_v0  ;;  %v10747_v31 = vand.u32 4294901760, %v1395_v1  ;;  %v1463_v0 = vand.u32 4294901760, %v1462_v45  ;;  %v1469_v45 = vand.u32 4294901760, %v1468_v41  ;;  %v16780_v50 = vand.u32 4294901760, %v10742_v59 }
  0xa2   : > { %1212 = vmatpush.msrb.mxu2 %v10662_v40  ;;  %1253 = vmatpush.msrb.mxu3 %v10617_v3  ;;  %v17222_v41 = vand.u32 4294901760, %v10727_v7 }
  0xa3   : > { %1280 = vmatpush.msra.mxu0 %v1074_v47  ;;  %1149 = vmatpush.msrb.mxu1 %v1148_v18  ;;  %v10761_v47 = vsub.f32 %v992_v49, %v10733_v53  ;;  %v10763_v18 = vand.u32 4294901760, %v1394_v60  ;;  %v10773_v9 = vsub.f32 %v1395_v1, %v10747_v31  ;;  %v10775_v49 = vand.u32 4294901760, %v1393_v51 }
  0xa4   : > { %1405 = vmatpush.msra.mxu2 %v10633_v46  ;;  %1255 = vmatpush.msrb.mxu3 %v10637_v16  ;;  %v1486_v30 = vsub.f32 %v10727_v7, %v17222_v41 }
  0xa5   : > { %1284 = vmatpush.msra.mxu0 %v17220_v15  ;;  %1155 = vmatpush.msrb.mxu1 %v1154_v21  ;;  %v1392_v15 = vld [vmem:[#allocation3 + $0x1a0] sm:$0xff]  ;;  %v1475_v21 = vand.u32 4294901760, %v1474_v55  ;;  %v10787_v1 = vsub.f32 %v1394_v60, %v10763_v18  ;;  %v1492_v55 = vsub.f32 %v10742_v59, %v16780_v50  ;;  %v16783_v60 = vand.u32 4294901760, %v10773_v9 }
  0xa6   : > { %1407 = vmatpush.msra.mxu2 %v10649_v25  ;;  %1458 = vmatpush.msra.mxu3 %v1457_v14  ;;  %v993_v14 = vld [vmem:[#allocation2 + $0x11] sm:$0xff]  ;;  %v10793_v41 = vand.u32 4294901760, %v1392_v15 }
  0xa7   : > { %1288 = vmatpush.msra.mxu0 %v17221_v8  ;;  %1343 = vmatpush.msra.mxu1 %v10457_v48  ;;  %v17223_v8 = vand.u32 4294901760, %v10533_v19  ;;  %v10795_v19 = vand.u32 4294901760, %v993_v14  ;;  %v1390_v48 = vld [vmem:[#allocation3 + $0x190] sm:$0xff] }
  0xa8   : > { %1409 = vmatpush.msra.mxu2 %v10664_v24  ;;  %1464 = vmatpush.msra.mxu3 %v1463_v0  ;;  %v1481_v0 = vand.u32 4294901760, %v1480_v2  ;;  %v1487_v2 = vand.u32 4294901760, %v1486_v30  ;;  %v1493_v30 = vand.u32 4294901760, %v1492_v55 }
  0xa9   : > { %1292 = vmatpush.msra.mxu0 %v17223_v8  ;;  %1345 = vmatpush.msra.mxu1 %v10464_v62  ;;  %v17224_v62 = vand.u32 4294901760, %v10541_v11  ;;  %v10802_v8 = vsub.f32 %v1393_v51, %v10775_v49  ;;  %v1509_v51 = vand.u32 4294901760, %v10787_v1 }
  0xaa   : > { %1411 = vmatpush.msra.mxu2 %v10676_v26  ;;  %1470 = vmatpush.msra.mxu3 %v1469_v45  ;;  %v17225_v45 = vand.u32 4294901760, %v10755_v44  ;;  %v17226_v26 = vand.u32 4294901760, %v10551_v54  ;;  %v10822_v54 = vsub.f32 %v993_v14, %v10795_v19  ;;  %v17229_v14 = vand.u32 4294901760, %v10584_v20 }
  0xab   : > { %1296 = vmatpush.msra.mxu0 %v17224_v62  ;;  %1347 = vmatpush.msra.mxu1 %v10469_v32  ;;  %v17227_v32 = vand.u32 4294901760, %v10761_v47  ;;  %v10815_v62 = vand.u32 4294901760, %v1391_v5 }
  0xac   : > { %1413 = vmatpush.msra.mxu2 %v10689_v4  ;;  %1476 = vmatpush.msra.mxu3 %v1475_v21  ;;  %v1498_v50 = vsub.f32 %v10755_v44, %v17225_v45  ;;  %v10819_v21 = vsub.f32 %v1392_v15, %v10793_v41  ;;  %v1504_v45 = vsub.f32 %v10773_v9, %v16783_v60  ;;  %v1388_v60 = vld [vmem:[#allocation3 + $0x180] sm:$0xff]  ;;  %v1053_v20 = vand.u32 4294901760, %v10822_v54 }
  0xad   : > { %1300 = vmatpush.msra.mxu0 %v17226_v26  ;;  %1349 = vmatpush.msra.mxu1 %v10485_v6  ;;  %v1046_v11 = vsub.f32 %v10761_v47, %v17227_v32  ;;  %v1389_v26 = vld [vmem:[#allocation3 + $0x188] sm:$0xff]  ;;  %v17228_v6 = vand.u32 4294901760, %v10572_v56  ;;  %v1515_v32 = vand.u32 4294901760, %v10802_v8  ;;  %v10841_v55 = vsub.f32 %v1391_v5, %v10815_v62 }
  0xae   : > { %1415 = vmatpush.msra.mxu2 %v10701_v23  ;;  %1482 = vmatpush.msra.mxu3 %v1481_v0  ;;  %v10831_v0 = vand.u32 4294901760, %v1390_v48  ;;  %v1499_v15 = vand.u32 4294901760, %v1498_v50  ;;  %v1521_v50 = vand.u32 4294901760, %v10819_v21 }
  0xaf   : > { %1304 = vmatpush.msra.mxu0 %v17228_v6  ;;  %1351 = vmatpush.msra.mxu1 %v10495_v61  ;;  %v1047_v56 = vand.u32 4294901760, %v1046_v11  ;;  %v1510_v61 = vsub.f32 %v10787_v1, %v1509_v51  ;;  %v10843_v6 = vand.u32 4294901760, %v1389_v26  ;;  %v1516_v5 = vsub.f32 %v10802_v8, %v1515_v32 }
  0xb0   : > { %1417 = vmatpush.msra.mxu2 %v10716_v27  ;;  %1488 = vmatpush.msra.mxu3 %v1487_v2  ;;  %v1505_v2 = vand.u32 4294901760, %v1504_v45  ;;  %v10855_v11 = vsub.f32 %v1390_v48, %v10831_v0  ;;  %v17231_v45 = vand.u32 4294901760, %v10608_v38  ;;  %v1522_v48 = vsub.f32 %v10819_v21, %v1521_v50 }
  0xb1   : > { %1308 = vmatpush.msra.mxu0 %v17229_v14  ;;  %1353 = vmatpush.msra.mxu1 %v10503_v29  ;;  %v17230_v29 = vand.u32 4294901760, %v10596_v63  ;;  %v1511_v63 = vand.u32 4294901760, %v1510_v61  ;;  %v1527_v14 = vand.u32 4294901760, %v10841_v55 }
  0xb2   : > { %1419 = vmatpush.msra.mxu2 %v10729_v42  ;;  %1494 = vmatpush.msra.mxu3 %v1493_v30  ;;  %v10858_v30 = vand.u32 4294901760, %v1388_v60 }
  0xb3   : > { %1312 = vmatpush.msra.mxu0 %v17230_v29  ;;  %1355 = vmatpush.msra.mxu1 %v10514_v10  ;;  %v10863_v10 = vsub.f32 %v1389_v26, %v10843_v6  ;;  %v1533_v26 = vand.u32 4294901760, %v10855_v11  ;;  %v1528_v61 = vsub.f32 %v10841_v55, %v1527_v14 }
  0xb4   : > { %1421 = vmatpush.msra.mxu2 %v10747_v31  ;;  %1500 = vmatpush.msra.mxu3 %v1499_v15  ;;  %v1054_v15 = vsub.f32 %v10822_v54, %v1053_v20  ;;  %v10880_v38 = vsub.f32 %v1388_v60, %v10858_v30  ;;  %v17234_v60 = vand.u32 4294901760, %v10645_v13 }
  0xb5   : > { %1048 = vmatmul.f32.vlgmr.msrb.gmra.mxu0 %v1047_v56  ;;  %1357 = vmatpush.msra.mxu1 %v10527_v43  ;;  %v1517_v43 = vand.u32 4294901760, %v1516_v5  ;;  %v17232_v56 = vand.u32 4294901760, %v10621_v12  ;;  %v1539_v29 = vand.u32 4294901760, %v10863_v10  ;;  %v1523_v12 = vand.u32 4294901760, %v1522_v48 }
  0xb6   : > { %1316 = vmatpush.msra.mxu0 %v17231_v45  ;;  %1423 = vmatpush.msra.mxu2 %v10763_v18  ;;  %v1055_v5 = vand.u32 4294901760, %v1054_v15  ;;  %v17235_v45 = vand.u32 4294901760, %v10761_v47  ;;  %v17236_v48 = vand.u32 4294901760, %v10662_v40 }
  0xb7   : > { %1506 = vmatpush.msra.mxu3 %v1505_v2  ;;  %1157 = vmatmul.f32.vlgmr.msrb.gmra.mxu1 %v10733_v53  ;;  %v17233_v2 = vand.u32 4294901760, %v10631_v33  ;;  %v1540_v33 = vsub.f32 %v10863_v10, %v1539_v29 }
  0xb8   : > { %1320 = vmatpush.msra.mxu0 %v17232_v56  ;;  %1359 = vmatpush.msra.mxu1 %v10545_v34  ;;  %v1534_v34 = vsub.f32 %v10855_v11, %v1533_v26 }
  0xb9   : > { %1425 = vmatpush.msra.mxu2 %v10775_v49  ;;  %1512 = vmatpush.msra.mxu3 %v1511_v63  ;;  %v1545_v63 = vand.u32 4294901760, %v10880_v38  ;;  %v1541_v15 = vand.u32 4294901760, %v1540_v33 }
  0xba   : > { %1324 = vmatpush.msra.mxu0 %v17233_v2  ;;  %1361 = vmatpush.msra.mxu1 %v10559_v17  ;;  %v1529_v17 = vand.u32 4294901760, %v1528_v61  ;;  %v1535_v13 = vand.u32 4294901760, %v1534_v34  ;;  %v1818_v2 = vld [vmem:[#allocation3 + $0x2d0] sm:$0xff] }
  0xbb   : > { %1427 = vmatpush.msra.mxu2 %v10793_v41  ;;  %1518 = vmatpush.msra.mxu3 %v1517_v43  ;;  %v1385_v43 = vld [vmem:[#allocation2 + $0xa] sm:$0xff] }
  0xbc   : > { %1215 = vmatmul.f32.vlgmr.msrb.gmra.mxu2 %v10761_v47  ;;  %1328 = vmatpush.msra.mxu0 %v17234_v60  ;;  %v10919_v40 = vand.u32 4294901760, %v1385_v43  ;;  %v17237_v47 = vand.u32 4294901760, %v10657_v37 }
  0xbd   : > { %1363 = vmatpush.msra.mxu1 %v10569_v39  ;;  %1429 = vmatpush.msra.mxu2 %v10815_v62  ;;  %v1546_v39 = vsub.f32 %v10880_v38, %v1545_v63 }
  0xbe   : > { %1524 = vmatpush.msra.mxu3 %v1523_v12  ;;  %1056 = vmatmul.f32.gmra.mxu0 %v1055_v5 }
  0xbf   : > { %1259 = vmatmul.f32.vlgmr.msrb.gmra.mxu3 %v17235_v45  ;;  %1332 = vmatpush.msra.mxu0 %v17236_v48  ;;  %v1817_v45 = vld [vmem:[#allocation3 + $0x2c8] sm:$0xff] }
  0xc0   : > { %1365 = vmatpush.msra.mxu1 %v10581_v28  ;;  %1431 = vmatpush.msra.mxu2 %v10831_v0  ;;  %v1547_v28 = vand.u32 4294901760, %v1546_v39 }
  0xc1   : > { %1530 = vmatpush.msra.mxu3 %v1529_v17  ;;  %1161 = vmatmul.f32.gmra.mxu1 %v10795_v19 }
  0xc2   : > { %1560 = vmatpush.msrb.mxu0 %v10657_v37  ;;  %1367 = vmatpush.msra.mxu1 %v10592_v57  ;;  %v10931_v57 = vsub.f32 %v1385_v43, %v10919_v40  ;;  %v17239_v37 = vand.u32 4294901760, %v10687_v58  ;;  %v1816_v43 = vld [vmem:[#allocation3 + $0x2c0] sm:$0xff] }
  0xc3   : > { %1433 = vmatpush.msra.mxu2 %v10843_v6  ;;  %1536 = vmatpush.msra.mxu3 %v1535_v13 }
  0xc4   : > { %1563 = vmatpush.msrb.mxu0 %v10674_v52  ;;  %1369 = vmatpush.msra.mxu1 %v10604_v36  ;;  %v17238_v36 = vand.u32 4294901760, %v10674_v52  ;;  %v17240_v52 = vand.u32 4294901760, %v10699_v22 }
  0xc5   : > { %1435 = vmatpush.msra.mxu2 %v10858_v30  ;;  %1542 = vmatpush.msra.mxu3 %v1541_v15  ;;  %v11107_v15 = vand.u32 4294901760, %v1817_v45 }
  0xc6   : > { %1220 = vmatmul.f32.gmra.mxu2 %v10822_v54  ;;  %1566 = vmatpush.msrb.mxu0 %v10687_v58  ;;  %v1438_v54 = vand.u32 4294901760, %v10931_v57  ;;  %v17241_v58 = vand.u32 4294901760, %v10714_v35 }
  0xc7   : > { %1665 = vmatpush.msrb.mxu2 %v17237_v47  ;;  %1371 = vmatpush.msra.mxu1 %v10617_v3  ;;  %v1386_v3 = vld [vmem:[#allocation2 + $0x12] sm:$0xff] }
  0xc8   : > { %1548 = vmatpush.msra.mxu3 %v1547_v28  ;;  %1334 = vmatmul.f32.vlgmr.msra.gmra.mxu0 %v10733_v53 }
  0xc9   : > { %1265 = vmatmul.f32.gmra.mxu3 %v1053_v20  ;;  %1569 = vmatpush.msrb.mxu0 %v10699_v22  ;;  %v1439_v22 = vsub.f32 %v10931_v57, %v1438_v54  ;;  %v17245_v20 = vand.u32 4294901760, %v10755_v44 }
  0xca   : > { %1669 = vmatpush.msrb.mxu2 %v17238_v36  ;;  %1736 = vmatpush.msrb.mxu3 %v10633_v46  ;;  %v11118_v36 = vsub.f32 %v1817_v45, %v11107_v15  ;;  %v1811_v45 = vld [vmem:[#allocation3 + $0x298] sm:$0xff] }
  0xcb   : > { %1373 = vmatpush.msra.mxu1 %v10637_v16  ;;  %1572 = vmatpush.msrb.mxu0 %v10714_v35  ;;  %v10947_v16 = vand.u32 4294901760, %v1386_v3  ;;  %v1440_v35 = vand.u32 4294901760, %v1439_v22  ;;  %v1814_v22 = vld [vmem:[#allocation3 + $0x2b0] sm:$0xff] }
  0xcc   : > { %1375 = vmatmul.f32.vlgmr.msra.gmra.mxu1 %v10733_v53  ;;  %1673 = vmatpush.msrb.mxu2 %v17239_v37  ;;  %v17243_v53 = vand.u32 4294901760, %v10727_v7  ;;  %v1815_v37 = vld [vmem:[#allocation3 + $0x2b8] sm:$0xff] }
  0xcd   : > { %1618 = vmatpush.msrb.mxu1 %v10633_v46  ;;  %1738 = vmatpush.msrb.mxu3 %v10649_v25  ;;  %v17242_v46 = vld [vmem:[#allocation9_spill] sm:$0xff] }
  0xce   : > { %1575 = vmatpush.msrb.mxu0 %v10727_v7  ;;  %1677 = vmatpush.msrb.mxu2 %v17240_v52 }
  0xcf   : > { %1620 = vmatpush.msrb.mxu1 %v10649_v25  ;;  %1740 = vmatpush.msrb.mxu3 %v10664_v24  ;;  %v1445_v25 = vsub.f32 %v1386_v3, %v10947_v16  ;;  %v11121_v3 = vand.u32 4294901760, %v1816_v43 }
  0xd0   : > { %1578 = vmatpush.msrb.mxu0 %v10742_v59  ;;  %1681 = vmatpush.msrb.mxu2 %v17241_v58  ;;  %v11130_v58 = vand.u32 4294901760, %v1815_v37 }
  0xd1   : > { %1622 = vmatpush.msrb.mxu1 %v10664_v24  ;;  %1742 = vmatpush.msrb.mxu3 %v17242_v46  ;;  %v17244_v24 = vand.u32 4294901760, %v10742_v59  ;;  %v1446_v7 = vand.u32 4294901760, %v1445_v25 }
  0xd2   : > { %1338 = vmatmul.f32.gmra.mxu0 %v10795_v19  ;;  %1685 = vmatpush.msrb.mxu2 %v17243_v53 }
  0xd3   : > { %1581 = vmatpush.msrb.mxu0 %v10755_v44  ;;  %1624 = vmatpush.msrb.mxu1 %v17242_v46  ;;  %v1447_v59 = vsub.f32 %v1445_v25, %v1446_v7  ;;  %v1823_v44 = vld [vmem:[#allocation3 + $0x2f8] sm:$0xff]  ;;  %v11133_v46 = vsub.f32 %v1816_v43, %v11121_v3 }
  0xd4   : > { %1744 = vmatpush.msrb.mxu3 %v10689_v4  ;;  %1379 = vmatmul.f32.gmra.mxu1 %v10795_v19 }
  0xd5   : > { %1584 = vmatpush.msrb.mxu0 %v10773_v9  ;;  %1626 = vmatpush.msrb.mxu1 %v10689_v4  ;;  %v17246_v4 = vand.u32 4294901760, %v10773_v9  ;;  %v11035_v9 = vand.u32 4294901760, %v1823_v44 }
  0xd6   : > { %1689 = vmatpush.msrb.mxu2 %v17244_v24  ;;  %1746 = vmatpush.msrb.mxu3 %v10701_v23  ;;  %v11143_v24 = vsub.f32 %v1815_v37, %v11130_v58  ;;  %v11189_v37 = vand.u32 4294901760, %v1811_v45 }
  0xd7   : > { %1587 = vmatpush.msrb.mxu0 %v10787_v1  ;;  %1628 = vmatpush.msrb.mxu1 %v10701_v23  ;;  %v1448_v23 = vand.u32 4294901760, %v1447_v59  ;;  %v1822_v1 = vld [vmem:[#allocation3 + $0x2f0] sm:$0xff]  ;;  %v16788_v59 = vand.u32 4294901760, %v11133_v46 }
  0xd8   : > { %1693 = vmatpush.msrb.mxu2 %v17245_v20  ;;  %1748 = vmatpush.msrb.mxu3 %v10716_v27  ;;  %v11042_v19 = vand.u32 4294901760, %v1822_v1 }
  0xd9   : > { %1441 = vmatmul.f32.vlgmr.msra.gmra.mxu2 %v1440_v35  ;;  %1550 = vmatmul.f32.vlgmr.msra.gmra.mxu3 %v10919_v40 }
  0xda   : > { %1590 = vmatpush.msrb.mxu0 %v10802_v8  ;;  %1630 = vmatpush.msrb.mxu1 %v10716_v27  ;;  %v11029_v27 = vpop.f32.mrf.mxu1  ;;  %v1821_v8 = vld [vmem:[#allocation3 + $0x2e8] sm:$0xff] }
  0xdb   : > { %1697 = vmatpush.msrb.mxu2 %v17246_v4  ;;  %1750 = vmatpush.msrb.mxu3 %v10729_v42  ;;  %v1813_v4 = vld [vmem:[#allocation3 + $0x2a8] sm:$0xff] }
  0xdc   : > { %1593 = vmatpush.msrb.mxu0 %v10819_v21  ;;  %1632 = vmatpush.msrb.mxu1 %v10729_v42  ;;  %v11027_v42 = vpop.f32.mrf.mxu0 }
  0xdd   : > { %1701 = vmatpush.msrb.mxu2 %v1509_v51  ;;  %1752 = vmatpush.msrb.mxu3 %v10747_v31  ;;  %v11046_v51 = vand.u32 4294901760, %v1821_v8 }
  0xde   : > { %1596 = vmatpush.msrb.mxu0 %v10841_v55  ;;  %1634 = vmatpush.msrb.mxu1 %v10747_v31  ;;  %v11031_v31 = vpop.f32.mrf.mxu2  ;;  %v1820_v55 = vld [vmem:[#allocation3 + $0x2e0] sm:$0xff] }
  0xdf   : > { %1705 = vmatpush.msrb.mxu2 %v1515_v32  ;;  %1754 = vmatpush.msrb.mxu3 %v10763_v18  ;;  %v11052_v32 = vsub.f32 %v1822_v1, %v11042_v19 }
  0xe0   : > { %1599 = vmatpush.msrb.mxu0 %v10855_v11  ;;  %1636 = vmatpush.msrb.mxu1 %v10763_v18  ;;  %v11065_v11 = vand.u32 4294901760, %v1820_v55 }
  0xe1   : > { %1709 = vmatpush.msrb.mxu2 %v1521_v50  ;;  %1756 = vmatpush.msrb.mxu3 %v10775_v49  ;;  %v16797_v50 = vand.u32 4294901760, %v11052_v32 }
  0xe2   : > { %1449 = vmatmul.f32.gmra.mxu2 %v1448_v23  ;;  %1554 = vmatmul.f32.gmra.mxu3 %v10947_v16  ;;  %v11074_v56 = vsub.f32 %v1820_v55, %v11065_v11 }
  0xe3   : > { %1602 = vmatpush.msrb.mxu0 %v10863_v10  ;;  %1638 = vmatpush.msrb.mxu1 %v10775_v49  ;;  %v11037_v49 = vpop.f32.mrf.mxu3 }
  0xe4   : > { %1713 = vmatpush.msrb.mxu2 %v1527_v14  ;;  %1758 = vmatpush.msrb.mxu3 %v10793_v41  ;;  %v11033_v18 = vpop.f32.mrf.mxu0  ;;  %v1819_v14 = vld [vmem:[#allocation3 + $0x2d8] sm:$0xff]  ;;  %v16795_v34 = vand.u32 4294901760, %v11074_v56 }
  0xe5   : > { %1605 = vmatpush.msrb.mxu0 %v10880_v38  ;;  %1640 = vmatpush.msrb.mxu1 %v10793_v41  ;;  %v11040_v41 = vsub.f32 %v1823_v44, %v11035_v9  ;;  %v11077_v38 = vand.u32 4294901760, %v1819_v14  ;;  %v16787_v44 = vand.u32 4294901760, %v11143_v24 }
  0xe6   : > { %1717 = vmatpush.msrb.mxu2 %v1533_v26  ;;  %1760 = vmatpush.msrb.mxu3 %v10815_v62  ;;  %v1882_v26 = vsub.f32 %v11052_v32, %v16797_v50  ;;  %v11080_v61 = vpop.f32.mrf.mxu2  ;;  %v1894_v48 = vsub.f32 %v11074_v56, %v16795_v34 }
  0xe7   : > { %1608 = vmatmul.f32.vlgmr.msrb.gmra.mxu0 %v10931_v57  ;;  %1642 = vmatpush.msrb.mxu1 %v10815_v62  ;;  %v11048_v62 = vpop.f32.mrf.mxu1  ;;  %v1875_v21 = vand.u32 4294901760, %v11040_v41  ;;  %v11090_v60 = vsub.f32 %v1819_v14, %v11077_v38  ;;  %v1812_v14 = vld [vmem:[#allocation3 + $0x2a0] sm:$0xff] }
  0xe8   : > { %1721 = vmatpush.msrb.mxu2 %v1539_v29  ;;  %1762 = vmatpush.msrb.mxu3 %v10831_v0  ;;  %v1883_v5 = vand.u32 4294901760, %v1882_v26  ;;  %v1924_v26 = vsub.f32 %v11143_v24, %v16787_v44 }
  0xe9   : > { %1644 = vmatpush.msrb.mxu1 %v10831_v0  ;;  %1825 = vmatpush.msra.mxu0 %v11035_v9  ;;  %v11057_v0 = vsub.f32 %v1821_v8, %v11046_v51  ;;  %v16793_v13 = vand.u32 4294901760, %v11090_v60  ;;  %v11156_v8 = vand.u32 4294901760, %v1813_v4 }
  0xea   : > { %1725 = vmatpush.msrb.mxu2 %v1545_v63  ;;  %1764 = vmatpush.msrb.mxu3 %v10843_v6  ;;  %v11093_v63 = vand.u32 4294901760, %v1818_v2 }
  0xeb   : > { %1727 = vmatmul.f32.vlgmr.msrb.gmra.mxu2 %v10919_v40  ;;  %1646 = vmatpush.msrb.mxu1 %v10843_v6  ;;  %v1876_v6 = vsub.f32 %v11040_v41, %v1875_v21  ;;  %v11095_v17 = vpop.f32.mrf.mxu3  ;;  %v1900_v47 = vsub.f32 %v11090_v60, %v16793_v13  ;;  %v1806_v13 = vld [vmem:[#allocation3 + $0x278] sm:$0xff] }
  0xec   : > { %1766 = vmatpush.msrb.mxu3 %v10858_v30  ;;  %1980 = vmatpush.msra.mxu2 %v11040_v41  ;;  %v11086_v12 = vpop.f32.mrf.mxu0  ;;  %v11104_v39 = vsub.f32 %v1818_v2, %v11093_v63  ;;  %v11173_v2 = vsub.f32 %v1813_v4, %v11156_v8 }
  0xed   : > { %1768 = vmatmul.f32.vlgmr.msrb.gmra.mxu3 %v10919_v40  ;;  %1648 = vmatpush.msrb.mxu1 %v10858_v30  ;;  %v16796_v30 = vand.u32 4294901760, %v11057_v0  ;;  %v1877_v10 = vand.u32 4294901760, %v1876_v6  ;;  %v1895_v40 = vand.u32 4294901760, %v1894_v48  ;;  %v1918_v6 = vsub.f32 %v11133_v46, %v16788_v59 }
  0xee   : > { %1652 = vmatmul.f32.vlgmr.msrb.gmra.mxu1 %v1438_v54  ;;  %2038 = vmatpush.msra.mxu3 %v11035_v9  ;;  %v16791_v57 = vand.u32 4294901760, %v11104_v39  ;;  %v1901_v54 = vand.u32 4294901760, %v1900_v47  ;;  %v11147_v20 = vpop.f32.mrf.mxu2  ;;  %v1925_v48 = vand.u32 4294901760, %v1924_v26 }
  0xef   : > { %1613 = vmatmul.f32.gmra.mxu0 %v1445_v25  ;;  %1983 = vmatpush.msra.mxu2 %v11052_v32  ;;  %v1888_v29 = vsub.f32 %v11057_v0, %v16796_v30  ;;  %v11111_v28 = vpop.f32.mrf.mxu1 }
  0xf0   : > { %2040 = vmatpush.msra.mxu3 %v11042_v19  ;;  %1827 = vmatpush.msra.mxu0 %v11042_v19  ;;  %v1906_v52 = vsub.f32 %v11104_v39, %v16791_v57 }
  0xf1   : > { %1986 = vmatpush.msra.mxu2 %v11057_v0  ;;  %1878 = vmatpush.msra.mxu1 %v1877_v10  ;;  %v1889_v33 = vand.u32 4294901760, %v1888_v29 }
  0xf2   : > { %2042 = vmatpush.msra.mxu3 %v11046_v51  ;;  %1829 = vmatpush.msra.mxu0 %v11046_v51  ;;  %v1907_v25 = vand.u32 4294901760, %v1906_v52 }
  0xf3   : > { %1731 = vmatmul.f32.gmra.mxu2 %v10947_v16  ;;  %1884 = vmatpush.msra.mxu1 %v1883_v5  ;;  %v11159_v55 = vpop.f32.mrf.mxu3  ;;  %v11175_v5 = vand.u32 4294901760, %v1812_v14 }
  0xf4   : > { %2044 = vmatpush.msra.mxu3 %v11065_v11  ;;  %1831 = vmatpush.msra.mxu0 %v11065_v11  ;;  %v11137_v53 = vpop.f32.mrf.mxu0 }
  0xf5   : > { %1772 = vmatmul.f32.gmra.mxu3 %v10947_v16  ;;  %1989 = vmatpush.msra.mxu2 %v11074_v56  ;;  %v16789_v16 = vand.u32 4294901760, %v11118_v36  ;;  %v11185_v47 = vsub.f32 %v1812_v14, %v11175_v5 }
  0xf6   : > { %1658 = vmatmul.f32.gmra.mxu1 %v1446_v7  ;;  %2046 = vmatpush.msra.mxu3 %v11077_v38  ;;  %v11145_v7 = vand.u32 4294901760, %v1814_v22 }
  0xf7   : > { %1833 = vmatpush.msra.mxu0 %v11077_v38  ;;  %1992 = vmatpush.msra.mxu2 %v11090_v60  ;;  %v1912_v35 = vsub.f32 %v11118_v36, %v16789_v16  ;;  %v11166_v10 = vpop.f32.mrf.mxu1 }
  0xf8   : > { %2048 = vmatpush.msra.mxu3 %v11093_v63  ;;  %1890 = vmatpush.msra.mxu1 %v1889_v33  ;;  %v11154_v1 = vsub.f32 %v1814_v22, %v11145_v7  ;;  %v1919_v33 = vand.u32 4294901760, %v1918_v6  ;;  %v11199_v4 = vpop.f32.mrf.mxu2  ;;  %v1809_v6 = vld [vmem:[#allocation3 + $0x288] sm:$0xff] }
  0xf9   : > { %1835 = vmatpush.msra.mxu0 %v11093_v63  ;;  %1995 = vmatpush.msra.mxu2 %v11104_v39  ;;  %v1913_v23 = vand.u32 4294901760, %v1912_v35 }
  0xfa   : > { %2050 = vmatpush.msra.mxu3 %v11107_v15  ;;  %1896 = vmatpush.msra.mxu1 %v1895_v40  ;;  %v16785_v29 = vand.u32 4294901760, %v11154_v1  ;;  %v16784_v40 = vand.u32 4294901760, %v11173_v2 }
  0xfb   : > { %1837 = vmatpush.msra.mxu0 %v11107_v15  ;;  %1998 = vmatpush.msra.mxu2 %v11118_v36 }
  0xfc   : > { %2052 = vmatpush.msra.mxu3 %v11121_v3  ;;  %1902 = vmatpush.msra.mxu1 %v1901_v54  ;;  %v1930_v43 = vsub.f32 %v11154_v1, %v16785_v29  ;;  %v1810_v54 = vld [vmem:[#allocation3 + $0x290] sm:$0xff]  ;;  %v1936_v22 = vsub.f32 %v11173_v2, %v16784_v40  ;;  %v11205_v14 = vpop.f32.mrf.mxu0  ;;  %v11213_v40 = vand.u32 4294901760, %v1809_v6 }
  0xfd   : > { %1839 = vmatpush.msra.mxu0 %v11121_v3  ;;  %2001 = vmatpush.msra.mxu2 %v11133_v46  ;;  %v11195_v35 = vand.u32 4294901760, %v1810_v54 }
  0xfe   : > { %2054 = vmatpush.msra.mxu3 %v11130_v58  ;;  %1908 = vmatpush.msra.mxu1 %v1907_v25  ;;  %v1931_v52 = vand.u32 4294901760, %v1930_v43  ;;  %v16786_v25 = vand.u32 4294901760, %v11185_v47  ;;  %v1937_v26 = vand.u32 4294901760, %v1936_v22  ;;  %v1808_v22 = vld [vmem:[#allocation3 + $0x280] sm:$0xff] }
  0xff   : > { %1841 = vmatpush.msra.mxu0 %v11130_v58  ;;  %2004 = vmatpush.msra.mxu2 %v11143_v24  ;;  %v11211_v43 = vsub.f32 %v1810_v54, %v11195_v35  ;;  %v11223_v54 = vsub.f32 %v1809_v6, %v11213_v40  ;;  %v11225_v44 = vand.u32 4294901760, %v1808_v22 }
 0x100   : > { %2056 = vmatpush.msra.mxu3 %v11145_v7  ;;  %1914 = vmatpush.msra.mxu1 %v1913_v23  ;;  %v11202_v23 = vsub.f32 %v1811_v45, %v11189_v37  ;;  %v11217_v45 = vpop.f32.mrf.mxu3 }
 0x101   : > { %1843 = vmatpush.msra.mxu0 %v11145_v7  ;;  %2007 = vmatpush.msra.mxu2 %v11154_v1  ;;  %v11240_v16 = vsub.f32 %v1808_v22, %v11225_v44  ;;  %v11252_v22 = vand.u32 4294901760, %v1806_v13 }
 0x102   : > { %2058 = vmatpush.msra.mxu3 %v11156_v8  ;;  %1920 = vmatpush.msra.mxu1 %v1919_v33  ;;  %v1942_v33 = vsub.f32 %v11185_v47, %v16786_v25  ;;  %v16792_v25 = vand.u32 4294901760, %v11211_v43  ;;  %v11233_v59 = vpop.f32.mrf.mxu1  ;;  %v11261_v34 = vpop.f32.mrf.mxu2 }
 0x103   : > { %1845 = vmatpush.msra.mxu0 %v11156_v8  ;;  %2010 = vmatpush.msra.mxu2 %v11173_v2  ;;  %17247 = vst [vmem:[#allocation10_spill] sm:$0xff] %v11252_v22 }
 0x104   : > { %2060 = vmatpush.msra.mxu3 %v11175_v5  ;;  %1926 = vmatpush.msra.mxu1 %v1925_v48  ;;  %v16790_v48 = vand.u32 4294901760, %v11202_v23  ;;  %v1943_v29 = vand.u32 4294901760, %v1942_v33  ;;  %v1954_v6 = vsub.f32 %v11211_v43, %v16792_v25  ;;  %v16794_v33 = vand.u32 4294901760, %v11223_v54 }
 0x105   : > { %1847 = vmatpush.msra.mxu0 %v11175_v5  ;;  %2013 = vmatpush.msra.mxu2 %v11185_v47  ;;  %v16798_v25 = vand.u32 4294901760, %v11240_v16 }
 0x106   : > { %2062 = vmatpush.msra.mxu3 %v11189_v37  ;;  %1932 = vmatpush.msra.mxu1 %v1931_v52  ;;  %v1948_v52 = vsub.f32 %v11202_v23, %v16790_v48  ;;  %v1955_v48 = vand.u32 4294901760, %v1954_v6  ;;  %v1960_v57 = vsub.f32 %v11223_v54, %v16794_v33  ;;  %v1805_v33 = vld [vmem:[#allocation3 + $0x270] sm:$0xff] }
 0x107   : > { %1849 = vmatpush.msra.mxu0 %v11189_v37  ;;  %2016 = vmatpush.msra.mxu2 %v11202_v23  ;;  %v1966_v6 = vsub.f32 %v11240_v16, %v16798_v25  ;;  %v11267_v30 = vand.u32 4294901760, %v1805_v33 }
 0x108   : > { %2064 = vmatpush.msra.mxu3 %v11195_v35  ;;  %1938 = vmatpush.msra.mxu1 %v1937_v26  ;;  %v1949_v26 = vand.u32 4294901760, %v1948_v52  ;;  %v1961_v52 = vand.u32 4294901760, %v1960_v57  ;;  %v1804_v57 = vld [vmem:[#allocation3 + $0x268] sm:$0xff]  ;;  %v11271_v25 = vpop.f32.mrf.mxu3 }
 0x109   : > { %1851 = vmatpush.msra.mxu0 %v11195_v35  ;;  %2019 = vmatpush.msra.mxu2 %v11211_v43  ;;  %17250 = vst [vmem:[#allocation12_spill] sm:$0xff] %v11267_v30  ;;  %v1967_v50 = vand.u32 4294901760, %v1966_v6 }
 0x10a   : > { %2066 = vmatpush.msra.mxu3 %v11213_v40  ;;  %1944 = vmatpush.msra.mxu1 %v1943_v29  ;;  %v11254_v29 = vpop.f32.mrf.mxu0 }
 0x10b   : > { %1853 = vmatpush.msra.mxu0 %v11213_v40  ;;  %2022 = vmatpush.msra.mxu2 %v11223_v54  ;;  %17248 = vst [vmem:[#allocation11_spill] sm:$0xff] %v11254_v29  ;;  %v17251_v29 = vand.u32 4294901760, %v11052_v32 }
 0x10c   : > { %2068 = vmatpush.msra.mxu3 %v11225_v44  ;;  %1950 = vmatpush.msra.mxu1 %v1949_v26  ;;  %v11265_v26 = vsub.f32 %v1806_v13, %v11252_v22  ;;  %v1803_v13 = vld [vmem:[#allocation3 + $0x260] sm:$0xff] }
 0x10d   : > { %1855 = vmatpush.msra.mxu0 %v11225_v44  ;;  %2025 = vmatpush.msra.mxu2 %v11240_v16 }
 0x10e   : > { %1956 = vmatpush.msra.mxu1 %v1955_v48  ;;  %17249 = vst [vmem:[#allocation9_spill] sm:$0xff] %v11265_v26  ;;  %v16801_v41 = vand.u32 4294901760, %v11265_v26  ;;  %v11278_v48 = vsub.f32 %v1805_v33, %v11267_v30  ;;  %v11292_v33 = vpop.f32.mrf.mxu1 }
 0x10f   : > { %2085 = vmatpush.msrb.mxu0 %v1875_v21  ;;  %2197 = vmatpush.msrb.mxu2 %v11252_v22  ;;  %v11275_v21 = vand.u32 4294901760, %v1804_v57  ;;  %v17253_v22 = vand.u32 4294901760, %v11057_v0  ;;  %v1802_v0 = vld [vmem:[#allocation3 + $0x258] sm:$0xff] }
 0x110   : > { %1962 = vmatpush.msra.mxu1 %v1961_v52  ;;  %17252 = vst [vmem:[#allocation13_spill] sm:$0xff] %v11278_v48  ;;  %v2248_v32 = vsub.f32 %v11265_v26, %v16801_v41  ;;  %v11287_v52 = vand.u32 4294901760, %v1803_v13 }
 0x111   : > { %2089 = vmatpush.msrb.mxu0 %v17251_v29  ;;  %2199 = vmatpush.msrb.mxu2 %v11267_v30  ;;  %v16806_v29 = vand.u32 4294901760, %v11278_v48  ;;  %v11290_v6 = vsub.f32 %v1804_v57, %v11275_v21  ;;  %v11302_v30 = vand.u32 4294901760, %v1802_v0 }
 0x112   : > { %1968 = vmatpush.msra.mxu1 %v1967_v50  ;;  %17254 = vst [vmem:[#allocation14_spill] sm:$0xff] %v11287_v52  ;;  %v17255_v50 = vand.u32 4294901760, %v11074_v56  ;;  %v1801_v56 = vld [vmem:[#allocation3 + $0x250] sm:$0xff] }
 0x113   : > { %2093 = vmatpush.msrb.mxu0 %v17253_v22  ;;  %2201 = vmatpush.msrb.mxu2 %v11275_v21  ;;  %v2249_v22 = vand.u32 4294901760, %v2248_v32  ;;  %v2254_v41 = vsub.f32 %v11278_v48, %v16806_v29  ;;  %v16811_v26 = vand.u32 4294901760, %v11290_v6  ;;  %v17257_v32 = vand.u32 4294901760, %v11090_v60 }
 0x114   : > { %2156 = vmatpush.msrb.mxu1 %v11035_v9  ;;  %v11308_v9 = vsub.f32 %v1803_v13, %v11287_v52  ;;  %v11316_v48 = vand.u32 4294901760, %v1801_v56  ;;  %v11321_v13 = vsub.f32 %v1802_v0, %v11302_v30  ;;  %v17259_v60 = vand.u32 4294901760, %v11104_v39  ;;  %v1799_v0 = vld [vmem:[#allocation3 + $0x240] sm:$0xff] }
 0x115   : > { %2097 = vmatpush.msrb.mxu0 %v17255_v50  ;;  %2203 = vmatpush.msrb.mxu2 %v11287_v52  ;;  %v2255_v50 = vand.u32 4294901760, %v2254_v41  ;;  %v2260_v29 = vsub.f32 %v11290_v6, %v16811_v26  ;;  %v1800_v52 = vld [vmem:[#allocation3 + $0x248] sm:$0xff]  ;;  %v11325_v41 = vpop.f32.mrf.mxu2 }
 0x116   : > { %2158 = vmatpush.msrb.mxu1 %v11042_v19  ;;  %17256 = vst [vmem:[#allocation15_spill] sm:$0xff] %v11308_v9  ;;  %2250 = vmatpush.msrb.mxu3 %v2249_v22  ;;  %v16814_v19 = vand.u32 4294901760, %v11308_v9  ;;  %v11331_v26 = vsub.f32 %v1801_v56, %v11316_v48  ;;  %v16819_v39 = vand.u32 4294901760, %v11321_v13 }
 0x117   : > { %2101 = vmatpush.msrb.mxu0 %v17257_v32  ;;  %2205 = vmatpush.msrb.mxu2 %v11302_v30  ;;  %17258 = vst [vmem:[#allocation16_spill] sm:$0xff] %v11316_v48  ;;  %v2261_v22 = vand.u32 4294901760, %v2260_v29  ;;  %v11328_v32 = vand.u32 4294901760, %v1800_v52  ;;  %v11340_v29 = vpop.f32.mrf.mxu3 }
 0x118   : > { %2160 = vmatpush.msrb.mxu1 %v11046_v51  ;;  %2256 = vmatpush.msrb.mxu3 %v2255_v50  ;;  %17261 = vst [vmem:[#allocation18_spill] sm:$0xff] %v11331_v26  ;;  %v2266_v51 = vsub.f32 %v11308_v9, %v16814_v19  ;;  %v16820_v56 = vand.u32 4294901760, %v11331_v26  ;;  %v11344_v50 = vand.u32 4294901760, %v1799_v0 }
 0x119   : > { %2105 = vmatpush.msrb.mxu0 %v17259_v60  ;;  %2207 = vmatpush.msrb.mxu2 %v11316_v48  ;;  %17260 = vst [vmem:[#allocation17_spill] sm:$0xff] %v11328_v32  ;;  %v17262_v60 = vand.u32 4294901760, %v11118_v36  ;;  %v2272_v36 = vsub.f32 %v11321_v13, %v16819_v39  ;;  %v1797_v39 = vld [vmem:[#allocation3 + $0x230] sm:$0xff] }
 0x11a   : > { %2162 = vmatpush.msrb.mxu1 %v11065_v11  ;;  %2262 = vmatpush.msrb.mxu3 %v2261_v22  ;;  %v11347_v11 = vsub.f32 %v1800_v52, %v11328_v32  ;;  %v2267_v19 = vand.u32 4294901760, %v2266_v51  ;;  %v17264_v22 = vand.u32 4294901760, %v11133_v46  ;;  %v2278_v9 = vsub.f32 %v11331_v26, %v16820_v56 }
 0x11b   : > { %2109 = vmatpush.msrb.mxu0 %v17262_v60  ;;  %2209 = vmatpush.msrb.mxu2 %v11328_v32  ;;  %v1798_v60 = vld [vmem:[#allocation3 + $0x238] sm:$0xff]  ;;  %v11366_v51 = vsub.f32 %v1799_v0, %v11344_v50  ;;  %v11372_v56 = vand.u32 4294901760, %v1797_v39  ;;  %v1796_v0 = vld [vmem:[#allocation3 + $0x228] sm:$0xff] }
 0x11c   : > { %17263 = vst [vmem:[#allocation19_spill] sm:$0xff] %v11347_v11  ;;  %2164 = vmatpush.msrb.mxu1 %v11077_v38  ;;  %v16823_v52 = vand.u32 4294901760, %v11347_v11  ;;  %v11362_v32 = vand.u32 4294901760, %v1798_v60  ;;  %2268 = vmatpush.msrb.mxu3 %v2267_v19  ;;  %v2273_v38 = vand.u32 4294901760, %v2272_v36  ;;  %v2279_v46 = vand.u32 4294901760, %v2278_v9 }
 0x11d   : > { %2113 = vmatpush.msrb.mxu0 %v17264_v22  ;;  %2211 = vmatpush.msrb.mxu2 %v11344_v50  ;;  %17265 = vst [vmem:[#allocation20_spill] sm:$0xff] %v11366_v51  ;;  %v16826_v9 = vand.u32 4294901760, %v11366_v51 }
 0x11e   : > { %2166 = vmatpush.msrb.mxu1 %v11093_v63  ;;  %v2284_v22 = vsub.f32 %v11347_v11, %v16823_v52  ;;  %17266 = vst [vmem:[#allocation21_spill] sm:$0xff] %v11372_v56  ;;  %v11375_v26 = vsub.f32 %v1798_v60, %v11362_v32  ;;  %v17267_v63 = vand.u32 4294901760, %v11143_v24  ;;  %2274 = vmatpush.msrb.mxu3 %v2273_v38  ;;  %v17268_v60 = vand.u32 4294901760, %v11154_v1 }
 0x11f   : > { %2213 = vmatpush.msrb.mxu2 %v11362_v32  ;;  %v396_v24 = vadd.f32 %v11029_v27, %v11027_v42  ;;  %v11395_v38 = vand.u32 4294901760, %v1796_v0  ;;  %v17270_v27 = vand.u32 4294901760, %v11173_v2  ;;  %v17271_v2 = vand.u32 4294901760, %v11185_v47 }
 0x120   : > { %2117 = vmatpush.msrb.mxu0 %v17267_v63  ;;  %2168 = vmatpush.msrb.mxu1 %v11107_v15  ;;  %v2285_v52 = vand.u32 4294901760, %v2284_v22  ;;  %v2290_v15 = vsub.f32 %v11366_v51, %v16826_v9  ;;  %v11398_v22 = vsub.f32 %v1797_v39, %v11372_v56  ;;  %v1795_v63 = vld [vmem:[#allocation3 + $0x220] sm:$0xff]  ;;  %v17269_v1 = vand.u32 4294901760, %v11375_v26  ;;  %v1794_v9 = vld [vmem:[#allocation3 + $0x218] sm:$0xff] }
 0x121   : > { %2215 = vmatpush.msrb.mxu2 %v11372_v56  ;;  %2280 = vmatpush.msrb.mxu3 %v2279_v46  ;;  %v11405_v42 = vand.u32 4294901760, %v1795_v63  ;;  %v11412_v39 = vsub.f32 %v1796_v0, %v11395_v38  ;;  %v11415_v51 = vand.u32 4294901760, %v1794_v9 }
 0x122   : > { %2121 = vmatpush.msrb.mxu0 %v17268_v60  ;;  %2170 = vmatpush.msrb.mxu1 %v11121_v3  ;;  %v2296_v60 = vsub.f32 %v11375_v26, %v17269_v1  ;;  %v2291_v3 = vand.u32 4294901760, %v2290_v15  ;;  %v2301_v46 = vand.u32 4294901760, %v11398_v22 }
 0x123   : > { %2286 = vmatpush.msrb.mxu3 %v2285_v52  ;;  %2217 = vmatpush.msrb.mxu2 %v11395_v38  ;;  %v11418_v1 = vsub.f32 %v1795_v63, %v11405_v42  ;;  %v16831_v15 = vand.u32 4294901760, %v11412_v39 }
 0x124   : > { %2125 = vmatpush.msrb.mxu0 %v17270_v27  ;;  %2172 = vmatpush.msrb.mxu1 %v11130_v58  ;;  %v2297_v56 = vand.u32 4294901760, %v2296_v60  ;;  %v454_v58 = vadd.f32 %v11031_v31, %v396_v24  ;;  %v2302_v0 = vsub.f32 %v11398_v22, %v2301_v46  ;;  %v1793_v60 = vld [vmem:[#allocation3 + $0x210] sm:$0xff]  ;;  %v11435_v31 = vsub.f32 %v1794_v9, %v11415_v51 }
 0x125   : > { %2292 = vmatpush.msrb.mxu3 %v2291_v3  ;;  %2219 = vmatpush.msrb.mxu2 %v11405_v42  ;;  %v16832_v63 = vand.u32 4294901760, %v11418_v1  ;;  %v11432_v47 = vand.u32 4294901760, %v1793_v60  ;;  %v17272_v24 = vand.u32 4294901760, %v11202_v23  ;;  %v2308_v3 = vsub.f32 %v11412_v39, %v16831_v15 }
 0x126   : > { %2129 = vmatpush.msrb.mxu0 %v17271_v2  ;;  %2174 = vmatpush.msrb.mxu1 %v11145_v7  ;;  %v400_v7 = vadd.f32 %v11048_v62, %v11033_v18  ;;  %v2303_v27 = vand.u32 4294901760, %v2302_v0  ;;  %v1792_v2 = vld [vmem:[#allocation3 + $0x208] sm:$0xff]  ;;  %v16833_v23 = vand.u32 4294901760, %v11435_v31  ;;  %v17273_v18 = vand.u32 4294901760, %v11211_v43 }
 0x127   : > { %2298 = vmatpush.msrb.mxu3 %v2297_v56  ;;  %2221 = vmatpush.msrb.mxu2 %v11415_v51  ;;  %v2314_v9 = vsub.f32 %v11418_v1, %v16832_v63  ;;  %v498_v62 = vadd.f32 %v11037_v49, %v454_v58  ;;  %v2309_v56 = vand.u32 4294901760, %v2308_v3  ;;  %v11459_v0 = vsub.f32 %v1793_v60, %v11432_v47 }
 0x128   : > { %2133 = vmatpush.msrb.mxu0 %v17272_v24  ;;  %2176 = vmatpush.msrb.mxu1 %v11156_v8  ;;  %v11450_v24 = vand.u32 4294901760, %v1792_v2  ;;  %v2320_v43 = vsub.f32 %v11435_v31, %v16833_v23  ;;  %v17274_v49 = vand.u32 4294901760, %v11223_v54  ;;  %v459_v58 = vadd.f32 %v11080_v61, %v400_v7 }
 0x129   : > { %2304 = vmatpush.msrb.mxu3 %v2303_v27  ;;  %v2315_v63 = vand.u32 4294901760, %v2314_v9  ;;  %2223 = vmatpush.msrb.mxu2 %v11432_v47  ;;  %v17275_v23 = vand.u32 4294901760, %v11240_v16  ;;  %v573_v54 = vadd.f32 %v11086_v12, %v498_v62 }
 0x12a   : > { %2137 = vmatpush.msrb.mxu0 %v17273_v18  ;;  %2178 = vmatpush.msrb.mxu1 %v11175_v5  ;;  %v1791_v18 = vld [vmem:[#allocation3 + $0x200] sm:$0xff]  ;;  %v2325_v5 = vand.u32 4294901760, %v11459_v0  ;;  %v11473_v27 = vsub.f32 %v1792_v2, %v11450_v24  ;;  %v2321_v9 = vand.u32 4294901760, %v2320_v43  ;;  %v504_v2 = vadd.f32 %v11095_v17, %v459_v58 }
 0x12b   : > { %2310 = vmatpush.msrb.mxu3 %v2309_v56  ;;  %v11470_v60 = vand.u32 4294901760, %v1791_v18  ;;  %2225 = vmatpush.msrb.mxu2 %v11450_v24 }
 0x12c   : > { %2141 = vmatpush.msrb.mxu0 %v17274_v49  ;;  %2180 = vmatpush.msrb.mxu1 %v11189_v37  ;;  %v2326_v61 = vsub.f32 %v11459_v0, %v2325_v5  ;;  %v2331_v37 = vand.u32 4294901760, %v11473_v27 }
 0x12d   : > { %2316 = vmatpush.msrb.mxu3 %v2315_v63  ;;  %v11485_v7 = vsub.f32 %v1791_v18, %v11470_v60  ;;  %2227 = vmatpush.msrb.mxu2 %v11470_v60 }
 0x12e   : > { %2145 = vmatpush.msrb.mxu0 %v17275_v23  ;;  %2182 = vmatpush.msrb.mxu1 %v11195_v35  ;;  %v2327_v12 = vand.u32 4294901760, %v2326_v61  ;;  %v2332_v35 = vsub.f32 %v11473_v27, %v2331_v37  ;;  %v614_v23 = vadd.f32 %v11111_v28, %v573_v54 }
 0x12f   : > { %2322 = vmatpush.msrb.mxu3 %v2321_v9  ;;  %v2337_v63 = vand.u32 4294901760, %v11485_v7 }
 0x130   : > { %2184 = vmatpush.msrb.mxu1 %v11213_v40  ;;  %v2333_v62 = vand.u32 4294901760, %v2332_v35  ;;  %v577_v40 = vadd.f32 %v11137_v53, %v504_v2  ;;  %v659_v28 = vadd.f32 %v11147_v20, %v614_v23 }
 0x131   : > { %2328 = vmatpush.msrb.mxu3 %v2327_v12  ;;  %v2338_v17 = vsub.f32 %v11485_v7, %v2337_v63 }
 0x132   : > { %v11304_v57 = vpop.f32.mrf.mxu0  ;;  %2186 = vmatpush.msrb.mxu1 %v11225_v44  ;;  %v618_v44 = vadd.f32 %v11166_v10, %v577_v40  ;;  %v768_v54 = vadd.f32 %v11159_v55, %v659_v28 }
 0x133   : > { %2334 = vmatpush.msrb.mxu3 %v2333_v62  ;;  %v2339_v49 = vand.u32 4294901760, %v2338_v17 }
 0x134   : > { %v11349_v48 = vpop.f32.mrf.mxu1  ;;  %v826_v12 = vadd.f32 %v11205_v14, %v768_v54  ;;  %v667_v53 = vadd.f32 %v11199_v4, %v618_v44  ;;  %v9799_v54 = vld [vmem:[#allocation5] ss:$0 sm:$0xff] }
 0x135   : > { %v1159_v43 = vadd.f32 %v11349_v48, %v11304_v57  ;;  %2340 = vmatpush.msrb.mxu3 %v2339_v49 }
 0x136   : > { %v870_v20 = vadd.f32 %v11233_v59, %v826_v12 }
 0x138   : > { %v945_v14 = vadd.f32 %v11261_v34, %v870_v20 }
 0x13a   : > { %v986_v28 = vadd.f32 %v11271_v25, %v945_v14 }
 0x13b   : > { %v11379_v19 = vpop.f32.mrf.mxu0 }
 0x13e   : > { %v11423_v52 = vpop.f32.mrf.mxu1 }
 0x13f   : > { %v11383_v36 = vpop.f32.mrf.mxu2  ;;  %v1163_v48 = vadd.f32 %v11423_v52, %v11379_v19 }
 0x140   : > { %v1217_v9 = vadd.f32 %v11383_v36, %v1159_v43  ;;  %v772_v36 = vadd.f32 %v11217_v45, %v667_v53  ;;  %v17276_v43 = vld [vmem:[#allocation11_spill] sm:$0xff] }
 0x142   : > { %v11400_v11 = vpop.f32.mrf.mxu3  ;;  %v831_v19 = vadd.f32 %v17276_v43, %v772_v36  ;;  %v17281_v43 = vld [vmem:[#allocation13_spill] sm:$0xff] }
 0x143   : > { %v1261_v57 = vadd.f32 %v11400_v11, %v1217_v9 }
 0x144   : > { %v876_v59 = vadd.f32 %v11292_v33, %v831_v19  ;;  %v17282_v19 = vand.u32 4294901760, %v17281_v43 }
 0x145   : > { %v11455_v8 = vpop.f32.mrf.mxu0 }
 0x146   : > { %v1336_v55 = vadd.f32 %v11455_v8, %v1261_v57  ;;  %v949_v12 = vadd.f32 %v11325_v41, %v876_v59  ;;  %v17283_v59 = vld [vmem:[#allocation14_spill] sm:$0xff] }
 0x148   : > { %v990_v25 = vadd.f32 %v11340_v29, %v949_v12  ;;  %v17279_v29 = vld [vmem:[#allocation9_spill] sm:$0xff]  ;;  %v17288_v12 = vand.u32 4294901760, %v11321_v13 }
 0x149   : > { %v1221_v15 = vpop.f32.mrf.mxu2  ;;  %v1376_v16 = vpop.f32.mrf.mxu1  ;;  %v17280_v14 = vand.u32 4294901760, %v17279_v29 }
 0x14a   : > { %v1222_v62 = vadd.f32 %v1221_v15, %v1163_v48  ;;  %v1377_v52 = vadd.f32 %v1376_v16, %v1336_v55  ;;  %v17277_v55 = vld [vmem:[#allocation10_spill] sm:$0xff] }
 0x14c   : > { %v1266_v3 = vpop.f32.mrf.mxu3  ;;  %v1383_v8 = vadd.f32 %v1377_v52, %v986_v28 }
 0x14d   : > { %v1267_v11 = vadd.f32 %v1266_v3, %v1222_v62 }
 0x14f   : > { %v1339_v18 = vpop.f32.mrf.mxu0 }
 0x150   : > { %v1340_v15 = vadd.f32 %v1339_v18, %v1267_v11 }
 0x151   : > { %v1380_v61 = vpop.f32.mrf.mxu1 }
 0x152   : > { %v1381_v3 = vadd.f32 %v1380_v61, %v1340_v15 }
 0x15c   : > { %v1442_v56 = vpop.f32.mrf.mxu2  ;;  %v1551_v58 = vpop.f32.mrf.mxu3 }
 0x15d   : > { %v1552_v23 = vadd.f32 %v1551_v58, %v1442_v56 }
 0x164   : > { %v1609_v2 = vpop.f32.mrf.mxu0 }
 0x165   : > { %v1450_v35 = vpop.f32.mrf.mxu2  ;;  %v1555_v10 = vpop.f32.mrf.mxu3  ;;  %v1610_v17 = vadd.f32 %v1609_v2, %v1552_v23 }
 0x166   : > { %v1556_v45 = vadd.f32 %v1555_v10, %v1450_v35  ;;  %v1384_v35 = vadd.f32 %v1381_v3, %v990_v25  ;;  %v17290_v3 = vld [vmem:[#allocation18_spill] sm:$0xff]  ;;  %v2586_v25 = vld [vmem:[#allocation3 + $0x378] sm:$0xff] }
 0x16b   : > { %v1653_v4 = vpop.f32.mrf.mxu1 }
 0x16c   : > { %v1654_v40 = vadd.f32 %v1653_v4, %v1610_v17  ;;  %v1614_v56 = vpop.f32.mrf.mxu0  ;;  %v17278_v17 = vld [vmem:[#allocation12_spill] sm:$0xff] }
 0x16d   : > { %v1615_v34 = vadd.f32 %v1614_v56, %v1556_v45  ;;  %v17284_v56 = vand.u32 4294901760, %v11290_v6 }
 0x16e   : > { %v1728_v49 = vpop.f32.mrf.mxu2 }
 0x16f   : > { %v1729_v58 = vadd.f32 %v1728_v49, %v1654_v40 }
 0x170   : > { %v1769_v44 = vpop.f32.mrf.mxu3 }
 0x171   : > { %v1770_v9 = vadd.f32 %v1769_v44, %v1729_v58  ;;  %v17285_v44 = vld [vmem:[#allocation15_spill] sm:$0xff] }
 0x173   : > { %v1776_v53 = vadd.f32 %v1770_v9, %v1383_v8  ;;  %v1659_v48 = vpop.f32.mrf.mxu1  ;;  %v17286_v8 = vand.u32 4294901760, %v17285_v44 }
 0x174   : > { %v1660_v16 = vadd.f32 %v1659_v48, %v1615_v34 }
 0x175   : > { %v1782_v57 = vadd.f32 %v9799_v54, %v1776_v53 }
 0x176   : > { %v1732_v2 = vpop.f32.mrf.mxu2 }
 0x177   : > { %v1784_v33 = vmax.f32 %v1782_v57, 0.0  ;;  %v1733_v20 = vadd.f32 %v1732_v2, %v1660_v16  ;;  %v17291_v57 = vand.u32 4294901760, %v17290_v3 }
 0x178   : > { %v1773_v23 = vpop.f32.mrf.mxu3 }
 0x179   : > { %1786 = vst [vmem:[#allocation2 + $0x8] sm:$0xff] %v1784_v33  ;;  %v1774_v10 = vadd.f32 %v1773_v23, %v1733_v20  ;;  %v11520_v18 = vand.u32 4294901760, %v1784_v33  ;;  %v11574_v23 = vand.u32 4294901760, %v2586_v25 }
 0x17b   : > { %v1777_v36 = vadd.f32 %v1774_v10, %v1384_v35  ;;  %1970 = vmatmul.f32.vlgmr.msra.gmra.mxu1 %v11520_v18  ;;  %v1857_v41 = vsub.f32 %v1784_v33, %v11520_v18  ;;  %v2585_v35 = vld [vmem:[#allocation3 + $0x370] sm:$0xff]  ;;  %v17294_v10 = vld [vmem:[#allocation20_spill] sm:$0xff] }
 0x17c   : > { %2410 = vmatpush.msra.mxu1 %v17277_v55 }
 0x17d   : > { %v1783_v61 = vadd.f32 %v9799_v54, %v1777_v36  ;;  %2028 = vmatmul.f32.vlgmr.msra.gmra.mxu2 %v1857_v41  ;;  %v1858_v62 = vand.u32 4294901760, %v1857_v41  ;;  %v17287_v54 = vld [vmem:[#allocation16_spill] sm:$0xff]  ;;  %v17295_v36 = vand.u32 4294901760, %v17294_v10 }
 0x17e   : > { %2412 = vmatpush.msra.mxu1 %v17278_v17  ;;  %2457 = vmatpush.msra.mxu2 %v17280_v14 }
 0x17f   : > { %v1785_v4 = vmax.f32 %v1783_v61, 0.0  ;;  %2072 = vmatmul.f32.vlgmr.msra.gmra.mxu3 %v1858_v62  ;;  %v1859_v40 = vsub.f32 %v1857_v41, %v1858_v62  ;;  %v2584_v61 = vld [vmem:[#allocation3 + $0x368] sm:$0xff] }
 0x180   : > { %2414 = vmatpush.msra.mxu1 %v11275_v21  ;;  %2461 = vmatpush.msra.mxu2 %v17282_v19  ;;  %v1788_v52 = vld [vmem:[#allocation2 + $0x7] sm:$0xff]  ;;  %v11595_v14 = vand.u32 4294901760, %v2584_v61 }
 0x181   : > { %1787 = vst [vmem:[#allocation2 + $0x10] sm:$0xff] %v1785_v4  ;;  %2528 = vmatpush.msra.mxu3 %v17277_v55  ;;  %v1860_v11 = vand.u32 4294901760, %v1859_v40  ;;  %v11532_v49 = vand.u32 4294901760, %v1785_v4  ;;  %v11534_v28 = vand.u32 4294901760, %v1788_v52  ;;  %v11583_v55 = vand.u32 4294901760, %v2585_v35  ;;  %v17296_v62 = vld [vmem:[#allocation21_spill] sm:$0xff] }
 0x182   : > { %2416 = vmatpush.msra.mxu1 %v17283_v59  ;;  %2465 = vmatpush.msra.mxu2 %v17284_v56  ;;  %v2581_v56 = vld [vmem:[#allocation3 + $0x350] sm:$0xff] }
 0x183   : > { %2530 = vmatpush.msra.mxu3 %v17278_v17  ;;  %1861 = vmatmul.f32.vlgmr.msra.gmra.mxu0 %v1860_v11  ;;  %v1865_v58 = vsub.f32 %v1785_v4, %v11532_v49  ;;  %v11542_v45 = vsub.f32 %v1788_v52, %v11534_v28  ;;  %v17297_v17 = vand.u32 4294901760, %v11375_v26  ;;  %v11604_v40 = vsub.f32 %v2585_v35, %v11583_v55  ;;  %v2575_v35 = vld [vmem:[#allocation3 + $0x320] sm:$0xff] }
 0x184   : > { %1974 = vmatmul.f32.gmra.mxu1 %v11532_v49  ;;  %2352 = vmatpush.msra.mxu0 %v17279_v29  ;;  %v2583_v29 = vld [vmem:[#allocation3 + $0x360] sm:$0xff]  ;;  %v11617_v52 = vsub.f32 %v2584_v61, %v11595_v14  ;;  %v2574_v61 = vld [vmem:[#allocation3 + $0x318] sm:$0xff] }
 0x185   : > { %2418 = vmatpush.msra.mxu1 %v11302_v30  ;;  %2469 = vmatpush.msra.mxu2 %v17286_v8  ;;  %v1866_v15 = vand.u32 4294901760, %v1865_v58  ;;  %v2230_v9 = vand.u32 4294901760, %v11542_v45  ;;  %v11609_v19 = vand.u32 4294901760, %v2583_v29 }
 0x186   : > { %2532 = vmatpush.msra.mxu3 %v11275_v21  ;;  %2033 = vmatmul.f32.gmra.mxu2 %v1865_v58  ;;  %v17289_v21 = vld [vmem:[#allocation17_spill] sm:$0xff]  ;;  %v16849_v8 = vand.u32 4294901760, %v11617_v52 }
 0x187   : > { %2355 = vmatpush.msra.mxu0 %v17281_v43  ;;  %2420 = vmatpush.msra.mxu1 %v17287_v54  ;;  %v1867_v34 = vsub.f32 %v1865_v58, %v1866_v15  ;;  %v2231_v2 = vsub.f32 %v11542_v45, %v2230_v9  ;;  %v17299_v58 = vand.u32 4294901760, %v11418_v1 }
 0x188   : > { %2473 = vmatpush.msra.mxu2 %v17288_v12  ;;  %2534 = vmatpush.msra.mxu3 %v17283_v59  ;;  %v1789_v53 = vld [vmem:[#allocation2 + $0xf] sm:$0xff]  ;;  %v16850_v59 = vand.u32 4294901760, %v11604_v40  ;;  %v2579_v12 = vld [vmem:[#allocation3 + $0x340] sm:$0xff] }
 0x189   : > { %2078 = vmatmul.f32.gmra.mxu3 %v1866_v15  ;;  %2358 = vmatpush.msra.mxu0 %v11290_v6  ;;  %v1868_v48 = vand.u32 4294901760, %v1867_v34  ;;  %v11557_v16 = vand.u32 4294901760, %v1789_v53  ;;  %v17292_v6 = vld [vmem:[#allocation19_spill] sm:$0xff]  ;;  %v17300_v34 = vand.u32 4294901760, %v11435_v31 }
 0x18a   : > { %2422 = vmatpush.msra.mxu1 %v17289_v21  ;;  %2477 = vmatpush.msra.mxu2 %v17291_v57  ;;  %v17293_v33 = vand.u32 4294901760, %v17292_v6  ;;  %v2578_v57 = vld [vmem:[#allocation3 + $0x338] sm:$0xff] }
 0x18b   : > { %2536 = vmatpush.msra.mxu3 %v11302_v30  ;;  %2361 = vmatpush.msra.mxu0 %v17285_v44  ;;  %v11571_v20 = vsub.f32 %v1789_v53, %v11557_v16  ;;  %v2232_v30 = vand.u32 4294901760, %v2231_v2  ;;  %v11631_v44 = vsub.f32 %v2583_v29, %v11609_v19  ;;  %v2577_v2 = vld [vmem:[#allocation3 + $0x330] sm:$0xff] }
 0x18c   : > { %2424 = vmatpush.msra.mxu1 %v11344_v50  ;;  %2481 = vmatpush.msra.mxu2 %v17293_v33  ;;  %v2573_v29 = vld [vmem:[#allocation3 + $0x310] sm:$0xff] }
 0x18d   : > { %2538 = vmatpush.msra.mxu3 %v17287_v54  ;;  %1869 = vmatmul.f32.gmra.mxu0 %v1868_v48  ;;  %v2238_v41 = vand.u32 4294901760, %v11571_v20  ;;  %v11640_v54 = vand.u32 4294901760, %v2581_v56  ;;  %v16848_v53 = vand.u32 4294901760, %v11631_v44 }
 0x18e   : > { %2188 = vmatmul.f32.vlgmr.msrb.gmra.mxu1 %v11520_v18  ;;  %2364 = vmatpush.msra.mxu0 %v11321_v13  ;;  %v11588_v13 = vsub.f32 %v2586_v25, %v11574_v23  ;;  %v11680_v25 = vand.u32 4294901760, %v2578_v57 }
 0x18f   : > { %2426 = vmatpush.msra.mxu1 %v11362_v32  ;;  %2485 = vmatpush.msra.mxu2 %v17295_v36  ;;  %v2239_v4 = vsub.f32 %v11571_v20, %v2238_v41 }
 0x190   : > { %2540 = vmatpush.msra.mxu3 %v17289_v21  ;;  %2233 = vmatmul.f32.vlgmr.msrb.gmra.mxu2 %v2232_v30  ;;  %v16852_v43 = vand.u32 4294901760, %v11588_v13  ;;  %v11663_v21 = vsub.f32 %v2581_v56, %v11640_v54  ;;  %v11701_v30 = vsub.f32 %v2578_v57, %v11680_v25 }
 0x191   : > { %2367 = vmatpush.msra.mxu0 %v17290_v3  ;;  %2428 = vmatpush.msra.mxu1 %v17296_v62  ;;  %v11665_v3 = vand.u32 4294901760, %v2579_v12 }
 0x192   : > { %2489 = vmatpush.msra.mxu2 %v17297_v17  ;;  %2542 = vmatpush.msra.mxu3 %v11344_v50  ;;  %v2582_v50 = vld [vmem:[#allocation3 + $0x358] sm:$0xff] }
 0x193   : > { %2342 = vmatmul.f32.vlgmr.msrb.gmra.mxu3 %v11534_v28  ;;  %2370 = vmatpush.msra.mxu0 %v17292_v6  ;;  %v11619_v11 = vand.u32 4294901760, %v2582_v50  ;;  %v16845_v6 = vand.u32 4294901760, %v11663_v21  ;;  %v11690_v33 = vsub.f32 %v2579_v12, %v11665_v3 }
 0x194   : > { %2430 = vmatpush.msra.mxu1 %v11395_v38  ;;  %2493 = vmatpush.msra.mxu2 %v2301_v46  ;;  %v17298_v46 = vand.u32 4294901760, %v11412_v39 }
 0x195   : > { %2544 = vmatpush.msra.mxu3 %v11362_v32  ;;  %2373 = vmatpush.msra.mxu0 %v17294_v10  ;;  %v2240_v32 = vand.u32 4294901760, %v2239_v4  ;;  %v11638_v15 = vsub.f32 %v2582_v50, %v11619_v11  ;;  %v16843_v36 = vand.u32 4294901760, %v11690_v33  ;;  %v16842_v4 = vand.u32 4294901760, %v11701_v30 }
 0x196   : > { %2432 = vmatpush.msra.mxu1 %v11405_v42  ;;  %2497 = vmatpush.msra.mxu2 %v17298_v46  ;;  %v11727_v50 = vand.u32 4294901760, %v2574_v61 }
 0x197   : > { %2546 = vmatpush.msra.mxu3 %v17296_v62  ;;  %2147 = vmatmul.f32.vlgmr.msrb.gmra.mxu0 %v11520_v18  ;;  %v2639_v18 = vsub.f32 %v11588_v13, %v16852_v43  ;;  %v11715_v62 = vand.u32 4294901760, %v2575_v35  ;;  %v2681_v46 = vsub.f32 %v11690_v33, %v16843_v36 }
 0x198   : > { %2192 = vmatmul.f32.gmra.mxu1 %v11532_v49  ;;  %2376 = vmatpush.msra.mxu0 %v11375_v26  ;;  %v2580_v26 = vld [vmem:[#allocation3 + $0x348] sm:$0xff]  ;;  %v11751_v12 = vsub.f32 %v2574_v61, %v11727_v50 }
 0x199   : > { %2434 = vmatpush.msra.mxu1 %v11415_v51  ;;  %2501 = vmatpush.msra.mxu2 %v17299_v58  ;;  %v11651_v48 = vand.u32 4294901760, %v2580_v26  ;;  %v11737_v58 = vsub.f32 %v2575_v35, %v11715_v62 }
 0x19a   : > { %2548 = vmatpush.msra.mxu3 %v11395_v38  ;;  %2241 = vmatmul.f32.gmra.mxu2 %v2240_v32  ;;  %v2645_v38 = vsub.f32 %v11604_v40, %v16850_v59  ;;  %v2572_v32 = vld [vmem:[#allocation3 + $0x308] sm:$0xff]  ;;  %v2970_v59 = vld [vmem:[#allocation3 + $0x3b0] sm:$0xff] }
 0x19b   : > { %2379 = vmatpush.msra.mxu0 %v11398_v22  ;;  %2436 = vmatpush.msra.mxu1 %v11432_v47  ;;  %v2640_v22 = vand.u32 4294901760, %v2639_v18  ;;  %v11739_v18 = vand.u32 4294901760, %v2573_v29 }
 0x19c   : > { %2505 = vmatpush.msra.mxu2 %v17300_v34  ;;  %2550 = vmatpush.msra.mxu3 %v11405_v42  ;;  %v2651_v42 = vsub.f32 %v11617_v52, %v16849_v8  ;;  %v2687_v34 = vsub.f32 %v11701_v30, %v16842_v4  ;;  %v2972_v4 = vld [vmem:[#allocation3 + $0x3c0] sm:$0xff] }
 0x19d   : > { %2346 = vmatmul.f32.gmra.mxu3 %v11557_v16  ;;  %2382 = vmatpush.msra.mxu0 %v11412_v39  ;;  %v16847_v39 = vand.u32 4294901760, %v11638_v15  ;;  %v11763_v57 = vsub.f32 %v2573_v29, %v11739_v18  ;;  %v2978_v29 = vld [vmem:[#allocation3 + $0x3f0] sm:$0xff] }
 0x19e   : > { %2438 = vmatpush.msra.mxu1 %v11450_v24  ;;  %2509 = vmatpush.msra.mxu2 %v2325_v5  ;;  %v11675_v5 = vsub.f32 %v2580_v26, %v11651_v48  ;;  %v2571_v26 = vld [vmem:[#allocation3 + $0x300] sm:$0xff] }
 0x19f   : > { %2552 = vmatpush.msra.mxu3 %v11415_v51  ;;  %2385 = vmatpush.msra.mxu0 %v11418_v1  ;;  %v2646_v51 = vand.u32 4294901760, %v2645_v38  ;;  %v2657_v1 = vsub.f32 %v11631_v44, %v16848_v53  ;;  %v16836_v35 = vand.u32 4294901760, %v11763_v57 }
 0x1a0   : > { %2440 = vmatpush.msra.mxu1 %v11470_v60  ;;  %2513 = vmatpush.msra.mxu2 %v2331_v37  ;;  %v2663_v37 = vsub.f32 %v11638_v15, %v16847_v39  ;;  %v2971_v39 = vld [vmem:[#allocation3 + $0x3b8] sm:$0xff] }
 0x1a1   : > { %2554 = vmatpush.msra.mxu3 %v11432_v47  ;;  %2151 = vmatmul.f32.gmra.mxu0 %v11532_v49  ;;  %v2652_v47 = vand.u32 4294901760, %v2651_v42  ;;  %v2576_v49 = vld [vmem:[#allocation3 + $0x328] sm:$0xff]  ;;  %v16838_v42 = vand.u32 4294901760, %v11737_v58 }
 0x1a2   : > { %2641 = vmatpush.msrb.mxu1 %v2640_v22  ;;  %2388 = vmatpush.msra.mxu0 %v11435_v31  ;;  %v2658_v31 = vand.u32 4294901760, %v2657_v1  ;;  %v11703_v10 = vand.u32 4294901760, %v2576_v49  ;;  %v11753_v22 = vand.u32 4294901760, %v2572_v32  ;;  %v2688_v1 = vand.u32 4294901760, %v2687_v34 }
 0x1a3   : > { %2444 = vmatmul.f32.vlgmr.msra.gmra.mxu1 %v2230_v9  ;;  %2517 = vmatpush.msra.mxu2 %v2337_v63  ;;  %v11693_v9 = vand.u32 4294901760, %v2577_v2  ;;  %v16844_v63 = vand.u32 4294901760, %v11675_v5  ;;  %v11809_v34 = vand.u32 4294901760, %v2978_v29 }
 0x1a4   : > { %2556 = vmatpush.msra.mxu3 %v11450_v24  ;;  %2647 = vmatpush.msrb.mxu1 %v2646_v51  ;;  %v2664_v24 = vand.u32 4294901760, %v2663_v37  ;;  %v11765_v51 = vand.u32 4294901760, %v2571_v26  ;;  %v11775_v37 = vsub.f32 %v2572_v32, %v11753_v22 }
 0x1a5   : > { %2743 = vmatpush.msrb.mxu2 %v11588_v13  ;;  %2391 = vmatpush.msra.mxu0 %v11459_v0  ;;  %v2669_v0 = vsub.f32 %v11663_v21, %v16845_v6  ;;  %v2675_v17 = vsub.f32 %v11675_v5, %v16844_v63 }
 0x1a6   : > { %2519 = vmatmul.f32.vlgmr.msra.gmra.mxu2 %v11534_v28  ;;  %2558 = vmatpush.msra.mxu3 %v11470_v60  ;;  %v11713_v60 = vsub.f32 %v2577_v2, %v11693_v9 }
 0x1a7   : > { %2653 = vmatpush.msrb.mxu1 %v2652_v47  ;;  %2746 = vmatpush.msrb.mxu2 %v11604_v40  ;;  %v16837_v47 = vand.u32 4294901760, %v11751_v12 }
 0x1a8   : > { %2801 = vmatpush.msrb.mxu3 %v11574_v23  ;;  %2394 = vmatpush.msra.mxu0 %v11473_v27  ;;  %v11725_v27 = vsub.f32 %v2576_v49, %v11703_v10  ;;  %v16841_v56 = vand.u32 4294901760, %v11713_v60 }
 0x1a9   : > { %2560 = vmatmul.f32.vlgmr.msra.gmra.mxu3 %v11534_v28  ;;  %2659 = vmatpush.msrb.mxu1 %v2658_v31  ;;  %v2670_v28 = vand.u32 4294901760, %v2669_v0  ;;  %v2705_v31 = vsub.f32 %v11737_v58, %v16838_v42  ;;  %v2711_v61 = vsub.f32 %v11751_v12, %v16837_v47  ;;  %v2569_v47 = vld [vmem:[#allocation2 + $0x11] sm:$0xff] }
 0x1aa   : > { %2749 = vmatpush.msrb.mxu2 %v11617_v52  ;;  %2803 = vmatpush.msrb.mxu3 %v11583_v55  ;;  %v16839_v38 = vand.u32 4294901760, %v11725_v27 }
 0x1ab   : > { %2397 = vmatpush.msra.mxu0 %v11485_v7  ;;  %2665 = vmatpush.msrb.mxu1 %v2664_v24  ;;  %v2676_v7 = vand.u32 4294901760, %v2675_v17  ;;  %v11785_v24 = vsub.f32 %v2571_v26, %v11765_v51  ;;  %v16835_v17 = vand.u32 4294901760, %v11775_v37 }
 0x1ac   : > { %2752 = vmatpush.msrb.mxu2 %v11631_v44  ;;  %2805 = vmatpush.msrb.mxu3 %v11595_v14  ;;  %v2699_v2 = vsub.f32 %v11725_v27, %v16839_v38  ;;  %v11859_v38 = vand.u32 4294901760, %v2569_v47 }
 0x1ad   : > { %2588 = vmatpush.msrb.mxu0 %v11574_v23  ;;  %2450 = vmatmul.f32.gmra.mxu1 %v2238_v41  ;;  %v2693_v41 = vsub.f32 %v11713_v60, %v16841_v56  ;;  %v16834_v32 = vand.u32 4294901760, %v11785_v24  ;;  %v2723_v26 = vsub.f32 %v11775_v37, %v16835_v17 }
 0x1ae   : > { %2400 = vmatmul.f32.vlgmr.msra.gmra.mxu0 %v11542_v45  ;;  %2671 = vmatpush.msrb.mxu1 %v2670_v28  ;;  %v2682_v45 = vand.u32 4294901760, %v2681_v46  ;;  %v2700_v0 = vand.u32 4294901760, %v2699_v2  ;;  %v2706_v28 = vand.u32 4294901760, %v2705_v31  ;;  %v2717_v46 = vsub.f32 %v11763_v57, %v16836_v35  ;;  %v2976_v31 = vld [vmem:[#allocation3 + $0x3e0] sm:$0xff]  ;;  %17302 = vst [vmem:[#allocation10_spill] sm:$0xff] %v11859_v38 }
 0x1af   : > { %2590 = vmatpush.msrb.mxu0 %v11583_v55  ;;  %2755 = vmatpush.msrb.mxu2 %v11638_v15  ;;  %v2694_v49 = vand.u32 4294901760, %v2693_v41  ;;  %v2977_v41 = vld [vmem:[#allocation3 + $0x3e8] sm:$0xff]  ;;  %v2729_v2 = vsub.f32 %v11785_v24, %v16834_v32 }
 0x1b0   : > { %2807 = vmatpush.msrb.mxu3 %v11609_v19  ;;  %2523 = vmatmul.f32.gmra.mxu2 %v11557_v16 }
 0x1b1   : > { %2592 = vmatpush.msrb.mxu0 %v11595_v14  ;;  %2677 = vmatpush.msrb.mxu1 %v2676_v7  ;;  %v2730_v32 = vand.u32 4294901760, %v2729_v2 }
 0x1b2   : > { %2758 = vmatpush.msrb.mxu2 %v11663_v21  ;;  %2809 = vmatpush.msrb.mxu3 %v11619_v11 }
 0x1b3   : > { %2564 = vmatmul.f32.gmra.mxu3 %v11557_v16  ;;  %2594 = vmatpush.msrb.mxu0 %v11609_v19  ;;  %v2979_v16 = vld [vmem:[#allocation3 + $0x3f8] sm:$0xff] }
 0x1b4   : > { %2683 = vmatpush.msrb.mxu1 %v2682_v45  ;;  %2761 = vmatpush.msrb.mxu2 %v11675_v5  ;;  %v11801_v7 = vand.u32 4294901760, %v2979_v16  ;;  %v2568_v45 = vld [vmem:[#allocation2 + $0x9] sm:$0xff] }
 0x1b5   : > { %2811 = vmatpush.msrb.mxu3 %v11640_v54  ;;  %2596 = vmatpush.msrb.mxu0 %v11619_v11 }
 0x1b6   : > { %2689 = vmatpush.msrb.mxu1 %v2688_v1  ;;  %2764 = vmatpush.msrb.mxu2 %v11690_v33  ;;  %v2718_v1 = vand.u32 4294901760, %v2717_v46  ;;  %v11828_v46 = vsub.f32 %v2978_v29, %v11809_v34 }
 0x1b7   : > { %2813 = vmatpush.msrb.mxu3 %v11651_v48  ;;  %2405 = vmatmul.f32.gmra.mxu0 %v11571_v20  ;;  %v2712_v20 = vand.u32 4294901760, %v2711_v61  ;;  %v11823_v61 = vand.u32 4294901760, %v2568_v45 }
 0x1b8   : > { %2598 = vmatpush.msrb.mxu0 %v11640_v54  ;;  %2695 = vmatpush.msrb.mxu1 %v2694_v49  ;;  %v11818_v49 = vsub.f32 %v2979_v16, %v11801_v7  ;;  %v2975_v16 = vld [vmem:[#allocation3 + $0x3d8] sm:$0xff]  ;;  %v16846_v35 = vand.u32 4294901760, %v11828_v46 }
 0x1b9   : > { %2767 = vmatpush.msrb.mxu2 %v11701_v30  ;;  %2815 = vmatpush.msrb.mxu3 %v11665_v3  ;;  %v2620_v29 = vsub.f32 %v2568_v45, %v11823_v61  ;;  %v11844_v2 = vand.u32 4294901760, %v2975_v16 }
 0x1ba   : > { %2600 = vmatpush.msrb.mxu0 %v11651_v48  ;;  %2701 = vmatpush.msrb.mxu1 %v2700_v0  ;;  %v2724_v0 = vand.u32 4294901760, %v2723_v26  ;;  %v16840_v17 = vand.u32 4294901760, %v11818_v49  ;;  %v2974_v26 = vld [vmem:[#allocation3 + $0x3d0] sm:$0xff] }
 0x1bb   : > { %2770 = vmatpush.msrb.mxu2 %v11713_v60  ;;  %2817 = vmatpush.msrb.mxu3 %v11680_v25  ;;  %v11855_v42 = vand.u32 4294901760, %v2974_v26  ;;  %v11868_v56 = vsub.f32 %v2975_v16, %v11844_v2  ;;  %v11882_v16 = vand.u32 4294901760, %v2972_v4 }
 0x1bc   : > { %2602 = vmatpush.msrb.mxu0 %v11665_v3  ;;  %2707 = vmatpush.msrb.mxu1 %v2706_v28  ;;  %v11825_v28 = vand.u32 4294901760, %v2977_v41 }
 0x1bd   : > { %2773 = vmatpush.msrb.mxu2 %v11725_v27  ;;  %2819 = vmatpush.msrb.mxu3 %v11693_v9  ;;  %17303 = vst [vmem:[#allocation12_spill] sm:$0xff] %v11868_v56  ;;  %v16856_v8 = vand.u32 4294901760, %v11868_v56 }
 0x1be   : > { %2604 = vmatpush.msrb.mxu0 %v11680_v25  ;;  %2713 = vmatpush.msrb.mxu1 %v2712_v20  ;;  %v11834_v20 = vand.u32 4294901760, %v2976_v31 }
 0x1bf   : > { %2776 = vmatpush.msrb.mxu2 %v11737_v58  ;;  %2821 = vmatpush.msrb.mxu3 %v11703_v10 }
 0x1c0   : > { %2606 = vmatpush.msrb.mxu0 %v11693_v9  ;;  %2719 = vmatpush.msrb.mxu1 %v2718_v1  ;;  %v11842_v1 = vsub.f32 %v2977_v41, %v11825_v28  ;;  %v11853_v45 = vsub.f32 %v2976_v31, %v11834_v20  ;;  %v2973_v41 = vld [vmem:[#allocation3 + $0x3c8] sm:$0xff] }
 0x1c1   : > { %2779 = vmatpush.msrb.mxu2 %v11751_v12  ;;  %2823 = vmatpush.msrb.mxu3 %v11715_v62  ;;  %v11872_v36 = vand.u32 4294901760, %v2973_v41 }
 0x1c2   : > { %2608 = vmatpush.msrb.mxu0 %v11703_v10  ;;  %2725 = vmatpush.msrb.mxu1 %v2724_v0  ;;  %v3032_v0 = vsub.f32 %v11818_v49, %v16840_v17  ;;  %17301 = vst [vmem:[#allocation11_spill] sm:$0xff] %v11853_v45  ;;  %v3038_v17 = vsub.f32 %v11828_v46, %v16846_v35  ;;  %v16851_v31 = vand.u32 4294901760, %v11842_v1  ;;  %v16853_v6 = vand.u32 4294901760, %v11853_v45 }
 0x1c3   : > { %2782 = vmatpush.msrb.mxu2 %v11763_v57  ;;  %2825 = vmatpush.msrb.mxu3 %v11727_v50  ;;  %v11877_v35 = vsub.f32 %v2974_v26, %v11855_v42 }
 0x1c4   : > { %2610 = vmatpush.msrb.mxu0 %v11715_v62  ;;  %2731 = vmatpush.msrb.mxu1 %v2730_v32  ;;  %v2621_v32 = vand.u32 4294901760, %v2620_v29  ;;  %v3033_v63 = vand.u32 4294901760, %v3032_v0  ;;  %v3039_v53 = vand.u32 4294901760, %v3038_v17  ;;  %v3044_v26 = vsub.f32 %v11842_v1, %v16851_v31  ;;  %v2969_v31 = vld [vmem:[#allocation3 + $0x3a8] sm:$0xff] }
 0x1c5   : > { %2785 = vmatpush.msrb.mxu2 %v11775_v37  ;;  %2827 = vmatpush.msrb.mxu3 %v11739_v18  ;;  %17304 = vst [vmem:[#allocation9_spill] sm:$0xff] %v11877_v35  ;;  %v3050_v17 = vsub.f32 %v11853_v45, %v16853_v6  ;;  %v3056_v6 = vsub.f32 %v11868_v56, %v16856_v8  ;;  %v11918_v45 = vand.u32 4294901760, %v2969_v31  ;;  %v2967_v8 = vld [vmem:[#allocation3 + $0x398] sm:$0xff]  ;;  %v17306_v56 = vand.u32 4294901760, %v11588_v13 }
 0x1c6   : > { %2733 = vmatmul.f32.vlgmr.msrb.gmra.mxu1 %v11823_v61  ;;  %2612 = vmatpush.msrb.mxu0 %v11727_v50  ;;  %v2622_v0 = vsub.f32 %v2620_v29, %v2621_v32 }
 0x1c7   : > { %2919 = vmatpush.msra.mxu1 %v11574_v23  ;;  %2788 = vmatpush.msrb.mxu2 %v11785_v24  ;;  %v2628_v23 = vsub.f32 %v2569_v47, %v11859_v38  ;;  %v11894_v47 = vand.u32 4294901760, %v2971_v39 }
 0x1c8   : > { %2829 = vmatpush.msrb.mxu3 %v11753_v22  ;;  %2791 = vmatmul.f32.vlgmr.msrb.gmra.mxu2 %v2620_v29  ;;  %v2968_v29 = vld [vmem:[#allocation3 + $0x3a0] sm:$0xff] }
 0x1c9   : > { %2921 = vmatpush.msra.mxu1 %v11583_v55  ;;  %2981 = vmatpush.msra.mxu2 %v11801_v7  ;;  %v11892_v55 = vsub.f32 %v2973_v41, %v11872_v36  ;;  %v11906_v41 = vand.u32 4294901760, %v2970_v59  ;;  %v2629_v43 = vand.u32 4294901760, %v2628_v23 }
 0x1ca   : > { %2614 = vmatpush.msrb.mxu0 %v11739_v18  ;;  %2831 = vmatpush.msrb.mxu3 %v11765_v51 }
 0x1cb   : > { %2835 = vmatmul.f32.vlgmr.msrb.gmra.mxu3 %v2621_v32  ;;  %2923 = vmatpush.msra.mxu1 %v11595_v14  ;;  %v11904_v14 = vsub.f32 %v2972_v4, %v11882_v16  ;;  %v3045_v32 = vand.u32 4294901760, %v3044_v26  ;;  %v11916_v4 = vsub.f32 %v2971_v39, %v11894_v47  ;;  %v11929_v39 = vsub.f32 %v2970_v59, %v11906_v41 }
 0x1cc   : > { %2983 = vmatpush.msra.mxu2 %v11809_v34  ;;  %3034 = vmatpush.msra.mxu3 %v3033_v63  ;;  %v2623_v63 = vand.u32 4294901760, %v2622_v0  ;;  %v17305_v0 = vand.u32 4294901760, %v11877_v35  ;;  %v17308_v13 = vand.u32 4294901760, %v11892_v55  ;;  %v11941_v59 = vsub.f32 %v2969_v31, %v11918_v45 }
 0x1cd   : > { %2616 = vmatpush.msrb.mxu0 %v11753_v22  ;;  %2925 = vmatpush.msra.mxu1 %v11609_v19  ;;  %v16863_v19 = vand.u32 4294901760, %v11916_v4 }
 0x1ce   : > { %2985 = vmatpush.msra.mxu2 %v11825_v28  ;;  %3040 = vmatpush.msra.mxu3 %v3039_v53  ;;  %v3051_v53 = vand.u32 4294901760, %v3050_v17  ;;  %v3062_v26 = vsub.f32 %v11877_v35, %v17305_v0  ;;  %v2630_v17 = vsub.f32 %v2628_v23, %v2629_v43  ;;  %v17307_v0 = vand.u32 4294901760, %v11604_v40 }
 0x1cf   : > { %2618 = vmatpush.msrb.mxu0 %v11765_v51  ;;  %2737 = vmatmul.f32.gmra.mxu1 %v11859_v38  ;;  %v11931_v38 = vand.u32 4294901760, %v2968_v29  ;;  %v11943_v35 = vand.u32 4294901760, %v2967_v8  ;;  %v17309_v40 = vand.u32 4294901760, %v11617_v52  ;;  %v17311_v52 = vand.u32 4294901760, %v11631_v44 }
 0x1d0   : > { %2624 = vmatmul.f32.vlgmr.msrb.gmra.mxu0 %v2623_v63  ;;  %2927 = vmatpush.msra.mxu1 %v11619_v11  ;;  %v3057_v11 = vand.u32 4294901760, %v3056_v6  ;;  %v2966_v63 = vld [vmem:[#allocation3 + $0x390] sm:$0xff]  ;;  %v3063_v6 = vand.u32 4294901760, %v3062_v26  ;;  %v3080_v26 = vsub.f32 %v11916_v4, %v16863_v19 }
 0x1d1   : > { %2848 = vmatpush.msra.mxu0 %v17306_v56  ;;  %2987 = vmatpush.msra.mxu2 %v11834_v20  ;;  %v3068_v56 = vsub.f32 %v11892_v55, %v17308_v13  ;;  %v11955_v31 = vand.u32 4294901760, %v2966_v63  ;;  %v2965_v13 = vld [vmem:[#allocation3 + $0x388] sm:$0xff] }
 0x1d2   : > { %3046 = vmatpush.msra.mxu3 %v3045_v32  ;;  %2796 = vmatmul.f32.gmra.mxu2 %v2628_v23  ;;  %v2961_v32 = vld [vmem:[#allocation2 + $0xa] sm:$0xff] }
 0x1d3   : > { %2852 = vmatpush.msra.mxu0 %v17307_v0  ;;  %2929 = vmatpush.msra.mxu1 %v11640_v54  ;;  %v17310_v54 = vand.u32 4294901760, %v11904_v14  ;;  %v11953_v0 = vsub.f32 %v2968_v29, %v11931_v38  ;;  %v3091_v29 = vand.u32 4294901760, %v11941_v59  ;;  %v11984_v19 = vand.u32 4294901760, %v2961_v32 }
 0x1d4   : > { %2989 = vmatpush.msra.mxu2 %v11844_v2  ;;  %3052 = vmatpush.msra.mxu3 %v3051_v53  ;;  %v3069_v53 = vand.u32 4294901760, %v3068_v56 }
 0x1d5   : > { %2841 = vmatmul.f32.gmra.mxu3 %v2629_v43  ;;  %2856 = vmatpush.msra.mxu0 %v17309_v40  ;;  %v3074_v23 = vsub.f32 %v11904_v14, %v17310_v54  ;;  %v2631_v43 = vand.u32 4294901760, %v2630_v17  ;;  %v11966_v40 = vsub.f32 %v2967_v8, %v11943_v35  ;;  %v2964_v54 = vld [vmem:[#allocation3 + $0x380] sm:$0xff]  ;;  %v3097_v56 = vand.u32 4294901760, %v11953_v0 }
 0x1d6   : > { %2931 = vmatpush.msra.mxu1 %v11651_v48  ;;  %2991 = vmatpush.msra.mxu2 %v11855_v42  ;;  %v11970_v48 = vand.u32 4294901760, %v2965_v13  ;;  %v11977_v8 = vsub.f32 %v2966_v63, %v11955_v31 }
 0x1d7   : > { %3058 = vmatpush.msra.mxu3 %v3057_v11  ;;  %2860 = vmatpush.msra.mxu0 %v17311_v52  ;;  %v3075_v44 = vand.u32 4294901760, %v3074_v23  ;;  %v17312_v11 = vand.u32 4294901760, %v11929_v39  ;;  %v17313_v52 = vand.u32 4294901760, %v11638_v15  ;;  %v3092_v23 = vsub.f32 %v11941_v59, %v3091_v29 }
 0x1d8   : > { %2933 = vmatpush.msra.mxu1 %v11665_v3  ;;  %2993 = vmatpush.msra.mxu2 %v11872_v36  ;;  %v11982_v3 = vand.u32 4294901760, %v2964_v54  ;;  %v3103_v63 = vand.u32 4294901760, %v11966_v40  ;;  %v11995_v15 = vsub.f32 %v2965_v13, %v11970_v48 }
 0x1d9   : > { %3064 = vmatpush.msra.mxu3 %v3063_v6  ;;  %2632 = vmatmul.f32.gmra.mxu0 %v2631_v43  ;;  %v3086_v17 = vsub.f32 %v11929_v39, %v17312_v11  ;;  %v3081_v6 = vand.u32 4294901760, %v3080_v26  ;;  %v17314_v43 = vand.u32 4294901760, %v11663_v21  ;;  %v3109_v26 = vand.u32 4294901760, %v11977_v8 }
 0x1da   : > { %2864 = vmatpush.msra.mxu0 %v17313_v52  ;;  %2935 = vmatpush.msra.mxu1 %v11680_v25  ;;  %v17315_v11 = vand.u32 4294901760, %v11675_v5  ;;  %v12006_v21 = vsub.f32 %v2961_v32, %v11984_v19  ;;  %v3093_v13 = vand.u32 4294901760, %v3092_v23  ;;  %v3115_v5 = vand.u32 4294901760, %v11995_v15 }
 0x1db   : > { %2995 = vmatpush.msra.mxu2 %v11882_v16  ;;  %3070 = vmatpush.msra.mxu3 %v3069_v53  ;;  %v3087_v25 = vand.u32 4294901760, %v3086_v17  ;;  %v3098_v53 = vsub.f32 %v11953_v0, %v3097_v56  ;;  %v17316_v17 = vand.u32 4294901760, %v11690_v33  ;;  %v3110_v32 = vsub.f32 %v11977_v8, %v3109_v26 }
 0x1dc   : > { %2868 = vmatpush.msra.mxu0 %v17314_v43  ;;  %2937 = vmatpush.msra.mxu1 %v11693_v9  ;;  %v12009_v9 = vsub.f32 %v2964_v54, %v11982_v3  ;;  %v2962_v54 = vld [vmem:[#allocation2 + $0x12] sm:$0xff]  ;;  %v17317_v52 = vand.u32 4294901760, %v11701_v30  ;;  %v3014_v33 = vand.u32 4294901760, %v12006_v21  ;;  %v17318_v23 = vand.u32 4294901760, %v11713_v60 }
 0x1dd   : > { %2997 = vmatpush.msra.mxu2 %v11894_v47  ;;  %3076 = vmatpush.msra.mxu3 %v3075_v44  ;;  %v3104_v44 = vsub.f32 %v11966_v40, %v3103_v63  ;;  %v3116_v30 = vsub.f32 %v11995_v15, %v3115_v5  ;;  %v12035_v43 = vand.u32 4294901760, %v2962_v54 }
 0x1de   : > { %2872 = vmatpush.msra.mxu0 %v17315_v11  ;;  %2939 = vmatpush.msra.mxu1 %v11703_v10  ;;  %v3099_v10 = vand.u32 4294901760, %v3098_v53  ;;  %v3015_v60 = vsub.f32 %v12006_v21, %v3014_v33  ;;  %v17320_v53 = vand.u32 4294901760, %v11737_v58 }
 0x1df   : > { %2999 = vmatpush.msra.mxu2 %v11906_v41  ;;  %3082 = vmatpush.msra.mxu3 %v3081_v6  ;;  %v3105_v6 = vand.u32 4294901760, %v3104_v44  ;;  %v12052_v11 = vsub.f32 %v2962_v54, %v12035_v43  ;;  %v17327_v54 = vand.u32 4294901760, %v11785_v24  ;;  %v17331_v24 = vld [vmem:[#allocation12_spill] sm:$0xff] }
 0x1e0   : > { %2876 = vmatpush.msra.mxu0 %v17316_v17  ;;  %2941 = vmatpush.msra.mxu1 %v11715_v62  ;;  %v3121_v62 = vand.u32 4294901760, %v12009_v9  ;;  %v17323_v17 = vand.u32 4294901760, %v11763_v57  ;;  %v17326_v57 = vand.u32 4294901760, %v11842_v1 }
 0x1e1   : > { %3001 = vmatpush.msra.mxu2 %v11918_v45  ;;  %3088 = vmatpush.msra.mxu3 %v3087_v25  ;;  %v17319_v25 = vand.u32 4294901760, %v11725_v27  ;;  %v3117_v27 = vand.u32 4294901760, %v3116_v30  ;;  %v3022_v58 = vand.u32 4294901760, %v12052_v11 }
 0x1e2   : > { %2880 = vmatpush.msra.mxu0 %v17317_v52  ;;  %2943 = vmatpush.msra.mxu1 %v11727_v50  ;;  %v3111_v50 = vand.u32 4294901760, %v3110_v32  ;;  %v17325_v32 = vand.u32 4294901760, %v11775_v37  ;;  %v17328_v52 = vld [vmem:[#allocation10_spill] sm:$0xff]  ;;  %v17329_v37 = vld [vmem:[#allocation11_spill] sm:$0xff] }
 0x1e3   : > { %3003 = vmatpush.msra.mxu2 %v11931_v38  ;;  %3094 = vmatpush.msra.mxu3 %v3093_v13  ;;  %v3016_v13 = vand.u32 4294901760, %v3015_v60 }
 0x1e4   : > { %2884 = vmatpush.msra.mxu0 %v17318_v23  ;;  %2945 = vmatpush.msra.mxu1 %v11739_v18  ;;  %v3122_v18 = vsub.f32 %v12009_v9, %v3121_v62 }
 0x1e5   : > { %3005 = vmatpush.msra.mxu2 %v11943_v35  ;;  %3100 = vmatpush.msra.mxu3 %v3099_v10  ;;  %v3023_v10 = vsub.f32 %v12052_v11, %v3022_v58 }
 0x1e6   : > { %2888 = vmatpush.msra.mxu0 %v17319_v25  ;;  %2947 = vmatpush.msra.mxu1 %v11753_v22  ;;  %v17321_v22 = vand.u32 4294901760, %v11751_v12  ;;  %v3123_v44 = vand.u32 4294901760, %v3122_v18  ;;  %v17324_v12 = vand.u32 4294901760, %v11828_v46  ;;  %v3394_v25 = vld [vmem:[#allocation3 + $0x4c8] sm:$0xff] }
 0x1e7   : > { %3007 = vmatpush.msra.mxu2 %v11955_v31  ;;  %3106 = vmatpush.msra.mxu3 %v3105_v6  ;;  %v17330_v6 = vand.u32 4294901760, %v17329_v37 }
 0x1e8   : > { %2892 = vmatpush.msra.mxu0 %v17320_v53  ;;  %2949 = vmatpush.msra.mxu1 %v11765_v51  ;;  %v17322_v51 = vand.u32 4294901760, %v11818_v49 }
 0x1e9   : > { %3009 = vmatpush.msra.mxu2 %v11970_v48  ;;  %3112 = vmatpush.msra.mxu3 %v3111_v50 }
 0x1ea   : > { %2951 = vmatmul.f32.vlgmr.msra.gmra.mxu1 %v11823_v61  ;;  %2896 = vmatpush.msra.mxu0 %v17321_v22 }
 0x1eb   : > { %3194 = vmatpush.msrb.mxu1 %v11801_v7  ;;  %3011 = vmatpush.msra.mxu2 %v11982_v3 }
 0x1ec   : > { %3118 = vmatpush.msra.mxu3 %v3117_v27  ;;  %3017 = vmatmul.f32.vlgmr.msra.gmra.mxu2 %v3016_v13  ;;  %v3393_v13 = vld [vmem:[#allocation3 + $0x4c0] sm:$0xff] }
 0x1ed   : > { %3196 = vmatpush.msrb.mxu1 %v11809_v34  ;;  %3241 = vmatpush.msrb.mxu2 %v17322_v51 }
 0x1ee   : > { %2900 = vmatpush.msra.mxu0 %v17323_v17  ;;  %3124 = vmatpush.msra.mxu3 %v3123_v44 }
 0x1ef   : > { %3126 = vmatmul.f32.vlgmr.msra.gmra.mxu3 %v11984_v19  ;;  %3198 = vmatpush.msrb.mxu1 %v11825_v28 }
 0x1f0   : > { %3245 = vmatpush.msrb.mxu2 %v17324_v12  ;;  %3312 = vmatpush.msrb.mxu3 %v11801_v7  ;;  %v3024_v7 = vand.u32 4294901760, %v3023_v10  ;;  %v12255_v12 = vand.u32 4294901760, %v3393_v13 }
 0x1f1   : > { %2904 = vmatpush.msra.mxu0 %v17325_v32  ;;  %3200 = vmatpush.msrb.mxu1 %v11834_v20  ;;  %v3392_v32 = vld [vmem:[#allocation3 + $0x4b8] sm:$0xff] }
 0x1f2   : > { %3249 = vmatpush.msrb.mxu2 %v17326_v57  ;;  %3314 = vmatpush.msrb.mxu3 %v11809_v34  ;;  %v17332_v34 = vand.u32 4294901760, %v17331_v24 }
 0x1f3   : > { %2908 = vmatpush.msra.mxu0 %v17327_v54  ;;  %2955 = vmatmul.f32.gmra.mxu1 %v17328_v52 }
 0x1f4   : > { %2910 = vmatmul.f32.vlgmr.msra.gmra.mxu0 %v11823_v61  ;;  %3202 = vmatpush.msrb.mxu1 %v11844_v2 }
 0x1f5   : > { %3136 = vmatpush.msrb.mxu0 %v11818_v49  ;;  %3253 = vmatpush.msrb.mxu2 %v17330_v6  ;;  %v17333_v49 = vld [vmem:[#allocation9_spill] sm:$0xff] }
 0x1f6   : > { %3316 = vmatpush.msrb.mxu3 %v11825_v28  ;;  %3025 = vmatmul.f32.gmra.mxu2 %v3024_v7  ;;  %v17334_v61 = vand.u32 4294901760, %v17333_v49  ;;  %v17335_v28 = vand.u32 4294901760, %v11892_v55  ;;  %v12270_v7 = vsub.f32 %v3393_v13, %v12255_v12 }
 0x1f7   : > { %3139 = vmatpush.msrb.mxu0 %v11828_v46  ;;  %3204 = vmatpush.msrb.mxu1 %v11855_v42  ;;  %v17336_v46 = vand.u32 4294901760, %v11904_v14 }
 0x1f8   : > { %3257 = vmatpush.msrb.mxu2 %v17332_v34  ;;  %3318 = vmatpush.msrb.mxu3 %v11834_v20  ;;  %v17337_v20 = vand.u32 4294901760, %v11916_v4 }
 0x1f9   : > { %3130 = vmatmul.f32.gmra.mxu3 %v12035_v43  ;;  %3142 = vmatpush.msrb.mxu0 %v11842_v1 }
 0x1fa   : > { %3206 = vmatpush.msrb.mxu1 %v11872_v36  ;;  %3261 = vmatpush.msrb.mxu2 %v17334_v61  ;;  %v16868_v61 = vand.u32 4294901760, %v12270_v7 }
 0x1fb   : > { %3320 = vmatpush.msrb.mxu3 %v11844_v2  ;;  %3145 = vmatpush.msrb.mxu0 %v17329_v37  ;;  %v3400_v2 = vld [vmem:[#allocation3 + $0x4f8] sm:$0xff]  ;;  %v12272_v37 = vand.u32 4294901760, %v3392_v32 }
 0x1fc   : > { %3208 = vmatpush.msrb.mxu1 %v11882_v16  ;;  %3265 = vmatpush.msrb.mxu2 %v17335_v28 }
 0x1fd   : > { %3322 = vmatpush.msrb.mxu3 %v11855_v42  ;;  %2914 = vmatmul.f32.gmra.mxu0 %v17328_v52  ;;  %v17338_v42 = vand.u32 4294901760, %v11929_v39  ;;  %v12283_v28 = vsub.f32 %v3392_v32, %v12272_v37 }
 0x1fe   : > { %3148 = vmatpush.msrb.mxu0 %v17331_v24  ;;  %3210 = vmatpush.msrb.mxu1 %v11894_v47  ;;  %v3391_v24 = vld [vmem:[#allocation3 + $0x4b0] sm:$0xff] }
 0x1ff   : > { %3269 = vmatpush.msrb.mxu2 %v17336_v46  ;;  %3324 = vmatpush.msrb.mxu3 %v11872_v36  ;;  %v12164_v36 = vpop.f32.mrf.mxu1  ;;  %v12286_v46 = vand.u32 4294901760, %v3391_v24 }
 0x200   : > { %3151 = vmatpush.msrb.mxu0 %v17333_v49  ;;  %3212 = vmatpush.msrb.mxu1 %v11906_v41 }
 0x201   : > { %3273 = vmatpush.msrb.mxu2 %v17337_v20  ;;  %3326 = vmatpush.msrb.mxu3 %v11882_v16  ;;  %v3398_v16 = vld [vmem:[#allocation3 + $0x4e8] sm:$0xff] }
 0x202   : > { %3154 = vmatpush.msrb.mxu0 %v11892_v55  ;;  %3214 = vmatpush.msrb.mxu1 %v11918_v45  ;;  %v12170_v1 = vpop.f32.mrf.mxu3  ;;  %v12172_v55 = vand.u32 4294901760, %v3400_v2  ;;  %v3390_v20 = vld [vmem:[#allocation3 + $0x4a8] sm:$0xff] }
 0x203   : > { %3277 = vmatpush.msrb.mxu2 %v17338_v42  ;;  %3328 = vmatpush.msrb.mxu3 %v11894_v47 }
 0x204   : > { %3157 = vmatpush.msrb.mxu0 %v11904_v14  ;;  %3216 = vmatpush.msrb.mxu1 %v11931_v38  ;;  %v12176_v14 = vand.u32 4294901760, %v3398_v16 }
 0x205   : > { %3281 = vmatpush.msrb.mxu2 %v3091_v29  ;;  %3330 = vmatpush.msrb.mxu3 %v11906_v41 }
 0x206   : > { %3160 = vmatpush.msrb.mxu0 %v11916_v4  ;;  %3218 = vmatpush.msrb.mxu1 %v11943_v35  ;;  %v12183_v4 = vsub.f32 %v3400_v2, %v12172_v55  ;;  %v3495_v2 = vsub.f32 %v12270_v7, %v16868_v61 }
 0x207   : > { %3285 = vmatpush.msrb.mxu2 %v3097_v56  ;;  %3332 = vmatpush.msrb.mxu3 %v11918_v45  ;;  %v3399_v45 = vld [vmem:[#allocation3 + $0x4f0] sm:$0xff]  ;;  %v12178_v41 = vpop.f32.mrf.mxu1 }
 0x208   : > { %3163 = vmatpush.msrb.mxu0 %v11929_v39  ;;  %3220 = vmatpush.msrb.mxu1 %v11955_v31  ;;  %v12174_v47 = vand.u32 4294901760, %v3399_v45 }
 0x209   : > { %3289 = vmatpush.msrb.mxu2 %v3103_v63  ;;  %3334 = vmatpush.msrb.mxu3 %v11931_v38  ;;  %v12166_v38 = vpop.f32.mrf.mxu0 }
 0x20a   : > { %3166 = vmatpush.msrb.mxu0 %v11941_v59  ;;  %3222 = vmatpush.msrb.mxu1 %v11970_v48  ;;  %v12186_v39 = vsub.f32 %v3399_v45, %v12174_v47  ;;  %v12189_v59 = vsub.f32 %v3398_v16, %v12176_v14  ;;  %v12291_v45 = vand.u32 4294901760, %v3390_v20  ;;  %v16867_v16 = vand.u32 4294901760, %v12283_v28 }
 0x20b   : > { %3293 = vmatpush.msrb.mxu2 %v3109_v26  ;;  %3336 = vmatpush.msrb.mxu3 %v11943_v35  ;;  %v12168_v35 = vpop.f32.mrf.mxu2  ;;  %v3396_v26 = vld [vmem:[#allocation3 + $0x4d8] sm:$0xff] }
 0x20c   : > { %3169 = vmatpush.msrb.mxu0 %v11953_v0  ;;  %3224 = vmatpush.msrb.mxu1 %v11982_v3  ;;  %v16876_v29 = vand.u32 4294901760, %v12186_v39  ;;  %v12201_v56 = vpop.f32.mrf.mxu3 }
 0x20d   : > { %3297 = vmatpush.msrb.mxu2 %v3115_v5  ;;  %3338 = vmatpush.msrb.mxu3 %v11955_v31  ;;  %v3452_v31 = vand.u32 4294901760, %v12183_v4 }
 0x20e   : > { %3228 = vmatmul.f32.vlgmr.msrb.gmra.mxu1 %v3014_v33  ;;  %3172 = vmatpush.msrb.mxu0 %v11966_v40  ;;  %v16875_v40 = vand.u32 4294901760, %v12189_v59  ;;  %v12222_v33 = vand.u32 4294901760, %v3396_v26 }
 0x20f   : > { %3301 = vmatpush.msrb.mxu2 %v3121_v62  ;;  %3340 = vmatpush.msrb.mxu3 %v11970_v48  ;;  %v3397_v48 = vld [vmem:[#allocation3 + $0x4e0] sm:$0xff]  ;;  %v3395_v62 = vld [vmem:[#allocation3 + $0x4d0] sm:$0xff]  ;;  %v12234_v60 = vpop.f32.mrf.mxu1 }
 0x210   : > { %3303 = vmatmul.f32.vlgmr.msrb.gmra.mxu2 %v11984_v19  ;;  %3175 = vmatpush.msrb.mxu0 %v11977_v8  ;;  %v3453_v8 = vsub.f32 %v12183_v4, %v3452_v31  ;;  %v3465_v63 = vsub.f32 %v12189_v59, %v16875_v40  ;;  %v12230_v50 = vsub.f32 %v3396_v26, %v12222_v33  ;;  %v3496_v26 = vand.u32 4294901760, %v3495_v2 }
 0x211   : > { %3342 = vmatpush.msrb.mxu3 %v11982_v3  ;;  %3557 = vmatpush.msra.mxu2 %v12183_v4  ;;  %v3459_v3 = vsub.f32 %v12186_v39, %v16876_v29 }
 0x212   : > { %3344 = vmatmul.f32.vlgmr.msrb.gmra.mxu3 %v11984_v19  ;;  %3178 = vmatpush.msrb.mxu0 %v11995_v15  ;;  %v12180_v19 = vpop.f32.mrf.mxu0  ;;  %v12213_v15 = vand.u32 4294901760, %v3397_v48  ;;  %v3466_v23 = vand.u32 4294901760, %v3465_v63  ;;  %v16872_v22 = vand.u32 4294901760, %v12230_v50 }
 0x213   : > { %3615 = vmatpush.msra.mxu3 %v12172_v55  ;;  %v12193_v0 = vpop.f32.mrf.mxu2  ;;  %3560 = vmatpush.msra.mxu2 %v12186_v39 }
 0x214   : > { %3181 = vmatpush.msrb.mxu0 %v12009_v9  ;;  %v3460_v9 = vand.u32 4294901760, %v3459_v3  ;;  %v12218_v5 = vsub.f32 %v3397_v48, %v12213_v15  ;;  %v3477_v10 = vsub.f32 %v12230_v50, %v16872_v22  ;;  %v12297_v48 = vsub.f32 %v3391_v24, %v12286_v46 }
 0x215   : > { %3184 = vmatmul.f32.vlgmr.msrb.gmra.mxu0 %v12006_v21  ;;  %3617 = vmatpush.msra.mxu3 %v12174_v47  ;;  %v3454_v21 = vand.u32 4294901760, %v3453_v8  ;;  %v3389_v8 = vld [vmem:[#allocation3 + $0x4a0] sm:$0xff] }
 0x216   : > { %3234 = vmatmul.f32.gmra.mxu1 %v3022_v58  ;;  %3402 = vmatpush.msra.mxu0 %v12172_v55  ;;  %v16873_v30 = vand.u32 4294901760, %v12218_v5  ;;  %v12263_v57 = vpop.f32.mrf.mxu3  ;;  %v3478_v6 = vand.u32 4294901760, %v3477_v10 }
 0x217   : > { %3619 = vmatpush.msra.mxu3 %v12176_v14  ;;  %3563 = vmatpush.msra.mxu2 %v12189_v59  ;;  %v12300_v3 = vpop.f32.mrf.mxu1 }
 0x218   : > { %3307 = vmatmul.f32.gmra.mxu2 %v12035_v43  ;;  %3404 = vmatpush.msra.mxu0 %v12174_v47  ;;  %v3471_v53 = vsub.f32 %v12218_v5, %v16873_v30 }
 0x219   : > { %3621 = vmatpush.msra.mxu3 %v12213_v15  ;;  %3455 = vmatpush.msra.mxu1 %v3454_v21  ;;  %v12305_v21 = vsub.f32 %v3390_v20, %v12291_v45 }
 0x21a   : > { %3348 = vmatmul.f32.gmra.mxu3 %v12035_v43  ;;  %3406 = vmatpush.msra.mxu0 %v12176_v14  ;;  %v12227_v43 = vand.u32 4294901760, %v3395_v62  ;;  %v12236_v18 = vpop.f32.mrf.mxu0  ;;  %v3472_v58 = vand.u32 4294901760, %v3471_v53 }
 0x21b   : > { %3566 = vmatpush.msra.mxu2 %v12218_v5  ;;  %3623 = vmatpush.msra.mxu3 %v12222_v33  ;;  %v12249_v44 = vpop.f32.mrf.mxu2  ;;  %v16864_v13 = vand.u32 4294901760, %v12305_v21 }
 0x21c   : > { %3408 = vmatpush.msra.mxu0 %v12213_v15  ;;  %3461 = vmatpush.msra.mxu1 %v3460_v9  ;;  %v12242_v27 = vsub.f32 %v3395_v62, %v12227_v43  ;;  %v12307_v9 = vand.u32 4294901760, %v3389_v8  ;;  %v3501_v62 = vsub.f32 %v12283_v28, %v16867_v16 }
 0x21d   : > { %3189 = vmatmul.f32.gmra.mxu0 %v12052_v11  ;;  %v12244_v11 = vand.u32 4294901760, %v3394_v25  ;;  %3569 = vmatpush.msra.mxu2 %v12230_v50 }
 0x21e   : > { %3410 = vmatpush.msra.mxu0 %v12222_v33  ;;  %3625 = vmatpush.msra.mxu3 %v12227_v43  ;;  %v16871_v51 = vand.u32 4294901760, %v12242_v27  ;;  %v3502_v32 = vand.u32 4294901760, %v3501_v62 }
 0x21f   : > { %3467 = vmatpush.msra.mxu1 %v3466_v23  ;;  %v12253_v17 = vsub.f32 %v3394_v25, %v12244_v11  ;;  %3572 = vmatpush.msra.mxu2 %v12242_v27  ;;  %v16866_v23 = vand.u32 4294901760, %v12297_v48  ;;  %v3388_v25 = vld [vmem:[#allocation3 + $0x498] sm:$0xff] }
 0x220   : > { %3412 = vmatpush.msra.mxu0 %v12227_v43  ;;  %3627 = vmatpush.msra.mxu3 %v12244_v11  ;;  %v3483_v54 = vsub.f32 %v12242_v27, %v16871_v51  ;;  %v12322_v10 = vand.u32 4294901760, %v3388_v25  ;;  %v12330_v24 = vpop.f32.mrf.mxu3  ;;  %v3382_v51 = vld [vmem:[#allocation3 + $0x470] sm:$0xff] }
 0x221   : > { %3473 = vmatpush.msra.mxu1 %v3472_v58  ;;  %v16870_v52 = vand.u32 4294901760, %v12253_v17  ;;  %3575 = vmatpush.msra.mxu2 %v12253_v17  ;;  %v12320_v58 = vsub.f32 %v3389_v8, %v12307_v9  ;;  %17339 = vst [vmem:[#allocation13_spill] sm:$0xff] %v12330_v24  ;;  %v3386_v8 = vld [vmem:[#allocation3 + $0x488] sm:$0xff]  ;;  %v17343_v24 = vand.u32 4294901760, %v12186_v39 }
 0x222   : > { %3414 = vmatpush.msra.mxu0 %v12244_v11  ;;  %3629 = vmatpush.msra.mxu3 %v12255_v12  ;;  %v3484_v34 = vand.u32 4294901760, %v3483_v54  ;;  %v12302_v63 = vpop.f32.mrf.mxu0  ;;  %v3507_v54 = vsub.f32 %v12297_v48, %v16866_v23  ;;  %v12337_v20 = vsub.f32 %v3388_v25, %v12322_v10 }
 0x223   : > { %v3489_v49 = vsub.f32 %v12253_v17, %v16870_v52  ;;  %3479 = vmatpush.msra.mxu1 %v3478_v6  ;;  %3578 = vmatpush.msra.mxu2 %v12270_v7  ;;  %v12316_v53 = vpop.f32.mrf.mxu2  ;;  %v3387_v6 = vld [vmem:[#allocation3 + $0x490] sm:$0xff] }
 0x224   : > { %3416 = vmatpush.msra.mxu0 %v12255_v12  ;;  %3631 = vmatpush.msra.mxu3 %v12272_v37  ;;  %v3508_v2 = vand.u32 4294901760, %v3507_v54  ;;  %v3385_v54 = vld [vmem:[#allocation3 + $0x480] sm:$0xff] }
 0x225   : > { %v3490_v42 = vand.u32 4294901760, %v3489_v49  ;;  %3485 = vmatpush.msra.mxu1 %v3484_v34  ;;  %3581 = vmatpush.msra.mxu2 %v12283_v28  ;;  %v3513_v34 = vsub.f32 %v12305_v21, %v16864_v13  ;;  %v16865_v49 = vand.u32 4294901760, %v12320_v58  ;;  %v16869_v13 = vand.u32 4294901760, %v12337_v20 }
 0x226   : > { %3418 = vmatpush.msra.mxu0 %v12272_v37  ;;  %3633 = vmatpush.msra.mxu3 %v12286_v46  ;;  %v12360_v16 = vand.u32 4294901760, %v3385_v54 }
 0x227   : > { %3491 = vmatpush.msra.mxu1 %v3490_v42  ;;  %3584 = vmatpush.msra.mxu2 %v12297_v48  ;;  %v12339_v42 = vand.u32 4294901760, %v3387_v6  ;;  %v3519_v62 = vsub.f32 %v12320_v58, %v16865_v49  ;;  %v3525_v49 = vsub.f32 %v12337_v20, %v16869_v13 }
 0x228   : > { %3420 = vmatpush.msra.mxu0 %v12286_v46  ;;  %3635 = vmatpush.msra.mxu3 %v12291_v45  ;;  %v12376_v52 = vsub.f32 %v3385_v54, %v12360_v16 }
 0x229   : > { %3497 = vmatpush.msra.mxu1 %v3496_v26  ;;  %3587 = vmatpush.msra.mxu2 %v12305_v21  ;;  %v3514_v26 = vand.u32 4294901760, %v3513_v34  ;;  %v12349_v25 = vsub.f32 %v3387_v6, %v12339_v42  ;;  %v3520_v34 = vand.u32 4294901760, %v3519_v62  ;;  %v3526_v61 = vand.u32 4294901760, %v3525_v49 }
 0x22a   : > { %3422 = vmatpush.msra.mxu0 %v12291_v45  ;;  %3637 = vmatpush.msra.mxu3 %v12307_v9  ;;  %v16878_v30 = vand.u32 4294901760, %v12376_v52 }
 0x22b   : > { %3503 = vmatpush.msra.mxu1 %v3502_v32  ;;  %3590 = vmatpush.msra.mxu2 %v12320_v58  ;;  %v12354_v32 = vand.u32 4294901760, %v3386_v8  ;;  %v16874_v23 = vand.u32 4294901760, %v12349_v25  ;;  %v12370_v62 = vpop.f32.mrf.mxu0  ;;  %v12382_v22 = vpop.f32.mrf.mxu2 }
 0x22c   : > { %3424 = vmatpush.msra.mxu0 %v12307_v9  ;;  %3639 = vmatpush.msra.mxu3 %v12322_v10  ;;  %17340 = vst [vmem:[#allocation14_spill] sm:$0xff] %v12382_v22  ;;  %v12395_v40 = vpop.f32.mrf.mxu3 }
 0x22d   : > { %3509 = vmatpush.msra.mxu1 %v3508_v2  ;;  %3593 = vmatpush.msra.mxu2 %v12337_v20  ;;  %v12365_v6 = vsub.f32 %v3386_v8, %v12354_v32  ;;  %v12368_v2 = vpop.f32.mrf.mxu1  ;;  %v3531_v13 = vsub.f32 %v12349_v25, %v16874_v23  ;;  %17341 = vst [vmem:[#allocation15_spill] sm:$0xff] %v12395_v40  ;;  %v3381_v40 = vld [vmem:[#allocation3 + $0x468] sm:$0xff] }
 0x22e   : > { %3426 = vmatpush.msra.mxu0 %v12322_v10  ;;  %3641 = vmatpush.msra.mxu3 %v12339_v42 }
 0x22f   : > { %3515 = vmatpush.msra.mxu1 %v3514_v26  ;;  %3596 = vmatpush.msra.mxu2 %v12349_v25  ;;  %v16877_v8 = vand.u32 4294901760, %v12365_v6  ;;  %v3383_v26 = vld [vmem:[#allocation3 + $0x478] sm:$0xff]  ;;  %v3532_v49 = vand.u32 4294901760, %v3531_v13  ;;  %v3543_v13 = vsub.f32 %v12376_v52, %v16878_v30  ;;  %v12410_v30 = vand.u32 4294901760, %v3381_v40 }
 0x230   : > { %3428 = vmatpush.msra.mxu0 %v12339_v42  ;;  %3643 = vmatpush.msra.mxu3 %v12354_v32  ;;  %v12385_v23 = vand.u32 4294901760, %v3383_v26 }
 0x231   : > { %3521 = vmatpush.msra.mxu1 %v3520_v34  ;;  %3599 = vmatpush.msra.mxu2 %v12365_v6  ;;  %v3537_v54 = vsub.f32 %v12365_v6, %v16877_v8  ;;  %v12393_v34 = vand.u32 4294901760, %v3382_v51  ;;  %v3544_v8 = vand.u32 4294901760, %v3543_v13  ;;  %17344 = vst [vmem:[#allocation17_spill] sm:$0xff] %v12410_v30 }
 0x232   : > { %3430 = vmatpush.msra.mxu0 %v12354_v32  ;;  %3645 = vmatpush.msra.mxu3 %v12360_v16  ;;  %v12402_v29 = vsub.f32 %v3383_v26, %v12385_v23 }
 0x233   : > { %3527 = vmatpush.msra.mxu1 %v3526_v61  ;;  %3602 = vmatpush.msra.mxu2 %v12376_v52  ;;  %v3538_v61 = vand.u32 4294901760, %v3537_v54  ;;  %v12413_v26 = vsub.f32 %v3382_v51, %v12393_v34  ;;  %v12425_v54 = vsub.f32 %v3381_v40, %v12410_v30 }
 0x234   : > { %3432 = vmatpush.msra.mxu0 %v12360_v16  ;;  %17342 = vst [vmem:[#allocation16_spill] sm:$0xff] %v12402_v29  ;;  %v16879_v22 = vand.u32 4294901760, %v12402_v29  ;;  %v12429_v13 = vpop.f32.mrf.mxu0 }
 0x235   : > { %3774 = vmatpush.msrb.mxu2 %v12385_v23  ;;  %3533 = vmatpush.msra.mxu1 %v3532_v49  ;;  %v17345_v49 = vand.u32 4294901760, %v12189_v59  ;;  %v16884_v39 = vand.u32 4294901760, %v12413_v26  ;;  %17347 = vst [vmem:[#allocation19_spill] sm:$0xff] %v12425_v54  ;;  %v12427_v51 = vpop.f32.mrf.mxu1  ;;  %v17348_v59 = vand.u32 4294901760, %v12218_v5  ;;  %v16887_v40 = vand.u32 4294901760, %v12425_v54 }
 0x236   : > { %3662 = vmatpush.msrb.mxu0 %v3452_v31  ;;  %v3825_v4 = vsub.f32 %v12402_v29, %v16879_v22  ;;  %v3380_v31 = vld [vmem:[#allocation3 + $0x460] sm:$0xff]  ;;  %v3379_v22 = vld [vmem:[#allocation3 + $0x458] sm:$0xff]  ;;  %v12444_v29 = vpop.f32.mrf.mxu2 }
 0x237   : > { %3776 = vmatpush.msrb.mxu2 %v12393_v34  ;;  %3539 = vmatpush.msra.mxu1 %v3538_v61 }
 0x238   : > { %3666 = vmatpush.msrb.mxu0 %v17343_v24  ;;  %v12422_v24 = vand.u32 4294901760, %v3380_v31  ;;  %v3826_v61 = vand.u32 4294901760, %v3825_v4  ;;  %v3837_v4 = vsub.f32 %v12425_v54, %v16887_v40 }
 0x239   : > { %3545 = vmatpush.msra.mxu1 %v3544_v8  ;;  %3778 = vmatpush.msrb.mxu2 %v12410_v30  ;;  %v3831_v8 = vsub.f32 %v12413_v26, %v16884_v39 }
 0x23a   : > { %3670 = vmatpush.msrb.mxu0 %v17345_v49  ;;  %17346 = vst [vmem:[#allocation18_spill] sm:$0xff] %v12422_v24  ;;  %v12439_v49 = vand.u32 4294901760, %v3379_v22  ;;  %v12442_v30 = vsub.f32 %v3380_v31, %v12422_v24  ;;  %3827 = vmatpush.msrb.mxu3 %v3826_v61  ;;  %v17351_v31 = vand.u32 4294901760, %v12230_v50  ;;  %v3377_v61 = vld [vmem:[#allocation3 + $0x448] sm:$0xff] }
 0x23b   : > { %3733 = vmatpush.msrb.mxu1 %v12172_v55  ;;  %3780 = vmatpush.msrb.mxu2 %v12422_v24  ;;  %v3378_v55 = vld [vmem:[#allocation3 + $0x450] sm:$0xff]  ;;  %v3832_v5 = vand.u32 4294901760, %v3831_v8  ;;  %v12456_v24 = vpop.f32.mrf.mxu3  ;;  %v3838_v8 = vand.u32 4294901760, %v3837_v4  ;;  %v12466_v54 = vand.u32 4294901760, %v3377_v61 }
 0x23c   : > { %3674 = vmatpush.msrb.mxu0 %v17348_v59  ;;  %17349 = vst [vmem:[#allocation20_spill] sm:$0xff] %v12442_v30  ;;  %v16890_v59 = vand.u32 4294901760, %v12442_v30  ;;  %v12452_v39 = vand.u32 4294901760, %v3378_v55 }
 0x23d   : > { %3735 = vmatpush.msrb.mxu1 %v12174_v47  ;;  %3782 = vmatpush.msrb.mxu2 %v12439_v49  ;;  %v12460_v47 = vsub.f32 %v3379_v22, %v12439_v49  ;;  %17352 = vst [vmem:[#allocation10_spill] sm:$0xff] %v12466_v54  ;;  %v3376_v22 = vld [vmem:[#allocation3 + $0x440] sm:$0xff] }
 0x23e   : > { %17350 = vst [vmem:[#allocation21_spill] sm:$0xff] %v12452_v39  ;;  %3678 = vmatpush.msrb.mxu0 %v17351_v31  ;;  %3833 = vmatpush.msrb.mxu3 %v3832_v5  ;;  %v3843_v40 = vsub.f32 %v12442_v30, %v16890_v59  ;;  %v12469_v50 = vsub.f32 %v3378_v55, %v12452_v39  ;;  %v17354_v31 = vand.u32 4294901760, %v12242_v27  ;;  %v12477_v59 = vand.u32 4294901760, %v3376_v22 }
 0x23f   : > { %3737 = vmatpush.msrb.mxu1 %v12176_v14  ;;  %3784 = vmatpush.msrb.mxu2 %v12452_v39  ;;  %v16897_v14 = vand.u32 4294901760, %v12460_v47  ;;  %v12480_v30 = vsub.f32 %v3377_v61, %v12466_v54 }
 0x240   : > { %17353 = vst [vmem:[#allocation11_spill] sm:$0xff] %v12469_v50  ;;  %3682 = vmatpush.msrb.mxu0 %v17354_v31  ;;  %3839 = vmatpush.msrb.mxu3 %v3838_v8  ;;  %v3844_v5 = vand.u32 4294901760, %v3843_v40  ;;  %v16898_v4 = vand.u32 4294901760, %v12469_v50  ;;  %v3375_v40 = vld [vmem:[#allocation3 + $0x438] sm:$0xff]  ;;  %v17356_v8 = vand.u32 4294901760, %v12253_v17 }
 0x241   : > { %3739 = vmatpush.msrb.mxu1 %v12213_v15  ;;  %3786 = vmatpush.msrb.mxu2 %v12466_v54  ;;  %17355 = vst [vmem:[#allocation12_spill] sm:$0xff] %v12477_v59  ;;  %v3849_v27 = vsub.f32 %v12460_v47, %v16897_v14  ;;  %v16903_v31 = vand.u32 4294901760, %v12480_v30  ;;  %v12497_v54 = vand.u32 4294901760, %v3375_v40 }
 0x242   : > { %3686 = vmatpush.msrb.mxu0 %v17356_v8  ;;  %3845 = vmatpush.msrb.mxu3 %v3844_v5  ;;  %v3855_v61 = vsub.f32 %v12469_v50, %v16898_v4  ;;  %v3374_v8 = vld [vmem:[#allocation3 + $0x430] sm:$0xff]  ;;  %v17357_v5 = vand.u32 4294901760, %v12270_v7 }
 0x243   : > { %v12482_v55 = vpop.f32.mrf.mxu1  ;;  %3741 = vmatpush.msrb.mxu1 %v12222_v33  ;;  %3788 = vmatpush.msrb.mxu2 %v12477_v59  ;;  %v12500_v33 = vsub.f32 %v3376_v22, %v12477_v59  ;;  %v3850_v17 = vand.u32 4294901760, %v3849_v27  ;;  %v3861_v4 = vsub.f32 %v12480_v30, %v16903_v31  ;;  %v12512_v22 = vand.u32 4294901760, %v3374_v8  ;;  %v3373_v27 = vld [vmem:[#allocation3 + $0x428] sm:$0xff] }
 0x244   : > { %3690 = vmatpush.msrb.mxu0 %v17357_v5  ;;  %v3856_v14 = vand.u32 4294901760, %v3855_v61  ;;  %v1972_v59 = vadd.f32 %v12164_v36, %v12166_v38  ;;  %v12520_v7 = vsub.f32 %v3375_v40, %v12497_v54  ;;  %v12526_v31 = vand.u32 4294901760, %v3373_v27 }
 0x245   : > { %3743 = vmatpush.msrb.mxu1 %v12227_v43  ;;  %3790 = vmatpush.msrb.mxu2 %v12497_v54  ;;  %v16904_v50 = vand.u32 4294901760, %v12500_v33  ;;  %v3862_v61 = vand.u32 4294901760, %v3861_v4  ;;  %v17358_v36 = vand.u32 4294901760, %v12283_v28  ;;  %v3372_v4 = vld [vmem:[#allocation3 + $0x420] sm:$0xff]  ;;  %v17362_v28 = vand.u32 4294901760, %v12297_v48 }
 0x246   : > { %3851 = vmatpush.msrb.mxu3 %v3850_v17  ;;  %v16905_v38 = vand.u32 4294901760, %v12520_v7  ;;  %v12536_v17 = vand.u32 4294901760, %v3372_v4 }
 0x247   : > { %3745 = vmatpush.msrb.mxu1 %v12244_v11  ;;  %v3867_v5 = vsub.f32 %v12500_v33, %v16904_v50  ;;  %3792 = vmatpush.msrb.mxu2 %v12512_v22  ;;  %v12533_v11 = vsub.f32 %v3374_v8, %v12512_v22  ;;  %v12539_v50 = vsub.f32 %v3373_v27, %v12526_v31 }
 0x248   : > { %3694 = vmatpush.msrb.mxu0 %v17358_v36  ;;  %3857 = vmatpush.msrb.mxu3 %v3856_v14  ;;  %17360 = vst [vmem:[#allocation22_spill] sm:$0xff] %v12536_v17  ;;  %v3873_v14 = vsub.f32 %v12520_v7, %v16905_v38  ;;  %v12554_v48 = vsub.f32 %v3372_v4, %v12536_v17  ;;  %v3370_v38 = vld [vmem:[#allocation3 + $0x410] sm:$0xff] }
 0x249   : > { %3747 = vmatpush.msrb.mxu1 %v12255_v12  ;;  %17359 = vst [vmem:[#allocation9_spill] sm:$0xff] %v12533_v11  ;;  %v3868_v40 = vand.u32 4294901760, %v3867_v5  ;;  %3794 = vmatpush.msrb.mxu2 %v12526_v31  ;;  %v2030_v12 = vadd.f32 %v12168_v35, %v1972_v59  ;;  %v16909_v8 = vand.u32 4294901760, %v12533_v11  ;;  %v3371_v5 = vld [vmem:[#allocation3 + $0x418] sm:$0xff]  ;;  %v16908_v27 = vand.u32 4294901760, %v12539_v50 }
 0x24a   : > { %17361 = vst [vmem:[#allocation23_spill] sm:$0xff] %v12539_v50  ;;  %3698 = vmatpush.msrb.mxu0 %v17362_v28  ;;  %3863 = vmatpush.msrb.mxu3 %v3862_v61  ;;  %v12551_v36 = vand.u32 4294901760, %v3371_v5  ;;  %v17363_v35 = vand.u32 4294901760, %v12305_v21  ;;  %v3874_v61 = vand.u32 4294901760, %v3873_v14  ;;  %v1976_v21 = vadd.f32 %v12178_v41, %v12180_v19  ;;  %v3368_v19 = vld [vmem:[#allocation3 + $0x400] sm:$0xff] }
 0x24b   : > { %v12502_v39 = vpop.f32.mrf.mxu2  ;;  %3749 = vmatpush.msrb.mxu1 %v12272_v37  ;;  %3796 = vmatpush.msrb.mxu2 %v12536_v17  ;;  %v3879_v28 = vsub.f32 %v12533_v11, %v16909_v8  ;;  %v3885_v4 = vsub.f32 %v12539_v50, %v16908_v27  ;;  %v3369_v8 = vld [vmem:[#allocation3 + $0x408] sm:$0xff]  ;;  %v17365_v11 = vand.u32 4294901760, %v12554_v48 }
 0x24c   : > { %3702 = vmatpush.msrb.mxu0 %v17363_v35  ;;  %v12558_v37 = vpop.f32.mrf.mxu1  ;;  %3869 = vmatpush.msrb.mxu3 %v3868_v40  ;;  %v12571_v35 = vand.u32 4294901760, %v3370_v38  ;;  %v12574_v17 = vsub.f32 %v3371_v5, %v12551_v36  ;;  %v2074_v40 = vadd.f32 %v12170_v1, %v2030_v12  ;;  %v17366_v1 = vand.u32 4294901760, %v12337_v20 }
 0x24d   : > { %v12484_v15 = vpop.f32.mrf.mxu0  ;;  %3751 = vmatpush.msrb.mxu1 %v12286_v46  ;;  %3798 = vmatpush.msrb.mxu2 %v12551_v36  ;;  %v17364_v46 = vand.u32 4294901760, %v12320_v58  ;;  %v3880_v27 = vand.u32 4294901760, %v3879_v28  ;;  %v3886_v50 = vand.u32 4294901760, %v3885_v4  ;;  %v3891_v5 = vsub.f32 %v12554_v48, %v17365_v11 }
 0x24e   : > { %v12516_v43 = vpop.f32.mrf.mxu3  ;;  %3875 = vmatpush.msrb.mxu3 %v3874_v61  ;;  %v3896_v58 = vand.u32 4294901760, %v12574_v17  ;;  %v12597_v41 = vsub.f32 %v3370_v38, %v12571_v35  ;;  %v2149_v11 = vadd.f32 %v12236_v18, %v2074_v40  ;;  %v17367_v20 = vand.u32 4294901760, %v12349_v25 }
 0x24f   : > { %3706 = vmatpush.msrb.mxu0 %v17364_v46  ;;  %3753 = vmatpush.msrb.mxu1 %v12291_v45  ;;  %v12594_v45 = vand.u32 4294901760, %v3369_v8  ;;  %v3892_v61 = vand.u32 4294901760, %v3891_v5  ;;  %v2035_v18 = vadd.f32 %v12193_v0, %v1976_v21  ;;  %v17368_v46 = vand.u32 4294901760, %v12365_v6 }
 0x250   : > { %3800 = vmatpush.msrb.mxu2 %v12571_v35  ;;  %3881 = vmatpush.msrb.mxu3 %v3880_v27  ;;  %v3897_v28 = vsub.f32 %v12574_v17, %v3896_v58  ;;  %v12607_v27 = vand.u32 4294901760, %v3368_v19  ;;  %v2190_v0 = vadd.f32 %v12234_v60, %v2149_v11  ;;  %v17369_v6 = vand.u32 4294901760, %v12376_v52 }
 0x251   : > { %3710 = vmatpush.msrb.mxu0 %v17366_v1  ;;  %3755 = vmatpush.msrb.mxu1 %v12307_v9  ;;  %v3902_v9 = vand.u32 4294901760, %v12597_v41  ;;  %v12610_v38 = vsub.f32 %v3369_v8, %v12594_v45 }
 0x252   : > { %3887 = vmatpush.msrb.mxu3 %v3886_v50  ;;  %v3898_v4 = vand.u32 4294901760, %v3897_v28  ;;  %3802 = vmatpush.msrb.mxu2 %v12594_v45  ;;  %v12622_v8 = vsub.f32 %v3368_v19, %v12607_v27  ;;  %v2080_v19 = vadd.f32 %v12201_v56, %v2035_v18 }
 0x253   : > { %3714 = vmatpush.msrb.mxu0 %v17367_v20  ;;  %3757 = vmatpush.msrb.mxu1 %v12322_v10  ;;  %v3903_v10 = vsub.f32 %v12597_v41, %v3902_v9  ;;  %v3908_v50 = vand.u32 4294901760, %v12610_v38  ;;  %v2735_v20 = vadd.f32 %v12482_v55, %v12484_v15 }
 0x254   : > { %3893 = vmatpush.msrb.mxu3 %v3892_v61  ;;  %3804 = vmatpush.msrb.mxu2 %v12607_v27  ;;  %v3914_v1 = vand.u32 4294901760, %v12622_v8  ;;  %v2153_v11 = vadd.f32 %v12302_v63, %v2080_v19 }
 0x255   : > { %v12579_v14 = vpop.f32.mrf.mxu2  ;;  %3718 = vmatpush.msrb.mxu0 %v17368_v46  ;;  %3759 = vmatpush.msrb.mxu1 %v12339_v42  ;;  %v3904_v42 = vand.u32 4294901760, %v3903_v10  ;;  %v3909_v5 = vsub.f32 %v12610_v38, %v3908_v50  ;;  %v2793_v10 = vadd.f32 %v12502_v39, %v2735_v20  ;;  %v17372_v20 = vld [vmem:[#allocation15_spill] sm:$0xff] }
 0x256   : > { %v12560_v59 = vpop.f32.mrf.mxu0  ;;  %3899 = vmatpush.msrb.mxu3 %v3898_v4  ;;  %v3915_v52 = vsub.f32 %v12622_v8, %v3914_v1 }
 0x257   : > { %3722 = vmatpush.msrb.mxu0 %v17369_v6  ;;  %3761 = vmatpush.msrb.mxu1 %v12354_v32  ;;  %v3910_v60 = vand.u32 4294901760, %v3909_v5  ;;  %v2235_v32 = vadd.f32 %v12249_v44, %v2190_v0  ;;  %v2739_v55 = vadd.f32 %v12558_v37, %v12560_v59 }
 0x258   : > { %v12591_v12 = vpop.f32.mrf.mxu3  ;;  %3905 = vmatpush.msrb.mxu3 %v3904_v42  ;;  %v3916_v28 = vand.u32 4294901760, %v3915_v52  ;;  %v2837_v42 = vadd.f32 %v12516_v43, %v2793_v10  ;;  %v9800_v10 = vld [vmem:[#allocation5 + $0x1] ss:$0 sm:$0xff] }
 0x259   : > { %3763 = vmatpush.msrb.mxu1 %v12360_v16  ;;  %v2344_v56 = vadd.f32 %v12263_v57, %v2235_v32  ;;  %v2194_v16 = vadd.f32 %v12300_v3, %v2153_v11  ;;  %v17370_v57 = vld [vmem:[#allocation13_spill] sm:$0xff] }
 0x25a   : > { %3911 = vmatpush.msrb.mxu3 %v3910_v60 }
 0x25b   : > { %v2402_v46 = vadd.f32 %v12370_v62, %v2344_v56  ;;  %v2243_v44 = vadd.f32 %v12316_v53, %v2194_v16  ;;  %v17371_v62 = vld [vmem:[#allocation14_spill] sm:$0xff]  ;;  %v2798_v53 = vadd.f32 %v12579_v14, %v2739_v55 }
 0x25c   : > { %3917 = vmatpush.msrb.mxu3 %v3916_v28 }
 0x25d   : > { %v2446_v0 = vadd.f32 %v12368_v2, %v2402_v46  ;;  %v2348_v15 = vadd.f32 %v17370_v57, %v2243_v44  ;;  %v2843_v59 = vadd.f32 %v12591_v12, %v2798_v53  ;;  %v17375_v53 = vld [vmem:[#allocation17_spill] sm:$0xff] }
 0x25f   : > { %v2521_v52 = vadd.f32 %v17371_v62, %v2446_v0  ;;  %v2407_v39 = vadd.f32 %v12429_v13, %v2348_v15 }
 0x261   : > { %v2562_v56 = vadd.f32 %v17372_v20, %v2521_v52  ;;  %v2452_v37 = vadd.f32 %v12427_v51, %v2407_v39  ;;  %v17377_v20 = vld [vmem:[#allocation18_spill] sm:$0xff] }
 0x263   : > { %v2525_v14 = vadd.f32 %v12444_v29, %v2452_v37 }
 0x265   : > { %v2566_v51 = vadd.f32 %v12456_v24, %v2525_v14  ;;  %v17373_v24 = vld [vmem:[#allocation16_spill] sm:$0xff] }
 0x266   : > { %v17374_v62 = vand.u32 4294901760, %v17373_v24 }
 0x267   : > { %v2952_v25 = vpop.f32.mrf.mxu1 }
 0x26f   : > { %v3018_v21 = vpop.f32.mrf.mxu2 }
 0x270   : > { %v2956_v18 = vpop.f32.mrf.mxu1 }
 0x271   : > { %v2911_v40 = vpop.f32.mrf.mxu0 }
 0x272   : > { %v3127_v61 = vpop.f32.mrf.mxu3  ;;  %v2912_v3 = vadd.f32 %v2911_v40, %v2837_v42 }
 0x273   : > { %v3128_v5 = vadd.f32 %v3127_v61, %v3018_v21 }
 0x274   : > { %v2953_v2 = vadd.f32 %v2952_v25, %v2912_v3 }
 0x276   : > { %v2959_v16 = vadd.f32 %v2953_v2, %v2562_v56  ;;  %v17378_v56 = vld [vmem:[#allocation19_spill] sm:$0xff] }
 0x277   : > { %v17379_v37 = vand.u32 4294901760, %v17378_v56 }
 0x279   : > { %v3026_v6 = vpop.f32.mrf.mxu2 }
 0x27a   : > { %v2915_v4 = vpop.f32.mrf.mxu0 }
 0x27b   : > { %v2916_v21 = vadd.f32 %v2915_v4, %v2843_v59 }
 0x27c   : > { %v3131_v63 = vpop.f32.mrf.mxu3 }
 0x27d   : > { %v3132_v61 = vadd.f32 %v3131_v63, %v3026_v6  ;;  %v2957_v42 = vadd.f32 %v2956_v18, %v2916_v21 }
 0x27f   : > { %v2960_v6 = vadd.f32 %v2957_v42, %v2566_v51 }
 0x28b   : > { %v3229_v19 = vpop.f32.mrf.mxu1 }
 0x292   : > { %v3185_v60 = vpop.f32.mrf.mxu0 }
 0x293   : > { %v3186_v32 = vadd.f32 %v3185_v60, %v3128_v5  ;;  %v3304_v11 = vpop.f32.mrf.mxu2  ;;  %v3235_v25 = vpop.f32.mrf.mxu1 }
 0x295   : > { %v3230_v28 = vadd.f32 %v3229_v19, %v3186_v32  ;;  %v3345_v43 = vpop.f32.mrf.mxu3  ;;  %v17376_v32 = vand.u32 4294901760, %v12413_v26 }
 0x297   : > { %v3305_v40 = vadd.f32 %v3304_v11, %v3230_v28 }
 0x299   : > { %v3346_v46 = vadd.f32 %v3345_v43, %v3305_v40 }
 0x29a   : > { %v3190_v13 = vpop.f32.mrf.mxu0 }
 0x29b   : > { %v3352_v44 = vadd.f32 %v3346_v46, %v2959_v16  ;;  %v3191_v0 = vadd.f32 %v3190_v13, %v3132_v61  ;;  %v3308_v15 = vpop.f32.mrf.mxu2  ;;  %v17382_v16 = vld [vmem:[#allocation21_spill] sm:$0xff] }
 0x29d   : > { %v3359_v55 = vadd.f32 %v9800_v10, %v3352_v44  ;;  %v3236_v57 = vadd.f32 %v3235_v25, %v3191_v0  ;;  %v3349_v5 = vpop.f32.mrf.mxu3  ;;  %v17384_v0 = vld [vmem:[#allocation10_spill] sm:$0xff]  ;;  %v17385_v25 = vld [vmem:[#allocation11_spill] sm:$0xff] }
 0x29e   : > { %v17386_v42 = vand.u32 4294901760, %v17385_v25 }
 0x29f   : > { %v3361_v3 = vmax.f32 %v3359_v55, 0.0  ;;  %v3309_v12 = vadd.f32 %v3308_v15, %v3236_v57  ;;  %v4163_v55 = vld [vmem:[#allocation3 + $0x578] sm:$0xff]  ;;  %v17388_v15 = vand.u32 4294901760, %v12480_v30 }
 0x2a0   : > { %v17387_v57 = vld [vmem:[#allocation12_spill] sm:$0xff] }
 0x2a1   : > { %v12660_v4 = vand.u32 4294901760, %v3361_v3  ;;  %3363 = vst [vmem:[#allocation2 + $0x8] sm:$0xff] %v3361_v3  ;;  %v3350_v63 = vadd.f32 %v3349_v5, %v3309_v12  ;;  %v4162_v12 = vld [vmem:[#allocation3 + $0x570] sm:$0xff]  ;;  %v17389_v5 = vand.u32 4294901760, %v12500_v33 }
 0x2a3   : > { %v3434_v19 = vsub.f32 %v3361_v3, %v12660_v4  ;;  %v3353_v29 = vadd.f32 %v3350_v63, %v2960_v6  ;;  %3547 = vmatmul.f32.vlgmr.msra.gmra.mxu1 %v12660_v4  ;;  %v12714_v3 = vand.u32 4294901760, %v4163_v55  ;;  %v12723_v63 = vand.u32 4294901760, %v4162_v12 }
 0x2a4   : > { %3987 = vmatpush.msra.mxu1 %v12385_v23 }
 0x2a5   : > { %v3360_v18 = vadd.f32 %v9800_v10, %v3353_v29  ;;  %3605 = vmatmul.f32.vlgmr.msra.gmra.mxu2 %v3434_v19  ;;  %v3435_v60 = vand.u32 4294901760, %v3434_v19  ;;  %v17383_v10 = vand.u32 4294901760, %v12460_v47  ;;  %v17390_v29 = vand.u32 4294901760, %v12520_v7 }
 0x2a6   : > { %3989 = vmatpush.msra.mxu1 %v12393_v34  ;;  %4034 = vmatpush.msra.mxu2 %v17374_v62 }
 0x2a7   : > { %v3362_v52 = vmax.f32 %v3360_v18, 0.0  ;;  %3649 = vmatmul.f32.vlgmr.msra.gmra.mxu3 %v3435_v60  ;;  %v3436_v39 = vsub.f32 %v3434_v19, %v3435_v60  ;;  %v4161_v19 = vld [vmem:[#allocation3 + $0x568] sm:$0xff]  ;;  %v4160_v18 = vld [vmem:[#allocation3 + $0x560] sm:$0xff] }
 0x2a8   : > { %3991 = vmatpush.msra.mxu1 %v17375_v53  ;;  %4038 = vmatpush.msra.mxu2 %v17376_v32  ;;  %v3365_v11 = vld [vmem:[#allocation2 + $0x7] sm:$0xff]  ;;  %v12735_v60 = vand.u32 4294901760, %v4161_v19  ;;  %v12749_v32 = vand.u32 4294901760, %v4160_v18 }
 0x2a9   : > { %3364 = vst [vmem:[#allocation2 + $0x10] sm:$0xff] %v3362_v52  ;;  %4105 = vmatpush.msra.mxu3 %v12385_v23  ;;  %v3437_v2 = vand.u32 4294901760, %v3436_v39  ;;  %v12672_v28 = vand.u32 4294901760, %v3362_v52  ;;  %v12674_v43 = vand.u32 4294901760, %v3365_v11  ;;  %v17380_v23 = vld [vmem:[#allocation20_spill] sm:$0xff]  ;;  %v12744_v39 = vsub.f32 %v4162_v12, %v12723_v63 }
 0x2aa   : > { %3993 = vmatpush.msra.mxu1 %v17377_v20  ;;  %4042 = vmatpush.msra.mxu2 %v17379_v37  ;;  %v17381_v21 = vand.u32 4294901760, %v17380_v23 }
 0x2ab   : > { %4107 = vmatpush.msra.mxu3 %v12393_v34  ;;  %3438 = vmatmul.f32.vlgmr.msra.gmra.mxu0 %v3437_v2  ;;  %v3442_v59 = vsub.f32 %v3362_v52, %v12672_v28  ;;  %v12682_v40 = vsub.f32 %v3365_v11, %v12674_v43  ;;  %v17393_v11 = vld [vmem:[#allocation22_spill] sm:$0xff]  ;;  %v17394_v2 = vld [vmem:[#allocation23_spill] sm:$0xff] }
 0x2ac   : > { %3551 = vmatmul.f32.gmra.mxu1 %v12672_v28  ;;  %3929 = vmatpush.msra.mxu0 %v17373_v24  ;;  %v17391_v24 = vld [vmem:[#allocation9_spill] sm:$0xff] }
 0x2ad   : > { %3995 = vmatpush.msra.mxu1 %v12439_v49  ;;  %4046 = vmatpush.msra.mxu2 %v17381_v21  ;;  %v3443_v61 = vand.u32 4294901760, %v3442_v59  ;;  %v3807_v34 = vand.u32 4294901760, %v12682_v40  ;;  %v17392_v62 = vand.u32 4294901760, %v17391_v24 }
 0x2ae   : > { %4109 = vmatpush.msra.mxu3 %v17375_v53  ;;  %3610 = vmatmul.f32.gmra.mxu2 %v3442_v59  ;;  %v4159_v53 = vld [vmem:[#allocation3 + $0x558] sm:$0xff] }
 0x2af   : > { %3932 = vmatpush.msra.mxu0 %v12413_v26  ;;  %3997 = vmatpush.msra.mxu1 %v17382_v16  ;;  %v3444_v46 = vsub.f32 %v3442_v59, %v3443_v61  ;;  %v3808_v26 = vsub.f32 %v12682_v40, %v3807_v34  ;;  %v12759_v37 = vand.u32 4294901760, %v4159_v53  ;;  %v4158_v59 = vld [vmem:[#allocation3 + $0x550] sm:$0xff] }
 0x2b0   : > { %4050 = vmatpush.msra.mxu2 %v17383_v10  ;;  %4111 = vmatpush.msra.mxu3 %v17377_v20  ;;  %v3366_v13 = vld [vmem:[#allocation2 + $0xf] sm:$0xff]  ;;  %v17395_v20 = vand.u32 4294901760, %v17394_v2 }
 0x2b1   : > { %3655 = vmatmul.f32.gmra.mxu3 %v3443_v61  ;;  %3935 = vmatpush.msra.mxu0 %v17378_v56  ;;  %v3445_v14 = vand.u32 4294901760, %v3444_v46  ;;  %v12697_v44 = vand.u32 4294901760, %v3366_v13  ;;  %v12757_v56 = vsub.f32 %v4161_v19, %v12735_v60  ;;  %v12778_v61 = vsub.f32 %v4159_v53, %v12759_v37  ;;  %v4156_v46 = vld [vmem:[#allocation3 + $0x540] sm:$0xff] }
 0x2b2   : > { %3999 = vmatpush.msra.mxu1 %v17384_v0  ;;  %4054 = vmatpush.msra.mxu2 %v17386_v42  ;;  %v12805_v42 = vand.u32 4294901760, %v4156_v46 }
 0x2b3   : > { %4113 = vmatpush.msra.mxu3 %v12439_v49  ;;  %3938 = vmatpush.msra.mxu0 %v17380_v23  ;;  %v12711_v51 = vsub.f32 %v3366_v13, %v12697_v44  ;;  %v3809_v49 = vand.u32 4294901760, %v3808_v26  ;;  %v17396_v23 = vand.u32 4294901760, %v12554_v48  ;;  %v16929_v21 = vand.u32 4294901760, %v12757_v56  ;;  %v4155_v26 = vld [vmem:[#allocation3 + $0x538] sm:$0xff] }
 0x2b4   : > { %4001 = vmatpush.msra.mxu1 %v17387_v57  ;;  %4058 = vmatpush.msra.mxu2 %v17388_v15  ;;  %v12830_v12 = vsub.f32 %v4156_v46, %v12805_v42 }
 0x2b5   : > { %4115 = vmatpush.msra.mxu3 %v17382_v16  ;;  %3446 = vmatmul.f32.gmra.mxu0 %v3445_v14  ;;  %v3815_v6 = vand.u32 4294901760, %v12711_v51  ;;  %v12780_v16 = vand.u32 4294901760, %v4158_v59 }
 0x2b6   : > { %3765 = vmatmul.f32.vlgmr.msrb.gmra.mxu1 %v12660_v4  ;;  %3941 = vmatpush.msra.mxu0 %v12460_v47  ;;  %v12728_v47 = vsub.f32 %v4163_v55, %v12714_v3  ;;  %v4154_v55 = vld [vmem:[#allocation3 + $0x530] sm:$0xff] }
 0x2b7   : > { %4003 = vmatpush.msra.mxu1 %v12497_v54  ;;  %4062 = vmatpush.msra.mxu2 %v17389_v5  ;;  %v3816_v52 = vsub.f32 %v12711_v51, %v3815_v6 }
 0x2b8   : > { %4117 = vmatpush.msra.mxu3 %v17384_v0  ;;  %3810 = vmatmul.f32.vlgmr.msrb.gmra.mxu2 %v3809_v49  ;;  %v16927_v0 = vand.u32 4294901760, %v12778_v61  ;;  %v4152_v49 = vld [vmem:[#allocation3 + $0x520] sm:$0xff] }
 0x2b9   : > { %3944 = vmatpush.msra.mxu0 %v17385_v25  ;;  %4005 = vmatpush.msra.mxu1 %v12512_v22  ;;  %v12803_v25 = vsub.f32 %v4158_v59, %v12780_v16 }
 0x2ba   : > { %4066 = vmatpush.msra.mxu2 %v17390_v29  ;;  %4119 = vmatpush.msra.mxu3 %v17387_v57  ;;  %v12820_v57 = vand.u32 4294901760, %v4155_v26  ;;  %v16923_v29 = vand.u32 4294901760, %v12830_v12 }
 0x2bb   : > { %3919 = vmatmul.f32.vlgmr.msrb.gmra.mxu3 %v12674_v43  ;;  %3947 = vmatpush.msra.mxu0 %v12480_v30  ;;  %v16932_v30 = vand.u32 4294901760, %v12728_v47  ;;  %v16925_v15 = vand.u32 4294901760, %v12803_v25 }
 0x2bc   : > { %4007 = vmatpush.msra.mxu1 %v12526_v31  ;;  %4070 = vmatpush.msra.mxu2 %v17392_v62  ;;  %v12841_v5 = vsub.f32 %v4155_v26, %v12820_v57 }
 0x2bd   : > { %4121 = vmatpush.msra.mxu3 %v12497_v54  ;;  %3950 = vmatpush.msra.mxu0 %v12500_v33  ;;  %v3817_v54 = vand.u32 4294901760, %v3816_v52  ;;  %v16930_v33 = vand.u32 4294901760, %v12744_v39  ;;  %v4150_v52 = vld [vmem:[#allocation3 + $0x510] sm:$0xff] }
 0x2be   : > { %4009 = vmatpush.msra.mxu1 %v17393_v11  ;;  %4074 = vmatpush.msra.mxu2 %v17395_v20  ;;  %v16922_v53 = vand.u32 4294901760, %v12841_v5  ;;  %v4149_v20 = vld [vmem:[#allocation3 + $0x508] sm:$0xff] }
 0x2bf   : > { %4123 = vmatpush.msra.mxu3 %v12512_v22  ;;  %3724 = vmatmul.f32.vlgmr.msrb.gmra.mxu0 %v12660_v4  ;;  %v4216_v22 = vsub.f32 %v12728_v47, %v16932_v30  ;;  %v12771_v4 = vsub.f32 %v4160_v18, %v12749_v32  ;;  %v4151_v18 = vld [vmem:[#allocation3 + $0x518] sm:$0xff] }
 0x2c0   : > { %3769 = vmatmul.f32.gmra.mxu1 %v12672_v28  ;;  %3953 = vmatpush.msra.mxu0 %v12520_v7  ;;  %v4157_v7 = vld [vmem:[#allocation3 + $0x548] sm:$0xff] }
 0x2c1   : > { %4011 = vmatpush.msra.mxu1 %v12551_v36  ;;  %4078 = vmatpush.msra.mxu2 %v17396_v23  ;;  %v4217_v10 = vand.u32 4294901760, %v4216_v22  ;;  %v16928_v13 = vand.u32 4294901760, %v12771_v4  ;;  %v12791_v14 = vand.u32 4294901760, %v4157_v7  ;;  %v12879_v23 = vand.u32 4294901760, %v4150_v52  ;;  %v4148_v22 = vld [vmem:[#allocation3 + $0x500] sm:$0xff] }
 0x2c2   : > { %4125 = vmatpush.msra.mxu3 %v12526_v31  ;;  %3818 = vmatmul.f32.gmra.mxu2 %v3817_v54  ;;  %v4222_v31 = vsub.f32 %v12744_v39, %v16930_v33  ;;  %v4547_v33 = vld [vmem:[#allocation3 + $0x5b0] sm:$0xff] }
 0x2c3   : > { %3956 = vmatpush.msra.mxu0 %v17391_v24  ;;  %4013 = vmatpush.msra.mxu1 %v12571_v35  ;;  %v12855_v24 = vand.u32 4294901760, %v4152_v49  ;;  %v12903_v26 = vsub.f32 %v4150_v52, %v12879_v23  ;;  %v4555_v52 = vld [vmem:[#allocation3 + $0x5f0] sm:$0xff] }
 0x2c4   : > { %4082 = vmatpush.msra.mxu2 %v3896_v58  ;;  %4127 = vmatpush.msra.mxu3 %v17393_v11  ;;  %v4228_v58 = vsub.f32 %v12757_v56, %v16929_v21  ;;  %v12867_v11 = vand.u32 4294901760, %v4151_v18 }
 0x2c5   : > { %3923 = vmatmul.f32.gmra.mxu3 %v12697_v44  ;;  %3959 = vmatpush.msra.mxu0 %v17394_v2  ;;  %v4258_v2 = vsub.f32 %v12830_v12, %v16923_v29  ;;  %v12877_v59 = vsub.f32 %v4152_v49, %v12855_v24  ;;  %v16916_v49 = vand.u32 4294901760, %v12903_v26 }
 0x2c6   : > { %4015 = vmatpush.msra.mxu1 %v12594_v45  ;;  %4086 = vmatpush.msra.mxu2 %v3902_v9  ;;  %v12815_v9 = vsub.f32 %v4157_v7, %v12791_v14  ;;  %v4264_v7 = vsub.f32 %v12841_v5, %v16922_v53  ;;  %v12891_v46 = vsub.f32 %v4151_v18, %v12867_v11  ;;  %v4549_v53 = vld [vmem:[#allocation3 + $0x5c0] sm:$0xff] }
 0x2c7   : > { %4129 = vmatpush.msra.mxu3 %v12551_v36  ;;  %3962 = vmatpush.msra.mxu0 %v12554_v48  ;;  %v4223_v36 = vand.u32 4294901760, %v4222_v31  ;;  %v4234_v48 = vsub.f32 %v12771_v4, %v16928_v13 }
 0x2c8   : > { %4017 = vmatpush.msra.mxu1 %v12607_v27  ;;  %4090 = vmatpush.msra.mxu2 %v3908_v50  ;;  %v4240_v50 = vsub.f32 %v12778_v61, %v16927_v0  ;;  %v4548_v0 = vld [vmem:[#allocation3 + $0x5b8] sm:$0xff] }
 0x2c9   : > { %4131 = vmatpush.msra.mxu3 %v12571_v35  ;;  %3728 = vmatmul.f32.gmra.mxu0 %v12672_v28  ;;  %v4229_v35 = vand.u32 4294901760, %v4228_v58  ;;  %v4153_v28 = vld [vmem:[#allocation3 + $0x528] sm:$0xff]  ;;  %v16918_v58 = vand.u32 4294901760, %v12877_v59 }
 0x2ca   : > { %4218 = vmatpush.msrb.mxu1 %v4217_v10  ;;  %3965 = vmatpush.msra.mxu0 %v12574_v17  ;;  %v4235_v17 = vand.u32 4294901760, %v4234_v48  ;;  %v12843_v19 = vand.u32 4294901760, %v4153_v28  ;;  %v12893_v10 = vand.u32 4294901760, %v4149_v20  ;;  %v4265_v48 = vand.u32 4294901760, %v4264_v7 }
 0x2cb   : > { %4021 = vmatmul.f32.vlgmr.msra.gmra.mxu1 %v3807_v34  ;;  %4094 = vmatpush.msra.mxu2 %v3914_v1  ;;  %v12833_v34 = vand.u32 4294901760, %v4154_v55  ;;  %v16924_v1 = vand.u32 4294901760, %v12815_v9  ;;  %v12949_v7 = vand.u32 4294901760, %v4555_v52 }
 0x2cc   : > { %4133 = vmatpush.msra.mxu3 %v12594_v45  ;;  %4224 = vmatpush.msrb.mxu1 %v4223_v36  ;;  %v4241_v45 = vand.u32 4294901760, %v4240_v50  ;;  %v12905_v36 = vand.u32 4294901760, %v4148_v22  ;;  %v12915_v50 = vsub.f32 %v4149_v20, %v12893_v10 }
 0x2cd   : > { %4320 = vmatpush.msrb.mxu2 %v12728_v47  ;;  %3968 = vmatpush.msra.mxu0 %v12597_v41  ;;  %v4246_v41 = vsub.f32 %v12803_v25, %v16925_v15  ;;  %v4252_v62 = vsub.f32 %v12815_v9, %v16924_v1 }
 0x2ce   : > { %4096 = vmatmul.f32.vlgmr.msra.gmra.mxu2 %v12674_v43  ;;  %4135 = vmatpush.msra.mxu3 %v12607_v27  ;;  %v12853_v27 = vsub.f32 %v4154_v55, %v12833_v34 }
 0x2cf   : > { %4230 = vmatpush.msrb.mxu1 %v4229_v35  ;;  %4323 = vmatpush.msrb.mxu2 %v12744_v39  ;;  %v16917_v35 = vand.u32 4294901760, %v12891_v46 }
 0x2d0   : > { %4378 = vmatpush.msrb.mxu3 %v12714_v3  ;;  %3971 = vmatpush.msra.mxu0 %v12610_v38  ;;  %v12865_v38 = vsub.f32 %v4153_v28, %v12843_v19  ;;  %v16921_v54 = vand.u32 4294901760, %v12853_v27 }
 0x2d1   : > { %4137 = vmatmul.f32.vlgmr.msra.gmra.mxu3 %v12674_v43  ;;  %4236 = vmatpush.msrb.mxu1 %v4235_v17  ;;  %v4247_v43 = vand.u32 4294901760, %v4246_v41  ;;  %v4282_v17 = vsub.f32 %v12877_v59, %v16918_v58  ;;  %v4288_v18 = vsub.f32 %v12891_v46, %v16917_v35  ;;  %v4146_v35 = vld [vmem:[#allocation2 + $0x11] sm:$0xff] }
 0x2d2   : > { %4326 = vmatpush.msrb.mxu2 %v12757_v56  ;;  %4380 = vmatpush.msrb.mxu3 %v12723_v63  ;;  %v16919_v31 = vand.u32 4294901760, %v12865_v38 }
 0x2d3   : > { %3974 = vmatpush.msra.mxu0 %v12622_v8  ;;  %4242 = vmatpush.msrb.mxu1 %v4241_v45  ;;  %v4253_v8 = vand.u32 4294901760, %v4252_v62  ;;  %v12925_v45 = vsub.f32 %v4148_v22, %v12905_v36  ;;  %v16915_v62 = vand.u32 4294901760, %v12915_v50 }
 0x2d4   : > { %4329 = vmatpush.msrb.mxu2 %v12771_v4  ;;  %4382 = vmatpush.msrb.mxu3 %v12735_v60  ;;  %v4276_v55 = vsub.f32 %v12865_v38, %v16919_v31  ;;  %v12999_v31 = vand.u32 4294901760, %v4146_v35 }
 0x2d5   : > { %4165 = vmatpush.msrb.mxu0 %v12714_v3  ;;  %4027 = vmatmul.f32.gmra.mxu1 %v3815_v6  ;;  %v4270_v6 = vsub.f32 %v12853_v27, %v16921_v54  ;;  %v16914_v20 = vand.u32 4294901760, %v12925_v45  ;;  %v4300_v22 = vsub.f32 %v12915_v50, %v16915_v62 }
 0x2d6   : > { %3977 = vmatmul.f32.vlgmr.msra.gmra.mxu0 %v12682_v40  ;;  %4248 = vmatpush.msrb.mxu1 %v4247_v43  ;;  %v4259_v40 = vand.u32 4294901760, %v4258_v2  ;;  %v4277_v41 = vand.u32 4294901760, %v4276_v55  ;;  %v4283_v43 = vand.u32 4294901760, %v4282_v17  ;;  %v4294_v2 = vsub.f32 %v12903_v26, %v16916_v49  ;;  %v4553_v17 = vld [vmem:[#allocation3 + $0x5e0] sm:$0xff]  ;;  %17398 = vst [vmem:[#allocation14_spill] sm:$0xff] %v12999_v31 }
 0x2d7   : > { %4167 = vmatpush.msrb.mxu0 %v12723_v63  ;;  %4332 = vmatpush.msrb.mxu2 %v12778_v61  ;;  %v4271_v28 = vand.u32 4294901760, %v4270_v6  ;;  %v4554_v6 = vld [vmem:[#allocation3 + $0x5e8] sm:$0xff]  ;;  %v4306_v55 = vsub.f32 %v12925_v45, %v16914_v20 }
 0x2d8   : > { %4384 = vmatpush.msrb.mxu3 %v12749_v32  ;;  %4100 = vmatmul.f32.gmra.mxu2 %v12697_v44 }
 0x2d9   : > { %4169 = vmatpush.msrb.mxu0 %v12735_v60  ;;  %4254 = vmatpush.msrb.mxu1 %v4253_v8  ;;  %v4307_v20 = vand.u32 4294901760, %v4306_v55 }
 0x2da   : > { %4335 = vmatpush.msrb.mxu2 %v12803_v25  ;;  %4386 = vmatpush.msrb.mxu3 %v12759_v37 }
 0x2db   : > { %4141 = vmatmul.f32.gmra.mxu3 %v12697_v44  ;;  %4171 = vmatpush.msrb.mxu0 %v12749_v32  ;;  %v4556_v44 = vld [vmem:[#allocation3 + $0x5f8] sm:$0xff] }
 0x2dc   : > { %4260 = vmatpush.msrb.mxu1 %v4259_v40  ;;  %4338 = vmatpush.msrb.mxu2 %v12815_v9  ;;  %v12941_v8 = vand.u32 4294901760, %v4556_v44  ;;  %v4145_v40 = vld [vmem:[#allocation2 + $0x9] sm:$0xff] }
 0x2dd   : > { %4388 = vmatpush.msrb.mxu3 %v12780_v16  ;;  %4173 = vmatpush.msrb.mxu0 %v12759_v37 }
 0x2de   : > { %4266 = vmatpush.msrb.mxu1 %v4265_v48  ;;  %4341 = vmatpush.msrb.mxu2 %v12830_v12  ;;  %v4295_v48 = vand.u32 4294901760, %v4294_v2  ;;  %v12968_v2 = vsub.f32 %v4555_v52, %v12949_v7 }
 0x2df   : > { %4390 = vmatpush.msrb.mxu3 %v12791_v14  ;;  %3982 = vmatmul.f32.gmra.mxu0 %v12711_v51  ;;  %v4289_v51 = vand.u32 4294901760, %v4288_v18  ;;  %v12963_v18 = vand.u32 4294901760, %v4145_v40 }
 0x2e0   : > { %4175 = vmatpush.msrb.mxu0 %v12780_v16  ;;  %4272 = vmatpush.msrb.mxu1 %v4271_v28  ;;  %v12958_v28 = vsub.f32 %v4556_v44, %v12941_v8  ;;  %v4552_v44 = vld [vmem:[#allocation3 + $0x5d8] sm:$0xff]  ;;  %v16926_v49 = vand.u32 4294901760, %v12968_v2 }
 0x2e1   : > { %4344 = vmatpush.msrb.mxu2 %v12841_v5  ;;  %4392 = vmatpush.msrb.mxu3 %v12805_v42  ;;  %v4197_v52 = vsub.f32 %v4145_v40, %v12963_v18  ;;  %v12984_v55 = vand.u32 4294901760, %v4552_v44 }
 0x2e2   : > { %4177 = vmatpush.msrb.mxu0 %v12791_v14  ;;  %4278 = vmatpush.msrb.mxu1 %v4277_v41  ;;  %v4301_v41 = vand.u32 4294901760, %v4300_v22  ;;  %v16920_v62 = vand.u32 4294901760, %v12958_v28  ;;  %v4551_v22 = vld [vmem:[#allocation3 + $0x5d0] sm:$0xff] }
 0x2e3   : > { %4347 = vmatpush.msrb.mxu2 %v12853_v27  ;;  %4394 = vmatpush.msrb.mxu3 %v12820_v57  ;;  %v12995_v58 = vand.u32 4294901760, %v4551_v22  ;;  %v13008_v54 = vsub.f32 %v4552_v44, %v12984_v55  ;;  %v13022_v44 = vand.u32 4294901760, %v4549_v53 }
 0x2e4   : > { %4179 = vmatpush.msrb.mxu0 %v12805_v42  ;;  %4284 = vmatpush.msrb.mxu1 %v4283_v43  ;;  %v12965_v43 = vand.u32 4294901760, %v4554_v6 }
 0x2e5   : > { %4350 = vmatpush.msrb.mxu2 %v12865_v38  ;;  %4396 = vmatpush.msrb.mxu3 %v12833_v34  ;;  %17399 = vst [vmem:[#allocation15_spill] sm:$0xff] %v13008_v54  ;;  %v16936_v21 = vand.u32 4294901760, %v13008_v54 }
 0x2e6   : > { %4181 = vmatpush.msrb.mxu0 %v12820_v57  ;;  %4290 = vmatpush.msrb.mxu1 %v4289_v51  ;;  %v12974_v51 = vand.u32 4294901760, %v4553_v17 }
 0x2e7   : > { %4353 = vmatpush.msrb.mxu2 %v12877_v59  ;;  %4398 = vmatpush.msrb.mxu3 %v12843_v19 }
 0x2e8   : > { %4183 = vmatpush.msrb.mxu0 %v12833_v34  ;;  %4296 = vmatpush.msrb.mxu1 %v4295_v48  ;;  %v12982_v48 = vsub.f32 %v4554_v6, %v12965_v43  ;;  %v12993_v40 = vsub.f32 %v4553_v17, %v12974_v51  ;;  %v4550_v6 = vld [vmem:[#allocation3 + $0x5c8] sm:$0xff] }
 0x2e9   : > { %4356 = vmatpush.msrb.mxu2 %v12891_v46  ;;  %4400 = vmatpush.msrb.mxu3 %v12855_v24  ;;  %v13012_v29 = vand.u32 4294901760, %v4550_v6 }
 0x2ea   : > { %4185 = vmatpush.msrb.mxu0 %v12843_v19  ;;  %4302 = vmatpush.msrb.mxu1 %v4301_v41  ;;  %v4609_v41 = vsub.f32 %v12958_v28, %v16920_v62  ;;  %17397 = vst [vmem:[#allocation13_spill] sm:$0xff] %v12993_v40  ;;  %v4615_v62 = vsub.f32 %v12968_v2, %v16926_v49  ;;  %v16931_v17 = vand.u32 4294901760, %v12982_v48  ;;  %v16933_v15 = vand.u32 4294901760, %v12993_v40 }
 0x2eb   : > { %4359 = vmatpush.msrb.mxu2 %v12903_v26  ;;  %4402 = vmatpush.msrb.mxu3 %v12867_v11  ;;  %v13017_v49 = vsub.f32 %v4551_v22, %v12995_v58 }
 0x2ec   : > { %4187 = vmatpush.msrb.mxu0 %v12855_v24  ;;  %4308 = vmatpush.msrb.mxu1 %v4307_v20  ;;  %v4198_v20 = vand.u32 4294901760, %v4197_v52  ;;  %v4610_v1 = vand.u32 4294901760, %v4609_v41  ;;  %v4616_v13 = vand.u32 4294901760, %v4615_v62  ;;  %v4621_v22 = vsub.f32 %v12982_v48, %v16931_v17  ;;  %v4546_v17 = vld [vmem:[#allocation3 + $0x5a8] sm:$0xff] }
 0x2ed   : > { %4362 = vmatpush.msrb.mxu2 %v12915_v50  ;;  %4404 = vmatpush.msrb.mxu3 %v12879_v23  ;;  %17400 = vst [vmem:[#allocation16_spill] sm:$0xff] %v13017_v49  ;;  %v4627_v62 = vsub.f32 %v12993_v40, %v16933_v15  ;;  %v4633_v15 = vsub.f32 %v13008_v54, %v16936_v21  ;;  %v13058_v40 = vand.u32 4294901760, %v4546_v17  ;;  %v4544_v21 = vld [vmem:[#allocation3 + $0x598] sm:$0xff]  ;;  %v17402_v54 = vand.u32 4294901760, %v12728_v47 }
 0x2ee   : > { %4310 = vmatmul.f32.vlgmr.msrb.gmra.mxu1 %v12963_v18  ;;  %4189 = vmatpush.msrb.mxu0 %v12867_v11  ;;  %v4199_v41 = vsub.f32 %v4197_v52, %v4198_v20 }
 0x2ef   : > { %4496 = vmatpush.msra.mxu1 %v12714_v3  ;;  %4365 = vmatpush.msrb.mxu2 %v12925_v45  ;;  %v4205_v3 = vsub.f32 %v4146_v35, %v12999_v31  ;;  %v13034_v35 = vand.u32 4294901760, %v4548_v0 }
 0x2f0   : > { %4406 = vmatpush.msrb.mxu3 %v12893_v10  ;;  %4368 = vmatmul.f32.vlgmr.msrb.gmra.mxu2 %v4197_v52  ;;  %v4545_v52 = vld [vmem:[#allocation3 + $0x5a0] sm:$0xff] }
 0x2f1   : > { %4498 = vmatpush.msra.mxu1 %v12723_v63  ;;  %4558 = vmatpush.msra.mxu2 %v12941_v8  ;;  %v13032_v63 = vsub.f32 %v4550_v6, %v13012_v29  ;;  %v13046_v6 = vand.u32 4294901760, %v4547_v33  ;;  %v4206_v30 = vand.u32 4294901760, %v4205_v3 }
 0x2f2   : > { %4191 = vmatpush.msrb.mxu0 %v12879_v23  ;;  %4408 = vmatpush.msrb.mxu3 %v12905_v36 }
 0x2f3   : > { %4412 = vmatmul.f32.vlgmr.msrb.gmra.mxu3 %v4198_v20  ;;  %4500 = vmatpush.msra.mxu1 %v12735_v60  ;;  %v13044_v60 = vsub.f32 %v4549_v53, %v13022_v44  ;;  %v4622_v20 = vand.u32 4294901760, %v4621_v22  ;;  %v13056_v53 = vsub.f32 %v4548_v0, %v13034_v35  ;;  %v13069_v0 = vsub.f32 %v4547_v33, %v13046_v6 }
 0x2f4   : > { %4560 = vmatpush.msra.mxu2 %v12949_v7  ;;  %4611 = vmatpush.msra.mxu3 %v4610_v1  ;;  %v4200_v1 = vand.u32 4294901760, %v4199_v41  ;;  %v17401_v41 = vand.u32 4294901760, %v13017_v49  ;;  %v17404_v47 = vand.u32 4294901760, %v13032_v63  ;;  %v13081_v33 = vsub.f32 %v4546_v17, %v13058_v40 }
 0x2f5   : > { %4193 = vmatpush.msrb.mxu0 %v12893_v10  ;;  %4502 = vmatpush.msra.mxu1 %v12749_v32  ;;  %v16943_v32 = vand.u32 4294901760, %v13056_v53 }
 0x2f6   : > { %4562 = vmatpush.msra.mxu2 %v12965_v43  ;;  %4617 = vmatpush.msra.mxu3 %v4616_v13  ;;  %v4628_v13 = vand.u32 4294901760, %v4627_v62  ;;  %v4639_v22 = vsub.f32 %v13017_v49, %v17401_v41  ;;  %v4207_v62 = vsub.f32 %v4205_v3, %v4206_v30  ;;  %v17403_v41 = vand.u32 4294901760, %v12744_v39 }
 0x2f7   : > { %4195 = vmatpush.msrb.mxu0 %v12905_v36  ;;  %4314 = vmatmul.f32.gmra.mxu1 %v12999_v31  ;;  %v13071_v31 = vand.u32 4294901760, %v4545_v52  ;;  %v13083_v49 = vand.u32 4294901760, %v4544_v21  ;;  %v17405_v39 = vand.u32 4294901760, %v12757_v56  ;;  %v17407_v56 = vand.u32 4294901760, %v12771_v4 }
 0x2f8   : > { %4201 = vmatmul.f32.vlgmr.msrb.gmra.mxu0 %v4200_v1  ;;  %4504 = vmatpush.msra.mxu1 %v12759_v37  ;;  %v4634_v37 = vand.u32 4294901760, %v4633_v15  ;;  %v4543_v1 = vld [vmem:[#allocation3 + $0x590] sm:$0xff]  ;;  %v4640_v15 = vand.u32 4294901760, %v4639_v22  ;;  %v4657_v22 = vsub.f32 %v13056_v53, %v16943_v32 }
 0x2f9   : > { %4425 = vmatpush.msra.mxu0 %v17402_v54  ;;  %4564 = vmatpush.msra.mxu2 %v12974_v51  ;;  %v4645_v54 = vsub.f32 %v13032_v63, %v17404_v47  ;;  %v13095_v17 = vand.u32 4294901760, %v4543_v1  ;;  %v4542_v47 = vld [vmem:[#allocation3 + $0x588] sm:$0xff] }
 0x2fa   : > { %4623 = vmatpush.msra.mxu3 %v4622_v20  ;;  %4373 = vmatmul.f32.gmra.mxu2 %v4205_v3  ;;  %v4538_v20 = vld [vmem:[#allocation2 + $0xa] sm:$0xff] }
 0x2fb   : > { %4429 = vmatpush.msra.mxu0 %v17403_v41  ;;  %4506 = vmatpush.msra.mxu1 %v12780_v16  ;;  %v17406_v16 = vand.u32 4294901760, %v13044_v60  ;;  %v13093_v41 = vsub.f32 %v4545_v52, %v13071_v31  ;;  %v4668_v52 = vand.u32 4294901760, %v13081_v33  ;;  %v13124_v32 = vand.u32 4294901760, %v4538_v20 }
 0x2fc   : > { %4566 = vmatpush.msra.mxu2 %v12984_v55  ;;  %4629 = vmatpush.msra.mxu3 %v4628_v13  ;;  %v4646_v13 = vand.u32 4294901760, %v4645_v54 }
 0x2fd   : > { %4418 = vmatmul.f32.gmra.mxu3 %v4206_v30  ;;  %4433 = vmatpush.msra.mxu0 %v17405_v39  ;;  %v4651_v3 = vsub.f32 %v13044_v60, %v17406_v16  ;;  %v4208_v30 = vand.u32 4294901760, %v4207_v62  ;;  %v13106_v39 = vsub.f32 %v4544_v21, %v13083_v49  ;;  %v4541_v16 = vld [vmem:[#allocation3 + $0x580] sm:$0xff]  ;;  %v4674_v54 = vand.u32 4294901760, %v13093_v41 }
 0x2fe   : > { %4508 = vmatpush.msra.mxu1 %v12791_v14  ;;  %4568 = vmatpush.msra.mxu2 %v12995_v58  ;;  %v13110_v14 = vand.u32 4294901760, %v4542_v47  ;;  %v13117_v21 = vsub.f32 %v4543_v1, %v13095_v17 }
 0x2ff   : > { %4635 = vmatpush.msra.mxu3 %v4634_v37  ;;  %4437 = vmatpush.msra.mxu0 %v17407_v56  ;;  %v4652_v4 = vand.u32 4294901760, %v4651_v3  ;;  %v17408_v37 = vand.u32 4294901760, %v13069_v0  ;;  %v17409_v56 = vand.u32 4294901760, %v12778_v61  ;;  %v4669_v3 = vsub.f32 %v13081_v33, %v4668_v52 }
 0x300   : > { %4510 = vmatpush.msra.mxu1 %v12805_v42  ;;  %4570 = vmatpush.msra.mxu2 %v13012_v29  ;;  %v13122_v42 = vand.u32 4294901760, %v4541_v16  ;;  %v4680_v1 = vand.u32 4294901760, %v13106_v39  ;;  %v13135_v61 = vsub.f32 %v4542_v47, %v13110_v14 }
 0x301   : > { %4641 = vmatpush.msra.mxu3 %v4640_v15  ;;  %4209 = vmatmul.f32.gmra.mxu0 %v4208_v30  ;;  %v4663_v62 = vsub.f32 %v13069_v0, %v17408_v37  ;;  %v4658_v15 = vand.u32 4294901760, %v4657_v22  ;;  %v17410_v30 = vand.u32 4294901760, %v12803_v25  ;;  %v4686_v22 = vand.u32 4294901760, %v13117_v21 }
 0x302   : > { %4441 = vmatpush.msra.mxu0 %v17409_v56  ;;  %4512 = vmatpush.msra.mxu1 %v12820_v57  ;;  %v17411_v37 = vand.u32 4294901760, %v12815_v9  ;;  %v13146_v25 = vsub.f32 %v4538_v20, %v13124_v32  ;;  %v4670_v47 = vand.u32 4294901760, %v4669_v3  ;;  %v4692_v9 = vand.u32 4294901760, %v13135_v61 }
 0x303   : > { %4572 = vmatpush.msra.mxu2 %v13022_v44  ;;  %4647 = vmatpush.msra.mxu3 %v4646_v13  ;;  %v4664_v57 = vand.u32 4294901760, %v4663_v62  ;;  %v4675_v13 = vsub.f32 %v13093_v41, %v4674_v54  ;;  %v17412_v62 = vand.u32 4294901760, %v12830_v12  ;;  %v4687_v20 = vsub.f32 %v13117_v21, %v4686_v22 }
 0x304   : > { %4445 = vmatpush.msra.mxu0 %v17410_v30  ;;  %4514 = vmatpush.msra.mxu1 %v12833_v34  ;;  %v13149_v34 = vsub.f32 %v4541_v16, %v13122_v42  ;;  %v4539_v16 = vld [vmem:[#allocation2 + $0x12] sm:$0xff]  ;;  %v17413_v56 = vand.u32 4294901760, %v12841_v5  ;;  %v4591_v12 = vand.u32 4294901760, %v13146_v25  ;;  %v17414_v3 = vand.u32 4294901760, %v12853_v27 }
 0x305   : > { %4574 = vmatpush.msra.mxu2 %v13034_v35  ;;  %4653 = vmatpush.msra.mxu3 %v4652_v4  ;;  %v4681_v4 = vsub.f32 %v13106_v39, %v4680_v1  ;;  %v4693_v5 = vsub.f32 %v13135_v61, %v4692_v9  ;;  %v13175_v30 = vand.u32 4294901760, %v4539_v16 }
 0x306   : > { %4449 = vmatpush.msra.mxu0 %v17411_v37  ;;  %4516 = vmatpush.msra.mxu1 %v12843_v19  ;;  %v4676_v19 = vand.u32 4294901760, %v4675_v13  ;;  %v4592_v27 = vsub.f32 %v13146_v25, %v4591_v12  ;;  %v17416_v13 = vand.u32 4294901760, %v12877_v59 }
 0x307   : > { %4576 = vmatpush.msra.mxu2 %v13046_v6  ;;  %4659 = vmatpush.msra.mxu3 %v4658_v15  ;;  %v4682_v15 = vand.u32 4294901760, %v4681_v4  ;;  %v13192_v37 = vsub.f32 %v4539_v16, %v13175_v30  ;;  %v17423_v16 = vand.u32 4294901760, %v12925_v45  ;;  %v17427_v45 = vld [vmem:[#allocation15_spill] sm:$0xff] }
 0x308   : > { %4453 = vmatpush.msra.mxu0 %v17412_v62  ;;  %4518 = vmatpush.msra.mxu1 %v12855_v24  ;;  %v4698_v24 = vand.u32 4294901760, %v13149_v34  ;;  %v17419_v62 = vand.u32 4294901760, %v12903_v26  ;;  %v17422_v26 = vand.u32 4294901760, %v12982_v48 }
 0x309   : > { %4578 = vmatpush.msra.mxu2 %v13058_v40  ;;  %4665 = vmatpush.msra.mxu3 %v4664_v57  ;;  %v17415_v57 = vand.u32 4294901760, %v12865_v38  ;;  %v4694_v38 = vand.u32 4294901760, %v4693_v5  ;;  %v4599_v59 = vand.u32 4294901760, %v13192_v37 }
 0x30a   : > { %4457 = vmatpush.msra.mxu0 %v17413_v56  ;;  %4520 = vmatpush.msra.mxu1 %v12867_v11  ;;  %v4688_v11 = vand.u32 4294901760, %v4687_v20  ;;  %v17421_v20 = vand.u32 4294901760, %v12915_v50  ;;  %v17424_v56 = vld [vmem:[#allocation14_spill] sm:$0xff]  ;;  %v17425_v50 = vld [vmem:[#allocation13_spill] sm:$0xff] }
 0x30b   : > { %4580 = vmatpush.msra.mxu2 %v13071_v31  ;;  %4671 = vmatpush.msra.mxu3 %v4670_v47  ;;  %v4593_v47 = vand.u32 4294901760, %v4592_v27 }
 0x30c   : > { %4461 = vmatpush.msra.mxu0 %v17414_v3  ;;  %4522 = vmatpush.msra.mxu1 %v12879_v23  ;;  %v4699_v23 = vsub.f32 %v13149_v34, %v4698_v24 }
 0x30d   : > { %4582 = vmatpush.msra.mxu2 %v13083_v49  ;;  %4677 = vmatpush.msra.mxu3 %v4676_v19  ;;  %v4600_v19 = vsub.f32 %v13192_v37, %v4599_v59 }
 0x30e   : > { %4465 = vmatpush.msra.mxu0 %v17415_v57  ;;  %4524 = vmatpush.msra.mxu1 %v12893_v10  ;;  %v17417_v10 = vand.u32 4294901760, %v12891_v46  ;;  %v4700_v4 = vand.u32 4294901760, %v4699_v23  ;;  %v17420_v46 = vand.u32 4294901760, %v12968_v2  ;;  %v4971_v57 = vld [vmem:[#allocation3 + $0x6c8] sm:$0xff] }
 0x30f   : > { %4584 = vmatpush.msra.mxu2 %v13095_v17  ;;  %4683 = vmatpush.msra.mxu3 %v4682_v15  ;;  %v17426_v15 = vand.u32 4294901760, %v17425_v50 }
 0x310   : > { %4469 = vmatpush.msra.mxu0 %v17416_v13  ;;  %4526 = vmatpush.msra.mxu1 %v12905_v36  ;;  %v17418_v36 = vand.u32 4294901760, %v12958_v28 }
 0x311   : > { %4586 = vmatpush.msra.mxu2 %v13110_v14  ;;  %4689 = vmatpush.msra.mxu3 %v4688_v11 }
 0x312   : > { %4528 = vmatmul.f32.vlgmr.msra.gmra.mxu1 %v12963_v18  ;;  %4473 = vmatpush.msra.mxu0 %v17417_v10 }
 0x313   : > { %4771 = vmatpush.msrb.mxu1 %v12941_v8  ;;  %4588 = vmatpush.msra.mxu2 %v13122_v42 }
 0x314   : > { %4695 = vmatpush.msra.mxu3 %v4694_v38  ;;  %4594 = vmatmul.f32.vlgmr.msra.gmra.mxu2 %v4593_v47  ;;  %v4970_v47 = vld [vmem:[#allocation3 + $0x6c0] sm:$0xff] }
 0x315   : > { %4773 = vmatpush.msrb.mxu1 %v12949_v7  ;;  %4818 = vmatpush.msrb.mxu2 %v17418_v36 }
 0x316   : > { %4477 = vmatpush.msra.mxu0 %v17419_v62  ;;  %4701 = vmatpush.msra.mxu3 %v4700_v4 }
 0x317   : > { %4703 = vmatmul.f32.vlgmr.msra.gmra.mxu3 %v13124_v32  ;;  %4775 = vmatpush.msrb.mxu1 %v12965_v43 }
 0x318   : > { %4822 = vmatpush.msrb.mxu2 %v17420_v46  ;;  %4889 = vmatpush.msrb.mxu3 %v12941_v8  ;;  %v4601_v8 = vand.u32 4294901760, %v4600_v19  ;;  %v13395_v46 = vand.u32 4294901760, %v4970_v47 }
 0x319   : > { %4481 = vmatpush.msra.mxu0 %v17421_v20  ;;  %4777 = vmatpush.msrb.mxu1 %v12974_v51  ;;  %v4969_v20 = vld [vmem:[#allocation3 + $0x6b8] sm:$0xff] }
 0x31a   : > { %4826 = vmatpush.msrb.mxu2 %v17422_v26  ;;  %4891 = vmatpush.msrb.mxu3 %v12949_v7  ;;  %v17428_v7 = vand.u32 4294901760, %v17427_v45 }
 0x31b   : > { %4485 = vmatpush.msra.mxu0 %v17423_v16  ;;  %4532 = vmatmul.f32.gmra.mxu1 %v17424_v56 }
 0x31c   : > { %4487 = vmatmul.f32.vlgmr.msra.gmra.mxu0 %v12963_v18  ;;  %4779 = vmatpush.msrb.mxu1 %v12984_v55 }
 0x31d   : > { %4713 = vmatpush.msrb.mxu0 %v12958_v28  ;;  %4830 = vmatpush.msrb.mxu2 %v17426_v15  ;;  %v17429_v28 = vld [vmem:[#allocation16_spill] sm:$0xff] }
 0x31e   : > { %4893 = vmatpush.msrb.mxu3 %v12965_v43  ;;  %4602 = vmatmul.f32.gmra.mxu2 %v4601_v8  ;;  %v17430_v18 = vand.u32 4294901760, %v17429_v28  ;;  %v17431_v43 = vand.u32 4294901760, %v13032_v63  ;;  %v13410_v8 = vsub.f32 %v4970_v47, %v13395_v46 }
 0x31f   : > { %4716 = vmatpush.msrb.mxu0 %v12968_v2  ;;  %4781 = vmatpush.msrb.mxu1 %v12995_v58  ;;  %v17432_v2 = vand.u32 4294901760, %v13044_v60 }
 0x320   : > { %4834 = vmatpush.msrb.mxu2 %v17428_v7  ;;  %4895 = vmatpush.msrb.mxu3 %v12974_v51  ;;  %v17433_v51 = vand.u32 4294901760, %v13056_v53 }
 0x321   : > { %4707 = vmatmul.f32.gmra.mxu3 %v13175_v30  ;;  %4719 = vmatpush.msrb.mxu0 %v12982_v48 }
 0x322   : > { %4783 = vmatpush.msrb.mxu1 %v13012_v29  ;;  %4838 = vmatpush.msrb.mxu2 %v17430_v18  ;;  %v16948_v18 = vand.u32 4294901760, %v13410_v8 }
 0x323   : > { %4897 = vmatpush.msrb.mxu3 %v12984_v55  ;;  %4722 = vmatpush.msrb.mxu0 %v17425_v50  ;;  %v4977_v55 = vld [vmem:[#allocation3 + $0x6f8] sm:$0xff]  ;;  %v13412_v50 = vand.u32 4294901760, %v4969_v20 }
 0x324   : > { %4785 = vmatpush.msrb.mxu1 %v13022_v44  ;;  %4842 = vmatpush.msrb.mxu2 %v17431_v43 }
 0x325   : > { %4899 = vmatpush.msrb.mxu3 %v12995_v58  ;;  %4491 = vmatmul.f32.gmra.mxu0 %v17424_v56  ;;  %v17434_v58 = vand.u32 4294901760, %v13069_v0  ;;  %v13423_v43 = vsub.f32 %v4969_v20, %v13412_v50 }
 0x326   : > { %4725 = vmatpush.msrb.mxu0 %v17427_v45  ;;  %4787 = vmatpush.msrb.mxu1 %v13034_v35  ;;  %v4968_v45 = vld [vmem:[#allocation3 + $0x6b0] sm:$0xff] }
 0x327   : > { %4846 = vmatpush.msrb.mxu2 %v17432_v2  ;;  %4901 = vmatpush.msrb.mxu3 %v13012_v29  ;;  %v13304_v29 = vpop.f32.mrf.mxu1  ;;  %v13426_v2 = vand.u32 4294901760, %v4968_v45 }
 0x328   : > { %4728 = vmatpush.msrb.mxu0 %v17429_v28  ;;  %4789 = vmatpush.msrb.mxu1 %v13046_v6 }
 0x329   : > { %4850 = vmatpush.msrb.mxu2 %v17433_v51  ;;  %4903 = vmatpush.msrb.mxu3 %v13022_v44  ;;  %v4975_v44 = vld [vmem:[#allocation3 + $0x6e8] sm:$0xff] }
 0x32a   : > { %4731 = vmatpush.msrb.mxu0 %v13032_v63  ;;  %4791 = vmatpush.msrb.mxu1 %v13058_v40  ;;  %v13310_v48 = vpop.f32.mrf.mxu3  ;;  %v13312_v63 = vand.u32 4294901760, %v4977_v55  ;;  %v4967_v51 = vld [vmem:[#allocation3 + $0x6a8] sm:$0xff] }
 0x32b   : > { %4854 = vmatpush.msrb.mxu2 %v17434_v58  ;;  %4905 = vmatpush.msrb.mxu3 %v13034_v35 }
 0x32c   : > { %4734 = vmatpush.msrb.mxu0 %v13044_v60  ;;  %4793 = vmatpush.msrb.mxu1 %v13071_v31  ;;  %v13316_v60 = vand.u32 4294901760, %v4975_v44 }
 0x32d   : > { %4858 = vmatpush.msrb.mxu2 %v4668_v52  ;;  %4907 = vmatpush.msrb.mxu3 %v13046_v6 }
 0x32e   : > { %4737 = vmatpush.msrb.mxu0 %v13056_v53  ;;  %4795 = vmatpush.msrb.mxu1 %v13083_v49  ;;  %v13323_v53 = vsub.f32 %v4977_v55, %v13312_v63  ;;  %v5072_v55 = vsub.f32 %v13410_v8, %v16948_v18 }
 0x32f   : > { %4862 = vmatpush.msrb.mxu2 %v4674_v54  ;;  %4909 = vmatpush.msrb.mxu3 %v13058_v40  ;;  %v4976_v40 = vld [vmem:[#allocation3 + $0x6f0] sm:$0xff]  ;;  %v13318_v6 = vpop.f32.mrf.mxu1 }
 0x330   : > { %4740 = vmatpush.msrb.mxu0 %v13069_v0  ;;  %4797 = vmatpush.msrb.mxu1 %v13095_v17  ;;  %v13314_v35 = vand.u32 4294901760, %v4976_v40 }
 0x331   : > { %4866 = vmatpush.msrb.mxu2 %v4680_v1  ;;  %4911 = vmatpush.msrb.mxu3 %v13071_v31  ;;  %v13306_v31 = vpop.f32.mrf.mxu0 }
 0x332   : > { %4743 = vmatpush.msrb.mxu0 %v13081_v33  ;;  %4799 = vmatpush.msrb.mxu1 %v13110_v14  ;;  %v13326_v0 = vsub.f32 %v4976_v40, %v13314_v35  ;;  %v13329_v33 = vsub.f32 %v4975_v44, %v13316_v60  ;;  %v13431_v40 = vand.u32 4294901760, %v4967_v51  ;;  %v16947_v44 = vand.u32 4294901760, %v13423_v43 }
 0x333   : > { %4870 = vmatpush.msrb.mxu2 %v4686_v22  ;;  %4913 = vmatpush.msrb.mxu3 %v13083_v49  ;;  %v13308_v49 = vpop.f32.mrf.mxu2  ;;  %v4973_v22 = vld [vmem:[#allocation3 + $0x6d8] sm:$0xff] }
 0x334   : > { %4746 = vmatpush.msrb.mxu0 %v13093_v41  ;;  %4801 = vmatpush.msrb.mxu1 %v13122_v42  ;;  %v16956_v52 = vand.u32 4294901760, %v13326_v0  ;;  %v13341_v54 = vpop.f32.mrf.mxu3 }
 0x335   : > { %4874 = vmatpush.msrb.mxu2 %v4692_v9  ;;  %4915 = vmatpush.msrb.mxu3 %v13095_v17  ;;  %v5029_v17 = vand.u32 4294901760, %v13323_v53 }
 0x336   : > { %4805 = vmatmul.f32.vlgmr.msrb.gmra.mxu1 %v4591_v12  ;;  %4749 = vmatpush.msrb.mxu0 %v13106_v39  ;;  %v16955_v39 = vand.u32 4294901760, %v13329_v33  ;;  %v13362_v12 = vand.u32 4294901760, %v4973_v22 }
 0x337   : > { %4878 = vmatpush.msrb.mxu2 %v4698_v24  ;;  %4917 = vmatpush.msrb.mxu3 %v13110_v14  ;;  %v4974_v14 = vld [vmem:[#allocation3 + $0x6e0] sm:$0xff]  ;;  %v4972_v24 = vld [vmem:[#allocation3 + $0x6d0] sm:$0xff]  ;;  %v13374_v27 = vpop.f32.mrf.mxu1 }
 0x338   : > { %4880 = vmatmul.f32.vlgmr.msrb.gmra.mxu2 %v13124_v32  ;;  %4752 = vmatpush.msrb.mxu0 %v13117_v21  ;;  %v5030_v21 = vsub.f32 %v13323_v53, %v5029_v17  ;;  %v5042_v1 = vsub.f32 %v13329_v33, %v16955_v39  ;;  %v13370_v11 = vsub.f32 %v4973_v22, %v13362_v12  ;;  %v5073_v22 = vand.u32 4294901760, %v5072_v55 }
 0x339   : > { %4919 = vmatpush.msrb.mxu3 %v13122_v42  ;;  %5134 = vmatpush.msra.mxu2 %v13323_v53  ;;  %v5036_v42 = vsub.f32 %v13326_v0, %v16956_v52 }
 0x33a   : > { %4921 = vmatmul.f32.vlgmr.msrb.gmra.mxu3 %v13124_v32  ;;  %4755 = vmatpush.msrb.mxu0 %v13135_v61  ;;  %v13320_v32 = vpop.f32.mrf.mxu0  ;;  %v13353_v61 = vand.u32 4294901760, %v4974_v14  ;;  %v5043_v3 = vand.u32 4294901760, %v5042_v1  ;;  %v16952_v10 = vand.u32 4294901760, %v13370_v11 }
 0x33b   : > { %5192 = vmatpush.msra.mxu3 %v13312_v63  ;;  %v13333_v41 = vpop.f32.mrf.mxu2  ;;  %5137 = vmatpush.msra.mxu2 %v13326_v0 }
 0x33c   : > { %4758 = vmatpush.msrb.mxu0 %v13149_v34  ;;  %v5037_v34 = vand.u32 4294901760, %v5036_v42  ;;  %v13358_v9 = vsub.f32 %v4974_v14, %v13353_v61  ;;  %v5054_v19 = vsub.f32 %v13370_v11, %v16952_v10  ;;  %v13437_v14 = vsub.f32 %v4968_v45, %v13426_v2 }
 0x33d   : > { %4761 = vmatmul.f32.vlgmr.msrb.gmra.mxu0 %v13146_v25  ;;  %5194 = vmatpush.msra.mxu3 %v13314_v35  ;;  %v5031_v25 = vand.u32 4294901760, %v5030_v21  ;;  %v4966_v21 = vld [vmem:[#allocation3 + $0x6a0] sm:$0xff] }
 0x33e   : > { %4811 = vmatmul.f32.gmra.mxu1 %v4599_v59  ;;  %4979 = vmatpush.msra.mxu0 %v13312_v63  ;;  %v16953_v5 = vand.u32 4294901760, %v13358_v9  ;;  %v13403_v26 = vpop.f32.mrf.mxu3  ;;  %v5055_v15 = vand.u32 4294901760, %v5054_v19 }
 0x33f   : > { %5196 = vmatpush.msra.mxu3 %v13316_v60  ;;  %5140 = vmatpush.msra.mxu2 %v13329_v33  ;;  %v13440_v42 = vpop.f32.mrf.mxu1 }
 0x340   : > { %4884 = vmatmul.f32.gmra.mxu2 %v13175_v30  ;;  %4981 = vmatpush.msra.mxu0 %v13314_v35  ;;  %v5048_v13 = vsub.f32 %v13358_v9, %v16953_v5 }
 0x341   : > { %5198 = vmatpush.msra.mxu3 %v13353_v61  ;;  %5032 = vmatpush.msra.mxu1 %v5031_v25  ;;  %v13445_v25 = vsub.f32 %v4967_v51, %v13431_v40 }
 0x342   : > { %4925 = vmatmul.f32.gmra.mxu3 %v13175_v30  ;;  %4983 = vmatpush.msra.mxu0 %v13316_v60  ;;  %v13367_v30 = vand.u32 4294901760, %v4972_v24  ;;  %v13376_v23 = vpop.f32.mrf.mxu0  ;;  %v5049_v59 = vand.u32 4294901760, %v5048_v13 }
 0x343   : > { %5143 = vmatpush.msra.mxu2 %v13358_v9  ;;  %5200 = vmatpush.msra.mxu3 %v13362_v12  ;;  %v13389_v4 = vpop.f32.mrf.mxu2  ;;  %v16944_v47 = vand.u32 4294901760, %v13445_v25 }
 0x344   : > { %4985 = vmatpush.msra.mxu0 %v13353_v61  ;;  %5038 = vmatpush.msra.mxu1 %v5037_v34  ;;  %v13382_v38 = vsub.f32 %v4972_v24, %v13367_v30  ;;  %v13447_v34 = vand.u32 4294901760, %v4966_v21  ;;  %v5078_v24 = vsub.f32 %v13423_v43, %v16947_v44 }
 0x345   : > { %4766 = vmatmul.f32.gmra.mxu0 %v13192_v37  ;;  %v13384_v37 = vand.u32 4294901760, %v4971_v57  ;;  %5146 = vmatpush.msra.mxu2 %v13370_v11 }
 0x346   : > { %4987 = vmatpush.msra.mxu0 %v13362_v12  ;;  %5202 = vmatpush.msra.mxu3 %v13367_v30  ;;  %v16951_v36 = vand.u32 4294901760, %v13382_v38  ;;  %v5079_v20 = vand.u32 4294901760, %v5078_v24 }
 0x347   : > { %5044 = vmatpush.msra.mxu1 %v5043_v3  ;;  %v13393_v62 = vsub.f32 %v4971_v57, %v13384_v37  ;;  %5149 = vmatpush.msra.mxu2 %v13382_v38  ;;  %v16946_v3 = vand.u32 4294901760, %v13437_v14  ;;  %v4965_v57 = vld [vmem:[#allocation3 + $0x698] sm:$0xff] }
 0x348   : > { %4989 = vmatpush.msra.mxu0 %v13367_v30  ;;  %5204 = vmatpush.msra.mxu3 %v13384_v37  ;;  %v5060_v16 = vsub.f32 %v13382_v38, %v16951_v36  ;;  %v13462_v19 = vand.u32 4294901760, %v4965_v57  ;;  %v13470_v45 = vpop.f32.mrf.mxu3  ;;  %v4959_v36 = vld [vmem:[#allocation3 + $0x670] sm:$0xff] }
 0x349   : > { %5050 = vmatpush.msra.mxu1 %v5049_v59  ;;  %v16950_v56 = vand.u32 4294901760, %v13393_v62  ;;  %5152 = vmatpush.msra.mxu2 %v13393_v62  ;;  %v13460_v59 = vsub.f32 %v4966_v21, %v13447_v34  ;;  %17435 = vst [vmem:[#allocation17_spill] sm:$0xff] %v13470_v45  ;;  %v4963_v21 = vld [vmem:[#allocation3 + $0x688] sm:$0xff]  ;;  %v17439_v45 = vand.u32 4294901760, %v13326_v0 }
 0x34a   : > { %4991 = vmatpush.msra.mxu0 %v13384_v37  ;;  %5206 = vmatpush.msra.mxu3 %v13395_v46  ;;  %v5061_v7 = vand.u32 4294901760, %v5060_v16  ;;  %v13442_v1 = vpop.f32.mrf.mxu0  ;;  %v5084_v16 = vsub.f32 %v13437_v14, %v16946_v3  ;;  %v13477_v51 = vsub.f32 %v4965_v57, %v13462_v19 }
 0x34b   : > { %v5066_v28 = vsub.f32 %v13393_v62, %v16950_v56  ;;  %5056 = vmatpush.msra.mxu1 %v5055_v15  ;;  %5155 = vmatpush.msra.mxu2 %v13410_v8  ;;  %v13456_v13 = vpop.f32.mrf.mxu2  ;;  %v4964_v15 = vld [vmem:[#allocation3 + $0x690] sm:$0xff] }
 0x34c   : > { %4993 = vmatpush.msra.mxu0 %v13395_v46  ;;  %5208 = vmatpush.msra.mxu3 %v13412_v50  ;;  %v5085_v55 = vand.u32 4294901760, %v5084_v16  ;;  %v4962_v16 = vld [vmem:[#allocation3 + $0x680] sm:$0xff] }
 0x34d   : > { %v5067_v58 = vand.u32 4294901760, %v5066_v28  ;;  %5062 = vmatpush.msra.mxu1 %v5061_v7  ;;  %5158 = vmatpush.msra.mxu2 %v13423_v43  ;;  %v5090_v7 = vsub.f32 %v13445_v25, %v16944_v47  ;;  %v16945_v28 = vand.u32 4294901760, %v13460_v59  ;;  %v16949_v47 = vand.u32 4294901760, %v13477_v51 }
 0x34e   : > { %4995 = vmatpush.msra.mxu0 %v13412_v50  ;;  %5210 = vmatpush.msra.mxu3 %v13426_v2  ;;  %v13500_v44 = vand.u32 4294901760, %v4962_v16 }
 0x34f   : > { %5068 = vmatpush.msra.mxu1 %v5067_v58  ;;  %5161 = vmatpush.msra.mxu2 %v13437_v14  ;;  %v13479_v58 = vand.u32 4294901760, %v4964_v15  ;;  %v5096_v24 = vsub.f32 %v13460_v59, %v16945_v28  ;;  %v5102_v28 = vsub.f32 %v13477_v51, %v16949_v47 }
 0x350   : > { %4997 = vmatpush.msra.mxu0 %v13426_v2  ;;  %5212 = vmatpush.msra.mxu3 %v13431_v40  ;;  %v13516_v56 = vsub.f32 %v4962_v16, %v13500_v44 }
 0x351   : > { %5074 = vmatpush.msra.mxu1 %v5073_v22  ;;  %5164 = vmatpush.msra.mxu2 %v13445_v25  ;;  %v5091_v22 = vand.u32 4294901760, %v5090_v7  ;;  %v13489_v57 = vsub.f32 %v4964_v15, %v13479_v58  ;;  %v5097_v7 = vand.u32 4294901760, %v5096_v24  ;;  %v5103_v18 = vand.u32 4294901760, %v5102_v28 }
 0x352   : > { %4999 = vmatpush.msra.mxu0 %v13431_v40  ;;  %5214 = vmatpush.msra.mxu3 %v13447_v34  ;;  %v16958_v5 = vand.u32 4294901760, %v13516_v56 }
 0x353   : > { %5080 = vmatpush.msra.mxu1 %v5079_v20  ;;  %5167 = vmatpush.msra.mxu2 %v13460_v59  ;;  %v13494_v20 = vand.u32 4294901760, %v4963_v21  ;;  %v16954_v3 = vand.u32 4294901760, %v13489_v57  ;;  %v13510_v24 = vpop.f32.mrf.mxu0  ;;  %v13522_v10 = vpop.f32.mrf.mxu2 }
 0x354   : > { %5001 = vmatpush.msra.mxu0 %v13447_v34  ;;  %5216 = vmatpush.msra.mxu3 %v13462_v19  ;;  %17436 = vst [vmem:[#allocation18_spill] sm:$0xff] %v13522_v10  ;;  %v13535_v39 = vpop.f32.mrf.mxu3 }
 0x355   : > { %5086 = vmatpush.msra.mxu1 %v5085_v55  ;;  %5170 = vmatpush.msra.mxu2 %v13477_v51  ;;  %v13505_v15 = vsub.f32 %v4963_v21, %v13494_v20  ;;  %v13508_v55 = vpop.f32.mrf.mxu1  ;;  %v5108_v47 = vsub.f32 %v13489_v57, %v16954_v3  ;;  %17437 = vst [vmem:[#allocation19_spill] sm:$0xff] %v13535_v39  ;;  %v4958_v39 = vld [vmem:[#allocation3 + $0x668] sm:$0xff] }
 0x356   : > { %5003 = vmatpush.msra.mxu0 %v13462_v19  ;;  %5218 = vmatpush.msra.mxu3 %v13479_v58 }
 0x357   : > { %5092 = vmatpush.msra.mxu1 %v5091_v22  ;;  %5173 = vmatpush.msra.mxu2 %v13489_v57  ;;  %v16957_v21 = vand.u32 4294901760, %v13505_v15  ;;  %v4960_v22 = vld [vmem:[#allocation3 + $0x678] sm:$0xff]  ;;  %v5109_v28 = vand.u32 4294901760, %v5108_v47  ;;  %v5120_v47 = vsub.f32 %v13516_v56, %v16958_v5  ;;  %v13550_v5 = vand.u32 4294901760, %v4958_v39 }
 0x358   : > { %5005 = vmatpush.msra.mxu0 %v13479_v58  ;;  %5220 = vmatpush.msra.mxu3 %v13494_v20  ;;  %v13525_v3 = vand.u32 4294901760, %v4960_v22 }
 0x359   : > { %5098 = vmatpush.msra.mxu1 %v5097_v7  ;;  %5176 = vmatpush.msra.mxu2 %v13505_v15  ;;  %v5114_v16 = vsub.f32 %v13505_v15, %v16957_v21  ;;  %v13533_v7 = vand.u32 4294901760, %v4959_v36  ;;  %v5121_v21 = vand.u32 4294901760, %v5120_v47  ;;  %17440 = vst [vmem:[#allocation21_spill] sm:$0xff] %v13550_v5 }
 0x35a   : > { %5007 = vmatpush.msra.mxu0 %v13494_v20  ;;  %5222 = vmatpush.msra.mxu3 %v13500_v44  ;;  %v13542_v52 = vsub.f32 %v4960_v22, %v13525_v3 }
 0x35b   : > { %5104 = vmatpush.msra.mxu1 %v5103_v18  ;;  %5179 = vmatpush.msra.mxu2 %v13516_v56  ;;  %v5115_v18 = vand.u32 4294901760, %v5114_v16  ;;  %v13553_v22 = vsub.f32 %v4959_v36, %v13533_v7  ;;  %v13565_v16 = vsub.f32 %v4958_v39, %v13550_v5 }
 0x35c   : > { %5009 = vmatpush.msra.mxu0 %v13500_v44  ;;  %17438 = vst [vmem:[#allocation20_spill] sm:$0xff] %v13542_v52  ;;  %v16959_v10 = vand.u32 4294901760, %v13542_v52  ;;  %v13569_v47 = vpop.f32.mrf.mxu0 }
 0x35d   : > { %5351 = vmatpush.msrb.mxu2 %v13525_v3  ;;  %5110 = vmatpush.msra.mxu1 %v5109_v28  ;;  %v17441_v28 = vand.u32 4294901760, %v13329_v33  ;;  %v16964_v0 = vand.u32 4294901760, %v13553_v22  ;;  %17443 = vst [vmem:[#allocation11_spill] sm:$0xff] %v13565_v16  ;;  %v13567_v36 = vpop.f32.mrf.mxu1  ;;  %v17444_v33 = vand.u32 4294901760, %v13358_v9  ;;  %v16967_v39 = vand.u32 4294901760, %v13565_v16 }
 0x35e   : > { %5239 = vmatpush.msrb.mxu0 %v5029_v17  ;;  %v5402_v53 = vsub.f32 %v13542_v52, %v16959_v10  ;;  %v4957_v17 = vld [vmem:[#allocation3 + $0x660] sm:$0xff]  ;;  %v4956_v10 = vld [vmem:[#allocation3 + $0x658] sm:$0xff]  ;;  %v13584_v52 = vpop.f32.mrf.mxu2 }
 0x35f   : > { %5353 = vmatpush.msrb.mxu2 %v13533_v7  ;;  %5116 = vmatpush.msra.mxu1 %v5115_v18 }
 0x360   : > { %5243 = vmatpush.msrb.mxu0 %v17439_v45  ;;  %v13562_v45 = vand.u32 4294901760, %v4957_v17  ;;  %v5403_v18 = vand.u32 4294901760, %v5402_v53  ;;  %v5414_v53 = vsub.f32 %v13565_v16, %v16967_v39 }
 0x361   : > { %5122 = vmatpush.msra.mxu1 %v5121_v21  ;;  %5355 = vmatpush.msrb.mxu2 %v13550_v5  ;;  %v5408_v21 = vsub.f32 %v13553_v22, %v16964_v0 }
 0x362   : > { %5247 = vmatpush.msrb.mxu0 %v17441_v28  ;;  %17442 = vst [vmem:[#allocation10_spill] sm:$0xff] %v13562_v45  ;;  %v13579_v28 = vand.u32 4294901760, %v4956_v10  ;;  %v13582_v5 = vsub.f32 %v4957_v17, %v13562_v45  ;;  %5404 = vmatpush.msrb.mxu3 %v5403_v18  ;;  %v17447_v17 = vand.u32 4294901760, %v13370_v11  ;;  %v4954_v18 = vld [vmem:[#allocation3 + $0x648] sm:$0xff] }
 0x363   : > { %5310 = vmatpush.msrb.mxu1 %v13312_v63  ;;  %5357 = vmatpush.msrb.mxu2 %v13562_v45  ;;  %v4955_v63 = vld [vmem:[#allocation3 + $0x650] sm:$0xff]  ;;  %v5409_v9 = vand.u32 4294901760, %v5408_v21  ;;  %v13596_v45 = vpop.f32.mrf.mxu3  ;;  %v5415_v21 = vand.u32 4294901760, %v5414_v53  ;;  %v13606_v16 = vand.u32 4294901760, %v4954_v18 }
 0x364   : > { %5251 = vmatpush.msrb.mxu0 %v17444_v33  ;;  %17445 = vst [vmem:[#allocation12_spill] sm:$0xff] %v13582_v5  ;;  %v16970_v33 = vand.u32 4294901760, %v13582_v5  ;;  %v13592_v0 = vand.u32 4294901760, %v4955_v63 }
 0x365   : > { %5312 = vmatpush.msrb.mxu1 %v13314_v35  ;;  %5359 = vmatpush.msrb.mxu2 %v13579_v28  ;;  %v13600_v35 = vsub.f32 %v4956_v10, %v13579_v28  ;;  %17448 = vst [vmem:[#allocation22_spill] sm:$0xff] %v13606_v16  ;;  %v4953_v10 = vld [vmem:[#allocation3 + $0x640] sm:$0xff] }
 0x366   : > { %17446 = vst [vmem:[#allocation9_spill] sm:$0xff] %v13592_v0  ;;  %5255 = vmatpush.msrb.mxu0 %v17447_v17  ;;  %5410 = vmatpush.msrb.mxu3 %v5409_v9  ;;  %v5420_v39 = vsub.f32 %v13582_v5, %v16970_v33  ;;  %v13609_v11 = vsub.f32 %v4955_v63, %v13592_v0  ;;  %v17450_v17 = vand.u32 4294901760, %v13382_v38  ;;  %v13617_v33 = vand.u32 4294901760, %v4953_v10 }
 0x367   : > { %5314 = vmatpush.msrb.mxu1 %v13316_v60  ;;  %5361 = vmatpush.msrb.mxu2 %v13592_v0  ;;  %v16977_v60 = vand.u32 4294901760, %v13600_v35  ;;  %v13620_v5 = vsub.f32 %v4954_v18, %v13606_v16 }
 0x368   : > { %17449 = vst [vmem:[#allocation23_spill] sm:$0xff] %v13609_v11  ;;  %5259 = vmatpush.msrb.mxu0 %v17450_v17  ;;  %5416 = vmatpush.msrb.mxu3 %v5415_v21  ;;  %v5421_v9 = vand.u32 4294901760, %v5420_v39  ;;  %v16978_v53 = vand.u32 4294901760, %v13609_v11  ;;  %v4952_v39 = vld [vmem:[#allocation3 + $0x638] sm:$0xff]  ;;  %v17452_v21 = vand.u32 4294901760, %v13393_v62 }
 0x369   : > { %5316 = vmatpush.msrb.mxu1 %v13353_v61  ;;  %5363 = vmatpush.msrb.mxu2 %v13606_v16  ;;  %17451 = vst [vmem:[#allocation14_spill] sm:$0xff] %v13617_v33  ;;  %v5426_v38 = vsub.f32 %v13600_v35, %v16977_v60  ;;  %v16983_v17 = vand.u32 4294901760, %v13620_v5  ;;  %v13637_v16 = vand.u32 4294901760, %v4952_v39 }
 0x36a   : > { %5263 = vmatpush.msrb.mxu0 %v17452_v21  ;;  %5422 = vmatpush.msrb.mxu3 %v5421_v9  ;;  %v5432_v18 = vsub.f32 %v13609_v11, %v16978_v53  ;;  %v4951_v21 = vld [vmem:[#allocation3 + $0x630] sm:$0xff]  ;;  %v17453_v9 = vand.u32 4294901760, %v13410_v8 }
 0x36b   : > { %v13622_v63 = vpop.f32.mrf.mxu1  ;;  %5318 = vmatpush.msrb.mxu1 %v13362_v12  ;;  %5365 = vmatpush.msrb.mxu2 %v13617_v33  ;;  %v13640_v12 = vsub.f32 %v4953_v10, %v13617_v33  ;;  %v5427_v62 = vand.u32 4294901760, %v5426_v38  ;;  %v5438_v53 = vsub.f32 %v13620_v5, %v16983_v17  ;;  %v13652_v10 = vand.u32 4294901760, %v4951_v21  ;;  %v4950_v38 = vld [vmem:[#allocation3 + $0x628] sm:$0xff] }
 0x36c   : > { %5267 = vmatpush.msrb.mxu0 %v17453_v9  ;;  %v5433_v60 = vand.u32 4294901760, %v5432_v18  ;;  %v3549_v33 = vadd.f32 %v13304_v29, %v13306_v31  ;;  %v13660_v8 = vsub.f32 %v4952_v39, %v13637_v16  ;;  %v13666_v17 = vand.u32 4294901760, %v4950_v38 }
 0x36d   : > { %5320 = vmatpush.msrb.mxu1 %v13367_v30  ;;  %5367 = vmatpush.msrb.mxu2 %v13637_v16  ;;  %v16984_v11 = vand.u32 4294901760, %v13640_v12  ;;  %v5439_v18 = vand.u32 4294901760, %v5438_v53  ;;  %v17454_v29 = vand.u32 4294901760, %v13423_v43  ;;  %v4949_v53 = vld [vmem:[#allocation3 + $0x620] sm:$0xff]  ;;  %v17458_v43 = vand.u32 4294901760, %v13437_v14 }
 0x36e   : > { %5428 = vmatpush.msrb.mxu3 %v5427_v62  ;;  %v16985_v31 = vand.u32 4294901760, %v13660_v8  ;;  %v13676_v62 = vand.u32 4294901760, %v4949_v53 }
 0x36f   : > { %5322 = vmatpush.msrb.mxu1 %v13384_v37  ;;  %v5444_v9 = vsub.f32 %v13640_v12, %v16984_v11  ;;  %5369 = vmatpush.msrb.mxu2 %v13652_v10  ;;  %v13673_v37 = vsub.f32 %v4951_v21, %v13652_v10  ;;  %v13679_v11 = vsub.f32 %v4950_v38, %v13666_v17 }
 0x370   : > { %5271 = vmatpush.msrb.mxu0 %v17454_v29  ;;  %5434 = vmatpush.msrb.mxu3 %v5433_v60  ;;  %17456 = vst [vmem:[#allocation15_spill] sm:$0xff] %v13676_v62  ;;  %v5450_v60 = vsub.f32 %v13660_v8, %v16985_v31  ;;  %v13694_v14 = vsub.f32 %v4949_v53, %v13676_v62  ;;  %v4947_v31 = vld [vmem:[#allocation3 + $0x610] sm:$0xff] }
 0x371   : > { %5324 = vmatpush.msrb.mxu1 %v13395_v46  ;;  %17455 = vst [vmem:[#allocation13_spill] sm:$0xff] %v13673_v37  ;;  %v5445_v39 = vand.u32 4294901760, %v5444_v9  ;;  %5371 = vmatpush.msrb.mxu2 %v13666_v17  ;;  %v3607_v46 = vadd.f32 %v13308_v49, %v3549_v33  ;;  %v16989_v21 = vand.u32 4294901760, %v13673_v37  ;;  %v4948_v9 = vld [vmem:[#allocation3 + $0x618] sm:$0xff]  ;;  %v16988_v38 = vand.u32 4294901760, %v13679_v11 }
 0x372   : > { %17457 = vst [vmem:[#allocation16_spill] sm:$0xff] %v13679_v11  ;;  %5275 = vmatpush.msrb.mxu0 %v17458_v43  ;;  %5440 = vmatpush.msrb.mxu3 %v5439_v18  ;;  %v13691_v29 = vand.u32 4294901760, %v4948_v9  ;;  %v17459_v49 = vand.u32 4294901760, %v13445_v25  ;;  %v5451_v18 = vand.u32 4294901760, %v5450_v60  ;;  %v3553_v25 = vadd.f32 %v13318_v6, %v13320_v32  ;;  %v4945_v32 = vld [vmem:[#allocation3 + $0x600] sm:$0xff] }
 0x373   : > { %v13642_v0 = vpop.f32.mrf.mxu2  ;;  %5326 = vmatpush.msrb.mxu1 %v13412_v50  ;;  %5373 = vmatpush.msrb.mxu2 %v13676_v62  ;;  %v5456_v43 = vsub.f32 %v13673_v37, %v16989_v21  ;;  %v5462_v53 = vsub.f32 %v13679_v11, %v16988_v38  ;;  %v4946_v21 = vld [vmem:[#allocation3 + $0x608] sm:$0xff]  ;;  %v17461_v37 = vand.u32 4294901760, %v13694_v14 }
 0x374   : > { %5279 = vmatpush.msrb.mxu0 %v17459_v49  ;;  %v13698_v50 = vpop.f32.mrf.mxu1  ;;  %5446 = vmatpush.msrb.mxu3 %v5445_v39  ;;  %v13711_v49 = vand.u32 4294901760, %v4947_v31  ;;  %v13714_v62 = vsub.f32 %v4948_v9, %v13691_v29  ;;  %v3651_v39 = vadd.f32 %v13310_v48, %v3607_v46  ;;  %v17462_v48 = vand.u32 4294901760, %v13477_v51 }
 0x375   : > { %v13624_v61 = vpop.f32.mrf.mxu0  ;;  %5328 = vmatpush.msrb.mxu1 %v13426_v2  ;;  %5375 = vmatpush.msrb.mxu2 %v13691_v29  ;;  %v17460_v2 = vand.u32 4294901760, %v13460_v59  ;;  %v5457_v38 = vand.u32 4294901760, %v5456_v43  ;;  %v5463_v11 = vand.u32 4294901760, %v5462_v53  ;;  %v5468_v9 = vsub.f32 %v13694_v14, %v17461_v37 }
 0x376   : > { %v13656_v30 = vpop.f32.mrf.mxu3  ;;  %5452 = vmatpush.msrb.mxu3 %v5451_v18  ;;  %v5473_v59 = vand.u32 4294901760, %v13714_v62  ;;  %v13737_v6 = vsub.f32 %v4947_v31, %v13711_v49  ;;  %v3726_v37 = vadd.f32 %v13376_v23, %v3651_v39  ;;  %v17463_v51 = vand.u32 4294901760, %v13489_v57 }
 0x377   : > { %5283 = vmatpush.msrb.mxu0 %v17460_v2  ;;  %5330 = vmatpush.msrb.mxu1 %v13431_v40  ;;  %v13734_v40 = vand.u32 4294901760, %v4946_v21  ;;  %v5469_v18 = vand.u32 4294901760, %v5468_v9  ;;  %v3612_v23 = vadd.f32 %v13333_v41, %v3553_v25  ;;  %v17464_v2 = vand.u32 4294901760, %v13505_v15 }
 0x378   : > { %5377 = vmatpush.msrb.mxu2 %v13711_v49  ;;  %5458 = vmatpush.msrb.mxu3 %v5457_v38  ;;  %v5474_v43 = vsub.f32 %v13714_v62, %v5473_v59  ;;  %v13747_v38 = vand.u32 4294901760, %v4945_v32  ;;  %v3767_v41 = vadd.f32 %v13374_v27, %v3726_v37  ;;  %v17465_v15 = vand.u32 4294901760, %v13516_v56 }
 0x379   : > { %5287 = vmatpush.msrb.mxu0 %v17462_v48  ;;  %5332 = vmatpush.msrb.mxu1 %v13447_v34  ;;  %v5479_v34 = vand.u32 4294901760, %v13737_v6  ;;  %v13750_v31 = vsub.f32 %v4946_v21, %v13734_v40 }
 0x37a   : > { %5464 = vmatpush.msrb.mxu3 %v5463_v11  ;;  %v5475_v53 = vand.u32 4294901760, %v5474_v43  ;;  %5379 = vmatpush.msrb.mxu2 %v13734_v40  ;;  %v13762_v21 = vsub.f32 %v4945_v32, %v13747_v38  ;;  %v3657_v32 = vadd.f32 %v13341_v54, %v3612_v23 }
 0x37b   : > { %5291 = vmatpush.msrb.mxu0 %v17463_v51  ;;  %5334 = vmatpush.msrb.mxu1 %v13462_v19  ;;  %v5480_v19 = vsub.f32 %v13737_v6, %v5479_v34  ;;  %v5485_v11 = vand.u32 4294901760, %v13750_v31  ;;  %v4312_v51 = vadd.f32 %v13622_v63, %v13624_v61 }
 0x37c   : > { %5470 = vmatpush.msrb.mxu3 %v5469_v18  ;;  %5381 = vmatpush.msrb.mxu2 %v13747_v38  ;;  %v5491_v48 = vand.u32 4294901760, %v13762_v21  ;;  %v3730_v37 = vadd.f32 %v13442_v1, %v3657_v32 }
 0x37d   : > { %v13719_v60 = vpop.f32.mrf.mxu2  ;;  %5295 = vmatpush.msrb.mxu0 %v17464_v2  ;;  %5336 = vmatpush.msrb.mxu1 %v13479_v58  ;;  %v5481_v58 = vand.u32 4294901760, %v5480_v19  ;;  %v5486_v9 = vsub.f32 %v13750_v31, %v5485_v11  ;;  %v4370_v19 = vadd.f32 %v13642_v0, %v4312_v51  ;;  %v17468_v51 = vld [vmem:[#allocation19_spill] sm:$0xff] }
 0x37e   : > { %v13700_v33 = vpop.f32.mrf.mxu0  ;;  %5476 = vmatpush.msrb.mxu3 %v5475_v53  ;;  %v5492_v56 = vsub.f32 %v13762_v21, %v5491_v48 }
 0x37f   : > { %5299 = vmatpush.msrb.mxu0 %v17465_v15  ;;  %5338 = vmatpush.msrb.mxu1 %v13494_v20  ;;  %v5487_v27 = vand.u32 4294901760, %v5486_v9  ;;  %v3812_v20 = vadd.f32 %v13389_v4, %v3767_v41  ;;  %v4316_v63 = vadd.f32 %v13698_v50, %v13700_v33 }
 0x380   : > { %v13731_v46 = vpop.f32.mrf.mxu3  ;;  %5482 = vmatpush.msrb.mxu3 %v5481_v58  ;;  %v5493_v43 = vand.u32 4294901760, %v5492_v56  ;;  %v4414_v58 = vadd.f32 %v13656_v30, %v4370_v19  ;;  %v9801_v19 = vld [vmem:[#allocation5 + $0x2] ss:$0 sm:$0xff] }
 0x381   : > { %5340 = vmatpush.msrb.mxu1 %v13500_v44  ;;  %v3921_v54 = vadd.f32 %v13403_v26, %v3812_v20  ;;  %v3771_v44 = vadd.f32 %v13440_v42, %v3730_v37  ;;  %v17466_v26 = vld [vmem:[#allocation17_spill] sm:$0xff] }
 0x382   : > { %5488 = vmatpush.msrb.mxu3 %v5487_v27 }
 0x383   : > { %v3979_v2 = vadd.f32 %v13510_v24, %v3921_v54  ;;  %v3820_v4 = vadd.f32 %v13456_v13, %v3771_v44  ;;  %v17467_v24 = vld [vmem:[#allocation18_spill] sm:$0xff]  ;;  %v4375_v13 = vadd.f32 %v13719_v60, %v4316_v63 }
 0x384   : > { %5494 = vmatpush.msrb.mxu3 %v5493_v43 }
 0x385   : > { %v4023_v41 = vadd.f32 %v13508_v55, %v3979_v2  ;;  %v3925_v61 = vadd.f32 %v17466_v26, %v3820_v4  ;;  %v4420_v33 = vadd.f32 %v13731_v46, %v4375_v13  ;;  %v17471_v13 = vld [vmem:[#allocation21_spill] sm:$0xff] }
 0x387   : > { %v4098_v56 = vadd.f32 %v17467_v24, %v4023_v41  ;;  %v3984_v0 = vadd.f32 %v13569_v47, %v3925_v61 }
 0x389   : > { %v4139_v54 = vadd.f32 %v17468_v51, %v4098_v56  ;;  %v4029_v50 = vadd.f32 %v13567_v36, %v3984_v0  ;;  %v17473_v51 = vld [vmem:[#allocation10_spill] sm:$0xff] }
 0x38b   : > { %v4102_v60 = vadd.f32 %v13584_v52, %v4029_v50 }
 0x38d   : > { %v4143_v36 = vadd.f32 %v13596_v45, %v4102_v60  ;;  %v17469_v45 = vld [vmem:[#allocation20_spill] sm:$0xff] }
 0x38e   : > { %v17470_v24 = vand.u32 4294901760, %v17469_v45 }
 0x38f   : > { %v4529_v57 = vpop.f32.mrf.mxu1 }
 0x397   : > { %v4595_v25 = vpop.f32.mrf.mxu2 }
 0x398   : > { %v4533_v23 = vpop.f32.mrf.mxu1 }
 0x399   : > { %v4488_v39 = vpop.f32.mrf.mxu0 }
 0x39a   : > { %v4704_v18 = vpop.f32.mrf.mxu3  ;;  %v4489_v42 = vadd.f32 %v4488_v39, %v4414_v58 }
 0x39b   : > { %v4705_v9 = vadd.f32 %v4704_v18, %v4595_v25 }
 0x39c   : > { %v4530_v55 = vadd.f32 %v4529_v57, %v4489_v42 }
 0x39e   : > { %v4536_v44 = vadd.f32 %v4530_v55, %v4139_v54  ;;  %v17474_v54 = vld [vmem:[#allocation11_spill] sm:$0xff] }
 0x39f   : > { %v17475_v50 = vand.u32 4294901760, %v17474_v54 }
 0x3a1   : > { %v4603_v15 = vpop.f32.mrf.mxu2 }
 0x3a2   : > { %v4492_v53 = vpop.f32.mrf.mxu0 }
 0x3a3   : > { %v4493_v25 = vadd.f32 %v4492_v53, %v4420_v33 }
 0x3a4   : > { %v4708_v1 = vpop.f32.mrf.mxu3 }
 0x3a5   : > { %v4709_v18 = vadd.f32 %v4708_v1, %v4603_v15  ;;  %v4534_v58 = vadd.f32 %v4533_v23, %v4493_v25 }
 0x3a7   : > { %v4537_v15 = vadd.f32 %v4534_v58, %v4143_v36 }
 0x3b3   : > { %v4806_v32 = vpop.f32.mrf.mxu1 }
 0x3ba   : > { %v4762_v27 = vpop.f32.mrf.mxu0 }
 0x3bb   : > { %v4763_v20 = vadd.f32 %v4762_v27, %v4705_v9  ;;  %v4881_v37 = vpop.f32.mrf.mxu2  ;;  %v4812_v57 = vpop.f32.mrf.mxu1 }
 0x3bd   : > { %v4807_v43 = vadd.f32 %v4806_v32, %v4763_v20  ;;  %v4922_v30 = vpop.f32.mrf.mxu3  ;;  %v17472_v20 = vand.u32 4294901760, %v13553_v22 }
 0x3bf   : > { %v4882_v39 = vadd.f32 %v4881_v37, %v4807_v43 }
 0x3c1   : > { %v4923_v2 = vadd.f32 %v4922_v30, %v4882_v39 }
 0x3c2   : > { %v4767_v47 = vpop.f32.mrf.mxu0 }
 0x3c3   : > { %v4929_v4 = vadd.f32 %v4923_v2, %v4536_v44  ;;  %v4768_v41 = vadd.f32 %v4767_v47, %v4709_v18  ;;  %v4885_v61 = vpop.f32.mrf.mxu2  ;;  %v17478_v44 = vld [vmem:[#allocation9_spill] sm:$0xff] }
 0x3c5   : > { %v4936_v63 = vadd.f32 %v9801_v19, %v4929_v4  ;;  %v4813_v26 = vadd.f32 %v4812_v57, %v4768_v41  ;;  %v4926_v9 = vpop.f32.mrf.mxu3  ;;  %v17480_v41 = vld [vmem:[#allocation22_spill] sm:$0xff]  ;;  %v17481_v57 = vld [vmem:[#allocation23_spill] sm:$0xff] }
 0x3c6   : > { %v17482_v58 = vand.u32 4294901760, %v17481_v57 }
 0x3c7   : > { %v4938_v42 = vmax.f32 %v4936_v63, 0.0  ;;  %v4886_v46 = vadd.f32 %v4885_v61, %v4813_v26  ;;  %v5740_v63 = vld [vmem:[#allocation3 + $0x778] sm:$0xff]  ;;  %v17483_v26 = vld [vmem:[#allocation14_spill] sm:$0xff]  ;;  %v17484_v61 = vand.u32 4294901760, %v13620_v5 }
 0x3c9   : > { %v13800_v53 = vand.u32 4294901760, %v4938_v42  ;;  %4940 = vst [vmem:[#allocation2 + $0x8] sm:$0xff] %v4938_v42  ;;  %v4927_v1 = vadd.f32 %v4926_v9, %v4886_v46  ;;  %v5739_v46 = vld [vmem:[#allocation3 + $0x770] sm:$0xff]  ;;  %v17485_v9 = vand.u32 4294901760, %v13640_v12 }
 0x3cb   : > { %v5011_v32 = vsub.f32 %v4938_v42, %v13800_v53  ;;  %v4930_v52 = vadd.f32 %v4927_v1, %v4537_v15  ;;  %5124 = vmatmul.f32.vlgmr.msra.gmra.mxu1 %v13800_v53  ;;  %v13854_v42 = vand.u32 4294901760, %v5740_v63  ;;  %v13863_v1 = vand.u32 4294901760, %v5739_v46 }
 0x3cc   : > { %5564 = vmatpush.msra.mxu1 %v13525_v3 }
 0x3cd   : > { %v4937_v23 = vadd.f32 %v9801_v19, %v4930_v52  ;;  %5182 = vmatmul.f32.vlgmr.msra.gmra.mxu2 %v5011_v32  ;;  %v5012_v27 = vand.u32 4294901760, %v5011_v32  ;;  %v17479_v19 = vand.u32 4294901760, %v13600_v35  ;;  %v17486_v52 = vand.u32 4294901760, %v13660_v8 }
 0x3ce   : > { %5566 = vmatpush.msra.mxu1 %v13533_v7  ;;  %5611 = vmatpush.msra.mxu2 %v17470_v24 }
 0x3cf   : > { %v4939_v56 = vmax.f32 %v4937_v23, 0.0  ;;  %5226 = vmatmul.f32.vlgmr.msra.gmra.mxu3 %v5012_v27  ;;  %v5013_v0 = vsub.f32 %v5011_v32, %v5012_v27  ;;  %v5738_v32 = vld [vmem:[#allocation3 + $0x768] sm:$0xff]  ;;  %v5737_v23 = vld [vmem:[#allocation3 + $0x760] sm:$0xff] }
 0x3d0   : > { %5568 = vmatpush.msra.mxu1 %v17471_v13  ;;  %5615 = vmatpush.msra.mxu2 %v17472_v20  ;;  %v4942_v37 = vld [vmem:[#allocation2 + $0x7] sm:$0xff]  ;;  %v13875_v27 = vand.u32 4294901760, %v5738_v32  ;;  %v13889_v20 = vand.u32 4294901760, %v5737_v23 }
 0x3d1   : > { %4941 = vst [vmem:[#allocation2 + $0x10] sm:$0xff] %v4939_v56  ;;  %5682 = vmatpush.msra.mxu3 %v13525_v3  ;;  %v5014_v55 = vand.u32 4294901760, %v5013_v0  ;;  %v13812_v43 = vand.u32 4294901760, %v4939_v56  ;;  %v13814_v30 = vand.u32 4294901760, %v4942_v37  ;;  %v17476_v3 = vld [vmem:[#allocation12_spill] sm:$0xff]  ;;  %v13884_v0 = vsub.f32 %v5739_v46, %v13863_v1 }
 0x3d2   : > { %5570 = vmatpush.msra.mxu1 %v17473_v51  ;;  %5619 = vmatpush.msra.mxu2 %v17475_v50  ;;  %v17477_v25 = vand.u32 4294901760, %v17476_v3 }
 0x3d3   : > { %5684 = vmatpush.msra.mxu3 %v13533_v7  ;;  %5015 = vmatmul.f32.vlgmr.msra.gmra.mxu0 %v5014_v55  ;;  %v5019_v33 = vsub.f32 %v4939_v56, %v13812_v43  ;;  %v13822_v39 = vsub.f32 %v4942_v37, %v13814_v30  ;;  %v17489_v37 = vld [vmem:[#allocation15_spill] sm:$0xff]  ;;  %v17490_v55 = vld [vmem:[#allocation16_spill] sm:$0xff] }
 0x3d4   : > { %5128 = vmatmul.f32.gmra.mxu1 %v13812_v43  ;;  %5506 = vmatpush.msra.mxu0 %v17469_v45  ;;  %v17487_v45 = vld [vmem:[#allocation13_spill] sm:$0xff] }
 0x3d5   : > { %5572 = vmatpush.msra.mxu1 %v13579_v28  ;;  %5623 = vmatpush.msra.mxu2 %v17477_v25  ;;  %v5020_v18 = vand.u32 4294901760, %v5019_v33  ;;  %v5384_v7 = vand.u32 4294901760, %v13822_v39  ;;  %v17488_v24 = vand.u32 4294901760, %v17487_v45 }
 0x3d6   : > { %5686 = vmatpush.msra.mxu3 %v17471_v13  ;;  %5187 = vmatmul.f32.gmra.mxu2 %v5019_v33  ;;  %v5736_v13 = vld [vmem:[#allocation3 + $0x758] sm:$0xff] }
 0x3d7   : > { %5509 = vmatpush.msra.mxu0 %v13553_v22  ;;  %5574 = vmatpush.msra.mxu1 %v17478_v44  ;;  %v5021_v2 = vsub.f32 %v5019_v33, %v5020_v18  ;;  %v5385_v22 = vsub.f32 %v13822_v39, %v5384_v7  ;;  %v13899_v50 = vand.u32 4294901760, %v5736_v13  ;;  %v5735_v33 = vld [vmem:[#allocation3 + $0x750] sm:$0xff] }
 0x3d8   : > { %5627 = vmatpush.msra.mxu2 %v17479_v19  ;;  %5688 = vmatpush.msra.mxu3 %v17473_v51  ;;  %v4943_v47 = vld [vmem:[#allocation2 + $0xf] sm:$0xff]  ;;  %v17491_v51 = vand.u32 4294901760, %v17490_v55 }
 0x3d9   : > { %5232 = vmatmul.f32.gmra.mxu3 %v5020_v18  ;;  %5512 = vmatpush.msra.mxu0 %v17474_v54  ;;  %v5022_v60 = vand.u32 4294901760, %v5021_v2  ;;  %v13837_v4 = vand.u32 4294901760, %v4943_v47  ;;  %v13897_v54 = vsub.f32 %v5738_v32, %v13875_v27  ;;  %v13918_v18 = vsub.f32 %v5736_v13, %v13899_v50  ;;  %v5733_v2 = vld [vmem:[#allocation3 + $0x740] sm:$0xff] }
 0x3da   : > { %5576 = vmatpush.msra.mxu1 %v17480_v41  ;;  %5631 = vmatpush.msra.mxu2 %v17482_v58  ;;  %v13945_v58 = vand.u32 4294901760, %v5733_v2 }
 0x3db   : > { %5690 = vmatpush.msra.mxu3 %v13579_v28  ;;  %5515 = vmatpush.msra.mxu0 %v17476_v3  ;;  %v13851_v36 = vsub.f32 %v4943_v47, %v13837_v4  ;;  %v5386_v28 = vand.u32 4294901760, %v5385_v22  ;;  %v17492_v3 = vand.u32 4294901760, %v13694_v14  ;;  %v17009_v25 = vand.u32 4294901760, %v13897_v54  ;;  %v5732_v22 = vld [vmem:[#allocation3 + $0x738] sm:$0xff] }
 0x3dc   : > { %5578 = vmatpush.msra.mxu1 %v17483_v26  ;;  %5635 = vmatpush.msra.mxu2 %v17484_v61  ;;  %v13970_v46 = vsub.f32 %v5733_v2, %v13945_v58 }
 0x3dd   : > { %5692 = vmatpush.msra.mxu3 %v17478_v44  ;;  %5023 = vmatmul.f32.gmra.mxu0 %v5022_v60  ;;  %v5392_v15 = vand.u32 4294901760, %v13851_v36  ;;  %v13920_v44 = vand.u32 4294901760, %v5735_v33 }
 0x3de   : > { %5342 = vmatmul.f32.vlgmr.msrb.gmra.mxu1 %v13800_v53  ;;  %5518 = vmatpush.msra.mxu0 %v13600_v35  ;;  %v13868_v35 = vsub.f32 %v5740_v63, %v13854_v42  ;;  %v5731_v63 = vld [vmem:[#allocation3 + $0x730] sm:$0xff] }
 0x3df   : > { %5580 = vmatpush.msra.mxu1 %v13637_v16  ;;  %5639 = vmatpush.msra.mxu2 %v17485_v9  ;;  %v5393_v56 = vsub.f32 %v13851_v36, %v5392_v15 }
 0x3e0   : > { %5694 = vmatpush.msra.mxu3 %v17480_v41  ;;  %5387 = vmatmul.f32.vlgmr.msrb.gmra.mxu2 %v5386_v28  ;;  %v17007_v41 = vand.u32 4294901760, %v13918_v18  ;;  %v5729_v28 = vld [vmem:[#allocation3 + $0x720] sm:$0xff] }
 0x3e1   : > { %5521 = vmatpush.msra.mxu0 %v17481_v57  ;;  %5582 = vmatpush.msra.mxu1 %v13652_v10  ;;  %v13943_v57 = vsub.f32 %v5735_v33, %v13920_v44 }
 0x3e2   : > { %5643 = vmatpush.msra.mxu2 %v17486_v52  ;;  %5696 = vmatpush.msra.mxu3 %v17483_v26  ;;  %v13960_v26 = vand.u32 4294901760, %v5732_v22  ;;  %v17003_v52 = vand.u32 4294901760, %v13970_v46 }
 0x3e3   : > { %5496 = vmatmul.f32.vlgmr.msrb.gmra.mxu3 %v13814_v30  ;;  %5524 = vmatpush.msra.mxu0 %v13620_v5  ;;  %v17012_v5 = vand.u32 4294901760, %v13868_v35  ;;  %v17005_v61 = vand.u32 4294901760, %v13943_v57 }
 0x3e4   : > { %5584 = vmatpush.msra.mxu1 %v13666_v17  ;;  %5647 = vmatpush.msra.mxu2 %v17488_v24  ;;  %v13981_v9 = vsub.f32 %v5732_v22, %v13960_v26 }
 0x3e5   : > { %5698 = vmatpush.msra.mxu3 %v13637_v16  ;;  %5527 = vmatpush.msra.mxu0 %v13640_v12  ;;  %v5394_v16 = vand.u32 4294901760, %v5393_v56  ;;  %v17010_v12 = vand.u32 4294901760, %v13884_v0  ;;  %v5727_v56 = vld [vmem:[#allocation3 + $0x710] sm:$0xff] }
 0x3e6   : > { %5586 = vmatpush.msra.mxu1 %v17489_v37  ;;  %5651 = vmatpush.msra.mxu2 %v17491_v51  ;;  %v17002_v13 = vand.u32 4294901760, %v13981_v9  ;;  %v5726_v51 = vld [vmem:[#allocation3 + $0x708] sm:$0xff] }
 0x3e7   : > { %5700 = vmatpush.msra.mxu3 %v13652_v10  ;;  %5301 = vmatmul.f32.vlgmr.msrb.gmra.mxu0 %v13800_v53  ;;  %v5793_v10 = vsub.f32 %v13868_v35, %v17012_v5  ;;  %v13911_v53 = vsub.f32 %v5737_v23, %v13889_v20  ;;  %v5728_v23 = vld [vmem:[#allocation3 + $0x718] sm:$0xff] }
 0x3e8   : > { %5346 = vmatmul.f32.gmra.mxu1 %v13812_v43  ;;  %5530 = vmatpush.msra.mxu0 %v13660_v8  ;;  %v5734_v8 = vld [vmem:[#allocation3 + $0x748] sm:$0xff] }
 0x3e9   : > { %5588 = vmatpush.msra.mxu1 %v13691_v29  ;;  %5655 = vmatpush.msra.mxu2 %v17492_v3  ;;  %v5794_v19 = vand.u32 4294901760, %v5793_v10  ;;  %v17008_v47 = vand.u32 4294901760, %v13911_v53  ;;  %v13931_v60 = vand.u32 4294901760, %v5734_v8  ;;  %v14019_v3 = vand.u32 4294901760, %v5727_v56  ;;  %v5725_v10 = vld [vmem:[#allocation3 + $0x700] sm:$0xff] }
 0x3ea   : > { %5702 = vmatpush.msra.mxu3 %v13666_v17  ;;  %5395 = vmatmul.f32.gmra.mxu2 %v5394_v16  ;;  %v5799_v17 = vsub.f32 %v13884_v0, %v17010_v12  ;;  %v6124_v12 = vld [vmem:[#allocation3 + $0x7b0] sm:$0xff] }
 0x3eb   : > { %5533 = vmatpush.msra.mxu0 %v17487_v45  ;;  %5590 = vmatpush.msra.mxu1 %v13711_v49  ;;  %v13995_v45 = vand.u32 4294901760, %v5729_v28  ;;  %v14043_v22 = vsub.f32 %v5727_v56, %v14019_v3  ;;  %v6132_v56 = vld [vmem:[#allocation3 + $0x7f0] sm:$0xff] }
 0x3ec   : > { %5659 = vmatpush.msra.mxu2 %v5473_v59  ;;  %5704 = vmatpush.msra.mxu3 %v17489_v37  ;;  %v5805_v59 = vsub.f32 %v13897_v54, %v17009_v25  ;;  %v14007_v37 = vand.u32 4294901760, %v5728_v23 }
 0x3ed   : > { %5500 = vmatmul.f32.gmra.mxu3 %v13837_v4  ;;  %5536 = vmatpush.msra.mxu0 %v17490_v55  ;;  %v5835_v55 = vsub.f32 %v13970_v46, %v17003_v52  ;;  %v14017_v33 = vsub.f32 %v5729_v28, %v13995_v45  ;;  %v16996_v28 = vand.u32 4294901760, %v14043_v22 }
 0x3ee   : > { %5592 = vmatpush.msra.mxu1 %v13734_v40  ;;  %5663 = vmatpush.msra.mxu2 %v5479_v34  ;;  %v13955_v34 = vsub.f32 %v5734_v8, %v13931_v60  ;;  %v5841_v8 = vsub.f32 %v13981_v9, %v17002_v13  ;;  %v14031_v2 = vsub.f32 %v5728_v23, %v14007_v37  ;;  %v6126_v13 = vld [vmem:[#allocation3 + $0x7c0] sm:$0xff] }
 0x3ef   : > { %5706 = vmatpush.msra.mxu3 %v13691_v29  ;;  %5539 = vmatpush.msra.mxu0 %v13694_v14  ;;  %v5800_v29 = vand.u32 4294901760, %v5799_v17  ;;  %v5811_v14 = vsub.f32 %v13911_v53, %v17008_v47 }
 0x3f0   : > { %5594 = vmatpush.msra.mxu1 %v13747_v38  ;;  %5667 = vmatpush.msra.mxu2 %v5485_v11  ;;  %v5817_v11 = vsub.f32 %v13918_v18, %v17007_v41  ;;  %v6125_v41 = vld [vmem:[#allocation3 + $0x7b8] sm:$0xff] }
 0x3f1   : > { %5708 = vmatpush.msra.mxu3 %v13711_v49  ;;  %5305 = vmatmul.f32.gmra.mxu0 %v13812_v43  ;;  %v5806_v49 = vand.u32 4294901760, %v5805_v59  ;;  %v5730_v43 = vld [vmem:[#allocation3 + $0x728] sm:$0xff]  ;;  %v16998_v59 = vand.u32 4294901760, %v14017_v33 }
 0x3f2   : > { %5795 = vmatpush.msrb.mxu1 %v5794_v19  ;;  %5542 = vmatpush.msra.mxu0 %v13714_v62  ;;  %v5812_v62 = vand.u32 4294901760, %v5811_v14  ;;  %v13983_v32 = vand.u32 4294901760, %v5730_v43  ;;  %v14033_v19 = vand.u32 4294901760, %v5726_v51  ;;  %v5842_v14 = vand.u32 4294901760, %v5841_v8 }
 0x3f3   : > { %5598 = vmatmul.f32.vlgmr.msra.gmra.mxu1 %v5384_v7  ;;  %5671 = vmatpush.msra.mxu2 %v5491_v48  ;;  %v13973_v7 = vand.u32 4294901760, %v5731_v63  ;;  %v17004_v48 = vand.u32 4294901760, %v13955_v34  ;;  %v14089_v8 = vand.u32 4294901760, %v6132_v56 }
 0x3f4   : > { %5710 = vmatpush.msra.mxu3 %v13734_v40  ;;  %5801 = vmatpush.msrb.mxu1 %v5800_v29  ;;  %v5818_v40 = vand.u32 4294901760, %v5817_v11  ;;  %v14045_v29 = vand.u32 4294901760, %v5725_v10  ;;  %v14055_v11 = vsub.f32 %v5726_v51, %v14033_v19 }
 0x3f5   : > { %5897 = vmatpush.msrb.mxu2 %v13868_v35  ;;  %5545 = vmatpush.msra.mxu0 %v13737_v6  ;;  %v5823_v6 = vsub.f32 %v13943_v57, %v17005_v61  ;;  %v5829_v24 = vsub.f32 %v13955_v34, %v17004_v48 }
 0x3f6   : > { %5673 = vmatmul.f32.vlgmr.msra.gmra.mxu2 %v13814_v30  ;;  %5712 = vmatpush.msra.mxu3 %v13747_v38  ;;  %v13993_v38 = vsub.f32 %v5731_v63, %v13973_v7 }
 0x3f7   : > { %5807 = vmatpush.msrb.mxu1 %v5806_v49  ;;  %5900 = vmatpush.msrb.mxu2 %v13884_v0  ;;  %v16997_v49 = vand.u32 4294901760, %v14031_v2 }
 0x3f8   : > { %5955 = vmatpush.msrb.mxu3 %v13854_v42  ;;  %5548 = vmatpush.msra.mxu0 %v13750_v31  ;;  %v14005_v31 = vsub.f32 %v5730_v43, %v13983_v32  ;;  %v17001_v16 = vand.u32 4294901760, %v13993_v38 }
 0x3f9   : > { %5714 = vmatmul.f32.vlgmr.msra.gmra.mxu3 %v13814_v30  ;;  %5813 = vmatpush.msrb.mxu1 %v5812_v62  ;;  %v5824_v30 = vand.u32 4294901760, %v5823_v6  ;;  %v5859_v62 = vsub.f32 %v14017_v33, %v16998_v59  ;;  %v5865_v23 = vsub.f32 %v14031_v2, %v16997_v49  ;;  %v5723_v49 = vld [vmem:[#allocation2 + $0x11] sm:$0xff] }
 0x3fa   : > { %5903 = vmatpush.msrb.mxu2 %v13897_v54  ;;  %5957 = vmatpush.msrb.mxu3 %v13863_v1  ;;  %v16999_v17 = vand.u32 4294901760, %v14005_v31 }
 0x3fb   : > { %5551 = vmatpush.msra.mxu0 %v13762_v21  ;;  %5819 = vmatpush.msrb.mxu1 %v5818_v40  ;;  %v5830_v21 = vand.u32 4294901760, %v5829_v24  ;;  %v14065_v40 = vsub.f32 %v5725_v10, %v14045_v29  ;;  %v16995_v24 = vand.u32 4294901760, %v14055_v11 }
 0x3fc   : > { %5906 = vmatpush.msrb.mxu2 %v13911_v53  ;;  %5959 = vmatpush.msrb.mxu3 %v13875_v27  ;;  %v5853_v63 = vsub.f32 %v14005_v31, %v16999_v17  ;;  %v14139_v17 = vand.u32 4294901760, %v5723_v49 }
 0x3fd   : > { %5742 = vmatpush.msrb.mxu0 %v13854_v42  ;;  %5604 = vmatmul.f32.gmra.mxu1 %v5392_v15  ;;  %v5847_v15 = vsub.f32 %v13993_v38, %v17001_v16  ;;  %v16994_v51 = vand.u32 4294901760, %v14065_v40  ;;  %v5877_v10 = vsub.f32 %v14055_v11, %v16995_v24 }
 0x3fe   : > { %5554 = vmatmul.f32.vlgmr.msra.gmra.mxu0 %v13822_v39  ;;  %5825 = vmatpush.msrb.mxu1 %v5824_v30  ;;  %v5836_v39 = vand.u32 4294901760, %v5835_v55  ;;  %v5854_v6 = vand.u32 4294901760, %v5853_v63  ;;  %v5860_v30 = vand.u32 4294901760, %v5859_v62  ;;  %v5871_v55 = vsub.f32 %v14043_v22, %v16996_v28  ;;  %v6130_v62 = vld [vmem:[#allocation3 + $0x7e0] sm:$0xff]  ;;  %17494 = vst [vmem:[#allocation18_spill] sm:$0xff] %v14139_v17 }
 0x3ff   : > { %5744 = vmatpush.msrb.mxu0 %v13863_v1  ;;  %5909 = vmatpush.msrb.mxu2 %v13918_v18  ;;  %v5848_v43 = vand.u32 4294901760, %v5847_v15  ;;  %v6131_v15 = vld [vmem:[#allocation3 + $0x7e8] sm:$0xff]  ;;  %v5883_v63 = vsub.f32 %v14065_v40, %v16994_v51 }
 0x400   : > { %5961 = vmatpush.msrb.mxu3 %v13889_v20  ;;  %5677 = vmatmul.f32.gmra.mxu2 %v13837_v4 }
 0x401   : > { %5746 = vmatpush.msrb.mxu0 %v13875_v27  ;;  %5831 = vmatpush.msrb.mxu1 %v5830_v21  ;;  %v5884_v51 = vand.u32 4294901760, %v5883_v63 }
 0x402   : > { %5912 = vmatpush.msrb.mxu2 %v13943_v57  ;;  %5963 = vmatpush.msrb.mxu3 %v13899_v50 }
 0x403   : > { %5718 = vmatmul.f32.gmra.mxu3 %v13837_v4  ;;  %5748 = vmatpush.msrb.mxu0 %v13889_v20  ;;  %v6133_v4 = vld [vmem:[#allocation3 + $0x7f8] sm:$0xff] }
 0x404   : > { %5837 = vmatpush.msrb.mxu1 %v5836_v39  ;;  %5915 = vmatpush.msrb.mxu2 %v13955_v34  ;;  %v14081_v21 = vand.u32 4294901760, %v6133_v4  ;;  %v5722_v39 = vld [vmem:[#allocation2 + $0x9] sm:$0xff] }
 0x405   : > { %5965 = vmatpush.msrb.mxu3 %v13920_v44  ;;  %5750 = vmatpush.msrb.mxu0 %v13899_v50 }
 0x406   : > { %5843 = vmatpush.msrb.mxu1 %v5842_v14  ;;  %5918 = vmatpush.msrb.mxu2 %v13970_v46  ;;  %v5872_v14 = vand.u32 4294901760, %v5871_v55  ;;  %v14108_v55 = vsub.f32 %v6132_v56, %v14089_v8 }
 0x407   : > { %5967 = vmatpush.msrb.mxu3 %v13931_v60  ;;  %5559 = vmatmul.f32.gmra.mxu0 %v13851_v36  ;;  %v5866_v36 = vand.u32 4294901760, %v5865_v23  ;;  %v14103_v23 = vand.u32 4294901760, %v5722_v39 }
 0x408   : > { %5752 = vmatpush.msrb.mxu0 %v13920_v44  ;;  %5849 = vmatpush.msrb.mxu1 %v5848_v43  ;;  %v14098_v43 = vsub.f32 %v6133_v4, %v14081_v21  ;;  %v6129_v4 = vld [vmem:[#allocation3 + $0x7d8] sm:$0xff]  ;;  %v17006_v28 = vand.u32 4294901760, %v14108_v55 }
 0x409   : > { %5921 = vmatpush.msrb.mxu2 %v13981_v9  ;;  %5969 = vmatpush.msrb.mxu3 %v13945_v58  ;;  %v5774_v56 = vsub.f32 %v5722_v39, %v14103_v23  ;;  %v14124_v63 = vand.u32 4294901760, %v6129_v4 }
 0x40a   : > { %5754 = vmatpush.msrb.mxu0 %v13931_v60  ;;  %5855 = vmatpush.msrb.mxu1 %v5854_v6  ;;  %v5878_v6 = vand.u32 4294901760, %v5877_v10  ;;  %v17000_v24 = vand.u32 4294901760, %v14098_v43  ;;  %v6128_v10 = vld [vmem:[#allocation3 + $0x7d0] sm:$0xff] }
 0x40b   : > { %5924 = vmatpush.msrb.mxu2 %v13993_v38  ;;  %5971 = vmatpush.msrb.mxu3 %v13960_v26  ;;  %v14135_v59 = vand.u32 4294901760, %v6128_v10  ;;  %v14148_v16 = vsub.f32 %v6129_v4, %v14124_v63  ;;  %v14162_v4 = vand.u32 4294901760, %v6126_v13 }
 0x40c   : > { %5756 = vmatpush.msrb.mxu0 %v13945_v58  ;;  %5861 = vmatpush.msrb.mxu1 %v5860_v30  ;;  %v14105_v30 = vand.u32 4294901760, %v6131_v15 }
 0x40d   : > { %5927 = vmatpush.msrb.mxu2 %v14005_v31  ;;  %5973 = vmatpush.msrb.mxu3 %v13973_v7  ;;  %17495 = vst [vmem:[#allocation19_spill] sm:$0xff] %v14148_v16  ;;  %v17016_v25 = vand.u32 4294901760, %v14148_v16 }
 0x40e   : > { %5758 = vmatpush.msrb.mxu0 %v13960_v26  ;;  %5867 = vmatpush.msrb.mxu1 %v5866_v36  ;;  %v14114_v36 = vand.u32 4294901760, %v6130_v62 }
 0x40f   : > { %5930 = vmatpush.msrb.mxu2 %v14017_v33  ;;  %5975 = vmatpush.msrb.mxu3 %v13983_v32 }
 0x410   : > { %5760 = vmatpush.msrb.mxu0 %v13973_v7  ;;  %5873 = vmatpush.msrb.mxu1 %v5872_v14  ;;  %v14122_v14 = vsub.f32 %v6131_v15, %v14105_v30  ;;  %v14133_v39 = vsub.f32 %v6130_v62, %v14114_v36  ;;  %v6127_v15 = vld [vmem:[#allocation3 + $0x7c8] sm:$0xff] }
 0x411   : > { %5933 = vmatpush.msrb.mxu2 %v14031_v2  ;;  %5977 = vmatpush.msrb.mxu3 %v13995_v45  ;;  %v14152_v52 = vand.u32 4294901760, %v6127_v15 }
 0x412   : > { %5762 = vmatpush.msrb.mxu0 %v13983_v32  ;;  %5879 = vmatpush.msrb.mxu1 %v5878_v6  ;;  %v6186_v6 = vsub.f32 %v14098_v43, %v17000_v24  ;;  %17493 = vst [vmem:[#allocation17_spill] sm:$0xff] %v14133_v39  ;;  %v6192_v24 = vsub.f32 %v14108_v55, %v17006_v28  ;;  %v17011_v62 = vand.u32 4294901760, %v14122_v14  ;;  %v17013_v61 = vand.u32 4294901760, %v14133_v39 }
 0x413   : > { %5936 = vmatpush.msrb.mxu2 %v14043_v22  ;;  %5979 = vmatpush.msrb.mxu3 %v14007_v37  ;;  %v14157_v28 = vsub.f32 %v6128_v10, %v14135_v59 }
 0x414   : > { %5764 = vmatpush.msrb.mxu0 %v13995_v45  ;;  %5885 = vmatpush.msrb.mxu1 %v5884_v51  ;;  %v5775_v51 = vand.u32 4294901760, %v5774_v56  ;;  %v6187_v48 = vand.u32 4294901760, %v6186_v6  ;;  %v6193_v47 = vand.u32 4294901760, %v6192_v24  ;;  %v6198_v10 = vsub.f32 %v14122_v14, %v17011_v62  ;;  %v6123_v62 = vld [vmem:[#allocation3 + $0x7a8] sm:$0xff] }
 0x415   : > { %5939 = vmatpush.msrb.mxu2 %v14055_v11  ;;  %5981 = vmatpush.msrb.mxu3 %v14019_v3  ;;  %17496 = vst [vmem:[#allocation20_spill] sm:$0xff] %v14157_v28  ;;  %v6204_v24 = vsub.f32 %v14133_v39, %v17013_v61  ;;  %v6210_v61 = vsub.f32 %v14148_v16, %v17016_v25  ;;  %v14198_v39 = vand.u32 4294901760, %v6123_v62  ;;  %v6121_v25 = vld [vmem:[#allocation3 + $0x798] sm:$0xff]  ;;  %v17498_v16 = vand.u32 4294901760, %v13868_v35 }
 0x416   : > { %5887 = vmatmul.f32.vlgmr.msrb.gmra.mxu1 %v14103_v23  ;;  %5766 = vmatpush.msrb.mxu0 %v14007_v37  ;;  %v5776_v6 = vsub.f32 %v5774_v56, %v5775_v51 }
 0x417   : > { %6073 = vmatpush.msra.mxu1 %v13854_v42  ;;  %5942 = vmatpush.msrb.mxu2 %v14065_v40  ;;  %v5782_v42 = vsub.f32 %v5723_v49, %v14139_v17  ;;  %v14174_v49 = vand.u32 4294901760, %v6125_v41 }
 0x418   : > { %5983 = vmatpush.msrb.mxu3 %v14033_v19  ;;  %5945 = vmatmul.f32.vlgmr.msrb.gmra.mxu2 %v5774_v56  ;;  %v6122_v56 = vld [vmem:[#allocation3 + $0x7a0] sm:$0xff] }
 0x419   : > { %6075 = vmatpush.msra.mxu1 %v13863_v1  ;;  %6135 = vmatpush.msra.mxu2 %v14081_v21  ;;  %v14172_v1 = vsub.f32 %v6127_v15, %v14152_v52  ;;  %v14186_v15 = vand.u32 4294901760, %v6124_v12  ;;  %v5783_v5 = vand.u32 4294901760, %v5782_v42 }
 0x41a   : > { %5768 = vmatpush.msrb.mxu0 %v14019_v3  ;;  %5985 = vmatpush.msrb.mxu3 %v14045_v29 }
 0x41b   : > { %5989 = vmatmul.f32.vlgmr.msrb.gmra.mxu3 %v5775_v51  ;;  %6077 = vmatpush.msra.mxu1 %v13875_v27  ;;  %v14184_v27 = vsub.f32 %v6126_v13, %v14162_v4  ;;  %v6199_v51 = vand.u32 4294901760, %v6198_v10  ;;  %v14196_v13 = vsub.f32 %v6125_v41, %v14174_v49  ;;  %v14209_v41 = vsub.f32 %v6124_v12, %v14186_v15 }
 0x41c   : > { %6137 = vmatpush.msra.mxu2 %v14089_v8  ;;  %6188 = vmatpush.msra.mxu3 %v6187_v48  ;;  %v5777_v48 = vand.u32 4294901760, %v5776_v6  ;;  %v17497_v6 = vand.u32 4294901760, %v14157_v28  ;;  %v17500_v35 = vand.u32 4294901760, %v14172_v1  ;;  %v14221_v12 = vsub.f32 %v6123_v62, %v14198_v39 }
 0x41d   : > { %5770 = vmatpush.msrb.mxu0 %v14033_v19  ;;  %6079 = vmatpush.msra.mxu1 %v13889_v20  ;;  %v17023_v20 = vand.u32 4294901760, %v14196_v13 }
 0x41e   : > { %6139 = vmatpush.msra.mxu2 %v14105_v30  ;;  %6194 = vmatpush.msra.mxu3 %v6193_v47  ;;  %v6205_v47 = vand.u32 4294901760, %v6204_v24  ;;  %v6216_v10 = vsub.f32 %v14157_v28, %v17497_v6  ;;  %v5784_v24 = vsub.f32 %v5782_v42, %v5783_v5  ;;  %v17499_v6 = vand.u32 4294901760, %v13884_v0 }
 0x41f   : > { %5772 = vmatpush.msrb.mxu0 %v14045_v29  ;;  %5891 = vmatmul.f32.gmra.mxu1 %v14139_v17  ;;  %v14211_v17 = vand.u32 4294901760, %v6122_v56  ;;  %v14223_v28 = vand.u32 4294901760, %v6121_v25  ;;  %v17501_v0 = vand.u32 4294901760, %v13897_v54  ;;  %v17503_v54 = vand.u32 4294901760, %v13911_v53 }
 0x420   : > { %5778 = vmatmul.f32.vlgmr.msrb.gmra.mxu0 %v5777_v48  ;;  %6081 = vmatpush.msra.mxu1 %v13899_v50  ;;  %v6211_v50 = vand.u32 4294901760, %v6210_v61  ;;  %v6120_v48 = vld [vmem:[#allocation3 + $0x790] sm:$0xff]  ;;  %v6217_v61 = vand.u32 4294901760, %v6216_v10  ;;  %v6234_v10 = vsub.f32 %v14196_v13, %v17023_v20 }
 0x421   : > { %6002 = vmatpush.msra.mxu0 %v17498_v16  ;;  %6141 = vmatpush.msra.mxu2 %v14114_v36  ;;  %v6222_v16 = vsub.f32 %v14172_v1, %v17500_v35  ;;  %v14235_v62 = vand.u32 4294901760, %v6120_v48  ;;  %v6119_v35 = vld [vmem:[#allocation3 + $0x788] sm:$0xff] }
 0x422   : > { %6200 = vmatpush.msra.mxu3 %v6199_v51  ;;  %5950 = vmatmul.f32.gmra.mxu2 %v5782_v42  ;;  %v6115_v51 = vld [vmem:[#allocation2 + $0xa] sm:$0xff] }
 0x423   : > { %6006 = vmatpush.msra.mxu0 %v17499_v6  ;;  %6083 = vmatpush.msra.mxu1 %v13920_v44  ;;  %v17502_v44 = vand.u32 4294901760, %v14184_v27  ;;  %v14233_v6 = vsub.f32 %v6122_v56, %v14211_v17  ;;  %v6245_v56 = vand.u32 4294901760, %v14221_v12  ;;  %v14264_v20 = vand.u32 4294901760, %v6115_v51 }
 0x424   : > { %6143 = vmatpush.msra.mxu2 %v14124_v63  ;;  %6206 = vmatpush.msra.mxu3 %v6205_v47  ;;  %v6223_v47 = vand.u32 4294901760, %v6222_v16 }
 0x425   : > { %5995 = vmatmul.f32.gmra.mxu3 %v5783_v5  ;;  %6010 = vmatpush.msra.mxu0 %v17501_v0  ;;  %v6228_v42 = vsub.f32 %v14184_v27, %v17502_v44  ;;  %v5785_v5 = vand.u32 4294901760, %v5784_v24  ;;  %v14246_v0 = vsub.f32 %v6121_v25, %v14223_v28  ;;  %v6118_v44 = vld [vmem:[#allocation3 + $0x780] sm:$0xff]  ;;  %v6251_v16 = vand.u32 4294901760, %v14233_v6 }
 0x426   : > { %6085 = vmatpush.msra.mxu1 %v13931_v60  ;;  %6145 = vmatpush.msra.mxu2 %v14135_v59  ;;  %v14250_v60 = vand.u32 4294901760, %v6119_v35  ;;  %v14257_v25 = vsub.f32 %v6120_v48, %v14235_v62 }
 0x427   : > { %6212 = vmatpush.msra.mxu3 %v6211_v50  ;;  %6014 = vmatpush.msra.mxu0 %v17503_v54  ;;  %v6229_v53 = vand.u32 4294901760, %v6228_v42  ;;  %v17504_v50 = vand.u32 4294901760, %v14209_v41  ;;  %v17505_v54 = vand.u32 4294901760, %v13918_v18  ;;  %v6246_v42 = vsub.f32 %v14221_v12, %v6245_v56 }
 0x428   : > { %6087 = vmatpush.msra.mxu1 %v13945_v58  ;;  %6147 = vmatpush.msra.mxu2 %v14152_v52  ;;  %v14262_v58 = vand.u32 4294901760, %v6118_v44  ;;  %v6257_v48 = vand.u32 4294901760, %v14246_v0  ;;  %v14275_v18 = vsub.f32 %v6119_v35, %v14250_v60 }
 0x429   : > { %6218 = vmatpush.msra.mxu3 %v6217_v61  ;;  %5786 = vmatmul.f32.gmra.mxu0 %v5785_v5  ;;  %v6240_v24 = vsub.f32 %v14209_v41, %v17504_v50  ;;  %v6235_v61 = vand.u32 4294901760, %v6234_v10  ;;  %v17506_v5 = vand.u32 4294901760, %v13943_v57  ;;  %v6263_v10 = vand.u32 4294901760, %v14257_v25 }
 0x42a   : > { %6018 = vmatpush.msra.mxu0 %v17505_v54  ;;  %6089 = vmatpush.msra.mxu1 %v13960_v26  ;;  %v17507_v50 = vand.u32 4294901760, %v13955_v34  ;;  %v14286_v57 = vsub.f32 %v6115_v51, %v14264_v20  ;;  %v6247_v35 = vand.u32 4294901760, %v6246_v42  ;;  %v6269_v34 = vand.u32 4294901760, %v14275_v18 }
 0x42b   : > { %6149 = vmatpush.msra.mxu2 %v14162_v4  ;;  %6224 = vmatpush.msra.mxu3 %v6223_v47  ;;  %v6241_v26 = vand.u32 4294901760, %v6240_v24  ;;  %v6252_v47 = vsub.f32 %v14233_v6, %v6251_v16  ;;  %v17508_v24 = vand.u32 4294901760, %v13970_v46  ;;  %v6264_v51 = vsub.f32 %v14257_v25, %v6263_v10 }
 0x42c   : > { %6022 = vmatpush.msra.mxu0 %v17506_v5  ;;  %6091 = vmatpush.msra.mxu1 %v13973_v7  ;;  %v14289_v7 = vsub.f32 %v6118_v44, %v14262_v58  ;;  %v6116_v44 = vld [vmem:[#allocation2 + $0x12] sm:$0xff]  ;;  %v17509_v54 = vand.u32 4294901760, %v13981_v9  ;;  %v6168_v46 = vand.u32 4294901760, %v14286_v57  ;;  %v17510_v42 = vand.u32 4294901760, %v13993_v38 }
 0x42d   : > { %6151 = vmatpush.msra.mxu2 %v14174_v49  ;;  %6230 = vmatpush.msra.mxu3 %v6229_v53  ;;  %v6258_v53 = vsub.f32 %v14246_v0, %v6257_v48  ;;  %v6270_v9 = vsub.f32 %v14275_v18, %v6269_v34  ;;  %v14315_v5 = vand.u32 4294901760, %v6116_v44 }
 0x42e   : > { %6026 = vmatpush.msra.mxu0 %v17507_v50  ;;  %6093 = vmatpush.msra.mxu1 %v13983_v32  ;;  %v6253_v32 = vand.u32 4294901760, %v6252_v47  ;;  %v6169_v38 = vsub.f32 %v14286_v57, %v6168_v46  ;;  %v17512_v47 = vand.u32 4294901760, %v14017_v33 }
 0x42f   : > { %6153 = vmatpush.msra.mxu2 %v14186_v15  ;;  %6236 = vmatpush.msra.mxu3 %v6235_v61  ;;  %v6259_v61 = vand.u32 4294901760, %v6258_v53  ;;  %v14332_v50 = vsub.f32 %v6116_v44, %v14315_v5  ;;  %v17519_v44 = vand.u32 4294901760, %v14065_v40  ;;  %v17523_v40 = vld [vmem:[#allocation19_spill] sm:$0xff] }
 0x430   : > { %6030 = vmatpush.msra.mxu0 %v17508_v24  ;;  %6095 = vmatpush.msra.mxu1 %v13995_v45  ;;  %v6275_v45 = vand.u32 4294901760, %v14289_v7  ;;  %v17515_v24 = vand.u32 4294901760, %v14043_v22  ;;  %v17518_v22 = vand.u32 4294901760, %v14122_v14 }
 0x431   : > { %6155 = vmatpush.msra.mxu2 %v14198_v39  ;;  %6242 = vmatpush.msra.mxu3 %v6241_v26  ;;  %v17511_v26 = vand.u32 4294901760, %v14005_v31  ;;  %v6271_v31 = vand.u32 4294901760, %v6270_v9  ;;  %v6176_v33 = vand.u32 4294901760, %v14332_v50 }
 0x432   : > { %6034 = vmatpush.msra.mxu0 %v17509_v54  ;;  %6097 = vmatpush.msra.mxu1 %v14007_v37  ;;  %v6265_v37 = vand.u32 4294901760, %v6264_v51  ;;  %v17517_v51 = vand.u32 4294901760, %v14055_v11  ;;  %v17520_v54 = vld [vmem:[#allocation18_spill] sm:$0xff]  ;;  %v17521_v11 = vld [vmem:[#allocation17_spill] sm:$0xff] }
 0x433   : > { %6157 = vmatpush.msra.mxu2 %v14211_v17  ;;  %6248 = vmatpush.msra.mxu3 %v6247_v35  ;;  %v6170_v35 = vand.u32 4294901760, %v6169_v38 }
 0x434   : > { %6038 = vmatpush.msra.mxu0 %v17510_v42  ;;  %6099 = vmatpush.msra.mxu1 %v14019_v3  ;;  %v6276_v3 = vsub.f32 %v14289_v7, %v6275_v45 }
 0x435   : > { %6159 = vmatpush.msra.mxu2 %v14223_v28  ;;  %6254 = vmatpush.msra.mxu3 %v6253_v32  ;;  %v6177_v32 = vsub.f32 %v14332_v50, %v6176_v33 }
 0x436   : > { %6042 = vmatpush.msra.mxu0 %v17511_v26  ;;  %6101 = vmatpush.msra.mxu1 %v14033_v19  ;;  %v17513_v19 = vand.u32 4294901760, %v14031_v2  ;;  %v6277_v53 = vand.u32 4294901760, %v6276_v3  ;;  %v17516_v2 = vand.u32 4294901760, %v14108_v55  ;;  %v6548_v26 = vld [vmem:[#allocation3 + $0x8c8] sm:$0xff] }
 0x437   : > { %6161 = vmatpush.msra.mxu2 %v14235_v62  ;;  %6260 = vmatpush.msra.mxu3 %v6259_v61  ;;  %v17522_v61 = vand.u32 4294901760, %v17521_v11 }
 0x438   : > { %6046 = vmatpush.msra.mxu0 %v17512_v47  ;;  %6103 = vmatpush.msra.mxu1 %v14045_v29  ;;  %v17514_v29 = vand.u32 4294901760, %v14098_v43 }
 0x439   : > { %6163 = vmatpush.msra.mxu2 %v14250_v60  ;;  %6266 = vmatpush.msra.mxu3 %v6265_v37 }
 0x43a   : > { %6105 = vmatmul.f32.vlgmr.msra.gmra.mxu1 %v14103_v23  ;;  %6050 = vmatpush.msra.mxu0 %v17513_v19 }
 0x43b   : > { %6348 = vmatpush.msrb.mxu1 %v14081_v21  ;;  %6165 = vmatpush.msra.mxu2 %v14262_v58 }
 0x43c   : > { %6272 = vmatpush.msra.mxu3 %v6271_v31  ;;  %6171 = vmatmul.f32.vlgmr.msra.gmra.mxu2 %v6170_v35  ;;  %v6547_v35 = vld [vmem:[#allocation3 + $0x8c0] sm:$0xff] }
 0x43d   : > { %6350 = vmatpush.msrb.mxu1 %v14089_v8  ;;  %6395 = vmatpush.msrb.mxu2 %v17514_v29 }
 0x43e   : > { %6054 = vmatpush.msra.mxu0 %v17515_v24  ;;  %6278 = vmatpush.msra.mxu3 %v6277_v53 }
 0x43f   : > { %6280 = vmatmul.f32.vlgmr.msra.gmra.mxu3 %v14264_v20  ;;  %6352 = vmatpush.msrb.mxu1 %v14105_v30 }
 0x440   : > { %6399 = vmatpush.msrb.mxu2 %v17516_v2  ;;  %6466 = vmatpush.msrb.mxu3 %v14081_v21  ;;  %v6178_v21 = vand.u32 4294901760, %v6177_v32  ;;  %v14535_v2 = vand.u32 4294901760, %v6547_v35 }
 0x441   : > { %6058 = vmatpush.msra.mxu0 %v17517_v51  ;;  %6354 = vmatpush.msrb.mxu1 %v14114_v36  ;;  %v6546_v51 = vld [vmem:[#allocation3 + $0x8b8] sm:$0xff] }
 0x442   : > { %6403 = vmatpush.msrb.mxu2 %v17518_v22  ;;  %6468 = vmatpush.msrb.mxu3 %v14089_v8  ;;  %v17524_v8 = vand.u32 4294901760, %v17523_v40 }
 0x443   : > { %6062 = vmatpush.msra.mxu0 %v17519_v44  ;;  %6109 = vmatmul.f32.gmra.mxu1 %v17520_v54 }
 0x444   : > { %6064 = vmatmul.f32.vlgmr.msra.gmra.mxu0 %v14103_v23  ;;  %6356 = vmatpush.msrb.mxu1 %v14124_v63 }
 0x445   : > { %6290 = vmatpush.msrb.mxu0 %v14098_v43  ;;  %6407 = vmatpush.msrb.mxu2 %v17522_v61  ;;  %v17525_v43 = vld [vmem:[#allocation20_spill] sm:$0xff] }
 0x446   : > { %6470 = vmatpush.msrb.mxu3 %v14105_v30  ;;  %6179 = vmatmul.f32.gmra.mxu2 %v6178_v21  ;;  %v17526_v23 = vand.u32 4294901760, %v17525_v43  ;;  %v17527_v30 = vand.u32 4294901760, %v14172_v1  ;;  %v14550_v21 = vsub.f32 %v6547_v35, %v14535_v2 }
 0x447   : > { %6293 = vmatpush.msrb.mxu0 %v14108_v55  ;;  %6358 = vmatpush.msrb.mxu1 %v14135_v59  ;;  %v17528_v55 = vand.u32 4294901760, %v14184_v27 }
 0x448   : > { %6411 = vmatpush.msrb.mxu2 %v17524_v8  ;;  %6472 = vmatpush.msrb.mxu3 %v14114_v36  ;;  %v17529_v36 = vand.u32 4294901760, %v14196_v13 }
 0x449   : > { %6284 = vmatmul.f32.gmra.mxu3 %v14315_v5  ;;  %6296 = vmatpush.msrb.mxu0 %v14122_v14 }
 0x44a   : > { %6360 = vmatpush.msrb.mxu1 %v14152_v52  ;;  %6415 = vmatpush.msrb.mxu2 %v17526_v23  ;;  %v17028_v23 = vand.u32 4294901760, %v14550_v21 }
 0x44b   : > { %6474 = vmatpush.msrb.mxu3 %v14124_v63  ;;  %6299 = vmatpush.msrb.mxu0 %v17521_v11  ;;  %v6554_v63 = vld [vmem:[#allocation3 + $0x8f8] sm:$0xff]  ;;  %v14552_v11 = vand.u32 4294901760, %v6546_v51 }
 0x44c   : > { %6362 = vmatpush.msrb.mxu1 %v14162_v4  ;;  %6419 = vmatpush.msrb.mxu2 %v17527_v30 }
 0x44d   : > { %6476 = vmatpush.msrb.mxu3 %v14135_v59  ;;  %6068 = vmatmul.f32.gmra.mxu0 %v17520_v54  ;;  %v17530_v59 = vand.u32 4294901760, %v14209_v41  ;;  %v14563_v30 = vsub.f32 %v6546_v51, %v14552_v11 }
 0x44e   : > { %6302 = vmatpush.msrb.mxu0 %v17523_v40  ;;  %6364 = vmatpush.msrb.mxu1 %v14174_v49  ;;  %v6545_v40 = vld [vmem:[#allocation3 + $0x8b0] sm:$0xff] }
 0x44f   : > { %6423 = vmatpush.msrb.mxu2 %v17528_v55  ;;  %6478 = vmatpush.msrb.mxu3 %v14152_v52  ;;  %v14444_v52 = vpop.f32.mrf.mxu1  ;;  %v14566_v55 = vand.u32 4294901760, %v6545_v40 }
 0x450   : > { %6305 = vmatpush.msrb.mxu0 %v17525_v43  ;;  %6366 = vmatpush.msrb.mxu1 %v14186_v15 }
 0x451   : > { %6427 = vmatpush.msrb.mxu2 %v17529_v36  ;;  %6480 = vmatpush.msrb.mxu3 %v14162_v4  ;;  %v6552_v4 = vld [vmem:[#allocation3 + $0x8e8] sm:$0xff] }
 0x452   : > { %6308 = vmatpush.msrb.mxu0 %v14172_v1  ;;  %6368 = vmatpush.msrb.mxu1 %v14198_v39  ;;  %v14450_v14 = vpop.f32.mrf.mxu3  ;;  %v14452_v1 = vand.u32 4294901760, %v6554_v63  ;;  %v6544_v36 = vld [vmem:[#allocation3 + $0x8a8] sm:$0xff] }
 0x453   : > { %6431 = vmatpush.msrb.mxu2 %v17530_v59  ;;  %6482 = vmatpush.msrb.mxu3 %v14174_v49 }
 0x454   : > { %6311 = vmatpush.msrb.mxu0 %v14184_v27  ;;  %6370 = vmatpush.msrb.mxu1 %v14211_v17  ;;  %v14456_v27 = vand.u32 4294901760, %v6552_v4 }
 0x455   : > { %6435 = vmatpush.msrb.mxu2 %v6245_v56  ;;  %6484 = vmatpush.msrb.mxu3 %v14186_v15 }
 0x456   : > { %6314 = vmatpush.msrb.mxu0 %v14196_v13  ;;  %6372 = vmatpush.msrb.mxu1 %v14223_v28  ;;  %v14463_v13 = vsub.f32 %v6554_v63, %v14452_v1  ;;  %v6649_v63 = vsub.f32 %v14550_v21, %v17028_v23 }
 0x457   : > { %6439 = vmatpush.msrb.mxu2 %v6251_v16  ;;  %6486 = vmatpush.msrb.mxu3 %v14198_v39  ;;  %v6553_v39 = vld [vmem:[#allocation3 + $0x8f0] sm:$0xff]  ;;  %v14458_v15 = vpop.f32.mrf.mxu1 }
 0x458   : > { %6317 = vmatpush.msrb.mxu0 %v14209_v41  ;;  %6374 = vmatpush.msrb.mxu1 %v14235_v62  ;;  %v14454_v49 = vand.u32 4294901760, %v6553_v39 }
 0x459   : > { %6443 = vmatpush.msrb.mxu2 %v6257_v48  ;;  %6488 = vmatpush.msrb.mxu3 %v14211_v17  ;;  %v14446_v17 = vpop.f32.mrf.mxu0 }
 0x45a   : > { %6320 = vmatpush.msrb.mxu0 %v14221_v12  ;;  %6376 = vmatpush.msrb.mxu1 %v14250_v60  ;;  %v14466_v41 = vsub.f32 %v6553_v39, %v14454_v49  ;;  %v14469_v12 = vsub.f32 %v6552_v4, %v14456_v27  ;;  %v14571_v39 = vand.u32 4294901760, %v6544_v36  ;;  %v17027_v4 = vand.u32 4294901760, %v14563_v30 }
 0x45b   : > { %6447 = vmatpush.msrb.mxu2 %v6263_v10  ;;  %6490 = vmatpush.msrb.mxu3 %v14223_v28  ;;  %v14448_v28 = vpop.f32.mrf.mxu2  ;;  %v6550_v10 = vld [vmem:[#allocation3 + $0x8d8] sm:$0xff] }
 0x45c   : > { %6323 = vmatpush.msrb.mxu0 %v14233_v6  ;;  %6378 = vmatpush.msrb.mxu1 %v14262_v58  ;;  %v17036_v56 = vand.u32 4294901760, %v14466_v41  ;;  %v14481_v16 = vpop.f32.mrf.mxu3 }
 0x45d   : > { %6451 = vmatpush.msrb.mxu2 %v6269_v34  ;;  %6492 = vmatpush.msrb.mxu3 %v14235_v62  ;;  %v6606_v62 = vand.u32 4294901760, %v14463_v13 }
 0x45e   : > { %6382 = vmatmul.f32.vlgmr.msrb.gmra.mxu1 %v6168_v46  ;;  %6326 = vmatpush.msrb.mxu0 %v14246_v0  ;;  %v17035_v0 = vand.u32 4294901760, %v14469_v12  ;;  %v14502_v46 = vand.u32 4294901760, %v6550_v10 }
 0x45f   : > { %6455 = vmatpush.msrb.mxu2 %v6275_v45  ;;  %6494 = vmatpush.msrb.mxu3 %v14250_v60  ;;  %v6551_v60 = vld [vmem:[#allocation3 + $0x8e0] sm:$0xff]  ;;  %v6549_v45 = vld [vmem:[#allocation3 + $0x8d0] sm:$0xff]  ;;  %v14514_v38 = vpop.f32.mrf.mxu1 }
 0x460   : > { %6457 = vmatmul.f32.vlgmr.msrb.gmra.mxu2 %v14264_v20  ;;  %6329 = vmatpush.msrb.mxu0 %v14257_v25  ;;  %v6607_v25 = vsub.f32 %v14463_v13, %v6606_v62  ;;  %v6619_v48 = vsub.f32 %v14469_v12, %v17035_v0  ;;  %v14510_v37 = vsub.f32 %v6550_v10, %v14502_v46  ;;  %v6650_v10 = vand.u32 4294901760, %v6649_v63 }
 0x461   : > { %6496 = vmatpush.msrb.mxu3 %v14262_v58  ;;  %6711 = vmatpush.msra.mxu2 %v14463_v13  ;;  %v6613_v58 = vsub.f32 %v14466_v41, %v17036_v56 }
 0x462   : > { %6498 = vmatmul.f32.vlgmr.msrb.gmra.mxu3 %v14264_v20  ;;  %6332 = vmatpush.msrb.mxu0 %v14275_v18  ;;  %v14460_v20 = vpop.f32.mrf.mxu0  ;;  %v14493_v18 = vand.u32 4294901760, %v6551_v60  ;;  %v6620_v42 = vand.u32 4294901760, %v6619_v48  ;;  %v17032_v19 = vand.u32 4294901760, %v14510_v37 }
 0x463   : > { %6769 = vmatpush.msra.mxu3 %v14452_v1  ;;  %v14473_v6 = vpop.f32.mrf.mxu2  ;;  %6714 = vmatpush.msra.mxu2 %v14466_v41 }
 0x464   : > { %6335 = vmatpush.msrb.mxu0 %v14289_v7  ;;  %v6614_v7 = vand.u32 4294901760, %v6613_v58  ;;  %v14498_v34 = vsub.f32 %v6551_v60, %v14493_v18  ;;  %v6631_v32 = vsub.f32 %v14510_v37, %v17032_v19  ;;  %v14577_v60 = vsub.f32 %v6545_v40, %v14566_v55 }
 0x465   : > { %6338 = vmatmul.f32.vlgmr.msrb.gmra.mxu0 %v14286_v57  ;;  %6771 = vmatpush.msra.mxu3 %v14454_v49  ;;  %v6608_v57 = vand.u32 4294901760, %v6607_v25  ;;  %v6543_v25 = vld [vmem:[#allocation3 + $0x8a0] sm:$0xff] }
 0x466   : > { %6388 = vmatmul.f32.gmra.mxu1 %v6176_v33  ;;  %6556 = vmatpush.msra.mxu0 %v14452_v1  ;;  %v17033_v9 = vand.u32 4294901760, %v14498_v34  ;;  %v14543_v22 = vpop.f32.mrf.mxu3  ;;  %v6632_v61 = vand.u32 4294901760, %v6631_v32 }
 0x467   : > { %6773 = vmatpush.msra.mxu3 %v14456_v27  ;;  %6717 = vmatpush.msra.mxu2 %v14469_v12  ;;  %v14580_v58 = vpop.f32.mrf.mxu1 }
 0x468   : > { %6461 = vmatmul.f32.gmra.mxu2 %v14315_v5  ;;  %6558 = vmatpush.msra.mxu0 %v14454_v49  ;;  %v6625_v47 = vsub.f32 %v14498_v34, %v17033_v9 }
 0x469   : > { %6775 = vmatpush.msra.mxu3 %v14493_v18  ;;  %6609 = vmatpush.msra.mxu1 %v6608_v57  ;;  %v14585_v57 = vsub.f32 %v6544_v36, %v14571_v39 }
 0x46a   : > { %6502 = vmatmul.f32.gmra.mxu3 %v14315_v5  ;;  %6560 = vmatpush.msra.mxu0 %v14456_v27  ;;  %v14507_v5 = vand.u32 4294901760, %v6549_v45  ;;  %v14516_v3 = vpop.f32.mrf.mxu0  ;;  %v6626_v33 = vand.u32 4294901760, %v6625_v47 }
 0x46b   : > { %6720 = vmatpush.msra.mxu2 %v14498_v34  ;;  %6777 = vmatpush.msra.mxu3 %v14502_v46  ;;  %v14529_v53 = vpop.f32.mrf.mxu2  ;;  %v17024_v35 = vand.u32 4294901760, %v14585_v57 }
 0x46c   : > { %6562 = vmatpush.msra.mxu0 %v14493_v18  ;;  %6615 = vmatpush.msra.mxu1 %v6614_v7  ;;  %v14522_v31 = vsub.f32 %v6549_v45, %v14507_v5  ;;  %v14587_v7 = vand.u32 4294901760, %v6543_v25  ;;  %v6655_v45 = vsub.f32 %v14563_v30, %v17027_v4 }
 0x46d   : > { %6343 = vmatmul.f32.gmra.mxu0 %v14332_v50  ;;  %v14524_v50 = vand.u32 4294901760, %v6548_v26  ;;  %6723 = vmatpush.msra.mxu2 %v14510_v37 }
 0x46e   : > { %6564 = vmatpush.msra.mxu0 %v14502_v46  ;;  %6779 = vmatpush.msra.mxu3 %v14507_v5  ;;  %v17031_v29 = vand.u32 4294901760, %v14522_v31  ;;  %v6656_v51 = vand.u32 4294901760, %v6655_v45 }
 0x46f   : > { %6621 = vmatpush.msra.mxu1 %v6620_v42  ;;  %v14533_v24 = vsub.f32 %v6548_v26, %v14524_v50  ;;  %6726 = vmatpush.msra.mxu2 %v14522_v31  ;;  %v17026_v42 = vand.u32 4294901760, %v14577_v60  ;;  %v6542_v26 = vld [vmem:[#allocation3 + $0x898] sm:$0xff] }
 0x470   : > { %6566 = vmatpush.msra.mxu0 %v14507_v5  ;;  %6781 = vmatpush.msra.mxu3 %v14524_v50  ;;  %v6637_v44 = vsub.f32 %v14522_v31, %v17031_v29  ;;  %v14602_v32 = vand.u32 4294901760, %v6542_v26  ;;  %v14610_v40 = vpop.f32.mrf.mxu3  ;;  %v6536_v29 = vld [vmem:[#allocation3 + $0x870] sm:$0xff] }
 0x471   : > { %6627 = vmatpush.msra.mxu1 %v6626_v33  ;;  %v17030_v54 = vand.u32 4294901760, %v14533_v24  ;;  %6729 = vmatpush.msra.mxu2 %v14533_v24  ;;  %v14600_v33 = vsub.f32 %v6543_v25, %v14587_v7  ;;  %17531 = vst [vmem:[#allocation21_spill] sm:$0xff] %v14610_v40  ;;  %v6540_v25 = vld [vmem:[#allocation3 + $0x888] sm:$0xff]  ;;  %v17535_v40 = vand.u32 4294901760, %v14466_v41 }
 0x472   : > { %6568 = vmatpush.msra.mxu0 %v14524_v50  ;;  %6783 = vmatpush.msra.mxu3 %v14535_v2  ;;  %v6638_v8 = vand.u32 4294901760, %v6637_v44  ;;  %v14582_v48 = vpop.f32.mrf.mxu0  ;;  %v6661_v44 = vsub.f32 %v14577_v60, %v17026_v42  ;;  %v14617_v36 = vsub.f32 %v6542_v26, %v14602_v32 }
 0x473   : > { %v6643_v43 = vsub.f32 %v14533_v24, %v17030_v54  ;;  %6633 = vmatpush.msra.mxu1 %v6632_v61  ;;  %6732 = vmatpush.msra.mxu2 %v14550_v21  ;;  %v14596_v47 = vpop.f32.mrf.mxu2  ;;  %v6541_v61 = vld [vmem:[#allocation3 + $0x890] sm:$0xff] }
 0x474   : > { %6570 = vmatpush.msra.mxu0 %v14535_v2  ;;  %6785 = vmatpush.msra.mxu3 %v14552_v11  ;;  %v6662_v63 = vand.u32 4294901760, %v6661_v44  ;;  %v6539_v44 = vld [vmem:[#allocation3 + $0x880] sm:$0xff] }
 0x475   : > { %v6644_v59 = vand.u32 4294901760, %v6643_v43  ;;  %6639 = vmatpush.msra.mxu1 %v6638_v8  ;;  %6735 = vmatpush.msra.mxu2 %v14563_v30  ;;  %v6667_v8 = vsub.f32 %v14585_v57, %v17024_v35  ;;  %v17025_v43 = vand.u32 4294901760, %v14600_v33  ;;  %v17029_v35 = vand.u32 4294901760, %v14617_v36 }
 0x476   : > { %6572 = vmatpush.msra.mxu0 %v14552_v11  ;;  %6787 = vmatpush.msra.mxu3 %v14566_v55  ;;  %v14640_v4 = vand.u32 4294901760, %v6539_v44 }
 0x477   : > { %6645 = vmatpush.msra.mxu1 %v6644_v59  ;;  %6738 = vmatpush.msra.mxu2 %v14577_v60  ;;  %v14619_v59 = vand.u32 4294901760, %v6541_v61  ;;  %v6673_v45 = vsub.f32 %v14600_v33, %v17025_v43  ;;  %v6679_v43 = vsub.f32 %v14617_v36, %v17029_v35 }
 0x478   : > { %6574 = vmatpush.msra.mxu0 %v14566_v55  ;;  %6789 = vmatpush.msra.mxu3 %v14571_v39  ;;  %v14656_v54 = vsub.f32 %v6539_v44, %v14640_v4 }
 0x479   : > { %6651 = vmatpush.msra.mxu1 %v6650_v10  ;;  %6741 = vmatpush.msra.mxu2 %v14585_v57  ;;  %v6668_v10 = vand.u32 4294901760, %v6667_v8  ;;  %v14629_v26 = vsub.f32 %v6541_v61, %v14619_v59  ;;  %v6674_v8 = vand.u32 4294901760, %v6673_v45  ;;  %v6680_v23 = vand.u32 4294901760, %v6679_v43 }
 0x47a   : > { %6576 = vmatpush.msra.mxu0 %v14571_v39  ;;  %6791 = vmatpush.msra.mxu3 %v14587_v7  ;;  %v17038_v9 = vand.u32 4294901760, %v14656_v54 }
 0x47b   : > { %6657 = vmatpush.msra.mxu1 %v6656_v51  ;;  %6744 = vmatpush.msra.mxu2 %v14600_v33  ;;  %v14634_v51 = vand.u32 4294901760, %v6540_v25  ;;  %v17034_v42 = vand.u32 4294901760, %v14629_v26  ;;  %v14650_v45 = vpop.f32.mrf.mxu0  ;;  %v14662_v19 = vpop.f32.mrf.mxu2 }
 0x47c   : > { %6578 = vmatpush.msra.mxu0 %v14587_v7  ;;  %6793 = vmatpush.msra.mxu3 %v14602_v32  ;;  %17532 = vst [vmem:[#allocation10_spill] sm:$0xff] %v14662_v19  ;;  %v14675_v0 = vpop.f32.mrf.mxu3 }
 0x47d   : > { %6663 = vmatpush.msra.mxu1 %v6662_v63  ;;  %6747 = vmatpush.msra.mxu2 %v14617_v36  ;;  %v14645_v61 = vsub.f32 %v6540_v25, %v14634_v51  ;;  %v14648_v63 = vpop.f32.mrf.mxu1  ;;  %v6685_v35 = vsub.f32 %v14629_v26, %v17034_v42  ;;  %17533 = vst [vmem:[#allocation11_spill] sm:$0xff] %v14675_v0  ;;  %v6535_v0 = vld [vmem:[#allocation3 + $0x868] sm:$0xff] }
 0x47e   : > { %6580 = vmatpush.msra.mxu0 %v14602_v32  ;;  %6795 = vmatpush.msra.mxu3 %v14619_v59 }
 0x47f   : > { %6669 = vmatpush.msra.mxu1 %v6668_v10  ;;  %6750 = vmatpush.msra.mxu2 %v14629_v26  ;;  %v17037_v25 = vand.u32 4294901760, %v14645_v61  ;;  %v6537_v10 = vld [vmem:[#allocation3 + $0x878] sm:$0xff]  ;;  %v6686_v43 = vand.u32 4294901760, %v6685_v35  ;;  %v6697_v35 = vsub.f32 %v14656_v54, %v17038_v9  ;;  %v14690_v9 = vand.u32 4294901760, %v6535_v0 }
 0x480   : > { %6582 = vmatpush.msra.mxu0 %v14619_v59  ;;  %6797 = vmatpush.msra.mxu3 %v14634_v51  ;;  %v14665_v42 = vand.u32 4294901760, %v6537_v10 }
 0x481   : > { %6675 = vmatpush.msra.mxu1 %v6674_v8  ;;  %6753 = vmatpush.msra.mxu2 %v14645_v61  ;;  %v6691_v44 = vsub.f32 %v14645_v61, %v17037_v25  ;;  %v14673_v8 = vand.u32 4294901760, %v6536_v29  ;;  %v6698_v25 = vand.u32 4294901760, %v6697_v35  ;;  %17536 = vst [vmem:[#allocation9_spill] sm:$0xff] %v14690_v9 }
 0x482   : > { %6584 = vmatpush.msra.mxu0 %v14634_v51  ;;  %6799 = vmatpush.msra.mxu3 %v14640_v4  ;;  %v14682_v56 = vsub.f32 %v6537_v10, %v14665_v42 }
 0x483   : > { %6681 = vmatpush.msra.mxu1 %v6680_v23  ;;  %6756 = vmatpush.msra.mxu2 %v14656_v54  ;;  %v6692_v23 = vand.u32 4294901760, %v6691_v44  ;;  %v14693_v10 = vsub.f32 %v6536_v29, %v14673_v8  ;;  %v14705_v44 = vsub.f32 %v6535_v0, %v14690_v9 }
 0x484   : > { %6586 = vmatpush.msra.mxu0 %v14640_v4  ;;  %17534 = vst [vmem:[#allocation12_spill] sm:$0xff] %v14682_v56  ;;  %v17039_v19 = vand.u32 4294901760, %v14682_v56  ;;  %v14709_v35 = vpop.f32.mrf.mxu0 }
 0x485   : > { %6928 = vmatpush.msrb.mxu2 %v14665_v42  ;;  %6687 = vmatpush.msra.mxu1 %v6686_v43  ;;  %v17537_v43 = vand.u32 4294901760, %v14469_v12  ;;  %v17044_v41 = vand.u32 4294901760, %v14693_v10  ;;  %17539 = vst [vmem:[#allocation23_spill] sm:$0xff] %v14705_v44  ;;  %v14707_v29 = vpop.f32.mrf.mxu1  ;;  %v17540_v12 = vand.u32 4294901760, %v14498_v34  ;;  %v17047_v0 = vand.u32 4294901760, %v14705_v44 }
 0x486   : > { %6816 = vmatpush.msrb.mxu0 %v6606_v62  ;;  %v6979_v13 = vsub.f32 %v14682_v56, %v17039_v19  ;;  %v6534_v62 = vld [vmem:[#allocation3 + $0x860] sm:$0xff]  ;;  %v6533_v19 = vld [vmem:[#allocation3 + $0x858] sm:$0xff]  ;;  %v14724_v56 = vpop.f32.mrf.mxu2 }
 0x487   : > { %6930 = vmatpush.msrb.mxu2 %v14673_v8  ;;  %6693 = vmatpush.msra.mxu1 %v6692_v23 }
 0x488   : > { %6820 = vmatpush.msrb.mxu0 %v17535_v40  ;;  %v14702_v40 = vand.u32 4294901760, %v6534_v62  ;;  %v6980_v23 = vand.u32 4294901760, %v6979_v13  ;;  %v6991_v13 = vsub.f32 %v14705_v44, %v17047_v0 }
 0x489   : > { %6699 = vmatpush.msra.mxu1 %v6698_v25  ;;  %6932 = vmatpush.msrb.mxu2 %v14690_v9  ;;  %v6985_v25 = vsub.f32 %v14693_v10, %v17044_v41 }
 0x48a   : > { %6824 = vmatpush.msrb.mxu0 %v17537_v43  ;;  %17538 = vst [vmem:[#allocation22_spill] sm:$0xff] %v14702_v40  ;;  %v14719_v43 = vand.u32 4294901760, %v6533_v19  ;;  %v14722_v9 = vsub.f32 %v6534_v62, %v14702_v40  ;;  %6981 = vmatpush.msrb.mxu3 %v6980_v23  ;;  %v17543_v62 = vand.u32 4294901760, %v14510_v37  ;;  %v6531_v23 = vld [vmem:[#allocation3 + $0x848] sm:$0xff] }
 0x48b   : > { %6887 = vmatpush.msrb.mxu1 %v14452_v1  ;;  %6934 = vmatpush.msrb.mxu2 %v14702_v40  ;;  %v6532_v1 = vld [vmem:[#allocation3 + $0x850] sm:$0xff]  ;;  %v6986_v34 = vand.u32 4294901760, %v6985_v25  ;;  %v14736_v40 = vpop.f32.mrf.mxu3  ;;  %v6992_v25 = vand.u32 4294901760, %v6991_v13  ;;  %v14746_v44 = vand.u32 4294901760, %v6531_v23 }
 0x48c   : > { %6828 = vmatpush.msrb.mxu0 %v17540_v12  ;;  %17541 = vst [vmem:[#allocation14_spill] sm:$0xff] %v14722_v9  ;;  %v17050_v12 = vand.u32 4294901760, %v14722_v9  ;;  %v14732_v41 = vand.u32 4294901760, %v6532_v1 }
 0x48d   : > { %6889 = vmatpush.msrb.mxu1 %v14454_v49  ;;  %6936 = vmatpush.msrb.mxu2 %v14719_v43  ;;  %v14740_v49 = vsub.f32 %v6533_v19, %v14719_v43  ;;  %17544 = vst [vmem:[#allocation15_spill] sm:$0xff] %v14746_v44  ;;  %v6530_v19 = vld [vmem:[#allocation3 + $0x840] sm:$0xff] }
 0x48e   : > { %17542 = vst [vmem:[#allocation13_spill] sm:$0xff] %v14732_v41  ;;  %6832 = vmatpush.msrb.mxu0 %v17543_v62  ;;  %6987 = vmatpush.msrb.mxu3 %v6986_v34  ;;  %v6997_v0 = vsub.f32 %v14722_v9, %v17050_v12  ;;  %v14749_v37 = vsub.f32 %v6532_v1, %v14732_v41  ;;  %v17546_v62 = vand.u32 4294901760, %v14522_v31  ;;  %v14757_v12 = vand.u32 4294901760, %v6530_v19 }
 0x48f   : > { %6891 = vmatpush.msrb.mxu1 %v14456_v27  ;;  %6938 = vmatpush.msrb.mxu2 %v14732_v41  ;;  %v17057_v27 = vand.u32 4294901760, %v14740_v49  ;;  %v14760_v9 = vsub.f32 %v6531_v23, %v14746_v44 }
 0x490   : > { %17545 = vst [vmem:[#allocation16_spill] sm:$0xff] %v14749_v37  ;;  %6836 = vmatpush.msrb.mxu0 %v17546_v62  ;;  %6993 = vmatpush.msrb.mxu3 %v6992_v25  ;;  %v6998_v34 = vand.u32 4294901760, %v6997_v0  ;;  %v17058_v13 = vand.u32 4294901760, %v14749_v37  ;;  %v6529_v0 = vld [vmem:[#allocation3 + $0x838] sm:$0xff]  ;;  %v17548_v25 = vand.u32 4294901760, %v14533_v24 }
 0x491   : > { %6893 = vmatpush.msrb.mxu1 %v14493_v18  ;;  %6940 = vmatpush.msrb.mxu2 %v14746_v44  ;;  %17547 = vst [vmem:[#allocation18_spill] sm:$0xff] %v14757_v12  ;;  %v7003_v31 = vsub.f32 %v14740_v49, %v17057_v27  ;;  %v17063_v62 = vand.u32 4294901760, %v14760_v9  ;;  %v14777_v44 = vand.u32 4294901760, %v6529_v0 }
 0x492   : > { %6840 = vmatpush.msrb.mxu0 %v17548_v25  ;;  %6999 = vmatpush.msrb.mxu3 %v6998_v34  ;;  %v7009_v23 = vsub.f32 %v14749_v37, %v17058_v13  ;;  %v6528_v25 = vld [vmem:[#allocation3 + $0x830] sm:$0xff]  ;;  %v17549_v34 = vand.u32 4294901760, %v14550_v21 }
 0x493   : > { %v14762_v1 = vpop.f32.mrf.mxu1  ;;  %6895 = vmatpush.msrb.mxu1 %v14502_v46  ;;  %6942 = vmatpush.msrb.mxu2 %v14757_v12  ;;  %v14780_v46 = vsub.f32 %v6530_v19, %v14757_v12  ;;  %v7004_v24 = vand.u32 4294901760, %v7003_v31  ;;  %v7015_v13 = vsub.f32 %v14760_v9, %v17063_v62  ;;  %v14792_v19 = vand.u32 4294901760, %v6528_v25  ;;  %v6527_v31 = vld [vmem:[#allocation3 + $0x828] sm:$0xff] }
 0x494   : > { %6844 = vmatpush.msrb.mxu0 %v17549_v34  ;;  %v7010_v27 = vand.u32 4294901760, %v7009_v23  ;;  %v5126_v12 = vadd.f32 %v14444_v52, %v14446_v17  ;;  %v14800_v21 = vsub.f32 %v6529_v0, %v14777_v44  ;;  %v14806_v62 = vand.u32 4294901760, %v6527_v31 }
 0x495   : > { %6897 = vmatpush.msrb.mxu1 %v14507_v5  ;;  %6944 = vmatpush.msrb.mxu2 %v14777_v44  ;;  %v17064_v37 = vand.u32 4294901760, %v14780_v46  ;;  %v7016_v23 = vand.u32 4294901760, %v7015_v13  ;;  %v17550_v52 = vand.u32 4294901760, %v14563_v30  ;;  %v6526_v13 = vld [vmem:[#allocation3 + $0x820] sm:$0xff]  ;;  %v17554_v30 = vand.u32 4294901760, %v14577_v60 }
 0x496   : > { %7005 = vmatpush.msrb.mxu3 %v7004_v24  ;;  %v17065_v17 = vand.u32 4294901760, %v14800_v21  ;;  %v14816_v24 = vand.u32 4294901760, %v6526_v13 }
 0x497   : > { %6899 = vmatpush.msrb.mxu1 %v14524_v50  ;;  %v7021_v34 = vsub.f32 %v14780_v46, %v17064_v37  ;;  %6946 = vmatpush.msrb.mxu2 %v14792_v19  ;;  %v14813_v50 = vsub.f32 %v6528_v25, %v14792_v19  ;;  %v14819_v37 = vsub.f32 %v6527_v31, %v14806_v62 }
 0x498   : > { %6848 = vmatpush.msrb.mxu0 %v17550_v52  ;;  %7011 = vmatpush.msrb.mxu3 %v7010_v27  ;;  %17552 = vst [vmem:[#allocation19_spill] sm:$0xff] %v14816_v24  ;;  %v7027_v27 = vsub.f32 %v14800_v21, %v17065_v17  ;;  %v14834_v60 = vsub.f32 %v6526_v13, %v14816_v24  ;;  %v6524_v17 = vld [vmem:[#allocation3 + $0x810] sm:$0xff] }
 0x499   : > { %6901 = vmatpush.msrb.mxu1 %v14535_v2  ;;  %17551 = vst [vmem:[#allocation17_spill] sm:$0xff] %v14813_v50  ;;  %v7022_v0 = vand.u32 4294901760, %v7021_v34  ;;  %6948 = vmatpush.msrb.mxu2 %v14806_v62  ;;  %v5184_v2 = vadd.f32 %v14448_v28, %v5126_v12  ;;  %v17069_v25 = vand.u32 4294901760, %v14813_v50  ;;  %v6525_v34 = vld [vmem:[#allocation3 + $0x818] sm:$0xff]  ;;  %v17068_v31 = vand.u32 4294901760, %v14819_v37 }
 0x49a   : > { %17553 = vst [vmem:[#allocation20_spill] sm:$0xff] %v14819_v37  ;;  %6852 = vmatpush.msrb.mxu0 %v17554_v30  ;;  %7017 = vmatpush.msrb.mxu3 %v7016_v23  ;;  %v14831_v52 = vand.u32 4294901760, %v6525_v34  ;;  %v17555_v28 = vand.u32 4294901760, %v14585_v57  ;;  %v7028_v23 = vand.u32 4294901760, %v7027_v27  ;;  %v5130_v57 = vadd.f32 %v14458_v15, %v14460_v20  ;;  %v6522_v20 = vld [vmem:[#allocation3 + $0x800] sm:$0xff] }
 0x49b   : > { %v14782_v41 = vpop.f32.mrf.mxu2  ;;  %6903 = vmatpush.msrb.mxu1 %v14552_v11  ;;  %6950 = vmatpush.msrb.mxu2 %v14816_v24  ;;  %v7033_v30 = vsub.f32 %v14813_v50, %v17069_v25  ;;  %v7039_v13 = vsub.f32 %v14819_v37, %v17068_v31  ;;  %v6523_v25 = vld [vmem:[#allocation3 + $0x808] sm:$0xff]  ;;  %v17557_v50 = vand.u32 4294901760, %v14834_v60 }
 0x49c   : > { %6856 = vmatpush.msrb.mxu0 %v17555_v28  ;;  %v14838_v11 = vpop.f32.mrf.mxu1  ;;  %7023 = vmatpush.msrb.mxu3 %v7022_v0  ;;  %v14851_v28 = vand.u32 4294901760, %v6524_v17  ;;  %v14854_v24 = vsub.f32 %v6525_v34, %v14831_v52  ;;  %v5228_v0 = vadd.f32 %v14450_v14, %v5184_v2  ;;  %v17558_v14 = vand.u32 4294901760, %v14617_v36 }
 0x49d   : > { %v14764_v18 = vpop.f32.mrf.mxu0  ;;  %6905 = vmatpush.msrb.mxu1 %v14566_v55  ;;  %6952 = vmatpush.msrb.mxu2 %v14831_v52  ;;  %v17556_v55 = vand.u32 4294901760, %v14600_v33  ;;  %v7034_v31 = vand.u32 4294901760, %v7033_v30  ;;  %v7040_v37 = vand.u32 4294901760, %v7039_v13  ;;  %v7045_v34 = vsub.f32 %v14834_v60, %v17557_v50 }
 0x49e   : > { %v14796_v5 = vpop.f32.mrf.mxu3  ;;  %7029 = vmatpush.msrb.mxu3 %v7028_v23  ;;  %v7050_v33 = vand.u32 4294901760, %v14854_v24  ;;  %v14877_v15 = vsub.f32 %v6524_v17, %v14851_v28  ;;  %v5303_v50 = vadd.f32 %v14516_v3, %v5228_v0  ;;  %v17559_v36 = vand.u32 4294901760, %v14629_v26 }
 0x49f   : > { %6860 = vmatpush.msrb.mxu0 %v17556_v55  ;;  %6907 = vmatpush.msrb.mxu1 %v14571_v39  ;;  %v14874_v39 = vand.u32 4294901760, %v6523_v25  ;;  %v7046_v23 = vand.u32 4294901760, %v7045_v34  ;;  %v5189_v3 = vadd.f32 %v14473_v6, %v5130_v57  ;;  %v17560_v55 = vand.u32 4294901760, %v14645_v61 }
 0x4a0   : > { %6954 = vmatpush.msrb.mxu2 %v14851_v28  ;;  %7035 = vmatpush.msrb.mxu3 %v7034_v31  ;;  %v7051_v30 = vsub.f32 %v14854_v24, %v7050_v33  ;;  %v14887_v31 = vand.u32 4294901760, %v6522_v20  ;;  %v5344_v6 = vadd.f32 %v14514_v38, %v5303_v50  ;;  %v17561_v61 = vand.u32 4294901760, %v14656_v54 }
 0x4a1   : > { %6864 = vmatpush.msrb.mxu0 %v17558_v14  ;;  %6909 = vmatpush.msrb.mxu1 %v14587_v7  ;;  %v7056_v7 = vand.u32 4294901760, %v14877_v15  ;;  %v14890_v17 = vsub.f32 %v6523_v25, %v14874_v39 }
 0x4a2   : > { %7041 = vmatpush.msrb.mxu3 %v7040_v37  ;;  %v7052_v13 = vand.u32 4294901760, %v7051_v30  ;;  %6956 = vmatpush.msrb.mxu2 %v14874_v39  ;;  %v14902_v25 = vsub.f32 %v6522_v20, %v14887_v31  ;;  %v5234_v20 = vadd.f32 %v14481_v16, %v5189_v3 }
 0x4a3   : > { %6868 = vmatpush.msrb.mxu0 %v17559_v36  ;;  %6911 = vmatpush.msrb.mxu1 %v14602_v32  ;;  %v7057_v32 = vsub.f32 %v14877_v15, %v7056_v7  ;;  %v7062_v37 = vand.u32 4294901760, %v14890_v17  ;;  %v5889_v36 = vadd.f32 %v14762_v1, %v14764_v18 }
 0x4a4   : > { %7047 = vmatpush.msrb.mxu3 %v7046_v23  ;;  %6958 = vmatpush.msrb.mxu2 %v14887_v31  ;;  %v7068_v14 = vand.u32 4294901760, %v14902_v25  ;;  %v5307_v50 = vadd.f32 %v14582_v48, %v5234_v20 }
 0x4a5   : > { %v14859_v27 = vpop.f32.mrf.mxu2  ;;  %6872 = vmatpush.msrb.mxu0 %v17560_v55  ;;  %6913 = vmatpush.msrb.mxu1 %v14619_v59  ;;  %v7058_v59 = vand.u32 4294901760, %v7057_v32  ;;  %v7063_v34 = vsub.f32 %v14890_v17, %v7062_v37  ;;  %v5947_v32 = vadd.f32 %v14782_v41, %v5889_v36  ;;  %v17564_v36 = vld [vmem:[#allocation11_spill] sm:$0xff] }
 0x4a6   : > { %v14840_v12 = vpop.f32.mrf.mxu0  ;;  %7053 = vmatpush.msrb.mxu3 %v7052_v13  ;;  %v7069_v54 = vsub.f32 %v14902_v25, %v7068_v14 }
 0x4a7   : > { %6876 = vmatpush.msrb.mxu0 %v17561_v61  ;;  %6915 = vmatpush.msrb.mxu1 %v14634_v51  ;;  %v7064_v38 = vand.u32 4294901760, %v7063_v34  ;;  %v5389_v51 = vadd.f32 %v14529_v53, %v5344_v6  ;;  %v5893_v1 = vadd.f32 %v14838_v11, %v14840_v12 }
 0x4a8   : > { %v14871_v2 = vpop.f32.mrf.mxu3  ;;  %7059 = vmatpush.msrb.mxu3 %v7058_v59  ;;  %v7070_v30 = vand.u32 4294901760, %v7069_v54  ;;  %v5991_v59 = vadd.f32 %v14796_v5, %v5947_v32  ;;  %v9802_v32 = vld [vmem:[#allocation5 + $0x3] ss:$0 sm:$0xff] }
 0x4a9   : > { %6917 = vmatpush.msrb.mxu1 %v14640_v4  ;;  %v5498_v16 = vadd.f32 %v14543_v22, %v5389_v51  ;;  %v5348_v4 = vadd.f32 %v14580_v58, %v5307_v50  ;;  %v17562_v22 = vld [vmem:[#allocation21_spill] sm:$0xff] }
 0x4aa   : > { %7065 = vmatpush.msrb.mxu3 %v7064_v38 }
 0x4ab   : > { %v5556_v55 = vadd.f32 %v14650_v45, %v5498_v16  ;;  %v5397_v53 = vadd.f32 %v14596_v47, %v5348_v4  ;;  %v17563_v45 = vld [vmem:[#allocation10_spill] sm:$0xff]  ;;  %v5952_v47 = vadd.f32 %v14859_v27, %v5893_v1 }
 0x4ac   : > { %7071 = vmatpush.msrb.mxu3 %v7070_v30 }
 0x4ad   : > { %v5600_v6 = vadd.f32 %v14648_v63, %v5556_v55  ;;  %v5502_v18 = vadd.f32 %v17562_v22, %v5397_v53  ;;  %v5997_v12 = vadd.f32 %v14871_v2, %v5952_v47  ;;  %v17567_v47 = vld [vmem:[#allocation9_spill] sm:$0xff] }
 0x4af   : > { %v5675_v54 = vadd.f32 %v17563_v45, %v5600_v6  ;;  %v5561_v41 = vadd.f32 %v14709_v35, %v5502_v18 }
 0x4b1   : > { %v5716_v16 = vadd.f32 %v17564_v36, %v5675_v54  ;;  %v5606_v11 = vadd.f32 %v14707_v29, %v5561_v41  ;;  %v17569_v36 = vld [vmem:[#allocation22_spill] sm:$0xff] }
 0x4b3   : > { %v5679_v27 = vadd.f32 %v14724_v56, %v5606_v11 }
 0x4b5   : > { %v5720_v29 = vadd.f32 %v14736_v40, %v5679_v27  ;;  %v17565_v40 = vld [vmem:[#allocation12_spill] sm:$0xff] }
 0x4b6   : > { %v17566_v45 = vand.u32 4294901760, %v17565_v40 }
 0x4b7   : > { %v6106_v26 = vpop.f32.mrf.mxu1 }
 0x4bf   : > { %v6172_v57 = vpop.f32.mrf.mxu2 }
 0x4c0   : > { %v6110_v3 = vpop.f32.mrf.mxu1 }
 0x4c1   : > { %v6065_v0 = vpop.f32.mrf.mxu0 }
 0x4c2   : > { %v6281_v23 = vpop.f32.mrf.mxu3  ;;  %v6066_v58 = vadd.f32 %v6065_v0, %v5991_v59 }
 0x4c3   : > { %v6282_v34 = vadd.f32 %v6281_v23, %v6172_v57 }
 0x4c4   : > { %v6107_v63 = vadd.f32 %v6106_v26, %v6066_v58 }
 0x4c6   : > { %v6113_v4 = vadd.f32 %v6107_v63, %v5716_v16  ;;  %v17570_v16 = vld [vmem:[#allocation23_spill] sm:$0xff] }
 0x4c7   : > { %v17571_v11 = vand.u32 4294901760, %v17570_v16 }
 0x4c9   : > { %v6180_v61 = vpop.f32.mrf.mxu2 }
 0x4ca   : > { %v6069_v13 = vpop.f32.mrf.mxu0 }
 0x4cb   : > { %v6070_v57 = vadd.f32 %v6069_v13, %v5997_v12 }
 0x4cc   : > { %v6285_v48 = vpop.f32.mrf.mxu3 }
 0x4cd   : > { %v6286_v23 = vadd.f32 %v6285_v48, %v6180_v61  ;;  %v6111_v59 = vadd.f32 %v6110_v3, %v6070_v57 }
 0x4cf   : > { %v6114_v61 = vadd.f32 %v6111_v59, %v5720_v29 }
 0x4db   : > { %v6383_v20 = vpop.f32.mrf.mxu1 }
 0x4e2   : > { %v6339_v38 = vpop.f32.mrf.mxu0 }
 0x4e3   : > { %v6340_v51 = vadd.f32 %v6339_v38, %v6282_v34  ;;  %v6458_v50 = vpop.f32.mrf.mxu2  ;;  %v6389_v26 = vpop.f32.mrf.mxu1 }
 0x4e5   : > { %v6384_v30 = vadd.f32 %v6383_v20, %v6340_v51  ;;  %v6499_v5 = vpop.f32.mrf.mxu3  ;;  %v17568_v51 = vand.u32 4294901760, %v14693_v10 }
 0x4e7   : > { %v6459_v0 = vadd.f32 %v6458_v50, %v6384_v30 }
 0x4e9   : > { %v6500_v55 = vadd.f32 %v6499_v5, %v6459_v0 }
 0x4ea   : > { %v6344_v35 = vpop.f32.mrf.mxu0 }
 0x4eb   : > { %v6506_v53 = vadd.f32 %v6500_v55, %v6113_v4  ;;  %v6345_v6 = vadd.f32 %v6344_v35, %v6286_v23  ;;  %v6462_v18 = vpop.f32.mrf.mxu2  ;;  %v17574_v4 = vld [vmem:[#allocation13_spill] sm:$0xff] }
 0x4ed   : > { %v6513_v1 = vadd.f32 %v9802_v32, %v6506_v53  ;;  %v6390_v22 = vadd.f32 %v6389_v26, %v6345_v6  ;;  %v6503_v34 = vpop.f32.mrf.mxu3  ;;  %v17576_v6 = vld [vmem:[#allocation15_spill] sm:$0xff]  ;;  %v17577_v26 = vld [vmem:[#allocation16_spill] sm:$0xff] }
 0x4ee   : > { %v17578_v59 = vand.u32 4294901760, %v17577_v26 }
 0x4ef   : > { %v6515_v58 = vmax.f32 %v6513_v1, 0.0  ;;  %v6463_v2 = vadd.f32 %v6462_v18, %v6390_v22  ;;  %v7317_v1 = vld [vmem:[#allocation3 + $0x978] sm:$0xff]  ;;  %v17579_v22 = vld [vmem:[#allocation18_spill] sm:$0xff]  ;;  %v17580_v18 = vand.u32 4294901760, %v14760_v9 }
 0x4f1   : > { %v14940_v13 = vand.u32 4294901760, %v6515_v58  ;;  %6517 = vst [vmem:[#allocation2 + $0x8] sm:$0xff] %v6515_v58  ;;  %v6504_v48 = vadd.f32 %v6503_v34, %v6463_v2  ;;  %v7316_v2 = vld [vmem:[#allocation3 + $0x970] sm:$0xff]  ;;  %v17581_v34 = vand.u32 4294901760, %v14780_v46 }
 0x4f3   : > { %v6588_v20 = vsub.f32 %v6515_v58, %v14940_v13  ;;  %v6507_v56 = vadd.f32 %v6504_v48, %v6114_v61  ;;  %6701 = vmatmul.f32.vlgmr.msra.gmra.mxu1 %v14940_v13  ;;  %v14994_v58 = vand.u32 4294901760, %v7317_v1  ;;  %v15003_v48 = vand.u32 4294901760, %v7316_v2 }
 0x4f4   : > { %7141 = vmatpush.msra.mxu1 %v14665_v42 }
 0x4f5   : > { %v6514_v3 = vadd.f32 %v9802_v32, %v6507_v56  ;;  %6759 = vmatmul.f32.vlgmr.msra.gmra.mxu2 %v6588_v20  ;;  %v6589_v38 = vand.u32 4294901760, %v6588_v20  ;;  %v17575_v32 = vand.u32 4294901760, %v14740_v49  ;;  %v17582_v56 = vand.u32 4294901760, %v14800_v21 }
 0x4f6   : > { %7143 = vmatpush.msra.mxu1 %v14673_v8  ;;  %7188 = vmatpush.msra.mxu2 %v17566_v45 }
 0x4f7   : > { %v6516_v54 = vmax.f32 %v6514_v3, 0.0  ;;  %6803 = vmatmul.f32.vlgmr.msra.gmra.mxu3 %v6589_v38  ;;  %v6590_v41 = vsub.f32 %v6588_v20, %v6589_v38  ;;  %v7315_v20 = vld [vmem:[#allocation3 + $0x968] sm:$0xff]  ;;  %v7314_v3 = vld [vmem:[#allocation3 + $0x960] sm:$0xff] }
 0x4f8   : > { %7145 = vmatpush.msra.mxu1 %v17567_v47  ;;  %7192 = vmatpush.msra.mxu2 %v17568_v51  ;;  %v6519_v50 = vld [vmem:[#allocation2 + $0x7] sm:$0xff]  ;;  %v15015_v38 = vand.u32 4294901760, %v7315_v20  ;;  %v15029_v51 = vand.u32 4294901760, %v7314_v3 }
 0x4f9   : > { %6518 = vst [vmem:[#allocation2 + $0x10] sm:$0xff] %v6516_v54  ;;  %7259 = vmatpush.msra.mxu3 %v14665_v42  ;;  %v6591_v63 = vand.u32 4294901760, %v6590_v41  ;;  %v14952_v30 = vand.u32 4294901760, %v6516_v54  ;;  %v14954_v5 = vand.u32 4294901760, %v6519_v50  ;;  %v17572_v42 = vld [vmem:[#allocation14_spill] sm:$0xff]  ;;  %v15024_v41 = vsub.f32 %v7316_v2, %v15003_v48 }
 0x4fa   : > { %7147 = vmatpush.msra.mxu1 %v17569_v36  ;;  %7196 = vmatpush.msra.mxu2 %v17571_v11  ;;  %v17573_v57 = vand.u32 4294901760, %v17572_v42 }
 0x4fb   : > { %7261 = vmatpush.msra.mxu3 %v14673_v8  ;;  %6592 = vmatmul.f32.vlgmr.msra.gmra.mxu0 %v6591_v63  ;;  %v6596_v12 = vsub.f32 %v6516_v54, %v14952_v30  ;;  %v14962_v0 = vsub.f32 %v6519_v50, %v14954_v5  ;;  %v17585_v50 = vld [vmem:[#allocation19_spill] sm:$0xff]  ;;  %v17586_v63 = vld [vmem:[#allocation20_spill] sm:$0xff] }
 0x4fc   : > { %6705 = vmatmul.f32.gmra.mxu1 %v14952_v30  ;;  %7083 = vmatpush.msra.mxu0 %v17565_v40  ;;  %v17583_v40 = vld [vmem:[#allocation17_spill] sm:$0xff] }
 0x4fd   : > { %7149 = vmatpush.msra.mxu1 %v14719_v43  ;;  %7200 = vmatpush.msra.mxu2 %v17573_v57  ;;  %v6597_v23 = vand.u32 4294901760, %v6596_v12  ;;  %v6961_v8 = vand.u32 4294901760, %v14962_v0  ;;  %v17584_v45 = vand.u32 4294901760, %v17583_v40 }
 0x4fe   : > { %7263 = vmatpush.msra.mxu3 %v17567_v47  ;;  %6764 = vmatmul.f32.gmra.mxu2 %v6596_v12  ;;  %v7313_v47 = vld [vmem:[#allocation3 + $0x958] sm:$0xff] }
 0x4ff   : > { %7086 = vmatpush.msra.mxu0 %v14693_v10  ;;  %7151 = vmatpush.msra.mxu1 %v17574_v4  ;;  %v6598_v55 = vsub.f32 %v6596_v12, %v6597_v23  ;;  %v6962_v10 = vsub.f32 %v14962_v0, %v6961_v8  ;;  %v15039_v11 = vand.u32 4294901760, %v7313_v47  ;;  %v7312_v12 = vld [vmem:[#allocation3 + $0x950] sm:$0xff] }
 0x500   : > { %7204 = vmatpush.msra.mxu2 %v17575_v32  ;;  %7265 = vmatpush.msra.mxu3 %v17569_v36  ;;  %v6520_v35 = vld [vmem:[#allocation2 + $0xf] sm:$0xff]  ;;  %v17587_v36 = vand.u32 4294901760, %v17586_v63 }
 0x501   : > { %6809 = vmatmul.f32.gmra.mxu3 %v6597_v23  ;;  %7089 = vmatpush.msra.mxu0 %v17570_v16  ;;  %v6599_v27 = vand.u32 4294901760, %v6598_v55  ;;  %v14977_v53 = vand.u32 4294901760, %v6520_v35  ;;  %v15037_v16 = vsub.f32 %v7315_v20, %v15015_v38  ;;  %v15058_v23 = vsub.f32 %v7313_v47, %v15039_v11  ;;  %v7310_v55 = vld [vmem:[#allocation3 + $0x940] sm:$0xff] }
 0x502   : > { %7153 = vmatpush.msra.mxu1 %v17576_v6  ;;  %7208 = vmatpush.msra.mxu2 %v17578_v59  ;;  %v15085_v59 = vand.u32 4294901760, %v7310_v55 }
 0x503   : > { %7267 = vmatpush.msra.mxu3 %v14719_v43  ;;  %7092 = vmatpush.msra.mxu0 %v17572_v42  ;;  %v14991_v29 = vsub.f32 %v6520_v35, %v14977_v53  ;;  %v6963_v43 = vand.u32 4294901760, %v6962_v10  ;;  %v17588_v42 = vand.u32 4294901760, %v14834_v60  ;;  %v17089_v57 = vand.u32 4294901760, %v15037_v16  ;;  %v7309_v10 = vld [vmem:[#allocation3 + $0x938] sm:$0xff] }
 0x504   : > { %7155 = vmatpush.msra.mxu1 %v17579_v22  ;;  %7212 = vmatpush.msra.mxu2 %v17580_v18  ;;  %v15110_v2 = vsub.f32 %v7310_v55, %v15085_v59 }
 0x505   : > { %7269 = vmatpush.msra.mxu3 %v17574_v4  ;;  %6600 = vmatmul.f32.gmra.mxu0 %v6599_v27  ;;  %v6969_v61 = vand.u32 4294901760, %v14991_v29  ;;  %v15060_v4 = vand.u32 4294901760, %v7312_v12 }
 0x506   : > { %6919 = vmatmul.f32.vlgmr.msrb.gmra.mxu1 %v14940_v13  ;;  %7095 = vmatpush.msra.mxu0 %v14740_v49  ;;  %v15008_v49 = vsub.f32 %v7317_v1, %v14994_v58  ;;  %v7308_v1 = vld [vmem:[#allocation3 + $0x930] sm:$0xff] }
 0x507   : > { %7157 = vmatpush.msra.mxu1 %v14777_v44  ;;  %7216 = vmatpush.msra.mxu2 %v17581_v34  ;;  %v6970_v54 = vsub.f32 %v14991_v29, %v6969_v61 }
 0x508   : > { %7271 = vmatpush.msra.mxu3 %v17576_v6  ;;  %6964 = vmatmul.f32.vlgmr.msrb.gmra.mxu2 %v6963_v43  ;;  %v17087_v6 = vand.u32 4294901760, %v15058_v23  ;;  %v7306_v43 = vld [vmem:[#allocation3 + $0x920] sm:$0xff] }
 0x509   : > { %7098 = vmatpush.msra.mxu0 %v17577_v26  ;;  %7159 = vmatpush.msra.mxu1 %v14792_v19  ;;  %v15083_v26 = vsub.f32 %v7312_v12, %v15060_v4 }
 0x50a   : > { %7220 = vmatpush.msra.mxu2 %v17582_v56  ;;  %7273 = vmatpush.msra.mxu3 %v17579_v22  ;;  %v15100_v22 = vand.u32 4294901760, %v7309_v10  ;;  %v17083_v56 = vand.u32 4294901760, %v15110_v2 }
 0x50b   : > { %7073 = vmatmul.f32.vlgmr.msrb.gmra.mxu3 %v14954_v5  ;;  %7101 = vmatpush.msra.mxu0 %v14760_v9  ;;  %v17092_v9 = vand.u32 4294901760, %v15008_v49  ;;  %v17085_v18 = vand.u32 4294901760, %v15083_v26 }
 0x50c   : > { %7161 = vmatpush.msra.mxu1 %v14806_v62  ;;  %7224 = vmatpush.msra.mxu2 %v17584_v45  ;;  %v15121_v34 = vsub.f32 %v7309_v10, %v15100_v22 }
 0x50d   : > { %7275 = vmatpush.msra.mxu3 %v14777_v44  ;;  %7104 = vmatpush.msra.mxu0 %v14780_v46  ;;  %v6971_v44 = vand.u32 4294901760, %v6970_v54  ;;  %v17090_v46 = vand.u32 4294901760, %v15024_v41  ;;  %v7304_v54 = vld [vmem:[#allocation3 + $0x910] sm:$0xff] }
 0x50e   : > { %7163 = vmatpush.msra.mxu1 %v17585_v50  ;;  %7228 = vmatpush.msra.mxu2 %v17587_v36  ;;  %v17082_v47 = vand.u32 4294901760, %v15121_v34  ;;  %v7303_v36 = vld [vmem:[#allocation3 + $0x908] sm:$0xff] }
 0x50f   : > { %7277 = vmatpush.msra.mxu3 %v14792_v19  ;;  %6878 = vmatmul.f32.vlgmr.msrb.gmra.mxu0 %v14940_v13  ;;  %v7370_v19 = vsub.f32 %v15008_v49, %v17092_v9  ;;  %v15051_v13 = vsub.f32 %v7314_v3, %v15029_v51  ;;  %v7305_v3 = vld [vmem:[#allocation3 + $0x918] sm:$0xff] }
 0x510   : > { %6923 = vmatmul.f32.gmra.mxu1 %v14952_v30  ;;  %7107 = vmatpush.msra.mxu0 %v14800_v21  ;;  %v7311_v21 = vld [vmem:[#allocation3 + $0x948] sm:$0xff] }
 0x511   : > { %7165 = vmatpush.msra.mxu1 %v14831_v52  ;;  %7232 = vmatpush.msra.mxu2 %v17588_v42  ;;  %v7371_v32 = vand.u32 4294901760, %v7370_v19  ;;  %v17088_v35 = vand.u32 4294901760, %v15051_v13  ;;  %v15071_v27 = vand.u32 4294901760, %v7311_v21  ;;  %v15159_v42 = vand.u32 4294901760, %v7304_v54  ;;  %v7302_v19 = vld [vmem:[#allocation3 + $0x900] sm:$0xff] }
 0x512   : > { %7279 = vmatpush.msra.mxu3 %v14806_v62  ;;  %6972 = vmatmul.f32.gmra.mxu2 %v6971_v44  ;;  %v7376_v62 = vsub.f32 %v15024_v41, %v17090_v46  ;;  %v7701_v46 = vld [vmem:[#allocation3 + $0x9b0] sm:$0xff] }
 0x513   : > { %7110 = vmatpush.msra.mxu0 %v17583_v40  ;;  %7167 = vmatpush.msra.mxu1 %v14851_v28  ;;  %v15135_v40 = vand.u32 4294901760, %v7306_v43  ;;  %v15183_v10 = vsub.f32 %v7304_v54, %v15159_v42  ;;  %v7709_v54 = vld [vmem:[#allocation3 + $0x9f0] sm:$0xff] }
 0x514   : > { %7236 = vmatpush.msra.mxu2 %v7050_v33  ;;  %7281 = vmatpush.msra.mxu3 %v17585_v50  ;;  %v7382_v33 = vsub.f32 %v15037_v16, %v17089_v57  ;;  %v15147_v50 = vand.u32 4294901760, %v7305_v3 }
 0x515   : > { %7077 = vmatmul.f32.gmra.mxu3 %v14977_v53  ;;  %7113 = vmatpush.msra.mxu0 %v17586_v63  ;;  %v7412_v63 = vsub.f32 %v15110_v2, %v17083_v56  ;;  %v15157_v12 = vsub.f32 %v7306_v43, %v15135_v40  ;;  %v17076_v43 = vand.u32 4294901760, %v15183_v10 }
 0x516   : > { %7169 = vmatpush.msra.mxu1 %v14874_v39  ;;  %7240 = vmatpush.msra.mxu2 %v7056_v7  ;;  %v15095_v7 = vsub.f32 %v7311_v21, %v15071_v27  ;;  %v7418_v21 = vsub.f32 %v15121_v34, %v17082_v47  ;;  %v15171_v55 = vsub.f32 %v7305_v3, %v15147_v50  ;;  %v7703_v47 = vld [vmem:[#allocation3 + $0x9c0] sm:$0xff] }
 0x517   : > { %7283 = vmatpush.msra.mxu3 %v14831_v52  ;;  %7116 = vmatpush.msra.mxu0 %v14834_v60  ;;  %v7377_v52 = vand.u32 4294901760, %v7376_v62  ;;  %v7388_v60 = vsub.f32 %v15051_v13, %v17088_v35 }
 0x518   : > { %7171 = vmatpush.msra.mxu1 %v14887_v31  ;;  %7244 = vmatpush.msra.mxu2 %v7062_v37  ;;  %v7394_v37 = vsub.f32 %v15058_v23, %v17087_v6  ;;  %v7702_v6 = vld [vmem:[#allocation3 + $0x9b8] sm:$0xff] }
 0x519   : > { %7285 = vmatpush.msra.mxu3 %v14851_v28  ;;  %6882 = vmatmul.f32.gmra.mxu0 %v14952_v30  ;;  %v7383_v28 = vand.u32 4294901760, %v7382_v33  ;;  %v7307_v30 = vld [vmem:[#allocation3 + $0x928] sm:$0xff]  ;;  %v17078_v33 = vand.u32 4294901760, %v15157_v12 }
 0x51a   : > { %7372 = vmatpush.msrb.mxu1 %v7371_v32  ;;  %7119 = vmatpush.msra.mxu0 %v14854_v24  ;;  %v7389_v24 = vand.u32 4294901760, %v7388_v60  ;;  %v15123_v20 = vand.u32 4294901760, %v7307_v30  ;;  %v15173_v32 = vand.u32 4294901760, %v7303_v36  ;;  %v7419_v60 = vand.u32 4294901760, %v7418_v21 }
 0x51b   : > { %7175 = vmatmul.f32.vlgmr.msra.gmra.mxu1 %v6961_v8  ;;  %7248 = vmatpush.msra.mxu2 %v7068_v14  ;;  %v15113_v8 = vand.u32 4294901760, %v7308_v1  ;;  %v17084_v14 = vand.u32 4294901760, %v15095_v7  ;;  %v15229_v21 = vand.u32 4294901760, %v7709_v54 }
 0x51c   : > { %7287 = vmatpush.msra.mxu3 %v14874_v39  ;;  %7378 = vmatpush.msrb.mxu1 %v7377_v52  ;;  %v7395_v39 = vand.u32 4294901760, %v7394_v37  ;;  %v15185_v52 = vand.u32 4294901760, %v7302_v19  ;;  %v15195_v37 = vsub.f32 %v7303_v36, %v15173_v32 }
 0x51d   : > { %7474 = vmatpush.msrb.mxu2 %v15008_v49  ;;  %7122 = vmatpush.msra.mxu0 %v14877_v15  ;;  %v7400_v15 = vsub.f32 %v15083_v26, %v17085_v18  ;;  %v7406_v45 = vsub.f32 %v15095_v7, %v17084_v14 }
 0x51e   : > { %7250 = vmatmul.f32.vlgmr.msra.gmra.mxu2 %v14954_v5  ;;  %7289 = vmatpush.msra.mxu3 %v14887_v31  ;;  %v15133_v31 = vsub.f32 %v7308_v1, %v15113_v8 }
 0x51f   : > { %7384 = vmatpush.msrb.mxu1 %v7383_v28  ;;  %7477 = vmatpush.msrb.mxu2 %v15024_v41  ;;  %v17077_v28 = vand.u32 4294901760, %v15171_v55 }
 0x520   : > { %7532 = vmatpush.msrb.mxu3 %v14994_v58  ;;  %7125 = vmatpush.msra.mxu0 %v14890_v17  ;;  %v15145_v17 = vsub.f32 %v7307_v30, %v15123_v20  ;;  %v17081_v44 = vand.u32 4294901760, %v15133_v31 }
 0x521   : > { %7291 = vmatmul.f32.vlgmr.msra.gmra.mxu3 %v14954_v5  ;;  %7390 = vmatpush.msrb.mxu1 %v7389_v24  ;;  %v7401_v5 = vand.u32 4294901760, %v7400_v15  ;;  %v7436_v24 = vsub.f32 %v15157_v12, %v17078_v33  ;;  %v7442_v3 = vsub.f32 %v15171_v55, %v17077_v28  ;;  %v7300_v28 = vld [vmem:[#allocation2 + $0x11] sm:$0xff] }
 0x522   : > { %7480 = vmatpush.msrb.mxu2 %v15037_v16  ;;  %7534 = vmatpush.msrb.mxu3 %v15003_v48  ;;  %v17079_v62 = vand.u32 4294901760, %v15145_v17 }
 0x523   : > { %7128 = vmatpush.msra.mxu0 %v14902_v25  ;;  %7396 = vmatpush.msrb.mxu1 %v7395_v39  ;;  %v7407_v25 = vand.u32 4294901760, %v7406_v45  ;;  %v15205_v39 = vsub.f32 %v7302_v19, %v15185_v52  ;;  %v17075_v45 = vand.u32 4294901760, %v15195_v37 }
 0x524   : > { %7483 = vmatpush.msrb.mxu2 %v15051_v13  ;;  %7536 = vmatpush.msrb.mxu3 %v15015_v38  ;;  %v7430_v1 = vsub.f32 %v15145_v17, %v17079_v62  ;;  %v15279_v62 = vand.u32 4294901760, %v7300_v28 }
 0x525   : > { %7319 = vmatpush.msrb.mxu0 %v14994_v58  ;;  %7181 = vmatmul.f32.gmra.mxu1 %v6969_v61  ;;  %v7424_v61 = vsub.f32 %v15133_v31, %v17081_v44  ;;  %v17074_v36 = vand.u32 4294901760, %v15205_v39  ;;  %v7454_v19 = vsub.f32 %v15195_v37, %v17075_v45 }
 0x526   : > { %7131 = vmatmul.f32.vlgmr.msra.gmra.mxu0 %v14962_v0  ;;  %7402 = vmatpush.msrb.mxu1 %v7401_v5  ;;  %v7413_v0 = vand.u32 4294901760, %v7412_v63  ;;  %v7431_v15 = vand.u32 4294901760, %v7430_v1  ;;  %v7437_v5 = vand.u32 4294901760, %v7436_v24  ;;  %v7448_v63 = vsub.f32 %v15183_v10, %v17076_v43  ;;  %v7707_v24 = vld [vmem:[#allocation3 + $0x9e0] sm:$0xff]  ;;  %17590 = vst [vmem:[#allocation10_spill] sm:$0xff] %v15279_v62 }
 0x527   : > { %7321 = vmatpush.msrb.mxu0 %v15003_v48  ;;  %7486 = vmatpush.msrb.mxu2 %v15058_v23  ;;  %v7425_v30 = vand.u32 4294901760, %v7424_v61  ;;  %v7708_v61 = vld [vmem:[#allocation3 + $0x9e8] sm:$0xff]  ;;  %v7460_v1 = vsub.f32 %v15205_v39, %v17074_v36 }
 0x528   : > { %7538 = vmatpush.msrb.mxu3 %v15029_v51  ;;  %7254 = vmatmul.f32.gmra.mxu2 %v14977_v53 }
 0x529   : > { %7323 = vmatpush.msrb.mxu0 %v15015_v38  ;;  %7408 = vmatpush.msrb.mxu1 %v7407_v25  ;;  %v7461_v36 = vand.u32 4294901760, %v7460_v1 }
 0x52a   : > { %7489 = vmatpush.msrb.mxu2 %v15083_v26  ;;  %7540 = vmatpush.msrb.mxu3 %v15039_v11 }
 0x52b   : > { %7295 = vmatmul.f32.gmra.mxu3 %v14977_v53  ;;  %7325 = vmatpush.msrb.mxu0 %v15029_v51  ;;  %v7710_v53 = vld [vmem:[#allocation3 + $0x9f8] sm:$0xff] }
 0x52c   : > { %7414 = vmatpush.msrb.mxu1 %v7413_v0  ;;  %7492 = vmatpush.msrb.mxu2 %v15095_v7  ;;  %v15221_v25 = vand.u32 4294901760, %v7710_v53  ;;  %v7299_v0 = vld [vmem:[#allocation2 + $0x9] sm:$0xff] }
 0x52d   : > { %7542 = vmatpush.msrb.mxu3 %v15060_v4  ;;  %7327 = vmatpush.msrb.mxu0 %v15039_v11 }
 0x52e   : > { %7420 = vmatpush.msrb.mxu1 %v7419_v60  ;;  %7495 = vmatpush.msrb.mxu2 %v15110_v2  ;;  %v7449_v60 = vand.u32 4294901760, %v7448_v63  ;;  %v15248_v63 = vsub.f32 %v7709_v54, %v15229_v21 }
 0x52f   : > { %7544 = vmatpush.msrb.mxu3 %v15071_v27  ;;  %7136 = vmatmul.f32.gmra.mxu0 %v14991_v29  ;;  %v7443_v29 = vand.u32 4294901760, %v7442_v3  ;;  %v15243_v3 = vand.u32 4294901760, %v7299_v0 }
 0x530   : > { %7329 = vmatpush.msrb.mxu0 %v15060_v4  ;;  %7426 = vmatpush.msrb.mxu1 %v7425_v30  ;;  %v15238_v30 = vsub.f32 %v7710_v53, %v15221_v25  ;;  %v7706_v53 = vld [vmem:[#allocation3 + $0x9d8] sm:$0xff]  ;;  %v17086_v43 = vand.u32 4294901760, %v15248_v63 }
 0x531   : > { %7498 = vmatpush.msrb.mxu2 %v15121_v34  ;;  %7546 = vmatpush.msrb.mxu3 %v15085_v59  ;;  %v7351_v54 = vsub.f32 %v7299_v0, %v15243_v3  ;;  %v15264_v1 = vand.u32 4294901760, %v7706_v53 }
 0x532   : > { %7331 = vmatpush.msrb.mxu0 %v15071_v27  ;;  %7432 = vmatpush.msrb.mxu1 %v7431_v15  ;;  %v7455_v15 = vand.u32 4294901760, %v7454_v19  ;;  %v17080_v45 = vand.u32 4294901760, %v15238_v30  ;;  %v7705_v19 = vld [vmem:[#allocation3 + $0x9d0] sm:$0xff] }
 0x533   : > { %7501 = vmatpush.msrb.mxu2 %v15133_v31  ;;  %7548 = vmatpush.msrb.mxu3 %v15100_v22  ;;  %v15275_v33 = vand.u32 4294901760, %v7705_v19  ;;  %v15288_v44 = vsub.f32 %v7706_v53, %v15264_v1  ;;  %v15302_v53 = vand.u32 4294901760, %v7703_v47 }
 0x534   : > { %7333 = vmatpush.msrb.mxu0 %v15085_v59  ;;  %7438 = vmatpush.msrb.mxu1 %v7437_v5  ;;  %v15245_v5 = vand.u32 4294901760, %v7708_v61 }
 0x535   : > { %7504 = vmatpush.msrb.mxu2 %v15145_v17  ;;  %7550 = vmatpush.msrb.mxu3 %v15113_v8  ;;  %17591 = vst [vmem:[#allocation11_spill] sm:$0xff] %v15288_v44  ;;  %v17096_v57 = vand.u32 4294901760, %v15288_v44 }
 0x536   : > { %7335 = vmatpush.msrb.mxu0 %v15100_v22  ;;  %7444 = vmatpush.msrb.mxu1 %v7443_v29  ;;  %v15254_v29 = vand.u32 4294901760, %v7707_v24 }
 0x537   : > { %7507 = vmatpush.msrb.mxu2 %v15157_v12  ;;  %7552 = vmatpush.msrb.mxu3 %v15123_v20 }
 0x538   : > { %7337 = vmatpush.msrb.mxu0 %v15113_v8  ;;  %7450 = vmatpush.msrb.mxu1 %v7449_v60  ;;  %v15262_v60 = vsub.f32 %v7708_v61, %v15245_v5  ;;  %v15273_v0 = vsub.f32 %v7707_v24, %v15254_v29  ;;  %v7704_v61 = vld [vmem:[#allocation3 + $0x9c8] sm:$0xff] }
 0x539   : > { %7510 = vmatpush.msrb.mxu2 %v15171_v55  ;;  %7554 = vmatpush.msrb.mxu3 %v15135_v40  ;;  %v15292_v56 = vand.u32 4294901760, %v7704_v61 }
 0x53a   : > { %7339 = vmatpush.msrb.mxu0 %v15123_v20  ;;  %7456 = vmatpush.msrb.mxu1 %v7455_v15  ;;  %v7763_v15 = vsub.f32 %v15238_v30, %v17080_v45  ;;  %17589 = vst [vmem:[#allocation21_spill] sm:$0xff] %v15273_v0  ;;  %v7769_v45 = vsub.f32 %v15248_v63, %v17086_v43  ;;  %v17091_v24 = vand.u32 4294901760, %v15262_v60  ;;  %v17093_v18 = vand.u32 4294901760, %v15273_v0 }
 0x53b   : > { %7513 = vmatpush.msrb.mxu2 %v15183_v10  ;;  %7556 = vmatpush.msrb.mxu3 %v15147_v50  ;;  %v15297_v43 = vsub.f32 %v7705_v19, %v15275_v33 }
 0x53c   : > { %7341 = vmatpush.msrb.mxu0 %v15135_v40  ;;  %7462 = vmatpush.msrb.mxu1 %v7461_v36  ;;  %v7352_v36 = vand.u32 4294901760, %v7351_v54  ;;  %v7764_v14 = vand.u32 4294901760, %v7763_v15  ;;  %v7770_v35 = vand.u32 4294901760, %v7769_v45  ;;  %v7775_v19 = vsub.f32 %v15262_v60, %v17091_v24  ;;  %v7700_v24 = vld [vmem:[#allocation3 + $0x9a8] sm:$0xff] }
 0x53d   : > { %7516 = vmatpush.msrb.mxu2 %v15195_v37  ;;  %7558 = vmatpush.msrb.mxu3 %v15159_v42  ;;  %17592 = vst [vmem:[#allocation12_spill] sm:$0xff] %v15297_v43  ;;  %v7781_v45 = vsub.f32 %v15273_v0, %v17093_v18  ;;  %v7787_v18 = vsub.f32 %v15288_v44, %v17096_v57  ;;  %v15338_v0 = vand.u32 4294901760, %v7700_v24  ;;  %v7698_v57 = vld [vmem:[#allocation3 + $0x998] sm:$0xff]  ;;  %v17594_v44 = vand.u32 4294901760, %v15008_v49 }
 0x53e   : > { %7464 = vmatmul.f32.vlgmr.msrb.gmra.mxu1 %v15243_v3  ;;  %7343 = vmatpush.msrb.mxu0 %v15147_v50  ;;  %v7353_v15 = vsub.f32 %v7351_v54, %v7352_v36 }
 0x53f   : > { %7650 = vmatpush.msra.mxu1 %v14994_v58  ;;  %7519 = vmatpush.msrb.mxu2 %v15205_v39  ;;  %v7359_v58 = vsub.f32 %v7300_v28, %v15279_v62  ;;  %v15314_v28 = vand.u32 4294901760, %v7702_v6 }
 0x540   : > { %7560 = vmatpush.msrb.mxu3 %v15173_v32  ;;  %7522 = vmatmul.f32.vlgmr.msrb.gmra.mxu2 %v7351_v54  ;;  %v7699_v54 = vld [vmem:[#allocation3 + $0x9a0] sm:$0xff] }
 0x541   : > { %7652 = vmatpush.msra.mxu1 %v15003_v48  ;;  %7712 = vmatpush.msra.mxu2 %v15221_v25  ;;  %v15312_v48 = vsub.f32 %v7704_v61, %v15292_v56  ;;  %v15326_v61 = vand.u32 4294901760, %v7701_v46  ;;  %v7360_v9 = vand.u32 4294901760, %v7359_v58 }
 0x542   : > { %7345 = vmatpush.msrb.mxu0 %v15159_v42  ;;  %7562 = vmatpush.msrb.mxu3 %v15185_v52 }
 0x543   : > { %7566 = vmatmul.f32.vlgmr.msrb.gmra.mxu3 %v7352_v36  ;;  %7654 = vmatpush.msra.mxu1 %v15015_v38  ;;  %v15324_v38 = vsub.f32 %v7703_v47, %v15302_v53  ;;  %v7776_v36 = vand.u32 4294901760, %v7775_v19  ;;  %v15336_v47 = vsub.f32 %v7702_v6, %v15314_v28  ;;  %v15349_v6 = vsub.f32 %v7701_v46, %v15326_v61 }
 0x544   : > { %7714 = vmatpush.msra.mxu2 %v15229_v21  ;;  %7765 = vmatpush.msra.mxu3 %v7764_v14  ;;  %v7354_v14 = vand.u32 4294901760, %v7353_v15  ;;  %v17593_v15 = vand.u32 4294901760, %v15297_v43  ;;  %v17596_v49 = vand.u32 4294901760, %v15312_v48  ;;  %v15361_v46 = vsub.f32 %v7700_v24, %v15338_v0 }
 0x545   : > { %7347 = vmatpush.msrb.mxu0 %v15173_v32  ;;  %7656 = vmatpush.msra.mxu1 %v15029_v51  ;;  %v17103_v51 = vand.u32 4294901760, %v15336_v47 }
 0x546   : > { %7716 = vmatpush.msra.mxu2 %v15245_v5  ;;  %7771 = vmatpush.msra.mxu3 %v7770_v35  ;;  %v7782_v35 = vand.u32 4294901760, %v7781_v45  ;;  %v7793_v19 = vsub.f32 %v15297_v43, %v17593_v15  ;;  %v7361_v45 = vsub.f32 %v7359_v58, %v7360_v9  ;;  %v17595_v15 = vand.u32 4294901760, %v15024_v41 }
 0x547   : > { %7349 = vmatpush.msrb.mxu0 %v15185_v52  ;;  %7468 = vmatmul.f32.gmra.mxu1 %v15279_v62  ;;  %v15351_v62 = vand.u32 4294901760, %v7699_v54  ;;  %v15363_v43 = vand.u32 4294901760, %v7698_v57  ;;  %v17597_v41 = vand.u32 4294901760, %v15037_v16  ;;  %v17599_v16 = vand.u32 4294901760, %v15051_v13 }
 0x548   : > { %7355 = vmatmul.f32.vlgmr.msrb.gmra.mxu0 %v7354_v14  ;;  %7658 = vmatpush.msra.mxu1 %v15039_v11  ;;  %v7788_v11 = vand.u32 4294901760, %v7787_v18  ;;  %v7697_v14 = vld [vmem:[#allocation3 + $0x990] sm:$0xff]  ;;  %v7794_v18 = vand.u32 4294901760, %v7793_v19  ;;  %v7811_v19 = vsub.f32 %v15336_v47, %v17103_v51 }
 0x549   : > { %7579 = vmatpush.msra.mxu0 %v17594_v44  ;;  %7718 = vmatpush.msra.mxu2 %v15254_v29  ;;  %v7799_v44 = vsub.f32 %v15312_v48, %v17596_v49  ;;  %v15375_v24 = vand.u32 4294901760, %v7697_v14  ;;  %v7696_v49 = vld [vmem:[#allocation3 + $0x988] sm:$0xff] }
 0x54a   : > { %7777 = vmatpush.msra.mxu3 %v7776_v36  ;;  %7527 = vmatmul.f32.gmra.mxu2 %v7359_v58  ;;  %v7692_v36 = vld [vmem:[#allocation2 + $0xa] sm:$0xff] }
 0x54b   : > { %7583 = vmatpush.msra.mxu0 %v17595_v15  ;;  %7660 = vmatpush.msra.mxu1 %v15060_v4  ;;  %v17598_v4 = vand.u32 4294901760, %v15324_v38  ;;  %v15373_v15 = vsub.f32 %v7699_v54, %v15351_v62  ;;  %v7822_v54 = vand.u32 4294901760, %v15361_v46  ;;  %v15404_v51 = vand.u32 4294901760, %v7692_v36 }
 0x54c   : > { %7720 = vmatpush.msra.mxu2 %v15264_v1  ;;  %7783 = vmatpush.msra.mxu3 %v7782_v35  ;;  %v7800_v35 = vand.u32 4294901760, %v7799_v44 }
 0x54d   : > { %7572 = vmatmul.f32.gmra.mxu3 %v7360_v9  ;;  %7587 = vmatpush.msra.mxu0 %v17597_v41  ;;  %v7805_v58 = vsub.f32 %v15324_v38, %v17598_v4  ;;  %v7362_v9 = vand.u32 4294901760, %v7361_v45  ;;  %v15386_v41 = vsub.f32 %v7698_v57, %v15363_v43  ;;  %v7695_v4 = vld [vmem:[#allocation3 + $0x980] sm:$0xff]  ;;  %v7828_v44 = vand.u32 4294901760, %v15373_v15 }
 0x54e   : > { %7662 = vmatpush.msra.mxu1 %v15071_v27  ;;  %7722 = vmatpush.msra.mxu2 %v15275_v33  ;;  %v15390_v27 = vand.u32 4294901760, %v7696_v49  ;;  %v15397_v57 = vsub.f32 %v7697_v14, %v15375_v24 }
 0x54f   : > { %7789 = vmatpush.msra.mxu3 %v7788_v11  ;;  %7591 = vmatpush.msra.mxu0 %v17599_v16  ;;  %v7806_v13 = vand.u32 4294901760, %v7805_v58  ;;  %v17600_v11 = vand.u32 4294901760, %v15349_v6  ;;  %v17601_v16 = vand.u32 4294901760, %v15058_v23  ;;  %v7823_v58 = vsub.f32 %v15361_v46, %v7822_v54 }
 0x550   : > { %7664 = vmatpush.msra.mxu1 %v15085_v59  ;;  %7724 = vmatpush.msra.mxu2 %v15292_v56  ;;  %v15402_v59 = vand.u32 4294901760, %v7695_v4  ;;  %v7834_v14 = vand.u32 4294901760, %v15386_v41  ;;  %v15415_v23 = vsub.f32 %v7696_v49, %v15390_v27 }
 0x551   : > { %7795 = vmatpush.msra.mxu3 %v7794_v18  ;;  %7363 = vmatmul.f32.gmra.mxu0 %v7362_v9  ;;  %v7817_v45 = vsub.f32 %v15349_v6, %v17600_v11  ;;  %v7812_v18 = vand.u32 4294901760, %v7811_v19  ;;  %v17602_v9 = vand.u32 4294901760, %v15083_v26  ;;  %v7840_v19 = vand.u32 4294901760, %v15397_v57 }
 0x552   : > { %7595 = vmatpush.msra.mxu0 %v17601_v16  ;;  %7666 = vmatpush.msra.mxu1 %v15100_v22  ;;  %v17603_v11 = vand.u32 4294901760, %v15095_v7  ;;  %v15426_v26 = vsub.f32 %v7692_v36, %v15404_v51  ;;  %v7824_v49 = vand.u32 4294901760, %v7823_v58  ;;  %v7846_v7 = vand.u32 4294901760, %v15415_v23 }
 0x553   : > { %7726 = vmatpush.msra.mxu2 %v15302_v53  ;;  %7801 = vmatpush.msra.mxu3 %v7800_v35  ;;  %v7818_v22 = vand.u32 4294901760, %v7817_v45  ;;  %v7829_v35 = vsub.f32 %v15373_v15, %v7828_v44  ;;  %v17604_v45 = vand.u32 4294901760, %v15110_v2  ;;  %v7841_v36 = vsub.f32 %v15397_v57, %v7840_v19 }
 0x554   : > { %7599 = vmatpush.msra.mxu0 %v17602_v9  ;;  %7668 = vmatpush.msra.mxu1 %v15113_v8  ;;  %v15429_v8 = vsub.f32 %v7695_v4, %v15402_v59  ;;  %v7693_v4 = vld [vmem:[#allocation2 + $0x12] sm:$0xff]  ;;  %v17605_v16 = vand.u32 4294901760, %v15121_v34  ;;  %v7745_v2 = vand.u32 4294901760, %v15426_v26  ;;  %v17606_v58 = vand.u32 4294901760, %v15133_v31 }
 0x555   : > { %7728 = vmatpush.msra.mxu2 %v15314_v28  ;;  %7807 = vmatpush.msra.mxu3 %v7806_v13  ;;  %v7835_v13 = vsub.f32 %v15386_v41, %v7834_v14  ;;  %v7847_v34 = vsub.f32 %v15415_v23, %v7846_v7  ;;  %v15455_v9 = vand.u32 4294901760, %v7693_v4 }
 0x556   : > { %7603 = vmatpush.msra.mxu0 %v17603_v11  ;;  %7670 = vmatpush.msra.mxu1 %v15123_v20  ;;  %v7830_v20 = vand.u32 4294901760, %v7829_v35  ;;  %v7746_v31 = vsub.f32 %v15426_v26, %v7745_v2  ;;  %v17608_v35 = vand.u32 4294901760, %v15157_v12 }
 0x557   : > { %7730 = vmatpush.msra.mxu2 %v15326_v61  ;;  %7813 = vmatpush.msra.mxu3 %v7812_v18  ;;  %v7836_v18 = vand.u32 4294901760, %v7835_v13  ;;  %v15472_v11 = vsub.f32 %v7693_v4, %v15455_v9  ;;  %v17615_v4 = vand.u32 4294901760, %v15205_v39  ;;  %v17619_v39 = vld [vmem:[#allocation11_spill] sm:$0xff] }
 0x558   : > { %7607 = vmatpush.msra.mxu0 %v17604_v45  ;;  %7672 = vmatpush.msra.mxu1 %v15135_v40  ;;  %v7852_v40 = vand.u32 4294901760, %v15429_v8  ;;  %v17611_v45 = vand.u32 4294901760, %v15183_v10  ;;  %v17614_v10 = vand.u32 4294901760, %v15262_v60 }
 0x559   : > { %7732 = vmatpush.msra.mxu2 %v15338_v0  ;;  %7819 = vmatpush.msra.mxu3 %v7818_v22  ;;  %v17607_v22 = vand.u32 4294901760, %v15145_v17  ;;  %v7848_v17 = vand.u32 4294901760, %v7847_v34  ;;  %v7753_v12 = vand.u32 4294901760, %v15472_v11 }
 0x55a   : > { %7611 = vmatpush.msra.mxu0 %v17605_v16  ;;  %7674 = vmatpush.msra.mxu1 %v15147_v50  ;;  %v7842_v50 = vand.u32 4294901760, %v7841_v36  ;;  %v17613_v36 = vand.u32 4294901760, %v15195_v37  ;;  %v17616_v16 = vld [vmem:[#allocation10_spill] sm:$0xff]  ;;  %v17617_v37 = vld [vmem:[#allocation21_spill] sm:$0xff] }
 0x55b   : > { %7734 = vmatpush.msra.mxu2 %v15351_v62  ;;  %7825 = vmatpush.msra.mxu3 %v7824_v49  ;;  %v7747_v49 = vand.u32 4294901760, %v7746_v31 }
 0x55c   : > { %7615 = vmatpush.msra.mxu0 %v17606_v58  ;;  %7676 = vmatpush.msra.mxu1 %v15159_v42  ;;  %v7853_v42 = vsub.f32 %v15429_v8, %v7852_v40 }
 0x55d   : > { %7736 = vmatpush.msra.mxu2 %v15363_v43  ;;  %7831 = vmatpush.msra.mxu3 %v7830_v20  ;;  %v7754_v20 = vsub.f32 %v15472_v11, %v7753_v12 }
 0x55e   : > { %7619 = vmatpush.msra.mxu0 %v17607_v22  ;;  %7678 = vmatpush.msra.mxu1 %v15173_v32  ;;  %v17609_v32 = vand.u32 4294901760, %v15171_v55  ;;  %v7854_v13 = vand.u32 4294901760, %v7853_v42  ;;  %v17612_v55 = vand.u32 4294901760, %v15248_v63  ;;  %v8125_v22 = vld [vmem:[#allocation3 + $0xac8] sm:$0xff] }
 0x55f   : > { %7738 = vmatpush.msra.mxu2 %v15375_v24  ;;  %7837 = vmatpush.msra.mxu3 %v7836_v18  ;;  %v17618_v18 = vand.u32 4294901760, %v17617_v37 }
 0x560   : > { %7623 = vmatpush.msra.mxu0 %v17608_v35  ;;  %7680 = vmatpush.msra.mxu1 %v15185_v52  ;;  %v17610_v52 = vand.u32 4294901760, %v15238_v30 }
 0x561   : > { %7740 = vmatpush.msra.mxu2 %v15390_v27  ;;  %7843 = vmatpush.msra.mxu3 %v7842_v50 }
 0x562   : > { %7682 = vmatmul.f32.vlgmr.msra.gmra.mxu1 %v15243_v3  ;;  %7627 = vmatpush.msra.mxu0 %v17609_v32 }
 0x563   : > { %7925 = vmatpush.msrb.mxu1 %v15221_v25  ;;  %7742 = vmatpush.msra.mxu2 %v15402_v59 }
 0x564   : > { %7849 = vmatpush.msra.mxu3 %v7848_v17  ;;  %7748 = vmatmul.f32.vlgmr.msra.gmra.mxu2 %v7747_v49  ;;  %v8124_v49 = vld [vmem:[#allocation3 + $0xac0] sm:$0xff] }
 0x565   : > { %7927 = vmatpush.msrb.mxu1 %v15229_v21  ;;  %7972 = vmatpush.msrb.mxu2 %v17610_v52 }
 0x566   : > { %7631 = vmatpush.msra.mxu0 %v17611_v45  ;;  %7855 = vmatpush.msra.mxu3 %v7854_v13 }
 0x567   : > { %7857 = vmatmul.f32.vlgmr.msra.gmra.mxu3 %v15404_v51  ;;  %7929 = vmatpush.msrb.mxu1 %v15245_v5 }
 0x568   : > { %7976 = vmatpush.msrb.mxu2 %v17612_v55  ;;  %8043 = vmatpush.msrb.mxu3 %v15221_v25  ;;  %v7755_v25 = vand.u32 4294901760, %v7754_v20  ;;  %v15675_v55 = vand.u32 4294901760, %v8124_v49 }
 0x569   : > { %7635 = vmatpush.msra.mxu0 %v17613_v36  ;;  %7931 = vmatpush.msrb.mxu1 %v15254_v29  ;;  %v8123_v36 = vld [vmem:[#allocation3 + $0xab8] sm:$0xff] }
 0x56a   : > { %7980 = vmatpush.msrb.mxu2 %v17614_v10  ;;  %8045 = vmatpush.msrb.mxu3 %v15229_v21  ;;  %v17620_v21 = vand.u32 4294901760, %v17619_v39 }
 0x56b   : > { %7639 = vmatpush.msra.mxu0 %v17615_v4  ;;  %7686 = vmatmul.f32.gmra.mxu1 %v17616_v16 }
 0x56c   : > { %7641 = vmatmul.f32.vlgmr.msra.gmra.mxu0 %v15243_v3  ;;  %7933 = vmatpush.msrb.mxu1 %v15264_v1 }
 0x56d   : > { %7867 = vmatpush.msrb.mxu0 %v15238_v30  ;;  %7984 = vmatpush.msrb.mxu2 %v17618_v18  ;;  %v17621_v30 = vld [vmem:[#allocation12_spill] sm:$0xff] }
 0x56e   : > { %8047 = vmatpush.msrb.mxu3 %v15245_v5  ;;  %7756 = vmatmul.f32.gmra.mxu2 %v7755_v25  ;;  %v17622_v3 = vand.u32 4294901760, %v17621_v30  ;;  %v17623_v5 = vand.u32 4294901760, %v15312_v48  ;;  %v15690_v25 = vsub.f32 %v8124_v49, %v15675_v55 }
 0x56f   : > { %7870 = vmatpush.msrb.mxu0 %v15248_v63  ;;  %7935 = vmatpush.msrb.mxu1 %v15275_v33  ;;  %v17624_v63 = vand.u32 4294901760, %v15324_v38 }
 0x570   : > { %7988 = vmatpush.msrb.mxu2 %v17620_v21  ;;  %8049 = vmatpush.msrb.mxu3 %v15254_v29  ;;  %v17625_v29 = vand.u32 4294901760, %v15336_v47 }
 0x571   : > { %7861 = vmatmul.f32.gmra.mxu3 %v15455_v9  ;;  %7873 = vmatpush.msrb.mxu0 %v15262_v60 }
 0x572   : > { %7937 = vmatpush.msrb.mxu1 %v15292_v56  ;;  %7992 = vmatpush.msrb.mxu2 %v17622_v3  ;;  %v17108_v3 = vand.u32 4294901760, %v15690_v25 }
 0x573   : > { %8051 = vmatpush.msrb.mxu3 %v15264_v1  ;;  %7876 = vmatpush.msrb.mxu0 %v17617_v37  ;;  %v8131_v1 = vld [vmem:[#allocation3 + $0xaf8] sm:$0xff]  ;;  %v15692_v37 = vand.u32 4294901760, %v8123_v36 }
 0x574   : > { %7939 = vmatpush.msrb.mxu1 %v15302_v53  ;;  %7996 = vmatpush.msrb.mxu2 %v17623_v5 }
 0x575   : > { %8053 = vmatpush.msrb.mxu3 %v15275_v33  ;;  %7645 = vmatmul.f32.gmra.mxu0 %v17616_v16  ;;  %v17626_v33 = vand.u32 4294901760, %v15349_v6  ;;  %v15703_v5 = vsub.f32 %v8123_v36, %v15692_v37 }
 0x576   : > { %7879 = vmatpush.msrb.mxu0 %v17619_v39  ;;  %7941 = vmatpush.msrb.mxu1 %v15314_v28  ;;  %v8122_v39 = vld [vmem:[#allocation3 + $0xab0] sm:$0xff] }
 0x577   : > { %8000 = vmatpush.msrb.mxu2 %v17624_v63  ;;  %8055 = vmatpush.msrb.mxu3 %v15292_v56  ;;  %v15584_v56 = vpop.f32.mrf.mxu1  ;;  %v15706_v63 = vand.u32 4294901760, %v8122_v39 }
 0x578   : > { %7882 = vmatpush.msrb.mxu0 %v17621_v30  ;;  %7943 = vmatpush.msrb.mxu1 %v15326_v61 }
 0x579   : > { %8004 = vmatpush.msrb.mxu2 %v17625_v29  ;;  %8057 = vmatpush.msrb.mxu3 %v15302_v53  ;;  %v8129_v53 = vld [vmem:[#allocation3 + $0xae8] sm:$0xff] }
 0x57a   : > { %7885 = vmatpush.msrb.mxu0 %v15312_v48  ;;  %7945 = vmatpush.msrb.mxu1 %v15338_v0  ;;  %v15590_v60 = vpop.f32.mrf.mxu3  ;;  %v15592_v48 = vand.u32 4294901760, %v8131_v1  ;;  %v8121_v29 = vld [vmem:[#allocation3 + $0xaa8] sm:$0xff] }
 0x57b   : > { %8008 = vmatpush.msrb.mxu2 %v17626_v33  ;;  %8059 = vmatpush.msrb.mxu3 %v15314_v28 }
 0x57c   : > { %7888 = vmatpush.msrb.mxu0 %v15324_v38  ;;  %7947 = vmatpush.msrb.mxu1 %v15351_v62  ;;  %v15596_v38 = vand.u32 4294901760, %v8129_v53 }
 0x57d   : > { %8012 = vmatpush.msrb.mxu2 %v7822_v54  ;;  %8061 = vmatpush.msrb.mxu3 %v15326_v61 }
 0x57e   : > { %7891 = vmatpush.msrb.mxu0 %v15336_v47  ;;  %7949 = vmatpush.msrb.mxu1 %v15363_v43  ;;  %v15603_v47 = vsub.f32 %v8131_v1, %v15592_v48  ;;  %v8226_v1 = vsub.f32 %v15690_v25, %v17108_v3 }
 0x57f   : > { %8016 = vmatpush.msrb.mxu2 %v7828_v44  ;;  %8063 = vmatpush.msrb.mxu3 %v15338_v0  ;;  %v8130_v0 = vld [vmem:[#allocation3 + $0xaf0] sm:$0xff]  ;;  %v15598_v61 = vpop.f32.mrf.mxu1 }
 0x580   : > { %7894 = vmatpush.msrb.mxu0 %v15349_v6  ;;  %7951 = vmatpush.msrb.mxu1 %v15375_v24  ;;  %v15594_v28 = vand.u32 4294901760, %v8130_v0 }
 0x581   : > { %8020 = vmatpush.msrb.mxu2 %v7834_v14  ;;  %8065 = vmatpush.msrb.mxu3 %v15351_v62  ;;  %v15586_v62 = vpop.f32.mrf.mxu0 }
 0x582   : > { %7897 = vmatpush.msrb.mxu0 %v15361_v46  ;;  %7953 = vmatpush.msrb.mxu1 %v15390_v27  ;;  %v15606_v6 = vsub.f32 %v8130_v0, %v15594_v28  ;;  %v15609_v46 = vsub.f32 %v8129_v53, %v15596_v38  ;;  %v15711_v0 = vand.u32 4294901760, %v8121_v29  ;;  %v17107_v53 = vand.u32 4294901760, %v15703_v5 }
 0x583   : > { %8024 = vmatpush.msrb.mxu2 %v7840_v19  ;;  %8067 = vmatpush.msrb.mxu3 %v15363_v43  ;;  %v15588_v43 = vpop.f32.mrf.mxu2  ;;  %v8127_v19 = vld [vmem:[#allocation3 + $0xad8] sm:$0xff] }
 0x584   : > { %7900 = vmatpush.msrb.mxu0 %v15373_v15  ;;  %7955 = vmatpush.msrb.mxu1 %v15402_v59  ;;  %v17116_v54 = vand.u32 4294901760, %v15606_v6  ;;  %v15621_v44 = vpop.f32.mrf.mxu3 }
 0x585   : > { %8028 = vmatpush.msrb.mxu2 %v7846_v7  ;;  %8069 = vmatpush.msrb.mxu3 %v15375_v24  ;;  %v8183_v24 = vand.u32 4294901760, %v15603_v47 }
 0x586   : > { %7959 = vmatmul.f32.vlgmr.msrb.gmra.mxu1 %v7745_v2  ;;  %7903 = vmatpush.msrb.mxu0 %v15386_v41  ;;  %v17115_v41 = vand.u32 4294901760, %v15609_v46  ;;  %v15642_v2 = vand.u32 4294901760, %v8127_v19 }
 0x587   : > { %8032 = vmatpush.msrb.mxu2 %v7852_v40  ;;  %8071 = vmatpush.msrb.mxu3 %v15390_v27  ;;  %v8128_v27 = vld [vmem:[#allocation3 + $0xae0] sm:$0xff]  ;;  %v8126_v40 = vld [vmem:[#allocation3 + $0xad0] sm:$0xff]  ;;  %v15654_v31 = vpop.f32.mrf.mxu1 }
 0x588   : > { %8034 = vmatmul.f32.vlgmr.msrb.gmra.mxu2 %v15404_v51  ;;  %7906 = vmatpush.msrb.mxu0 %v15397_v57  ;;  %v8184_v57 = vsub.f32 %v15603_v47, %v8183_v24  ;;  %v8196_v14 = vsub.f32 %v15609_v46, %v17115_v41  ;;  %v15650_v50 = vsub.f32 %v8127_v19, %v15642_v2  ;;  %v8227_v19 = vand.u32 4294901760, %v8226_v1 }
 0x589   : > { %8073 = vmatpush.msrb.mxu3 %v15402_v59  ;;  %8288 = vmatpush.msra.mxu2 %v15603_v47  ;;  %v8190_v59 = vsub.f32 %v15606_v6, %v17116_v54 }
 0x58a   : > { %8075 = vmatmul.f32.vlgmr.msrb.gmra.mxu3 %v15404_v51  ;;  %7909 = vmatpush.msrb.mxu0 %v15415_v23  ;;  %v15600_v51 = vpop.f32.mrf.mxu0  ;;  %v15633_v23 = vand.u32 4294901760, %v8128_v27  ;;  %v8197_v58 = vand.u32 4294901760, %v8196_v14  ;;  %v17112_v32 = vand.u32 4294901760, %v15650_v50 }
 0x58b   : > { %8346 = vmatpush.msra.mxu3 %v15592_v48  ;;  %v15613_v15 = vpop.f32.mrf.mxu2  ;;  %8291 = vmatpush.msra.mxu2 %v15606_v6 }
 0x58c   : > { %7912 = vmatpush.msrb.mxu0 %v15429_v8  ;;  %v8191_v8 = vand.u32 4294901760, %v8190_v59  ;;  %v15638_v7 = vsub.f32 %v8128_v27, %v15633_v23  ;;  %v8208_v20 = vsub.f32 %v15650_v50, %v17112_v32  ;;  %v15717_v27 = vsub.f32 %v8122_v39, %v15706_v63 }
 0x58d   : > { %7915 = vmatmul.f32.vlgmr.msrb.gmra.mxu0 %v15426_v26  ;;  %8348 = vmatpush.msra.mxu3 %v15594_v28  ;;  %v8185_v26 = vand.u32 4294901760, %v8184_v57  ;;  %v8120_v57 = vld [vmem:[#allocation3 + $0xaa0] sm:$0xff] }
 0x58e   : > { %7965 = vmatmul.f32.gmra.mxu1 %v7753_v12  ;;  %8133 = vmatpush.msra.mxu0 %v15592_v48  ;;  %v17113_v34 = vand.u32 4294901760, %v15638_v7  ;;  %v15683_v10 = vpop.f32.mrf.mxu3  ;;  %v8209_v18 = vand.u32 4294901760, %v8208_v20 }
 0x58f   : > { %8350 = vmatpush.msra.mxu3 %v15596_v38  ;;  %8294 = vmatpush.msra.mxu2 %v15609_v46  ;;  %v15720_v59 = vpop.f32.mrf.mxu1 }
 0x590   : > { %8038 = vmatmul.f32.gmra.mxu2 %v15455_v9  ;;  %8135 = vmatpush.msra.mxu0 %v15594_v28  ;;  %v8202_v35 = vsub.f32 %v15638_v7, %v17113_v34 }
 0x591   : > { %8352 = vmatpush.msra.mxu3 %v15633_v23  ;;  %8186 = vmatpush.msra.mxu1 %v8185_v26  ;;  %v15725_v26 = vsub.f32 %v8121_v29, %v15711_v0 }
 0x592   : > { %8079 = vmatmul.f32.gmra.mxu3 %v15455_v9  ;;  %8137 = vmatpush.msra.mxu0 %v15596_v38  ;;  %v15647_v9 = vand.u32 4294901760, %v8126_v40  ;;  %v15656_v42 = vpop.f32.mrf.mxu0  ;;  %v8203_v12 = vand.u32 4294901760, %v8202_v35 }
 0x593   : > { %8297 = vmatpush.msra.mxu2 %v15638_v7  ;;  %8354 = vmatpush.msra.mxu3 %v15642_v2  ;;  %v15669_v13 = vpop.f32.mrf.mxu2  ;;  %v17104_v49 = vand.u32 4294901760, %v15725_v26 }
 0x594   : > { %8139 = vmatpush.msra.mxu0 %v15633_v23  ;;  %8192 = vmatpush.msra.mxu1 %v8191_v8  ;;  %v15662_v17 = vsub.f32 %v8126_v40, %v15647_v9  ;;  %v15727_v8 = vand.u32 4294901760, %v8120_v57  ;;  %v8232_v40 = vsub.f32 %v15703_v5, %v17107_v53 }
 0x595   : > { %7920 = vmatmul.f32.gmra.mxu0 %v15472_v11  ;;  %v15664_v11 = vand.u32 4294901760, %v8125_v22  ;;  %8300 = vmatpush.msra.mxu2 %v15650_v50 }
 0x596   : > { %8141 = vmatpush.msra.mxu0 %v15642_v2  ;;  %8356 = vmatpush.msra.mxu3 %v15647_v9  ;;  %v17111_v52 = vand.u32 4294901760, %v15662_v17  ;;  %v8233_v36 = vand.u32 4294901760, %v8232_v40 }
 0x597   : > { %8198 = vmatpush.msra.mxu1 %v8197_v58  ;;  %v15673_v45 = vsub.f32 %v8125_v22, %v15664_v11  ;;  %8303 = vmatpush.msra.mxu2 %v15662_v17  ;;  %v17106_v58 = vand.u32 4294901760, %v15717_v27  ;;  %v8119_v22 = vld [vmem:[#allocation3 + $0xa98] sm:$0xff] }
 0x598   : > { %8143 = vmatpush.msra.mxu0 %v15647_v9  ;;  %8358 = vmatpush.msra.mxu3 %v15664_v11  ;;  %v8214_v4 = vsub.f32 %v15662_v17, %v17111_v52  ;;  %v15742_v20 = vand.u32 4294901760, %v8119_v22  ;;  %v15750_v39 = vpop.f32.mrf.mxu3  ;;  %v8113_v52 = vld [vmem:[#allocation3 + $0xa70] sm:$0xff] }
 0x599   : > { %8204 = vmatpush.msra.mxu1 %v8203_v12  ;;  %v17110_v16 = vand.u32 4294901760, %v15673_v45  ;;  %8306 = vmatpush.msra.mxu2 %v15673_v45  ;;  %v15740_v12 = vsub.f32 %v8120_v57, %v15727_v8  ;;  %17627 = vst [vmem:[#allocation9_spill] sm:$0xff] %v15750_v39  ;;  %v8117_v57 = vld [vmem:[#allocation3 + $0xa88] sm:$0xff]  ;;  %v17631_v39 = vand.u32 4294901760, %v15606_v6 }
 0x59a   : > { %8145 = vmatpush.msra.mxu0 %v15664_v11  ;;  %8360 = vmatpush.msra.mxu3 %v15675_v55  ;;  %v8215_v21 = vand.u32 4294901760, %v8214_v4  ;;  %v15722_v14 = vpop.f32.mrf.mxu0  ;;  %v8238_v4 = vsub.f32 %v15717_v27, %v17106_v58  ;;  %v15757_v29 = vsub.f32 %v8119_v22, %v15742_v20 }
 0x59b   : > { %v8220_v30 = vsub.f32 %v15673_v45, %v17110_v16  ;;  %8210 = vmatpush.msra.mxu1 %v8209_v18  ;;  %8309 = vmatpush.msra.mxu2 %v15690_v25  ;;  %v15736_v35 = vpop.f32.mrf.mxu2  ;;  %v8118_v18 = vld [vmem:[#allocation3 + $0xa90] sm:$0xff] }
 0x59c   : > { %8147 = vmatpush.msra.mxu0 %v15675_v55  ;;  %8362 = vmatpush.msra.mxu3 %v15692_v37  ;;  %v8239_v1 = vand.u32 4294901760, %v8238_v4  ;;  %v8116_v4 = vld [vmem:[#allocation3 + $0xa80] sm:$0xff] }
 0x59d   : > { %v8221_v33 = vand.u32 4294901760, %v8220_v30  ;;  %8216 = vmatpush.msra.mxu1 %v8215_v21  ;;  %8312 = vmatpush.msra.mxu2 %v15703_v5  ;;  %v8244_v21 = vsub.f32 %v15725_v26, %v17104_v49  ;;  %v17105_v30 = vand.u32 4294901760, %v15740_v12  ;;  %v17109_v49 = vand.u32 4294901760, %v15757_v29 }
 0x59e   : > { %8149 = vmatpush.msra.mxu0 %v15692_v37  ;;  %8364 = vmatpush.msra.mxu3 %v15706_v63  ;;  %v15780_v53 = vand.u32 4294901760, %v8116_v4 }
 0x59f   : > { %8222 = vmatpush.msra.mxu1 %v8221_v33  ;;  %8315 = vmatpush.msra.mxu2 %v15717_v27  ;;  %v15759_v33 = vand.u32 4294901760, %v8118_v18  ;;  %v8250_v40 = vsub.f32 %v15740_v12, %v17105_v30  ;;  %v8256_v30 = vsub.f32 %v15757_v29, %v17109_v49 }
 0x5a0   : > { %8151 = vmatpush.msra.mxu0 %v15706_v63  ;;  %8366 = vmatpush.msra.mxu3 %v15711_v0  ;;  %v15796_v16 = vsub.f32 %v8116_v4, %v15780_v53 }
 0x5a1   : > { %8228 = vmatpush.msra.mxu1 %v8227_v19  ;;  %8318 = vmatpush.msra.mxu2 %v15725_v26  ;;  %v8245_v19 = vand.u32 4294901760, %v8244_v21  ;;  %v15769_v22 = vsub.f32 %v8118_v18, %v15759_v33  ;;  %v8251_v21 = vand.u32 4294901760, %v8250_v40  ;;  %v8257_v3 = vand.u32 4294901760, %v8256_v30 }
 0x5a2   : > { %8153 = vmatpush.msra.mxu0 %v15711_v0  ;;  %8368 = vmatpush.msra.mxu3 %v15727_v8  ;;  %v17118_v34 = vand.u32 4294901760, %v15796_v16 }
 0x5a3   : > { %8234 = vmatpush.msra.mxu1 %v8233_v36  ;;  %8321 = vmatpush.msra.mxu2 %v15740_v12  ;;  %v15774_v36 = vand.u32 4294901760, %v8117_v57  ;;  %v17114_v58 = vand.u32 4294901760, %v15769_v22  ;;  %v15790_v40 = vpop.f32.mrf.mxu0  ;;  %v15802_v32 = vpop.f32.mrf.mxu2 }
 0x5a4   : > { %8155 = vmatpush.msra.mxu0 %v15727_v8  ;;  %8370 = vmatpush.msra.mxu3 %v15742_v20  ;;  %17628 = vst [vmem:[#allocation22_spill] sm:$0xff] %v15802_v32  ;;  %v15815_v41 = vpop.f32.mrf.mxu3 }
 0x5a5   : > { %8240 = vmatpush.msra.mxu1 %v8239_v1  ;;  %8324 = vmatpush.msra.mxu2 %v15757_v29  ;;  %v15785_v18 = vsub.f32 %v8117_v57, %v15774_v36  ;;  %v15788_v1 = vpop.f32.mrf.mxu1  ;;  %v8262_v49 = vsub.f32 %v15769_v22, %v17114_v58  ;;  %17629 = vst [vmem:[#allocation23_spill] sm:$0xff] %v15815_v41  ;;  %v8112_v41 = vld [vmem:[#allocation3 + $0xa68] sm:$0xff] }
 0x5a6   : > { %8157 = vmatpush.msra.mxu0 %v15742_v20  ;;  %8372 = vmatpush.msra.mxu3 %v15759_v33 }
 0x5a7   : > { %8246 = vmatpush.msra.mxu1 %v8245_v19  ;;  %8327 = vmatpush.msra.mxu2 %v15769_v22  ;;  %v17117_v57 = vand.u32 4294901760, %v15785_v18  ;;  %v8114_v19 = vld [vmem:[#allocation3 + $0xa78] sm:$0xff]  ;;  %v8263_v30 = vand.u32 4294901760, %v8262_v49  ;;  %v8274_v49 = vsub.f32 %v15796_v16, %v17118_v34  ;;  %v15830_v34 = vand.u32 4294901760, %v8112_v41 }
 0x5a8   : > { %8159 = vmatpush.msra.mxu0 %v15759_v33  ;;  %8374 = vmatpush.msra.mxu3 %v15774_v36  ;;  %v15805_v58 = vand.u32 4294901760, %v8114_v19 }
 0x5a9   : > { %8252 = vmatpush.msra.mxu1 %v8251_v21  ;;  %8330 = vmatpush.msra.mxu2 %v15785_v18  ;;  %v8268_v4 = vsub.f32 %v15785_v18, %v17117_v57  ;;  %v15813_v21 = vand.u32 4294901760, %v8113_v52  ;;  %v8275_v57 = vand.u32 4294901760, %v8274_v49  ;;  %17632 = vst [vmem:[#allocation13_spill] sm:$0xff] %v15830_v34 }
 0x5aa   : > { %8161 = vmatpush.msra.mxu0 %v15774_v36  ;;  %8376 = vmatpush.msra.mxu3 %v15780_v53  ;;  %v15822_v54 = vsub.f32 %v8114_v19, %v15805_v58 }
 0x5ab   : > { %8258 = vmatpush.msra.mxu1 %v8257_v3  ;;  %8333 = vmatpush.msra.mxu2 %v15796_v16  ;;  %v8269_v3 = vand.u32 4294901760, %v8268_v4  ;;  %v15833_v19 = vsub.f32 %v8113_v52, %v15813_v21  ;;  %v15845_v4 = vsub.f32 %v8112_v41, %v15830_v34 }
 0x5ac   : > { %8163 = vmatpush.msra.mxu0 %v15780_v53  ;;  %17630 = vst [vmem:[#allocation14_spill] sm:$0xff] %v15822_v54  ;;  %v17119_v32 = vand.u32 4294901760, %v15822_v54  ;;  %v15849_v49 = vpop.f32.mrf.mxu0 }
 0x5ad   : > { %8505 = vmatpush.msrb.mxu2 %v15805_v58  ;;  %8264 = vmatpush.msra.mxu1 %v8263_v30  ;;  %v17633_v30 = vand.u32 4294901760, %v15609_v46  ;;  %v17124_v6 = vand.u32 4294901760, %v15833_v19  ;;  %17635 = vst [vmem:[#allocation16_spill] sm:$0xff] %v15845_v4  ;;  %v15847_v52 = vpop.f32.mrf.mxu1  ;;  %v17636_v46 = vand.u32 4294901760, %v15638_v7  ;;  %v17127_v41 = vand.u32 4294901760, %v15845_v4 }
 0x5ae   : > { %8393 = vmatpush.msrb.mxu0 %v8183_v24  ;;  %v8556_v47 = vsub.f32 %v15822_v54, %v17119_v32  ;;  %v8111_v24 = vld [vmem:[#allocation3 + $0xa60] sm:$0xff]  ;;  %v8110_v32 = vld [vmem:[#allocation3 + $0xa58] sm:$0xff]  ;;  %v15864_v54 = vpop.f32.mrf.mxu2 }
 0x5af   : > { %8507 = vmatpush.msrb.mxu2 %v15813_v21  ;;  %8270 = vmatpush.msra.mxu1 %v8269_v3 }
 0x5b0   : > { %8397 = vmatpush.msrb.mxu0 %v17631_v39  ;;  %v15842_v39 = vand.u32 4294901760, %v8111_v24  ;;  %v8557_v3 = vand.u32 4294901760, %v8556_v47  ;;  %v8568_v47 = vsub.f32 %v15845_v4, %v17127_v41 }
 0x5b1   : > { %8276 = vmatpush.msra.mxu1 %v8275_v57  ;;  %8509 = vmatpush.msrb.mxu2 %v15830_v34  ;;  %v8562_v57 = vsub.f32 %v15833_v19, %v17124_v6 }
 0x5b2   : > { %8401 = vmatpush.msrb.mxu0 %v17633_v30  ;;  %17634 = vst [vmem:[#allocation15_spill] sm:$0xff] %v15842_v39  ;;  %v15859_v30 = vand.u32 4294901760, %v8110_v32  ;;  %v15862_v34 = vsub.f32 %v8111_v24, %v15842_v39  ;;  %8558 = vmatpush.msrb.mxu3 %v8557_v3  ;;  %v17639_v24 = vand.u32 4294901760, %v15650_v50  ;;  %v8108_v3 = vld [vmem:[#allocation3 + $0xa48] sm:$0xff] }
 0x5b3   : > { %8464 = vmatpush.msrb.mxu1 %v15592_v48  ;;  %8511 = vmatpush.msrb.mxu2 %v15842_v39  ;;  %v8109_v48 = vld [vmem:[#allocation3 + $0xa50] sm:$0xff]  ;;  %v8563_v7 = vand.u32 4294901760, %v8562_v57  ;;  %v15876_v39 = vpop.f32.mrf.mxu3  ;;  %v8569_v57 = vand.u32 4294901760, %v8568_v47  ;;  %v15886_v4 = vand.u32 4294901760, %v8108_v3 }
 0x5b4   : > { %8405 = vmatpush.msrb.mxu0 %v17636_v46  ;;  %17637 = vst [vmem:[#allocation18_spill] sm:$0xff] %v15862_v34  ;;  %v17130_v46 = vand.u32 4294901760, %v15862_v34  ;;  %v15872_v6 = vand.u32 4294901760, %v8109_v48 }
 0x5b5   : > { %8466 = vmatpush.msrb.mxu1 %v15594_v28  ;;  %8513 = vmatpush.msrb.mxu2 %v15859_v30  ;;  %v15880_v28 = vsub.f32 %v8110_v32, %v15859_v30  ;;  %17640 = vst [vmem:[#allocation19_spill] sm:$0xff] %v15886_v4  ;;  %v8107_v32 = vld [vmem:[#allocation3 + $0xa40] sm:$0xff] }
 0x5b6   : > { %17638 = vst [vmem:[#allocation17_spill] sm:$0xff] %v15872_v6  ;;  %8409 = vmatpush.msrb.mxu0 %v17639_v24  ;;  %8564 = vmatpush.msrb.mxu3 %v8563_v7  ;;  %v8574_v41 = vsub.f32 %v15862_v34, %v17130_v46  ;;  %v15889_v50 = vsub.f32 %v8109_v48, %v15872_v6  ;;  %v17642_v24 = vand.u32 4294901760, %v15662_v17  ;;  %v15897_v46 = vand.u32 4294901760, %v8107_v32 }
 0x5b7   : > { %8468 = vmatpush.msrb.mxu1 %v15596_v38  ;;  %8515 = vmatpush.msrb.mxu2 %v15872_v6  ;;  %v17137_v38 = vand.u32 4294901760, %v15880_v28  ;;  %v15900_v34 = vsub.f32 %v8108_v3, %v15886_v4 }
 0x5b8   : > { %17641 = vst [vmem:[#allocation20_spill] sm:$0xff] %v15889_v50  ;;  %8413 = vmatpush.msrb.mxu0 %v17642_v24  ;;  %8570 = vmatpush.msrb.mxu3 %v8569_v57  ;;  %v8575_v7 = vand.u32 4294901760, %v8574_v41  ;;  %v17138_v47 = vand.u32 4294901760, %v15889_v50  ;;  %v8106_v41 = vld [vmem:[#allocation3 + $0xa38] sm:$0xff]  ;;  %v17644_v57 = vand.u32 4294901760, %v15673_v45 }
 0x5b9   : > { %8470 = vmatpush.msrb.mxu1 %v15633_v23  ;;  %8517 = vmatpush.msrb.mxu2 %v15886_v4  ;;  %17643 = vst [vmem:[#allocation10_spill] sm:$0xff] %v15897_v46  ;;  %v8580_v17 = vsub.f32 %v15880_v28, %v17137_v38  ;;  %v17143_v24 = vand.u32 4294901760, %v15900_v34  ;;  %v15917_v4 = vand.u32 4294901760, %v8106_v41 }
 0x5ba   : > { %8417 = vmatpush.msrb.mxu0 %v17644_v57  ;;  %8576 = vmatpush.msrb.mxu3 %v8575_v7  ;;  %v8586_v3 = vsub.f32 %v15889_v50, %v17138_v47  ;;  %v8105_v57 = vld [vmem:[#allocation3 + $0xa30] sm:$0xff]  ;;  %v17645_v7 = vand.u32 4294901760, %v15690_v25 }
 0x5bb   : > { %v15902_v48 = vpop.f32.mrf.mxu1  ;;  %8472 = vmatpush.msrb.mxu1 %v15642_v2  ;;  %8519 = vmatpush.msrb.mxu2 %v15897_v46  ;;  %v15920_v2 = vsub.f32 %v8107_v32, %v15897_v46  ;;  %v8581_v45 = vand.u32 4294901760, %v8580_v17  ;;  %v8592_v47 = vsub.f32 %v15900_v34, %v17143_v24  ;;  %v15932_v32 = vand.u32 4294901760, %v8105_v57  ;;  %v8104_v17 = vld [vmem:[#allocation3 + $0xa28] sm:$0xff] }
 0x5bc   : > { %8421 = vmatpush.msrb.mxu0 %v17645_v7  ;;  %v8587_v38 = vand.u32 4294901760, %v8586_v3  ;;  %v6703_v46 = vadd.f32 %v15584_v56, %v15586_v62  ;;  %v15940_v25 = vsub.f32 %v8106_v41, %v15917_v4  ;;  %v15946_v24 = vand.u32 4294901760, %v8104_v17 }
 0x5bd   : > { %8474 = vmatpush.msrb.mxu1 %v15647_v9  ;;  %8521 = vmatpush.msrb.mxu2 %v15917_v4  ;;  %v17144_v50 = vand.u32 4294901760, %v15920_v2  ;;  %v8593_v3 = vand.u32 4294901760, %v8592_v47  ;;  %v17646_v56 = vand.u32 4294901760, %v15703_v5  ;;  %v8103_v47 = vld [vmem:[#allocation3 + $0xa20] sm:$0xff]  ;;  %v17650_v5 = vand.u32 4294901760, %v15717_v27 }
 0x5be   : > { %8582 = vmatpush.msrb.mxu3 %v8581_v45  ;;  %v17145_v62 = vand.u32 4294901760, %v15940_v25  ;;  %v15956_v45 = vand.u32 4294901760, %v8103_v47 }
 0x5bf   : > { %8476 = vmatpush.msrb.mxu1 %v15664_v11  ;;  %v8598_v7 = vsub.f32 %v15920_v2, %v17144_v50  ;;  %8523 = vmatpush.msrb.mxu2 %v15932_v32  ;;  %v15953_v11 = vsub.f32 %v8105_v57, %v15932_v32  ;;  %v15959_v50 = vsub.f32 %v8104_v17, %v15946_v24 }
 0x5c0   : > { %8425 = vmatpush.msrb.mxu0 %v17646_v56  ;;  %8588 = vmatpush.msrb.mxu3 %v8587_v38  ;;  %17648 = vst [vmem:[#allocation11_spill] sm:$0xff] %v15956_v45  ;;  %v8604_v38 = vsub.f32 %v15940_v25, %v17145_v62  ;;  %v15974_v27 = vsub.f32 %v8103_v47, %v15956_v45  ;;  %v8101_v62 = vld [vmem:[#allocation3 + $0xa10] sm:$0xff] }
 0x5c1   : > { %8478 = vmatpush.msrb.mxu1 %v15675_v55  ;;  %17647 = vst [vmem:[#allocation21_spill] sm:$0xff] %v15953_v11  ;;  %v8599_v41 = vand.u32 4294901760, %v8598_v7  ;;  %8525 = vmatpush.msrb.mxu2 %v15946_v24  ;;  %v6761_v55 = vadd.f32 %v15588_v43, %v6703_v46  ;;  %v17149_v57 = vand.u32 4294901760, %v15953_v11  ;;  %v8102_v7 = vld [vmem:[#allocation3 + $0xa18] sm:$0xff]  ;;  %v17148_v17 = vand.u32 4294901760, %v15959_v50 }
 0x5c2   : > { %17649 = vst [vmem:[#allocation12_spill] sm:$0xff] %v15959_v50  ;;  %8429 = vmatpush.msrb.mxu0 %v17650_v5  ;;  %8594 = vmatpush.msrb.mxu3 %v8593_v3  ;;  %v15971_v56 = vand.u32 4294901760, %v8102_v7  ;;  %v17651_v43 = vand.u32 4294901760, %v15725_v26  ;;  %v8605_v3 = vand.u32 4294901760, %v8604_v38  ;;  %v6707_v26 = vadd.f32 %v15598_v61, %v15600_v51  ;;  %v8099_v51 = vld [vmem:[#allocation3 + $0xa00] sm:$0xff] }
 0x5c3   : > { %v15922_v6 = vpop.f32.mrf.mxu2  ;;  %8480 = vmatpush.msrb.mxu1 %v15692_v37  ;;  %8527 = vmatpush.msrb.mxu2 %v15956_v45  ;;  %v8610_v5 = vsub.f32 %v15953_v11, %v17149_v57  ;;  %v8616_v47 = vsub.f32 %v15959_v50, %v17148_v17  ;;  %v8100_v57 = vld [vmem:[#allocation3 + $0xa08] sm:$0xff]  ;;  %v17653_v11 = vand.u32 4294901760, %v15974_v27 }
 0x5c4   : > { %8433 = vmatpush.msrb.mxu0 %v17651_v43  ;;  %v15978_v37 = vpop.f32.mrf.mxu1  ;;  %8600 = vmatpush.msrb.mxu3 %v8599_v41  ;;  %v15991_v43 = vand.u32 4294901760, %v8101_v62  ;;  %v15994_v45 = vsub.f32 %v8102_v7, %v15971_v56  ;;  %v6805_v41 = vadd.f32 %v15590_v60, %v6761_v55  ;;  %v17654_v60 = vand.u32 4294901760, %v15757_v29 }
 0x5c5   : > { %v15904_v23 = vpop.f32.mrf.mxu0  ;;  %8482 = vmatpush.msrb.mxu1 %v15706_v63  ;;  %8529 = vmatpush.msrb.mxu2 %v15971_v56  ;;  %v17652_v63 = vand.u32 4294901760, %v15740_v12  ;;  %v8611_v17 = vand.u32 4294901760, %v8610_v5  ;;  %v8617_v50 = vand.u32 4294901760, %v8616_v47  ;;  %v8622_v7 = vsub.f32 %v15974_v27, %v17653_v11 }
 0x5c6   : > { %v15936_v9 = vpop.f32.mrf.mxu3  ;;  %8606 = vmatpush.msrb.mxu3 %v8605_v3  ;;  %v8627_v12 = vand.u32 4294901760, %v15994_v45  ;;  %v16017_v61 = vsub.f32 %v8101_v62, %v15991_v43  ;;  %v6880_v11 = vadd.f32 %v15656_v42, %v6805_v41  ;;  %v17655_v29 = vand.u32 4294901760, %v15769_v22 }
 0x5c7   : > { %8437 = vmatpush.msrb.mxu0 %v17652_v63  ;;  %8484 = vmatpush.msrb.mxu1 %v15711_v0  ;;  %v16014_v0 = vand.u32 4294901760, %v8100_v57  ;;  %v8623_v3 = vand.u32 4294901760, %v8622_v7  ;;  %v6766_v42 = vadd.f32 %v15613_v15, %v6707_v26  ;;  %v17656_v63 = vand.u32 4294901760, %v15785_v18 }
 0x5c8   : > { %8531 = vmatpush.msrb.mxu2 %v15991_v43  ;;  %8612 = vmatpush.msrb.mxu3 %v8611_v17  ;;  %v8628_v5 = vsub.f32 %v15994_v45, %v8627_v12  ;;  %v16027_v17 = vand.u32 4294901760, %v8099_v51  ;;  %v6921_v15 = vadd.f32 %v15654_v31, %v6880_v11  ;;  %v17657_v18 = vand.u32 4294901760, %v15796_v16 }
 0x5c9   : > { %8441 = vmatpush.msrb.mxu0 %v17654_v60  ;;  %8486 = vmatpush.msrb.mxu1 %v15727_v8  ;;  %v8633_v8 = vand.u32 4294901760, %v16017_v61  ;;  %v16030_v62 = vsub.f32 %v8100_v57, %v16014_v0 }
 0x5ca   : > { %8618 = vmatpush.msrb.mxu3 %v8617_v50  ;;  %v8629_v47 = vand.u32 4294901760, %v8628_v5  ;;  %8533 = vmatpush.msrb.mxu2 %v16014_v0  ;;  %v16042_v57 = vsub.f32 %v8099_v51, %v16027_v17  ;;  %v6811_v51 = vadd.f32 %v15621_v44, %v6766_v42 }
 0x5cb   : > { %8445 = vmatpush.msrb.mxu0 %v17655_v29  ;;  %8488 = vmatpush.msrb.mxu1 %v15742_v20  ;;  %v8634_v20 = vsub.f32 %v16017_v61, %v8633_v8  ;;  %v8639_v50 = vand.u32 4294901760, %v16030_v62  ;;  %v7466_v29 = vadd.f32 %v15902_v48, %v15904_v23 }
 0x5cc   : > { %8624 = vmatpush.msrb.mxu3 %v8623_v3  ;;  %8535 = vmatpush.msrb.mxu2 %v16027_v17  ;;  %v8645_v60 = vand.u32 4294901760, %v16042_v57  ;;  %v6884_v11 = vadd.f32 %v15722_v14, %v6811_v51 }
 0x5cd   : > { %v15999_v38 = vpop.f32.mrf.mxu2  ;;  %8449 = vmatpush.msrb.mxu0 %v17656_v63  ;;  %8490 = vmatpush.msrb.mxu1 %v15759_v33  ;;  %v8635_v33 = vand.u32 4294901760, %v8634_v20  ;;  %v8640_v7 = vsub.f32 %v16030_v62, %v8639_v50  ;;  %v7524_v20 = vadd.f32 %v15922_v6, %v7466_v29  ;;  %v17660_v29 = vld [vmem:[#allocation23_spill] sm:$0xff] }
 0x5ce   : > { %v15980_v46 = vpop.f32.mrf.mxu0  ;;  %8630 = vmatpush.msrb.mxu3 %v8629_v47  ;;  %v8646_v16 = vsub.f32 %v16042_v57, %v8645_v60 }
 0x5cf   : > { %8453 = vmatpush.msrb.mxu0 %v17657_v18  ;;  %8492 = vmatpush.msrb.mxu1 %v15774_v36  ;;  %v8641_v31 = vand.u32 4294901760, %v8640_v7  ;;  %v6966_v36 = vadd.f32 %v15669_v13, %v6921_v15  ;;  %v7470_v48 = vadd.f32 %v15978_v37, %v15980_v46 }
 0x5d0   : > { %v16011_v55 = vpop.f32.mrf.mxu3  ;;  %8636 = vmatpush.msrb.mxu3 %v8635_v33  ;;  %v8647_v5 = vand.u32 4294901760, %v8646_v16  ;;  %v7568_v33 = vadd.f32 %v15936_v9, %v7524_v20  ;;  %v9803_v20 = vld [vmem:[#allocation5 + $0x4] ss:$0 sm:$0xff] }
 0x5d1   : > { %8494 = vmatpush.msrb.mxu1 %v15780_v53  ;;  %v7075_v44 = vadd.f32 %v15683_v10, %v6966_v36  ;;  %v6925_v53 = vadd.f32 %v15720_v59, %v6884_v11  ;;  %v17658_v10 = vld [vmem:[#allocation9_spill] sm:$0xff] }
 0x5d2   : > { %8642 = vmatpush.msrb.mxu3 %v8641_v31 }
 0x5d3   : > { %v7133_v63 = vadd.f32 %v15790_v40, %v7075_v44  ;;  %v6974_v13 = vadd.f32 %v15736_v35, %v6925_v53  ;;  %v17659_v40 = vld [vmem:[#allocation22_spill] sm:$0xff]  ;;  %v7529_v35 = vadd.f32 %v15999_v38, %v7470_v48 }
 0x5d4   : > { %8648 = vmatpush.msrb.mxu3 %v8647_v5 }
 0x5d5   : > { %v7177_v15 = vadd.f32 %v15788_v1, %v7133_v63  ;;  %v7079_v23 = vadd.f32 %v17658_v10, %v6974_v13  ;;  %v7574_v46 = vadd.f32 %v16011_v55, %v7529_v35  ;;  %v17663_v35 = vld [vmem:[#allocation13_spill] sm:$0xff] }
 0x5d7   : > { %v7252_v16 = vadd.f32 %v17659_v40, %v7177_v15  ;;  %v7138_v6 = vadd.f32 %v15849_v49, %v7079_v23 }
 0x5d9   : > { %v7293_v44 = vadd.f32 %v17660_v29, %v7252_v16  ;;  %v7183_v37 = vadd.f32 %v15847_v52, %v7138_v6  ;;  %v17665_v29 = vld [vmem:[#allocation15_spill] sm:$0xff] }
 0x5db   : > { %v7256_v38 = vadd.f32 %v15864_v54, %v7183_v37 }
 0x5dd   : > { %v7297_v52 = vadd.f32 %v15876_v39, %v7256_v38  ;;  %v17661_v39 = vld [vmem:[#allocation14_spill] sm:$0xff] }
 0x5de   : > { %v17662_v40 = vand.u32 4294901760, %v17661_v39 }
 0x5df   : > { %v7683_v22 = vpop.f32.mrf.mxu1 }
 0x5e7   : > { %v7749_v26 = vpop.f32.mrf.mxu2 }
 0x5e8   : > { %v7687_v42 = vpop.f32.mrf.mxu1 }
 0x5e9   : > { %v7642_v41 = vpop.f32.mrf.mxu0 }
 0x5ea   : > { %v7858_v3 = vpop.f32.mrf.mxu3  ;;  %v7643_v59 = vadd.f32 %v7642_v41, %v7568_v33 }
 0x5eb   : > { %v7859_v7 = vadd.f32 %v7858_v3, %v7749_v26 }
 0x5ec   : > { %v7684_v1 = vadd.f32 %v7683_v22, %v7643_v59 }
 0x5ee   : > { %v7690_v53 = vadd.f32 %v7684_v1, %v7293_v44  ;;  %v17666_v44 = vld [vmem:[#allocation16_spill] sm:$0xff] }
 0x5ef   : > { %v17667_v37 = vand.u32 4294901760, %v17666_v44 }
 0x5f1   : > { %v7757_v18 = vpop.f32.mrf.mxu2 }
 0x5f2   : > { %v7646_v47 = vpop.f32.mrf.mxu0 }
 0x5f3   : > { %v7647_v26 = vadd.f32 %v7646_v47, %v7574_v46 }
 0x5f4   : > { %v7862_v14 = vpop.f32.mrf.mxu3 }
 0x5f5   : > { %v7863_v3 = vadd.f32 %v7862_v14, %v7757_v18  ;;  %v7688_v33 = vadd.f32 %v7687_v42, %v7647_v26 }
 0x5f7   : > { %v7691_v18 = vadd.f32 %v7688_v33, %v7297_v52 }
 0x603   : > { %v7960_v51 = vpop.f32.mrf.mxu1 }
 0x60a   : > { %v7916_v31 = vpop.f32.mrf.mxu0 }
 0x60b   : > { %v7917_v36 = vadd.f32 %v7916_v31, %v7859_v7  ;;  %v8035_v11 = vpop.f32.mrf.mxu2  ;;  %v7966_v22 = vpop.f32.mrf.mxu1 }
 0x60d   : > { %v7961_v5 = vadd.f32 %v7960_v51, %v7917_v36  ;;  %v8076_v9 = vpop.f32.mrf.mxu3  ;;  %v17664_v36 = vand.u32 4294901760, %v15833_v19 }
 0x60f   : > { %v8036_v41 = vadd.f32 %v8035_v11, %v7961_v5 }
 0x611   : > { %v8077_v63 = vadd.f32 %v8076_v9, %v8036_v41 }
 0x612   : > { %v7921_v49 = vpop.f32.mrf.mxu0 }
 0x613   : > { %v8083_v13 = vadd.f32 %v8077_v63, %v7690_v53  ;;  %v7922_v15 = vadd.f32 %v7921_v49, %v7863_v3  ;;  %v8039_v23 = vpop.f32.mrf.mxu2  ;;  %v17670_v53 = vld [vmem:[#allocation17_spill] sm:$0xff] }
 0x615   : > { %v8090_v48 = vadd.f32 %v9803_v20, %v8083_v13  ;;  %v7967_v10 = vadd.f32 %v7966_v22, %v7922_v15  ;;  %v8080_v7 = vpop.f32.mrf.mxu3  ;;  %v17672_v15 = vld [vmem:[#allocation19_spill] sm:$0xff]  ;;  %v17673_v22 = vld [vmem:[#allocation20_spill] sm:$0xff] }
 0x616   : > { %v17674_v33 = vand.u32 4294901760, %v17673_v22 }
 0x617   : > { %v8092_v59 = vmax.f32 %v8090_v48, 0.0  ;;  %v8040_v55 = vadd.f32 %v8039_v23, %v7967_v10  ;;  %v8894_v48 = vld [vmem:[#allocation3 + $0xb78] sm:$0xff]  ;;  %v17675_v10 = vld [vmem:[#allocation10_spill] sm:$0xff]  ;;  %v17676_v23 = vand.u32 4294901760, %v15900_v34 }
 0x619   : > { %v16080_v47 = vand.u32 4294901760, %v8092_v59  ;;  %8094 = vst [vmem:[#allocation2 + $0x8] sm:$0xff] %v8092_v59  ;;  %v8081_v14 = vadd.f32 %v8080_v7, %v8040_v55  ;;  %v8893_v55 = vld [vmem:[#allocation3 + $0xb70] sm:$0xff]  ;;  %v17677_v7 = vand.u32 4294901760, %v15920_v2 }
 0x61b   : > { %v8165_v51 = vsub.f32 %v8092_v59, %v16080_v47  ;;  %v8084_v54 = vadd.f32 %v8081_v14, %v7691_v18  ;;  %8278 = vmatmul.f32.vlgmr.msra.gmra.mxu1 %v16080_v47  ;;  %v16134_v59 = vand.u32 4294901760, %v8894_v48  ;;  %v16143_v14 = vand.u32 4294901760, %v8893_v55 }
 0x61c   : > { %8718 = vmatpush.msra.mxu1 %v15805_v58 }
 0x61d   : > { %v8091_v42 = vadd.f32 %v9803_v20, %v8084_v54  ;;  %8336 = vmatmul.f32.vlgmr.msra.gmra.mxu2 %v8165_v51  ;;  %v8166_v31 = vand.u32 4294901760, %v8165_v51  ;;  %v17671_v20 = vand.u32 4294901760, %v15880_v28  ;;  %v17678_v54 = vand.u32 4294901760, %v15940_v25 }
 0x61e   : > { %8720 = vmatpush.msra.mxu1 %v15813_v21  ;;  %8765 = vmatpush.msra.mxu2 %v17662_v40 }
 0x61f   : > { %v8093_v16 = vmax.f32 %v8091_v42, 0.0  ;;  %8380 = vmatmul.f32.vlgmr.msra.gmra.mxu3 %v8166_v31  ;;  %v8167_v6 = vsub.f32 %v8165_v51, %v8166_v31  ;;  %v8892_v51 = vld [vmem:[#allocation3 + $0xb68] sm:$0xff]  ;;  %v8891_v42 = vld [vmem:[#allocation3 + $0xb60] sm:$0xff] }
 0x620   : > { %8722 = vmatpush.msra.mxu1 %v17663_v35  ;;  %8769 = vmatpush.msra.mxu2 %v17664_v36  ;;  %v8096_v11 = vld [vmem:[#allocation2 + $0x7] sm:$0xff]  ;;  %v16155_v31 = vand.u32 4294901760, %v8892_v51  ;;  %v16169_v36 = vand.u32 4294901760, %v8891_v42 }
 0x621   : > { %8095 = vst [vmem:[#allocation2 + $0x10] sm:$0xff] %v8093_v16  ;;  %8836 = vmatpush.msra.mxu3 %v15805_v58  ;;  %v8168_v1 = vand.u32 4294901760, %v8167_v6  ;;  %v16092_v5 = vand.u32 4294901760, %v8093_v16  ;;  %v16094_v9 = vand.u32 4294901760, %v8096_v11  ;;  %v17668_v58 = vld [vmem:[#allocation18_spill] sm:$0xff]  ;;  %v16164_v6 = vsub.f32 %v8893_v55, %v16143_v14 }
 0x622   : > { %8724 = vmatpush.msra.mxu1 %v17665_v29  ;;  %8773 = vmatpush.msra.mxu2 %v17667_v37  ;;  %v17669_v26 = vand.u32 4294901760, %v17668_v58 }
 0x623   : > { %8838 = vmatpush.msra.mxu3 %v15813_v21  ;;  %8169 = vmatmul.f32.vlgmr.msra.gmra.mxu0 %v8168_v1  ;;  %v8173_v46 = vsub.f32 %v8093_v16, %v16092_v5  ;;  %v16102_v41 = vsub.f32 %v8096_v11, %v16094_v9  ;;  %v17681_v11 = vld [vmem:[#allocation11_spill] sm:$0xff]  ;;  %v17682_v1 = vld [vmem:[#allocation12_spill] sm:$0xff] }
 0x624   : > { %8282 = vmatmul.f32.gmra.mxu1 %v16092_v5  ;;  %8660 = vmatpush.msra.mxu0 %v17661_v39  ;;  %v17679_v39 = vld [vmem:[#allocation21_spill] sm:$0xff] }
 0x625   : > { %8726 = vmatpush.msra.mxu1 %v15859_v30  ;;  %8777 = vmatpush.msra.mxu2 %v17669_v26  ;;  %v8174_v3 = vand.u32 4294901760, %v8173_v46  ;;  %v8538_v21 = vand.u32 4294901760, %v16102_v41  ;;  %v17680_v40 = vand.u32 4294901760, %v17679_v39 }
 0x626   : > { %8840 = vmatpush.msra.mxu3 %v17663_v35  ;;  %8341 = vmatmul.f32.gmra.mxu2 %v8173_v46  ;;  %v8890_v35 = vld [vmem:[#allocation3 + $0xb58] sm:$0xff] }
 0x627   : > { %8663 = vmatpush.msra.mxu0 %v15833_v19  ;;  %8728 = vmatpush.msra.mxu1 %v17670_v53  ;;  %v8175_v63 = vsub.f32 %v8173_v46, %v8174_v3  ;;  %v8539_v19 = vsub.f32 %v16102_v41, %v8538_v21  ;;  %v16179_v37 = vand.u32 4294901760, %v8890_v35  ;;  %v8889_v46 = vld [vmem:[#allocation3 + $0xb50] sm:$0xff] }
 0x628   : > { %8781 = vmatpush.msra.mxu2 %v17671_v20  ;;  %8842 = vmatpush.msra.mxu3 %v17665_v29  ;;  %v8097_v49 = vld [vmem:[#allocation2 + $0xf] sm:$0xff]  ;;  %v17683_v29 = vand.u32 4294901760, %v17682_v1 }
 0x629   : > { %8386 = vmatmul.f32.gmra.mxu3 %v8174_v3  ;;  %8666 = vmatpush.msra.mxu0 %v17666_v44  ;;  %v8176_v38 = vand.u32 4294901760, %v8175_v63  ;;  %v16117_v13 = vand.u32 4294901760, %v8097_v49  ;;  %v16177_v44 = vsub.f32 %v8892_v51, %v16155_v31  ;;  %v16198_v3 = vsub.f32 %v8890_v35, %v16179_v37  ;;  %v8887_v63 = vld [vmem:[#allocation3 + $0xb40] sm:$0xff] }
 0x62a   : > { %8730 = vmatpush.msra.mxu1 %v17672_v15  ;;  %8785 = vmatpush.msra.mxu2 %v17674_v33  ;;  %v16225_v33 = vand.u32 4294901760, %v8887_v63 }
 0x62b   : > { %8844 = vmatpush.msra.mxu3 %v15859_v30  ;;  %8669 = vmatpush.msra.mxu0 %v17668_v58  ;;  %v16131_v52 = vsub.f32 %v8097_v49, %v16117_v13  ;;  %v8540_v30 = vand.u32 4294901760, %v8539_v19  ;;  %v17684_v58 = vand.u32 4294901760, %v15974_v27  ;;  %v17169_v26 = vand.u32 4294901760, %v16177_v44  ;;  %v8886_v19 = vld [vmem:[#allocation3 + $0xb38] sm:$0xff] }
 0x62c   : > { %8732 = vmatpush.msra.mxu1 %v17675_v10  ;;  %8789 = vmatpush.msra.mxu2 %v17676_v23  ;;  %v16250_v55 = vsub.f32 %v8887_v63, %v16225_v33 }
 0x62d   : > { %8846 = vmatpush.msra.mxu3 %v17670_v53  ;;  %8177 = vmatmul.f32.gmra.mxu0 %v8176_v38  ;;  %v8546_v18 = vand.u32 4294901760, %v16131_v52  ;;  %v16200_v53 = vand.u32 4294901760, %v8889_v46 }
 0x62e   : > { %8496 = vmatmul.f32.vlgmr.msrb.gmra.mxu1 %v16080_v47  ;;  %8672 = vmatpush.msra.mxu0 %v15880_v28  ;;  %v16148_v28 = vsub.f32 %v8894_v48, %v16134_v59  ;;  %v8885_v48 = vld [vmem:[#allocation3 + $0xb30] sm:$0xff] }
 0x62f   : > { %8734 = vmatpush.msra.mxu1 %v15917_v4  ;;  %8793 = vmatpush.msra.mxu2 %v17677_v7  ;;  %v8547_v16 = vsub.f32 %v16131_v52, %v8546_v18 }
 0x630   : > { %8848 = vmatpush.msra.mxu3 %v17672_v15  ;;  %8541 = vmatmul.f32.vlgmr.msrb.gmra.mxu2 %v8540_v30  ;;  %v17167_v15 = vand.u32 4294901760, %v16198_v3  ;;  %v8883_v30 = vld [vmem:[#allocation3 + $0xb20] sm:$0xff] }
 0x631   : > { %8675 = vmatpush.msra.mxu0 %v17673_v22  ;;  %8736 = vmatpush.msra.mxu1 %v15932_v32  ;;  %v16223_v22 = vsub.f32 %v8889_v46, %v16200_v53 }
 0x632   : > { %8797 = vmatpush.msra.mxu2 %v17678_v54  ;;  %8850 = vmatpush.msra.mxu3 %v17675_v10  ;;  %v16240_v10 = vand.u32 4294901760, %v8886_v19  ;;  %v17163_v54 = vand.u32 4294901760, %v16250_v55 }
 0x633   : > { %8650 = vmatmul.f32.vlgmr.msrb.gmra.mxu3 %v16094_v9  ;;  %8678 = vmatpush.msra.mxu0 %v15900_v34  ;;  %v17172_v34 = vand.u32 4294901760, %v16148_v28  ;;  %v17165_v23 = vand.u32 4294901760, %v16223_v22 }
 0x634   : > { %8738 = vmatpush.msra.mxu1 %v15946_v24  ;;  %8801 = vmatpush.msra.mxu2 %v17680_v40  ;;  %v16261_v7 = vsub.f32 %v8886_v19, %v16240_v10 }
 0x635   : > { %8852 = vmatpush.msra.mxu3 %v15917_v4  ;;  %8681 = vmatpush.msra.mxu0 %v15920_v2  ;;  %v8548_v4 = vand.u32 4294901760, %v8547_v16  ;;  %v17170_v2 = vand.u32 4294901760, %v16164_v6  ;;  %v8881_v16 = vld [vmem:[#allocation3 + $0xb10] sm:$0xff] }
 0x636   : > { %8740 = vmatpush.msra.mxu1 %v17681_v11  ;;  %8805 = vmatpush.msra.mxu2 %v17683_v29  ;;  %v17162_v35 = vand.u32 4294901760, %v16261_v7  ;;  %v8880_v29 = vld [vmem:[#allocation3 + $0xb08] sm:$0xff] }
 0x637   : > { %8854 = vmatpush.msra.mxu3 %v15932_v32  ;;  %8455 = vmatmul.f32.vlgmr.msrb.gmra.mxu0 %v16080_v47  ;;  %v8947_v32 = vsub.f32 %v16148_v28, %v17172_v34  ;;  %v16191_v47 = vsub.f32 %v8891_v42, %v16169_v36  ;;  %v8882_v42 = vld [vmem:[#allocation3 + $0xb18] sm:$0xff] }
 0x638   : > { %8500 = vmatmul.f32.gmra.mxu1 %v16092_v5  ;;  %8684 = vmatpush.msra.mxu0 %v15940_v25  ;;  %v8888_v25 = vld [vmem:[#allocation3 + $0xb48] sm:$0xff] }
 0x639   : > { %8742 = vmatpush.msra.mxu1 %v15971_v56  ;;  %8809 = vmatpush.msra.mxu2 %v17684_v58  ;;  %v8948_v20 = vand.u32 4294901760, %v8947_v32  ;;  %v17168_v49 = vand.u32 4294901760, %v16191_v47  ;;  %v16211_v38 = vand.u32 4294901760, %v8888_v25  ;;  %v16299_v58 = vand.u32 4294901760, %v8881_v16  ;;  %v8879_v32 = vld [vmem:[#allocation3 + $0xb00] sm:$0xff] }
 0x63a   : > { %8856 = vmatpush.msra.mxu3 %v15946_v24  ;;  %8549 = vmatmul.f32.gmra.mxu2 %v8548_v4  ;;  %v8953_v24 = vsub.f32 %v16164_v6, %v17170_v2  ;;  %v9278_v2 = vld [vmem:[#allocation3 + $0xbb0] sm:$0xff] }
 0x63b   : > { %8687 = vmatpush.msra.mxu0 %v17679_v39  ;;  %8744 = vmatpush.msra.mxu1 %v15991_v43  ;;  %v16275_v39 = vand.u32 4294901760, %v8883_v30  ;;  %v16323_v19 = vsub.f32 %v8881_v16, %v16299_v58  ;;  %v9286_v16 = vld [vmem:[#allocation3 + $0xbf0] sm:$0xff] }
 0x63c   : > { %8813 = vmatpush.msra.mxu2 %v8627_v12  ;;  %8858 = vmatpush.msra.mxu3 %v17681_v11  ;;  %v8959_v12 = vsub.f32 %v16177_v44, %v17169_v26  ;;  %v16287_v11 = vand.u32 4294901760, %v8882_v42 }
 0x63d   : > { %8654 = vmatmul.f32.gmra.mxu3 %v16117_v13  ;;  %8690 = vmatpush.msra.mxu0 %v17682_v1  ;;  %v8989_v1 = vsub.f32 %v16250_v55, %v17163_v54  ;;  %v16297_v46 = vsub.f32 %v8883_v30, %v16275_v39  ;;  %v17156_v30 = vand.u32 4294901760, %v16323_v19 }
 0x63e   : > { %8746 = vmatpush.msra.mxu1 %v16014_v0  ;;  %8817 = vmatpush.msra.mxu2 %v8633_v8  ;;  %v16235_v8 = vsub.f32 %v8888_v25, %v16211_v38  ;;  %v8995_v25 = vsub.f32 %v16261_v7, %v17162_v35  ;;  %v16311_v63 = vsub.f32 %v8882_v42, %v16287_v11  ;;  %v9280_v35 = vld [vmem:[#allocation3 + $0xbc0] sm:$0xff] }
 0x63f   : > { %8860 = vmatpush.msra.mxu3 %v15971_v56  ;;  %8693 = vmatpush.msra.mxu0 %v15974_v27  ;;  %v8954_v56 = vand.u32 4294901760, %v8953_v24  ;;  %v8965_v27 = vsub.f32 %v16191_v47, %v17168_v49 }
 0x640   : > { %8748 = vmatpush.msra.mxu1 %v16027_v17  ;;  %8821 = vmatpush.msra.mxu2 %v8639_v50  ;;  %v8971_v50 = vsub.f32 %v16198_v3, %v17167_v15  ;;  %v9279_v15 = vld [vmem:[#allocation3 + $0xbb8] sm:$0xff] }
 0x641   : > { %8862 = vmatpush.msra.mxu3 %v15991_v43  ;;  %8459 = vmatmul.f32.gmra.mxu0 %v16092_v5  ;;  %v8960_v43 = vand.u32 4294901760, %v8959_v12  ;;  %v8884_v5 = vld [vmem:[#allocation3 + $0xb28] sm:$0xff]  ;;  %v17158_v12 = vand.u32 4294901760, %v16297_v46 }
 0x642   : > { %8949 = vmatpush.msrb.mxu1 %v8948_v20  ;;  %8696 = vmatpush.msra.mxu0 %v15994_v45  ;;  %v8966_v45 = vand.u32 4294901760, %v8965_v27  ;;  %v16263_v51 = vand.u32 4294901760, %v8884_v5  ;;  %v16313_v20 = vand.u32 4294901760, %v8880_v29  ;;  %v8996_v27 = vand.u32 4294901760, %v8995_v25 }
 0x643   : > { %8752 = vmatmul.f32.vlgmr.msra.gmra.mxu1 %v8538_v21  ;;  %8825 = vmatpush.msra.mxu2 %v8645_v60  ;;  %v16253_v21 = vand.u32 4294901760, %v8885_v48  ;;  %v17164_v60 = vand.u32 4294901760, %v16235_v8  ;;  %v16369_v25 = vand.u32 4294901760, %v9286_v16 }
 0x644   : > { %8864 = vmatpush.msra.mxu3 %v16014_v0  ;;  %8955 = vmatpush.msrb.mxu1 %v8954_v56  ;;  %v8972_v0 = vand.u32 4294901760, %v8971_v50  ;;  %v16325_v56 = vand.u32 4294901760, %v8879_v32  ;;  %v16335_v50 = vsub.f32 %v8880_v29, %v16313_v20 }
 0x645   : > { %9051 = vmatpush.msrb.mxu2 %v16148_v28  ;;  %8699 = vmatpush.msra.mxu0 %v16017_v61  ;;  %v8977_v61 = vsub.f32 %v16223_v22, %v17165_v23  ;;  %v8983_v40 = vsub.f32 %v16235_v8, %v17164_v60 }
 0x646   : > { %8827 = vmatmul.f32.vlgmr.msra.gmra.mxu2 %v16094_v9  ;;  %8866 = vmatpush.msra.mxu3 %v16027_v17  ;;  %v16273_v17 = vsub.f32 %v8885_v48, %v16253_v21 }
 0x647   : > { %8961 = vmatpush.msrb.mxu1 %v8960_v43  ;;  %9054 = vmatpush.msrb.mxu2 %v16164_v6  ;;  %v17157_v43 = vand.u32 4294901760, %v16311_v63 }
 0x648   : > { %9109 = vmatpush.msrb.mxu3 %v16134_v59  ;;  %8702 = vmatpush.msra.mxu0 %v16030_v62  ;;  %v16285_v62 = vsub.f32 %v8884_v5, %v16263_v51  ;;  %v17161_v4 = vand.u32 4294901760, %v16273_v17 }
 0x649   : > { %8868 = vmatmul.f32.vlgmr.msra.gmra.mxu3 %v16094_v9  ;;  %8967 = vmatpush.msrb.mxu1 %v8966_v45  ;;  %v8978_v9 = vand.u32 4294901760, %v8977_v61  ;;  %v9013_v45 = vsub.f32 %v16297_v46, %v17158_v12  ;;  %v9019_v42 = vsub.f32 %v16311_v63, %v17157_v43  ;;  %v8877_v43 = vld [vmem:[#allocation2 + $0x11] sm:$0xff] }
 0x64a   : > { %9057 = vmatpush.msrb.mxu2 %v16177_v44  ;;  %9111 = vmatpush.msrb.mxu3 %v16143_v14  ;;  %v17159_v24 = vand.u32 4294901760, %v16285_v62 }
 0x64b   : > { %8705 = vmatpush.msra.mxu0 %v16042_v57  ;;  %8973 = vmatpush.msrb.mxu1 %v8972_v0  ;;  %v8984_v57 = vand.u32 4294901760, %v8983_v40  ;;  %v16345_v0 = vsub.f32 %v8879_v32, %v16325_v56  ;;  %v17155_v40 = vand.u32 4294901760, %v16335_v50 }
 0x64c   : > { %9060 = vmatpush.msrb.mxu2 %v16191_v47  ;;  %9113 = vmatpush.msrb.mxu3 %v16155_v31  ;;  %v9007_v48 = vsub.f32 %v16285_v62, %v17159_v24  ;;  %v16419_v24 = vand.u32 4294901760, %v8877_v43 }
 0x64d   : > { %8896 = vmatpush.msrb.mxu0 %v16134_v59  ;;  %8758 = vmatmul.f32.gmra.mxu1 %v8546_v18  ;;  %v9001_v18 = vsub.f32 %v16273_v17, %v17161_v4  ;;  %v17154_v29 = vand.u32 4294901760, %v16345_v0  ;;  %v9031_v32 = vsub.f32 %v16335_v50, %v17155_v40 }
 0x64e   : > { %8708 = vmatmul.f32.vlgmr.msra.gmra.mxu0 %v16102_v41  ;;  %8979 = vmatpush.msrb.mxu1 %v8978_v9  ;;  %v8990_v41 = vand.u32 4294901760, %v8989_v1  ;;  %v9008_v61 = vand.u32 4294901760, %v9007_v48  ;;  %v9014_v9 = vand.u32 4294901760, %v9013_v45  ;;  %v9025_v1 = vsub.f32 %v16323_v19, %v17156_v30  ;;  %v9284_v45 = vld [vmem:[#allocation3 + $0xbe0] sm:$0xff]  ;;  %17686 = vst [vmem:[#allocation22_spill] sm:$0xff] %v16419_v24 }
 0x64f   : > { %8898 = vmatpush.msrb.mxu0 %v16143_v14  ;;  %9063 = vmatpush.msrb.mxu2 %v16198_v3  ;;  %v9002_v5 = vand.u32 4294901760, %v9001_v18  ;;  %v9285_v18 = vld [vmem:[#allocation3 + $0xbe8] sm:$0xff]  ;;  %v9037_v48 = vsub.f32 %v16345_v0, %v17154_v29 }
 0x650   : > { %9115 = vmatpush.msrb.mxu3 %v16169_v36  ;;  %8831 = vmatmul.f32.gmra.mxu2 %v16117_v13 }
 0x651   : > { %8900 = vmatpush.msrb.mxu0 %v16155_v31  ;;  %8985 = vmatpush.msrb.mxu1 %v8984_v57  ;;  %v9038_v29 = vand.u32 4294901760, %v9037_v48 }
 0x652   : > { %9066 = vmatpush.msrb.mxu2 %v16223_v22  ;;  %9117 = vmatpush.msrb.mxu3 %v16179_v37 }
 0x653   : > { %8872 = vmatmul.f32.gmra.mxu3 %v16117_v13  ;;  %8902 = vmatpush.msrb.mxu0 %v16169_v36  ;;  %v9287_v13 = vld [vmem:[#allocation3 + $0xbf8] sm:$0xff] }
 0x654   : > { %8991 = vmatpush.msrb.mxu1 %v8990_v41  ;;  %9069 = vmatpush.msrb.mxu2 %v16235_v8  ;;  %v16361_v57 = vand.u32 4294901760, %v9287_v13  ;;  %v8876_v41 = vld [vmem:[#allocation2 + $0x9] sm:$0xff] }
 0x655   : > { %9119 = vmatpush.msrb.mxu3 %v16200_v53  ;;  %8904 = vmatpush.msrb.mxu0 %v16179_v37 }
 0x656   : > { %8997 = vmatpush.msrb.mxu1 %v8996_v27  ;;  %9072 = vmatpush.msrb.mxu2 %v16250_v55  ;;  %v9026_v27 = vand.u32 4294901760, %v9025_v1  ;;  %v16388_v1 = vsub.f32 %v9286_v16, %v16369_v25 }
 0x657   : > { %9121 = vmatpush.msrb.mxu3 %v16211_v38  ;;  %8713 = vmatmul.f32.gmra.mxu0 %v16131_v52  ;;  %v9020_v52 = vand.u32 4294901760, %v9019_v42  ;;  %v16383_v42 = vand.u32 4294901760, %v8876_v41 }
 0x658   : > { %8906 = vmatpush.msrb.mxu0 %v16200_v53  ;;  %9003 = vmatpush.msrb.mxu1 %v9002_v5  ;;  %v16378_v5 = vsub.f32 %v9287_v13, %v16361_v57  ;;  %v9283_v13 = vld [vmem:[#allocation3 + $0xbd8] sm:$0xff]  ;;  %v17166_v30 = vand.u32 4294901760, %v16388_v1 }
 0x659   : > { %9075 = vmatpush.msrb.mxu2 %v16261_v7  ;;  %9123 = vmatpush.msrb.mxu3 %v16225_v33  ;;  %v8928_v16 = vsub.f32 %v8876_v41, %v16383_v42  ;;  %v16404_v48 = vand.u32 4294901760, %v9283_v13 }
 0x65a   : > { %8908 = vmatpush.msrb.mxu0 %v16211_v38  ;;  %9009 = vmatpush.msrb.mxu1 %v9008_v61  ;;  %v9032_v61 = vand.u32 4294901760, %v9031_v32  ;;  %v17160_v40 = vand.u32 4294901760, %v16378_v5  ;;  %v9282_v32 = vld [vmem:[#allocation3 + $0xbd0] sm:$0xff] }
 0x65b   : > { %9078 = vmatpush.msrb.mxu2 %v16273_v17  ;;  %9125 = vmatpush.msrb.mxu3 %v16240_v10  ;;  %v16415_v12 = vand.u32 4294901760, %v9282_v32  ;;  %v16428_v4 = vsub.f32 %v9283_v13, %v16404_v48  ;;  %v16442_v13 = vand.u32 4294901760, %v9280_v35 }
 0x65c   : > { %8910 = vmatpush.msrb.mxu0 %v16225_v33  ;;  %9015 = vmatpush.msrb.mxu1 %v9014_v9  ;;  %v16385_v9 = vand.u32 4294901760, %v9285_v18 }
 0x65d   : > { %9081 = vmatpush.msrb.mxu2 %v16285_v62  ;;  %9127 = vmatpush.msrb.mxu3 %v16253_v21  ;;  %17687 = vst [vmem:[#allocation23_spill] sm:$0xff] %v16428_v4  ;;  %v17176_v26 = vand.u32 4294901760, %v16428_v4 }
 0x65e   : > { %8912 = vmatpush.msrb.mxu0 %v16240_v10  ;;  %9021 = vmatpush.msrb.mxu1 %v9020_v52  ;;  %v16394_v52 = vand.u32 4294901760, %v9284_v45 }
 0x65f   : > { %9084 = vmatpush.msrb.mxu2 %v16297_v46  ;;  %9129 = vmatpush.msrb.mxu3 %v16263_v51 }
 0x660   : > { %8914 = vmatpush.msrb.mxu0 %v16253_v21  ;;  %9027 = vmatpush.msrb.mxu1 %v9026_v27  ;;  %v16402_v27 = vsub.f32 %v9285_v18, %v16385_v9  ;;  %v16413_v41 = vsub.f32 %v9284_v45, %v16394_v52  ;;  %v9281_v18 = vld [vmem:[#allocation3 + $0xbc8] sm:$0xff] }
 0x661   : > { %9087 = vmatpush.msrb.mxu2 %v16311_v63  ;;  %9131 = vmatpush.msrb.mxu3 %v16275_v39  ;;  %v16432_v54 = vand.u32 4294901760, %v9281_v18 }
 0x662   : > { %8916 = vmatpush.msrb.mxu0 %v16263_v51  ;;  %9033 = vmatpush.msrb.mxu1 %v9032_v61  ;;  %v9340_v61 = vsub.f32 %v16378_v5, %v17160_v40  ;;  %17685 = vst [vmem:[#allocation9_spill] sm:$0xff] %v16413_v41  ;;  %v9346_v40 = vsub.f32 %v16388_v1, %v17166_v30  ;;  %v17171_v45 = vand.u32 4294901760, %v16402_v27  ;;  %v17173_v23 = vand.u32 4294901760, %v16413_v41 }
 0x663   : > { %9090 = vmatpush.msrb.mxu2 %v16323_v19  ;;  %9133 = vmatpush.msrb.mxu3 %v16287_v11  ;;  %v16437_v30 = vsub.f32 %v9282_v32, %v16415_v12 }
 0x664   : > { %8918 = vmatpush.msrb.mxu0 %v16275_v39  ;;  %9039 = vmatpush.msrb.mxu1 %v9038_v29  ;;  %v8929_v29 = vand.u32 4294901760, %v8928_v16  ;;  %v9341_v60 = vand.u32 4294901760, %v9340_v61  ;;  %v9347_v49 = vand.u32 4294901760, %v9346_v40  ;;  %v9352_v32 = vsub.f32 %v16402_v27, %v17171_v45  ;;  %v9277_v45 = vld [vmem:[#allocation3 + $0xba8] sm:$0xff] }
 0x665   : > { %9093 = vmatpush.msrb.mxu2 %v16335_v50  ;;  %9135 = vmatpush.msrb.mxu3 %v16299_v58  ;;  %17688 = vst [vmem:[#allocation14_spill] sm:$0xff] %v16437_v30  ;;  %v9358_v40 = vsub.f32 %v16413_v41, %v17173_v23  ;;  %v9364_v23 = vsub.f32 %v16428_v4, %v17176_v26  ;;  %v16478_v41 = vand.u32 4294901760, %v9277_v45  ;;  %v9275_v26 = vld [vmem:[#allocation3 + $0xb98] sm:$0xff]  ;;  %v17690_v4 = vand.u32 4294901760, %v16148_v28 }
 0x666   : > { %9041 = vmatmul.f32.vlgmr.msrb.gmra.mxu1 %v16383_v42  ;;  %8920 = vmatpush.msrb.mxu0 %v16287_v11  ;;  %v8930_v61 = vsub.f32 %v8928_v16, %v8929_v29 }
 0x667   : > { %9227 = vmatpush.msra.mxu1 %v16134_v59  ;;  %9096 = vmatpush.msrb.mxu2 %v16345_v0  ;;  %v8936_v59 = vsub.f32 %v8877_v43, %v16419_v24  ;;  %v16454_v43 = vand.u32 4294901760, %v9279_v15 }
 0x668   : > { %9137 = vmatpush.msrb.mxu3 %v16313_v20  ;;  %9099 = vmatmul.f32.vlgmr.msrb.gmra.mxu2 %v8928_v16  ;;  %v9276_v16 = vld [vmem:[#allocation3 + $0xba0] sm:$0xff] }
 0x669   : > { %9229 = vmatpush.msra.mxu1 %v16143_v14  ;;  %9289 = vmatpush.msra.mxu2 %v16361_v57  ;;  %v16452_v14 = vsub.f32 %v9281_v18, %v16432_v54  ;;  %v16466_v18 = vand.u32 4294901760, %v9278_v2  ;;  %v8937_v34 = vand.u32 4294901760, %v8936_v59 }
 0x66a   : > { %8922 = vmatpush.msrb.mxu0 %v16299_v58  ;;  %9139 = vmatpush.msrb.mxu3 %v16325_v56 }
 0x66b   : > { %9143 = vmatmul.f32.vlgmr.msrb.gmra.mxu3 %v8929_v29  ;;  %9231 = vmatpush.msra.mxu1 %v16155_v31  ;;  %v16464_v31 = vsub.f32 %v9280_v35, %v16442_v13  ;;  %v9353_v29 = vand.u32 4294901760, %v9352_v32  ;;  %v16476_v35 = vsub.f32 %v9279_v15, %v16454_v43  ;;  %v16489_v15 = vsub.f32 %v9278_v2, %v16466_v18 }
 0x66c   : > { %9291 = vmatpush.msra.mxu2 %v16369_v25  ;;  %9342 = vmatpush.msra.mxu3 %v9341_v60  ;;  %v8931_v60 = vand.u32 4294901760, %v8930_v61  ;;  %v17689_v61 = vand.u32 4294901760, %v16437_v30  ;;  %v17692_v28 = vand.u32 4294901760, %v16452_v14  ;;  %v16501_v2 = vsub.f32 %v9277_v45, %v16478_v41 }
 0x66d   : > { %8924 = vmatpush.msrb.mxu0 %v16313_v20  ;;  %9233 = vmatpush.msra.mxu1 %v16169_v36  ;;  %v17183_v36 = vand.u32 4294901760, %v16476_v35 }
 0x66e   : > { %9293 = vmatpush.msra.mxu2 %v16385_v9  ;;  %9348 = vmatpush.msra.mxu3 %v9347_v49  ;;  %v9359_v49 = vand.u32 4294901760, %v9358_v40  ;;  %v9370_v32 = vsub.f32 %v16437_v30, %v17689_v61  ;;  %v8938_v40 = vsub.f32 %v8936_v59, %v8937_v34  ;;  %v17691_v61 = vand.u32 4294901760, %v16164_v6 }
 0x66f   : > { %8926 = vmatpush.msrb.mxu0 %v16325_v56  ;;  %9045 = vmatmul.f32.gmra.mxu1 %v16419_v24  ;;  %v16491_v24 = vand.u32 4294901760, %v9276_v16  ;;  %v16503_v30 = vand.u32 4294901760, %v9275_v26  ;;  %v17693_v6 = vand.u32 4294901760, %v16177_v44  ;;  %v17695_v44 = vand.u32 4294901760, %v16191_v47 }
 0x670   : > { %8932 = vmatmul.f32.vlgmr.msrb.gmra.mxu0 %v8931_v60  ;;  %9235 = vmatpush.msra.mxu1 %v16179_v37  ;;  %v9365_v37 = vand.u32 4294901760, %v9364_v23  ;;  %v9274_v60 = vld [vmem:[#allocation3 + $0xb90] sm:$0xff]  ;;  %v9371_v23 = vand.u32 4294901760, %v9370_v32  ;;  %v9388_v32 = vsub.f32 %v16476_v35, %v17183_v36 }
 0x671   : > { %9156 = vmatpush.msra.mxu0 %v17690_v4  ;;  %9295 = vmatpush.msra.mxu2 %v16394_v52  ;;  %v9376_v4 = vsub.f32 %v16452_v14, %v17692_v28  ;;  %v16515_v45 = vand.u32 4294901760, %v9274_v60  ;;  %v9273_v28 = vld [vmem:[#allocation3 + $0xb88] sm:$0xff] }
 0x672   : > { %9354 = vmatpush.msra.mxu3 %v9353_v29  ;;  %9104 = vmatmul.f32.gmra.mxu2 %v8936_v59  ;;  %v9269_v29 = vld [vmem:[#allocation2 + $0xa] sm:$0xff] }
 0x673   : > { %9160 = vmatpush.msra.mxu0 %v17691_v61  ;;  %9237 = vmatpush.msra.mxu1 %v16200_v53  ;;  %v17694_v53 = vand.u32 4294901760, %v16464_v31  ;;  %v16513_v61 = vsub.f32 %v9276_v16, %v16491_v24  ;;  %v9399_v16 = vand.u32 4294901760, %v16501_v2  ;;  %v16544_v36 = vand.u32 4294901760, %v9269_v29 }
 0x674   : > { %9297 = vmatpush.msra.mxu2 %v16404_v48  ;;  %9360 = vmatpush.msra.mxu3 %v9359_v49  ;;  %v9377_v49 = vand.u32 4294901760, %v9376_v4 }
 0x675   : > { %9149 = vmatmul.f32.gmra.mxu3 %v8937_v34  ;;  %9164 = vmatpush.msra.mxu0 %v17693_v6  ;;  %v9382_v59 = vsub.f32 %v16464_v31, %v17694_v53  ;;  %v8939_v34 = vand.u32 4294901760, %v8938_v40  ;;  %v16526_v6 = vsub.f32 %v9275_v26, %v16503_v30  ;;  %v9272_v53 = vld [vmem:[#allocation3 + $0xb80] sm:$0xff]  ;;  %v9405_v4 = vand.u32 4294901760, %v16513_v61 }
 0x676   : > { %9239 = vmatpush.msra.mxu1 %v16211_v38  ;;  %9299 = vmatpush.msra.mxu2 %v16415_v12  ;;  %v16530_v38 = vand.u32 4294901760, %v9273_v28  ;;  %v16537_v26 = vsub.f32 %v9274_v60, %v16515_v45 }
 0x677   : > { %9366 = vmatpush.msra.mxu3 %v9365_v37  ;;  %9168 = vmatpush.msra.mxu0 %v17695_v44  ;;  %v9383_v47 = vand.u32 4294901760, %v9382_v59  ;;  %v17696_v37 = vand.u32 4294901760, %v16489_v15  ;;  %v17697_v44 = vand.u32 4294901760, %v16198_v3  ;;  %v9400_v59 = vsub.f32 %v16501_v2, %v9399_v16 }
 0x678   : > { %9241 = vmatpush.msra.mxu1 %v16225_v33  ;;  %9301 = vmatpush.msra.mxu2 %v16432_v54  ;;  %v16542_v33 = vand.u32 4294901760, %v9272_v53  ;;  %v9411_v60 = vand.u32 4294901760, %v16526_v6  ;;  %v16555_v3 = vsub.f32 %v9273_v28, %v16530_v38 }
 0x679   : > { %9372 = vmatpush.msra.mxu3 %v9371_v23  ;;  %8940 = vmatmul.f32.gmra.mxu0 %v8939_v34  ;;  %v9394_v40 = vsub.f32 %v16489_v15, %v17696_v37  ;;  %v9389_v23 = vand.u32 4294901760, %v9388_v32  ;;  %v17698_v34 = vand.u32 4294901760, %v16223_v22  ;;  %v9417_v32 = vand.u32 4294901760, %v16537_v26 }
 0x67a   : > { %9172 = vmatpush.msra.mxu0 %v17697_v44  ;;  %9243 = vmatpush.msra.mxu1 %v16240_v10  ;;  %v17699_v37 = vand.u32 4294901760, %v16235_v8  ;;  %v16566_v22 = vsub.f32 %v9269_v29, %v16544_v36  ;;  %v9401_v28 = vand.u32 4294901760, %v9400_v59  ;;  %v9423_v8 = vand.u32 4294901760, %v16555_v3 }
 0x67b   : > { %9303 = vmatpush.msra.mxu2 %v16442_v13  ;;  %9378 = vmatpush.msra.mxu3 %v9377_v49  ;;  %v9395_v10 = vand.u32 4294901760, %v9394_v40  ;;  %v9406_v49 = vsub.f32 %v16513_v61, %v9405_v4  ;;  %v17700_v40 = vand.u32 4294901760, %v16250_v55  ;;  %v9418_v29 = vsub.f32 %v16537_v26, %v9417_v32 }
 0x67c   : > { %9176 = vmatpush.msra.mxu0 %v17698_v34  ;;  %9245 = vmatpush.msra.mxu1 %v16253_v21  ;;  %v16569_v21 = vsub.f32 %v9272_v53, %v16542_v33  ;;  %v9270_v53 = vld [vmem:[#allocation2 + $0x12] sm:$0xff]  ;;  %v17701_v44 = vand.u32 4294901760, %v16261_v7  ;;  %v9322_v55 = vand.u32 4294901760, %v16566_v22  ;;  %v17702_v59 = vand.u32 4294901760, %v16273_v17 }
 0x67d   : > { %9305 = vmatpush.msra.mxu2 %v16454_v43  ;;  %9384 = vmatpush.msra.mxu3 %v9383_v47  ;;  %v9412_v47 = vsub.f32 %v16526_v6, %v9411_v60  ;;  %v9424_v7 = vsub.f32 %v16555_v3, %v9423_v8  ;;  %v16595_v34 = vand.u32 4294901760, %v9270_v53 }
 0x67e   : > { %9180 = vmatpush.msra.mxu0 %v17699_v37  ;;  %9247 = vmatpush.msra.mxu1 %v16263_v51  ;;  %v9407_v51 = vand.u32 4294901760, %v9406_v49  ;;  %v9323_v17 = vsub.f32 %v16566_v22, %v9322_v55  ;;  %v17704_v49 = vand.u32 4294901760, %v16297_v46 }
 0x67f   : > { %9307 = vmatpush.msra.mxu2 %v16466_v18  ;;  %9390 = vmatpush.msra.mxu3 %v9389_v23  ;;  %v9413_v23 = vand.u32 4294901760, %v9412_v47  ;;  %v16612_v37 = vsub.f32 %v9270_v53, %v16595_v34  ;;  %v17711_v53 = vand.u32 4294901760, %v16345_v0  ;;  %v17715_v0 = vld [vmem:[#allocation23_spill] sm:$0xff] }
 0x680   : > { %9184 = vmatpush.msra.mxu0 %v17700_v40  ;;  %9249 = vmatpush.msra.mxu1 %v16275_v39  ;;  %v9429_v39 = vand.u32 4294901760, %v16569_v21  ;;  %v17707_v40 = vand.u32 4294901760, %v16323_v19  ;;  %v17710_v19 = vand.u32 4294901760, %v16402_v27 }
 0x681   : > { %9309 = vmatpush.msra.mxu2 %v16478_v41  ;;  %9396 = vmatpush.msra.mxu3 %v9395_v10  ;;  %v17703_v10 = vand.u32 4294901760, %v16285_v62  ;;  %v9425_v62 = vand.u32 4294901760, %v9424_v7  ;;  %v9330_v46 = vand.u32 4294901760, %v16612_v37 }
 0x682   : > { %9188 = vmatpush.msra.mxu0 %v17701_v44  ;;  %9251 = vmatpush.msra.mxu1 %v16287_v11  ;;  %v9419_v11 = vand.u32 4294901760, %v9418_v29  ;;  %v17709_v29 = vand.u32 4294901760, %v16335_v50  ;;  %v17712_v44 = vld [vmem:[#allocation22_spill] sm:$0xff]  ;;  %v17713_v50 = vld [vmem:[#allocation9_spill] sm:$0xff] }
 0x683   : > { %9311 = vmatpush.msra.mxu2 %v16491_v24  ;;  %9402 = vmatpush.msra.mxu3 %v9401_v28  ;;  %v9324_v28 = vand.u32 4294901760, %v9323_v17 }
 0x684   : > { %9192 = vmatpush.msra.mxu0 %v17702_v59  ;;  %9253 = vmatpush.msra.mxu1 %v16299_v58  ;;  %v9430_v58 = vsub.f32 %v16569_v21, %v9429_v39 }
 0x685   : > { %9313 = vmatpush.msra.mxu2 %v16503_v30  ;;  %9408 = vmatpush.msra.mxu3 %v9407_v51  ;;  %v9331_v51 = vsub.f32 %v16612_v37, %v9330_v46 }
 0x686   : > { %9196 = vmatpush.msra.mxu0 %v17703_v10  ;;  %9255 = vmatpush.msra.mxu1 %v16313_v20  ;;  %v17705_v20 = vand.u32 4294901760, %v16311_v63  ;;  %v9431_v47 = vand.u32 4294901760, %v9430_v58  ;;  %v17708_v63 = vand.u32 4294901760, %v16388_v1 }
 0x687   : > { %9315 = vmatpush.msra.mxu2 %v16515_v45  ;;  %9414 = vmatpush.msra.mxu3 %v9413_v23  ;;  %v17714_v23 = vand.u32 4294901760, %v17713_v50 }
 0x688   : > { %9200 = vmatpush.msra.mxu0 %v17704_v49  ;;  %9257 = vmatpush.msra.mxu1 %v16325_v56  ;;  %v17706_v56 = vand.u32 4294901760, %v16378_v5 }
 0x689   : > { %9317 = vmatpush.msra.mxu2 %v16530_v38  ;;  %9420 = vmatpush.msra.mxu3 %v9419_v11 }
 0x68a   : > { %9259 = vmatmul.f32.vlgmr.msra.gmra.mxu1 %v16383_v42  ;;  %9204 = vmatpush.msra.mxu0 %v17705_v20 }
 0x68b   : > { %9502 = vmatpush.msrb.mxu1 %v16361_v57  ;;  %9319 = vmatpush.msra.mxu2 %v16542_v33 }
 0x68c   : > { %9426 = vmatpush.msra.mxu3 %v9425_v62  ;;  %9325 = vmatmul.f32.vlgmr.msra.gmra.mxu2 %v9324_v28 }
 0x68d   : > { %9504 = vmatpush.msrb.mxu1 %v16369_v25  ;;  %9549 = vmatpush.msrb.mxu2 %v17706_v56 }
 0x68e   : > { %9208 = vmatpush.msra.mxu0 %v17707_v40  ;;  %9432 = vmatpush.msra.mxu3 %v9431_v47 }
 0x68f   : > { %9434 = vmatmul.f32.vlgmr.msra.gmra.mxu3 %v16544_v36  ;;  %9506 = vmatpush.msrb.mxu1 %v16385_v9 }
 0x690   : > { %9553 = vmatpush.msrb.mxu2 %v17708_v63  ;;  %9620 = vmatpush.msrb.mxu3 %v16361_v57  ;;  %v9332_v57 = vand.u32 4294901760, %v9331_v51 }
 0x691   : > { %9212 = vmatpush.msra.mxu0 %v17709_v29  ;;  %9508 = vmatpush.msrb.mxu1 %v16394_v52 }
 0x692   : > { %9557 = vmatpush.msrb.mxu2 %v17710_v19  ;;  %9622 = vmatpush.msrb.mxu3 %v16369_v25  ;;  %v17716_v25 = vand.u32 4294901760, %v17715_v0 }
 0x693   : > { %9216 = vmatpush.msra.mxu0 %v17711_v53  ;;  %9263 = vmatmul.f32.gmra.mxu1 %v17712_v44 }
 0x694   : > { %9218 = vmatmul.f32.vlgmr.msra.gmra.mxu0 %v16383_v42  ;;  %9510 = vmatpush.msrb.mxu1 %v16404_v48 }
 0x695   : > { %9444 = vmatpush.msrb.mxu0 %v16378_v5  ;;  %9561 = vmatpush.msrb.mxu2 %v17714_v23  ;;  %v17717_v5 = vld [vmem:[#allocation14_spill] sm:$0xff] }
 0x696   : > { %9624 = vmatpush.msrb.mxu3 %v16385_v9  ;;  %9333 = vmatmul.f32.gmra.mxu2 %v9332_v57  ;;  %v17718_v42 = vand.u32 4294901760, %v17717_v5  ;;  %v17719_v9 = vand.u32 4294901760, %v16452_v14 }
 0x697   : > { %9447 = vmatpush.msrb.mxu0 %v16388_v1  ;;  %9512 = vmatpush.msrb.mxu1 %v16415_v12  ;;  %v17720_v1 = vand.u32 4294901760, %v16464_v31 }
 0x698   : > { %9565 = vmatpush.msrb.mxu2 %v17716_v25  ;;  %9626 = vmatpush.msrb.mxu3 %v16394_v52  ;;  %v17721_v52 = vand.u32 4294901760, %v16476_v35 }
 0x699   : > { %9438 = vmatmul.f32.gmra.mxu3 %v16595_v34  ;;  %9450 = vmatpush.msrb.mxu0 %v16402_v27 }
 0x69a   : > { %9514 = vmatpush.msrb.mxu1 %v16432_v54  ;;  %9569 = vmatpush.msrb.mxu2 %v17718_v42 }
 0x69b   : > { %9628 = vmatpush.msrb.mxu3 %v16404_v48  ;;  %9453 = vmatpush.msrb.mxu0 %v17713_v50 }
 0x69c   : > { %9516 = vmatpush.msrb.mxu1 %v16442_v13  ;;  %9573 = vmatpush.msrb.mxu2 %v17719_v9 }
 0x69d   : > { %9630 = vmatpush.msrb.mxu3 %v16415_v12  ;;  %9222 = vmatmul.f32.gmra.mxu0 %v17712_v44  ;;  %v17722_v12 = vand.u32 4294901760, %v16489_v15 }
 0x69e   : > { %9456 = vmatpush.msrb.mxu0 %v17715_v0  ;;  %9518 = vmatpush.msrb.mxu1 %v16454_v43 }
 0x69f   : > { %9577 = vmatpush.msrb.mxu2 %v17720_v1  ;;  %9632 = vmatpush.msrb.mxu3 %v16432_v54  ;;  %v8279_v54 = vpop.f32.mrf.mxu1 }
 0x6a0   : > { %9459 = vmatpush.msrb.mxu0 %v17717_v5  ;;  %9520 = vmatpush.msrb.mxu1 %v16466_v18 }
 0x6a1   : > { %9581 = vmatpush.msrb.mxu2 %v17721_v52  ;;  %9634 = vmatpush.msrb.mxu3 %v16442_v13 }
 0x6a2   : > { %9462 = vmatpush.msrb.mxu0 %v16452_v14  ;;  %9522 = vmatpush.msrb.mxu1 %v16478_v41  ;;  %v8381_v27 = vpop.f32.mrf.mxu3 }
 0x6a3   : > { %9585 = vmatpush.msrb.mxu2 %v17722_v12  ;;  %9636 = vmatpush.msrb.mxu3 %v16454_v43 }
 0x6a4   : > { %9465 = vmatpush.msrb.mxu0 %v16464_v31  ;;  %9524 = vmatpush.msrb.mxu1 %v16491_v24 }
 0x6a5   : > { %9589 = vmatpush.msrb.mxu2 %v9399_v16  ;;  %9638 = vmatpush.msrb.mxu3 %v16466_v18 }
 0x6a6   : > { %9468 = vmatpush.msrb.mxu0 %v16476_v35  ;;  %9526 = vmatpush.msrb.mxu1 %v16503_v30 }
 0x6a7   : > { %9593 = vmatpush.msrb.mxu2 %v9405_v4  ;;  %9640 = vmatpush.msrb.mxu3 %v16478_v41  ;;  %v8283_v48 = vpop.f32.mrf.mxu1 }
 0x6a8   : > { %9471 = vmatpush.msrb.mxu0 %v16489_v15  ;;  %9528 = vmatpush.msrb.mxu1 %v16515_v45 }
 0x6a9   : > { %9597 = vmatpush.msrb.mxu2 %v9411_v60  ;;  %9642 = vmatpush.msrb.mxu3 %v16491_v24  ;;  %v8170_v24 = vpop.f32.mrf.mxu0 }
 0x6aa   : > { %9474 = vmatpush.msrb.mxu0 %v16501_v2  ;;  %9530 = vmatpush.msrb.mxu1 %v16530_v38 }
 0x6ab   : > { %9601 = vmatpush.msrb.mxu2 %v9417_v32  ;;  %9644 = vmatpush.msrb.mxu3 %v16503_v30  ;;  %v8337_v30 = vpop.f32.mrf.mxu2 }
 0x6ac   : > { %9477 = vmatpush.msrb.mxu0 %v16513_v61  ;;  %9532 = vmatpush.msrb.mxu1 %v16542_v33  ;;  %v8387_v14 = vpop.f32.mrf.mxu3 }
 0x6ad   : > { %9605 = vmatpush.msrb.mxu2 %v9423_v8  ;;  %9646 = vmatpush.msrb.mxu3 %v16515_v45  ;;  %v8280_v8 = vadd.f32 %v8279_v54, %v8170_v24 }
 0x6ae   : > { %9536 = vmatmul.f32.vlgmr.msrb.gmra.mxu1 %v9322_v55  ;;  %9480 = vmatpush.msrb.mxu0 %v16526_v6 }
 0x6af   : > { %9609 = vmatpush.msrb.mxu2 %v9429_v39  ;;  %9648 = vmatpush.msrb.mxu3 %v16530_v38  ;;  %v8497_v43 = vpop.f32.mrf.mxu1  ;;  %v8338_v55 = vadd.f32 %v8337_v30, %v8280_v8 }
 0x6b0   : > { %9611 = vmatmul.f32.vlgmr.msrb.gmra.mxu2 %v16544_v36  ;;  %9483 = vmatpush.msrb.mxu0 %v16537_v26 }
 0x6b1   : > { %9650 = vmatpush.msrb.mxu3 %v16542_v33  ;;  %v8178_v41 = vpop.f32.mrf.mxu0 }
 0x6b2   : > { %9652 = vmatmul.f32.vlgmr.msrb.gmra.mxu3 %v16544_v36  ;;  %9486 = vmatpush.msrb.mxu0 %v16555_v3  ;;  %v8284_v11 = vadd.f32 %v8283_v48, %v8178_v41 }
 0x6b3   : > { %v8342_v13 = vpop.f32.mrf.mxu2 }
 0x6b4   : > { %9489 = vmatpush.msrb.mxu0 %v16569_v21  ;;  %v8343_v58 = vadd.f32 %v8342_v13, %v8284_v11 }
 0x6b5   : > { %9492 = vmatmul.f32.vlgmr.msrb.gmra.mxu0 %v16566_v22 }
 0x6b6   : > { %9542 = vmatmul.f32.gmra.mxu1 %v9330_v46  ;;  %v8651_v36 = vpop.f32.mrf.mxu3  ;;  %v8388_v28 = vadd.f32 %v8387_v14, %v8343_v58 }
 0x6b7   : > { %v8501_v35 = vpop.f32.mrf.mxu1 }
 0x6b8   : > { %9615 = vmatmul.f32.gmra.mxu2 %v16595_v34 }
 0x6b9   : > { %v8456_v31 = vpop.f32.mrf.mxu0 }
 0x6ba   : > { %9656 = vmatmul.f32.gmra.mxu3 %v16595_v34  ;;  %v8382_v34 = vadd.f32 %v8381_v27, %v8338_v55 }
 0x6bb   : > { %v8542_v18 = vpop.f32.mrf.mxu2 }
 0x6bc   : > { %v8457_v17 = vadd.f32 %v8456_v31, %v8382_v34 }
 0x6bd   : > { %9497 = vmatmul.f32.gmra.mxu0 %v16612_v37 }
 0x6be   : > { %v8498_v37 = vadd.f32 %v8497_v43, %v8457_v17 }
 0x6c0   : > { %v8655_v61 = vpop.f32.mrf.mxu3  ;;  %v8753_v45 = vpop.f32.mrf.mxu1  ;;  %v8543_v46 = vadd.f32 %v8542_v18, %v8498_v37 }
 0x6c1   : > { %v8460_v15 = vpop.f32.mrf.mxu0 }
 0x6c2   : > { %v8461_v56 = vadd.f32 %v8460_v15, %v8388_v28  ;;  %v8652_v63 = vadd.f32 %v8651_v36, %v8543_v46 }
 0x6c3   : > { %v8550_v2 = vpop.f32.mrf.mxu2 }
 0x6c4   : > { %v8502_v51 = vadd.f32 %v8501_v35, %v8461_v56 }
 0x6c6   : > { %v8551_v50 = vadd.f32 %v8550_v2, %v8502_v51 }
 0x6c8   : > { %v8656_v42 = vadd.f32 %v8655_v61, %v8551_v50 }
 0x6ca   : > { %v8759_v4 = vpop.f32.mrf.mxu1 }
 0x6cb   : > { %v8709_v16 = vpop.f32.mrf.mxu0  ;;  %v8828_v6 = vpop.f32.mrf.mxu2 }
 0x6cc   : > { %v8869_v38 = vpop.f32.mrf.mxu3  ;;  %v8710_v53 = vadd.f32 %v8709_v16, %v8652_v63 }
 0x6ce   : > { %v8754_v0 = vadd.f32 %v8753_v45, %v8710_v53  ;;  %v9804_v45 = vld [vmem:[#allocation5 + $0x5] ss:$0 sm:$0xff] }
 0x6d0   : > { %v8829_v54 = vadd.f32 %v8828_v6, %v8754_v0 }
 0x6d2   : > { %v8870_v43 = vadd.f32 %v8869_v38, %v8829_v54 }
 0x6d3   : > { %v8832_v33 = vpop.f32.mrf.mxu2 }
 0x6d4   : > { %v8714_v26 = vpop.f32.mrf.mxu0 }
 0x6d5   : > { %v8715_v24 = vadd.f32 %v8714_v26, %v8656_v42 }
 0x6d6   : > { %v16724_v60 = vpop.f32.mrf.mxu3 }
 0x6d7   : > { %v8760_v31 = vadd.f32 %v8759_v4, %v8715_v24 }
 0x6e3   : > { %v9042_v3 = vpop.f32.mrf.mxu1 }
 0x6eb   : > { %v9100_v22 = vpop.f32.mrf.mxu2 }
 0x6ec   : > { %v9046_v39 = vpop.f32.mrf.mxu1 }
 0x6ed   : > { %v8933_v32 = vpop.f32.mrf.mxu0 }
 0x6ee   : > { %v9144_v21 = vpop.f32.mrf.mxu3  ;;  %v9043_v40 = vadd.f32 %v9042_v3, %v8933_v32  ;;  %v8833_v3 = vadd.f32 %v8832_v33, %v8760_v31 }
 0x6f0   : > { %v9101_v44 = vadd.f32 %v9100_v22, %v9043_v40  ;;  %v8874_v8 = vadd.f32 %v16724_v60, %v8833_v3 }
 0x6f2   : > { %v9145_v25 = vadd.f32 %v9144_v21, %v9101_v44 }
 0x6f5   : > { %v9105_v7 = vpop.f32.mrf.mxu2 }
 0x6f6   : > { %v8941_v59 = vpop.f32.mrf.mxu0 }
 0x6f7   : > { %v9047_v5 = vadd.f32 %v9046_v39, %v8941_v59 }
 0x6f8   : > { %v9150_v10 = vpop.f32.mrf.mxu3 }
 0x6f9   : > { %v9106_v30 = vadd.f32 %v9105_v7, %v9047_v5 }
 0x6fb   : > { %v9151_v18 = vadd.f32 %v9150_v10, %v9106_v30 }
 0x707   : > { %v9260_v49 = vpop.f32.mrf.mxu1 }
 0x70f   : > { %v9326_v20 = vpop.f32.mrf.mxu2 }
 0x710   : > { %v9264_v29 = vpop.f32.mrf.mxu1 }
 0x711   : > { %v9219_v62 = vpop.f32.mrf.mxu0 }
 0x712   : > { %v9435_v47 = vpop.f32.mrf.mxu3  ;;  %v9220_v9 = vadd.f32 %v9219_v62, %v9145_v25 }
 0x713   : > { %v9436_v1 = vadd.f32 %v9435_v47, %v9326_v20 }
 0x714   : > { %v9261_v41 = vadd.f32 %v9260_v49, %v9220_v9 }
 0x716   : > { %v9267_v2 = vadd.f32 %v9261_v41, %v8870_v43 }
 0x719   : > { %v9334_v57 = vpop.f32.mrf.mxu2 }
 0x71a   : > { %v9223_v19 = vpop.f32.mrf.mxu0 }
 0x71b   : > { %v9224_v35 = vadd.f32 %v9223_v19, %v9151_v18 }
 0x71c   : > { %v9439_v23 = vpop.f32.mrf.mxu3 }
 0x71d   : > { %v9440_v15 = vadd.f32 %v9439_v23, %v9334_v57  ;;  %v9265_v22 = vadd.f32 %v9264_v29, %v9224_v35 }
 0x71f   : > { %v9268_v59 = vadd.f32 %v9265_v22, %v8874_v8 }
 0x72b   : > { %v9537_v52 = vpop.f32.mrf.mxu1 }
 0x732   : > { %v9493_v12 = vpop.f32.mrf.mxu0 }
 0x733   : > { %v9494_v27 = vadd.f32 %v9493_v12, %v9436_v1  ;;  %v9612_v48 = vpop.f32.mrf.mxu2  ;;  %v9543_v32 = vpop.f32.mrf.mxu1 }
 0x735   : > { %v9538_v13 = vadd.f32 %v9537_v52, %v9494_v27  ;;  %v9653_v14 = vpop.f32.mrf.mxu3 }
 0x737   : > { %v9613_v36 = vadd.f32 %v9612_v48, %v9538_v13 }
 0x739   : > { %v9654_v61 = vadd.f32 %v9653_v14, %v9613_v36 }
 0x73a   : > { %v9498_v16 = vpop.f32.mrf.mxu0 }
 0x73b   : > { %v9660_v6 = vadd.f32 %v9654_v61, %v9267_v2  ;;  %v9499_v26 = vadd.f32 %v9498_v16, %v9440_v15  ;;  %v9616_v21 = vpop.f32.mrf.mxu2 }
 0x73d   : > { %v9667_v38 = vadd.f32 %v9804_v45, %v9660_v6  ;;  %v9544_v4 = vadd.f32 %v9543_v32, %v9499_v26  ;;  %v9657_v39 = vpop.f32.mrf.mxu3 }
 0x73f   : > { %9669 = vst [vmem:[%s204_s8] sm:$0xff] %v9667_v38  ;;  %v9617_v55 = vadd.f32 %v9616_v21, %v9544_v4 }
 0x741   : > { %v9658_v7 = vadd.f32 %v9657_v39, %v9617_v55 }
 0x743   : > { %v9661_v33 = vadd.f32 %v9658_v7, %v9268_v59 }
 0x745   : > { %v9668_v34 = vadd.f32 %v9804_v45, %v9661_v33 }
 0x747   : > { %9670 = vst [vmem:[%s204_s8 + $0x8] sm:$0xff] %v9668_v34 }
 0x748 PF: > { %s15_s12 = sadd.s32 1, %s9879_s12  }
 0x749   : > { %p12_p7 = scmp.ge.s32.totalorder %s15_s12, 4  }
 0x74b   :  { %14 = sbr.rel (!%p12_p7) target bundleno = 2 (0x2), region = 99 }
 0x750   :  { %9692 = vsyncpa [#allocation4], 1 }
 0x751   :  { %9694 = vsyncpa [#allocation4 + $0x1], 1 }
 0x752   :  { %9695 = vsyncpa [#allocation6], 1 }

</bundles_post_ra>
